<compile_context>
chip_gen: v6e
topology: v6e:2x2x1
jax: 0.10.0
libtpu: 0.0.40
codegen_flags: <defaults>
</compile_context>

<pallas_src>
import functools

import jax
import jax.numpy as jnp
from jax.experimental import pallas as pl
from jax.experimental.pallas import tpu as pltpu


# -----------------------------------------------------------------------------
# helpers
# -----------------------------------------------------------------------------
@functools.lru_cache(maxsize=1)
def _vmem_limit_bytes():
    """Generation-aware scoped-VMEM request (v7x: 64 MiB physical, not 128)."""
    cap = 128 * 1024 * 1024
    try:
        cap = int(getattr(pltpu.get_tpu_info(), "vmem_capacity_bytes", cap))
    except Exception:
        pass
    return int(min(cap // 2, 64 * 1024 * 1024))


def _bn_scale_shift(s_sum, s_sq, gamma, beta, count, eps):
    """Training-mode BN batch stats -> per-channel scale/shift (O(C) JAX glue).

    Single-pass E[x^2] - E[x]^2 with a clamp; fine in f32 at these magnitudes.
    """
    mean = s_sum / count
    var = jnp.maximum(s_sq / count - mean * mean, 0.0)
    scale = gamma * jax.lax.rsqrt(var + eps)
    shift = beta - mean * scale
    return scale, shift


# -----------------------------------------------------------------------------
# Pallas kernels
# -----------------------------------------------------------------------------
def _conv3x3_kernel(*refs, add_bias, fuse_in_bn):
    """3x3 / stride-1 / pad-1 conv on one full-image (batch) tile.

    * optional fused input transform relu(x*scale + shift)  (= bn1+ReLU for conv2)
    * zero-padded slab assembled in a VMEM scratch (padding folded in)
    * im2col staging -> ONE bf16 MXU matmul with K = 9*Cin, f32 accumulation
    * per-batch BN sum / sum-of-squares written to small per-sample out blocks
    """
    it = iter(refs)
    x_ref, w_ref = next(it), next(it)
    b_ref = next(it) if add_bias else None
    sc_ref = next(it) if fuse_in_bn else None
    sh_ref = next(it) if fuse_in_bn else None
    y_ref, ssum_ref, ssq_ref, xbuf, col = next(it), next(it), next(it), next(it), next(it)

    TH = xbuf.shape[0] - 2
    W = xbuf.shape[1] - 2
    Cin = xbuf.shape[2]
    Cout = w_ref.shape[1]
    C_stat = ssum_ref.shape[-1]

    # input transform (conv2 path: bn1 + ReLU applied right on the streamed block)
    x = x_ref[0]                                              # (TH, W, Cin)
    if fuse_in_bn:
        x = jnp.maximum(x.astype(jnp.float32) * sc_ref[...] + sh_ref[...], 0.0)
    x = x.astype(jnp.bfloat16)

    # zero-padded input slab in VMEM (1-px border folded in; no HBM jnp.pad)
    xbuf[...] = jnp.zeros_like(xbuf)
    xbuf[1:TH + 1, 1:W + 1, :] = x

    # im2col staging: whole 3x3 conv becomes ONE MXU matmul with K = 9*Cin
    for kh in range(3):
        for kw in range(3):
            t = kh * 3 + kw
            col[:, t * Cin:(t + 1) * Cin] = (
                xbuf[kh:kh + TH, kw:kw + W, :].reshape(TH * W, Cin))

    acc = jnp.dot(col[...], w_ref[...], preferred_element_type=jnp.float32)
    if add_bias:
        acc = acc + b_ref[...]                                # (1, Cout) broadcast

    # per-batch BN batch statistics (first C_stat channels only)
    a_bn = acc[:, :C_stat]
    ssum_ref[...] = jnp.sum(a_bn, axis=0).reshape(1, 1, C_stat)
    ssq_ref[...] = jnp.sum(a_bn * a_bn, axis=0).reshape(1, 1, C_stat)

    y_ref[...] = acc.reshape(1, TH, W, Cout)                  # pre-BN f32 output


def _bn_add_relu_kernel(a_ref, id_ref, scale_ref, shift_ref, o_ref):
    """out = relu(a * scale + shift + identity)  (identity already channel-blocked)."""
    h = a_ref[...] * scale_ref[...] + shift_ref[...] + id_ref[...]
    o_ref[...] = jnp.maximum(h, 0.0)


# -----------------------------------------------------------------------------
# wrappers (pallas_call plumbing)
# -----------------------------------------------------------------------------
def conv3x3(x, w_flat, bias, *, cin, c_stat, add_bias, in_scale=None, in_shift=None):
    """3x3 conv, stride 1, pad 1 (padding handled in-kernel).

    x:      (N,H,W,Cx) -- only the first `cin` channels are streamed per block.
    w_flat: (9*cin, Cout) bf16 (HWIO weights pre-reshaped in the caller).
    bias:   (1, Cout) f32 or None.
    in_scale/in_shift: (1, cin) f32 -> fused relu(x*scale+shift) on the input.
    Returns (pre-BN f32 output, per-batch chan sums (N,1,c_stat), per-batch sumsq).
    """
    N, H, W = x.shape[0], x.shape[1], x.shape[2]
    cout = w_flat.shape[-1]
    fuse_in_bn = in_scale is not None
    TH = H  # full-image row tile: M = TH*W fills the MXU at these shapes
    # TODO(synk): for large H*W*Cin add row tiling with halo handling so the
    # padded slab + im2col scratch stay within the per-generation VMEM budget.

    inputs = [x, w_flat]
    in_specs = [
        pl.BlockSpec((1, TH, W, cin), lambda n: (n, 0, 0, 0)),       # channel block 0
        pl.BlockSpec((9 * cin, cout), lambda n: (0, 0)),             # resident weights
    ]
    if add_bias:
        inputs.append(bias)
        in_specs.append(pl.BlockSpec((1, cout), lambda n: (0, 0)))   # resident bias
    if fuse_in_bn:
        inputs.extend([in_scale, in_shift])
        in_specs.extend([pl.BlockSpec((1, cin), lambda n: (0, 0)),
                         pl.BlockSpec((1, cin), lambda n: (0, 0))])

    kernel = functools.partial(_conv3x3_kernel, add_bias=add_bias,
                               fuse_in_bn=fuse_in_bn)

    return pl.pallas_call(
        kernel,
        grid=(N,),
        in_specs=in_specs,
        out_specs=[
            pl.BlockSpec((1, TH, W, cout), lambda n: (n, 0, 0, 0)),
            pl.BlockSpec((1, 1, c_stat), lambda n: (n, 0, 0)),       # per-batch stats
            pl.BlockSpec((1, 1, c_stat), lambda n: (n, 0, 0)),
        ],
        out_shape=[
            jax.ShapeDtypeStruct((N, H, W, cout), jnp.float32),
            jax.ShapeDtypeStruct((N, 1, c_stat), jnp.float32),
            jax.ShapeDtypeStruct((N, 1, c_stat), jnp.float32),
        ],
        scratch_shapes=[
            pltpu.VMEM((TH + 2, W + 2, cin), jnp.bfloat16),          # padded slab
            pltpu.VMEM((TH * W, 9 * cin), jnp.bfloat16),             # im2col slab
        ],
        compiler_params=pltpu.CompilerParams(
            dimension_semantics=("parallel",),                       # v7x megacore
            vmem_limit_bytes=_vmem_limit_bytes()),
    )(*inputs)


def bn_add_relu(a2, y_pair, scale, shift):
    """relu(a2*scale + shift + identity); identity = channel-block 1 of y_pair."""
    N, H, W, C = a2.shape
    return pl.pallas_call(
        _bn_add_relu_kernel,
        grid=(N,),
        in_specs=[
            pl.BlockSpec((1, H, W, C), lambda n: (n, 0, 0, 0)),
            pl.BlockSpec((1, H, W, C), lambda n: (n, 0, 0, 1)),      # identity half only
            pl.BlockSpec((1, 1, 1, C), lambda n: (0, 0, 0, 0)),
            pl.BlockSpec((1, 1, 1, C), lambda n: (0, 0, 0, 0)),
        ],
        out_specs=pl.BlockSpec((1, H, W, C), lambda n: (n, 0, 0, 0)),
        out_shape=jax.ShapeDtypeStruct((N, H, W, C), jnp.float32),
        compiler_params=pltpu.CompilerParams(
            dimension_semantics=("parallel",),
            vmem_limit_bytes=_vmem_limit_bytes()),
    )(a2, y_pair, scale, shift)


# -----------------------------------------------------------------------------
# ResBlock forward (NCHW in / NCHW out, like the torch module)
# -----------------------------------------------------------------------------
@jax.jit
def resblock_forward(params, x_nchw):
    eps = 1e-5
    x = jnp.transpose(x_nchw, (0, 2, 3, 1))                           # NHWC
    N, H, W, Cin = x.shape
    C = params['conv1']['w'].shape[-1]
    count = N * H * W

    # --- conv1 + identity_conv fused along Cout (both read the same x) -------
    w_pair = jnp.concatenate([params['conv1']['w'], params['idconv']['w']], axis=-1)
    w_pair = w_pair.reshape(9 * Cin, 2 * C).astype(jnp.bfloat16)
    # conv1/conv2 biases are dropped: a per-channel constant is exactly
    # cancelled by training-mode BN mean subtraction.  idconv keeps its bias.
    b_pair = jnp.concatenate([jnp.zeros((C,), jnp.float32),
                              params['idconv']['b'].astype(jnp.float32)]
                             ).reshape(1, 2 * C)

    y_pair, s1_sum, s1_sq = conv3x3(x.astype(jnp.bfloat16), w_pair, b_pair,
                                    cin=Cin, c_stat=C, add_bias=True)
    scale1, shift1 = _bn_scale_shift(jnp.sum(s1_sum, axis=(0, 1)),
                                     jnp.sum(s1_sq, axis=(0, 1)),
                                     params['bn1']['g'], params['bn1']['b'],
                                     count, eps)

    # --- conv2, with bn1+ReLU fused into its input read of y_pair[..., :C] ---
    w2 = params['conv2']['w'].reshape(9 * C, C).astype(jnp.bfloat16)
    a2, s2_sum, s2_sq = conv3x3(y_pair, w2, None, cin=C, c_stat=C, add_bias=False,
                                in_scale=scale1.reshape(1, C),
                                in_shift=shift1.reshape(1, C))
    scale2, shift2 = _bn_scale_shift(jnp.sum(s2_sum, axis=(0, 1)),
                                     jnp.sum(s2_sq, axis=(0, 1)),
                                     params['bn2']['g'], params['bn2']['b'],
                                     count, eps)

    out = bn_add_relu(a2, y_pair,
                      scale2.reshape(1, 1, 1, C), shift2.reshape(1, 1, 1, C))
    return jnp.transpose(out, (0, 3, 1, 2))                           # NCHW


# -----------------------------------------------------------------------------
# deterministic params (HWIO weights; BN gamma/beta perturbed to exercise math)
# -----------------------------------------------------------------------------
def init_resblock_params(key, cin, cout, k=3):
    keys = jax.random.split(key, 10)

    def conv_init(kw_key, kb_key, ci, co):
        fan_in = ci * k * k
        w = jax.random.normal(kw_key, (k, k, ci, co), jnp.float32) * (1.0 / fan_in) ** 0.5
        bound = 1.0 / (fan_in ** 0.5)
        b = jax.random.uniform(kb_key, (co,), jnp.float32, -bound, bound)
        return {'w': w, 'b': b}

    def bn_init(kg, kb):
        return {'g': (1.0 + 0.1 * jax.random.normal(kg, (cout,))).astype(jnp.float32),
                'b': (0.1 * jax.random.normal(kb, (cout,))).astype(jnp.float32)}

    return {
        'conv1': conv_init(keys[0], keys[1], cin, cout),
        'bn1': bn_init(keys[2], keys[3]),
        'conv2': conv_init(keys[4], keys[5], cout, cout),
        'bn2': bn_init(keys[6], keys[7]),
        'idconv': conv_init(keys[8], keys[9], cin, cout),
    }


# -----------------------------------------------------------------------------
# pure-JAX reference (same bf16 operand rounding as the kernels)
# -----------------------------------------------------------------------------
def _resblock_reference(params, x_nchw, eps=1e-5):
    x = jnp.transpose(x_nchw, (0, 2, 3, 1))
    x = x.astype(jnp.bfloat16).astype(jnp.float32)

    def conv(h, w, b):
        w = w.astype(jnp.bfloat16).astype(jnp.float32)
        y = jax.lax.conv_general_dilated(
            h, w, window_strides=(1, 1), padding=((1, 1), (1, 1)),
            dimension_numbers=('NHWC', 'HWIO', 'NHWC'))
        return y + b

    def bn(a, g, b):
        mean = jnp.mean(a, axis=(0, 1, 2))
        var = jnp.mean((a - mean) ** 2, axis=(0, 1, 2))
        return (a - mean) * jax.lax.rsqrt(var + eps) * g + b

    identity = conv(x, params['idconv']['w'], params['idconv']['b'])
    a1 = conv(x, params['conv1']['w'], params['conv1']['b'])
    h1 = jnp.maximum(bn(a1, params['bn1']['g'], params['bn1']['b']), 0.0)
    h1 = h1.astype(jnp.bfloat16).astype(jnp.float32)
    a2 = conv(h1, params['conv2']['w'], params['conv2']['b'])
    y = jnp.maximum(bn(a2, params['bn2']['g'], params['bn2']['b']) + identity, 0.0)
    return jnp.transpose(y, (0, 3, 1, 2))


# -----------------------------------------------------------------------------
if __name__ == "__main__":
    key = jax.random.PRNGKey(0)
    kp, kx = jax.random.split(key)

    N, Cin, Cout, H, W = 2, 64, 128, 16, 16          # small, lane-friendly shapes
    params = init_resblock_params(kp, Cin, Cout)
    x = jax.random.normal(kx, (N, Cin, H, W), jnp.float32)   # NCHW like torch

    out = jax.block_until_ready(resblock_forward(params, x))
    assert out.shape == (N, Cout, H, W)

    ref = jax.block_until_ready(_resblock_reference(params, x))
    err = float(jnp.max(jnp.abs(out - ref)))
    assert err < 5e-2, f"max abs error vs reference: {err}"

    print("KERNEL_OK")
</pallas_src>

<mosaic_0001>
module attributes {stable_mosaic.version = 11 : i64} {
  func.func @_conv3x3_kernel(%arg0: i32, %arg1: memref<1x16x16x64xbf16, #tpu.memory_space<vmem>>, %arg2: memref<576x256xbf16, #tpu.memory_space<vmem>>, %arg3: memref<1x256xf32, #tpu.memory_space<vmem>>, %arg4: memref<1x16x16x256xf32, #tpu.memory_space<vmem>>, %arg5: memref<1x1x128xf32, #tpu.memory_space<vmem>>, %arg6: memref<1x1x128xf32, #tpu.memory_space<vmem>>, %arg7: memref<18x18x64xbf16, #tpu.memory_space<vmem>>, %arg8: memref<256x576xbf16, #tpu.memory_space<vmem>>) attributes {dimension_semantics = [#tpu.dimension_semantics<parallel>], iteration_bounds = array<i64: 2>, scalar_prefetch = 0 : i64, scratch_operands = 2 : i64, tpu.core_type = #tpu.core_type<tc>, window_params = [{transform_indices = @transform_0, window_bounds = array<i64: 1, 16, 16, 64>}, {pipeline_mode = #tpu.pipeline_mode<synchronous>, transform_indices = @transform_1, window_bounds = array<i64: 576, 256>}, {pipeline_mode = #tpu.pipeline_mode<synchronous>, transform_indices = @transform_2, window_bounds = array<i64: 1, 256>}, {transform_indices = @transform_3, window_bounds = array<i64: 1, 16, 16, 256>}, {transform_indices = @transform_4, window_bounds = array<i64: 1, 1, 128>}, {transform_indices = @transform_5, window_bounds = array<i64: 1, 1, 128>}]} {
    %c0 = arith.constant 0 : index
    %c0_0 = arith.constant 0 : index
    %c0_1 = arith.constant 0 : index
    %c0_2 = arith.constant 0 : index
    %0 = vector.load %arg1[%c0, %c0_0, %c0_1, %c0_2] : memref<1x16x16x64xbf16, #tpu.memory_space<vmem>>, vector<1x16x16x64xbf16>
    %1 = vector.shape_cast %0 : vector<1x16x16x64xbf16> to vector<16x16x64xbf16>
    %cst = arith.constant 0.000000e+00 : bf16
    %2 = vector.broadcast %cst : bf16 to vector<18x18x64xbf16>
    %c0_3 = arith.constant 0 : index
    %c0_4 = arith.constant 0 : index
    %c0_5 = arith.constant 0 : index
    %3 = vector.load %arg7[%c0_3, %c0_4, %c0_5] : memref<18x18x64xbf16, #tpu.memory_space<vmem>>, vector<18x18x64xbf16>
    tpu.vector_store %arg7[%c0_3, %c0_4, %c0_5], %2 {strides = array<i32>} : memref<18x18x64xbf16, #tpu.memory_space<vmem>>, vector<18x18x64xbf16>,
    %c1 = arith.constant 1 : index
    %c1_6 = arith.constant 1 : index
    %c0_7 = arith.constant 0 : index
    %4 = vector.load %arg7[%c1, %c1_6, %c0_7] : memref<18x18x64xbf16, #tpu.memory_space<vmem>>, vector<16x16x64xbf16>
    tpu.vector_store %arg7[%c1, %c1_6, %c0_7], %1 {strides = array<i32>} : memref<18x18x64xbf16, #tpu.memory_space<vmem>>, vector<16x16x64xbf16>,
    %c0_8 = arith.constant 0 : index
    %c0_9 = arith.constant 0 : index
    %c0_10 = arith.constant 0 : index
    %5 = vector.load %arg7[%c0_8, %c0_9, %c0_10] : memref<18x18x64xbf16, #tpu.memory_space<vmem>>, vector<16x16x64xbf16>
    %6 = vector.shape_cast %5 : vector<16x16x64xbf16> to vector<256x64xbf16>
    %c0_11 = arith.constant 0 : index
    %c0_12 = arith.constant 0 : index
    %7 = vector.load %arg8[%c0_11, %c0_12] : memref<256x576xbf16, #tpu.memory_space<vmem>>, vector<256x64xbf16>
    tpu.vector_store %arg8[%c0_11, %c0_12], %6 {strides = array<i32>} : memref<256x576xbf16, #tpu.memory_space<vmem>>, vector<256x64xbf16>,
    %c0_13 = arith.constant 0 : index
    %c1_14 = arith.constant 1 : index
    %c0_15 = arith.constant 0 : index
    %8 = vector.load %arg7[%c0_13, %c1_14, %c0_15] : memref<18x18x64xbf16, #tpu.memory_space<vmem>>, vector<16x16x64xbf16>
    %9 = vector.shape_cast %8 : vector<16x16x64xbf16> to vector<256x64xbf16>
    %c0_16 = arith.constant 0 : index
    %c64 = arith.constant 64 : index
    %10 = vector.load %arg8[%c0_16, %c64] : memref<256x576xbf16, #tpu.memory_space<vmem>>, vector<256x64xbf16>
    tpu.vector_store %arg8[%c0_16, %c64], %9 {strides = array<i32>} : memref<256x576xbf16, #tpu.memory_space<vmem>>, vector<256x64xbf16>,
    %c0_17 = arith.constant 0 : index
    %c2 = arith.constant 2 : index
    %c0_18 = arith.constant 0 : index
    %11 = vector.load %arg7[%c0_17, %c2, %c0_18] : memref<18x18x64xbf16, #tpu.memory_space<vmem>>, vector<16x16x64xbf16>
    %12 = vector.shape_cast %11 : vector<16x16x64xbf16> to vector<256x64xbf16>
    %c0_19 = arith.constant 0 : index
    %c128 = arith.constant 128 : index
    %13 = vector.load %arg8[%c0_19, %c128] : memref<256x576xbf16, #tpu.memory_space<vmem>>, vector<256x64xbf16>
    tpu.vector_store %arg8[%c0_19, %c128], %12 {strides = array<i32>} : memref<256x576xbf16, #tpu.memory_space<vmem>>, vector<256x64xbf16>,
    %c1_20 = arith.constant 1 : index
    %c0_21 = arith.constant 0 : index
    %c0_22 = arith.constant 0 : index
    %14 = vector.load %arg7[%c1_20, %c0_21, %c0_22] : memref<18x18x64xbf16, #tpu.memory_space<vmem>>, vector<16x16x64xbf16>
    %15 = vector.shape_cast %14 : vector<16x16x64xbf16> to vector<256x64xbf16>
    %c0_23 = arith.constant 0 : index
    %c192 = arith.constant 192 : index
    %16 = vector.load %arg8[%c0_23, %c192] : memref<256x576xbf16, #tpu.memory_space<vmem>>, vector<256x64xbf16>
    tpu.vector_store %arg8[%c0_23, %c192], %15 {strides = array<i32>} : memref<256x576xbf16, #tpu.memory_space<vmem>>, vector<256x64xbf16>,
    %c1_24 = arith.constant 1 : index
    %c1_25 = arith.constant 1 : index
    %c0_26 = arith.constant 0 : index
    %17 = vector.load %arg7[%c1_24, %c1_25, %c0_26] : memref<18x18x64xbf16, #tpu.memory_space<vmem>>, vector<16x16x64xbf16>
    %18 = vector.shape_cast %17 : vector<16x16x64xbf16> to vector<256x64xbf16>
    %c0_27 = arith.constant 0 : index
    %c256 = arith.constant 256 : index
    %19 = vector.load %arg8[%c0_27, %c256] : memref<256x576xbf16, #tpu.memory_space<vmem>>, vector<256x64xbf16>
    tpu.vector_store %arg8[%c0_27, %c256], %18 {strides = array<i32>} : memref<256x576xbf16, #tpu.memory_space<vmem>>, vector<256x64xbf16>,
    %c1_28 = arith.constant 1 : index
    %c2_29 = arith.constant 2 : index
    %c0_30 = arith.constant 0 : index
    %20 = vector.load %arg7[%c1_28, %c2_29, %c0_30] : memref<18x18x64xbf16, #tpu.memory_space<vmem>>, vector<16x16x64xbf16>
    %21 = vector.shape_cast %20 : vector<16x16x64xbf16> to vector<256x64xbf16>
    %c0_31 = arith.constant 0 : index
    %c320 = arith.constant 320 : index
    %22 = vector.load %arg8[%c0_31, %c320] : memref<256x576xbf16, #tpu.memory_space<vmem>>, vector<256x64xbf16>
    tpu.vector_store %arg8[%c0_31, %c320], %21 {strides = array<i32>} : memref<256x576xbf16, #tpu.memory_space<vmem>>, vector<256x64xbf16>,
    %c2_32 = arith.constant 2 : index
    %c0_33 = arith.constant 0 : index
    %c0_34 = arith.constant 0 : index
    %23 = vector.load %arg7[%c2_32, %c0_33, %c0_34] : memref<18x18x64xbf16, #tpu.memory_space<vmem>>, vector<16x16x64xbf16>
    %24 = vector.shape_cast %23 : vector<16x16x64xbf16> to vector<256x64xbf16>
    %c0_35 = arith.constant 0 : index
    %c384 = arith.constant 384 : index
    %25 = vector.load %arg8[%c0_35, %c384] : memref<256x576xbf16, #tpu.memory_space<vmem>>, vector<256x64xbf16>
    tpu.vector_store %arg8[%c0_35, %c384], %24 {strides = array<i32>} : memref<256x576xbf16, #tpu.memory_space<vmem>>, vector<256x64xbf16>,
    %c2_36 = arith.constant 2 : index
    %c1_37 = arith.constant 1 : index
    %c0_38 = arith.constant 0 : index
    %26 = vector.load %arg7[%c2_36, %c1_37, %c0_38] : memref<18x18x64xbf16, #tpu.memory_space<vmem>>, vector<16x16x64xbf16>
    %27 = vector.shape_cast %26 : vector<16x16x64xbf16> to vector<256x64xbf16>
    %c0_39 = arith.constant 0 : index
    %c448 = arith.constant 448 : index
    %28 = vector.load %arg8[%c0_39, %c448] : memref<256x576xbf16, #tpu.memory_space<vmem>>, vector<256x64xbf16>
    tpu.vector_store %arg8[%c0_39, %c448], %27 {strides = array<i32>} : memref<256x576xbf16, #tpu.memory_space<vmem>>, vector<256x64xbf16>,
    %c2_40 = arith.constant 2 : index
    %c2_41 = arith.constant 2 : index
    %c0_42 = arith.constant 0 : index
    %29 = vector.load %arg7[%c2_40, %c2_41, %c0_42] : memref<18x18x64xbf16, #tpu.memory_space<vmem>>, vector<16x16x64xbf16>
    %30 = vector.shape_cast %29 : vector<16x16x64xbf16> to vector<256x64xbf16>
    %c0_43 = arith.constant 0 : index
    %c512 = arith.constant 512 : index
    %31 = vector.load %arg8[%c0_43, %c512] : memref<256x576xbf16, #tpu.memory_space<vmem>>, vector<256x64xbf16>
    tpu.vector_store %arg8[%c0_43, %c512], %30 {strides = array<i32>} : memref<256x576xbf16, #tpu.memory_space<vmem>>, vector<256x64xbf16>,
    %c0_44 = arith.constant 0 : index
    %c0_45 = arith.constant 0 : index
    %32 = vector.load %arg8[%c0_44, %c0_45] : memref<256x576xbf16, #tpu.memory_space<vmem>>, vector<256x576xbf16>
    %c0_46 = arith.constant 0 : index
    %c0_47 = arith.constant 0 : index
    %33 = vector.load %arg2[%c0_46, %c0_47] : memref<576x256xbf16, #tpu.memory_space<vmem>>, vector<576x256xbf16>
    %cst_48 = arith.constant dense<0.000000e+00> : vector<256x256xf32>
    %34 = tpu.matmul %32, %33, %cst_48 {dimension_numbers = #tpu.dot_dimension_numbers<[1], [0], [0], [1], [0, 0, 1, 1], [], []>} : vector<256x576xbf16>, vector<576x256xbf16>, vector<256x256xf32> -> vector<256x256xf32>
    %c0_49 = arith.constant 0 : index
    %c0_50 = arith.constant 0 : index
    %35 = vector.load %arg3[%c0_49, %c0_50] : memref<1x256xf32, #tpu.memory_space<vmem>>, vector<1x256xf32>
    %36 = vector.broadcast %35 : vector<1x256xf32> to vector<256x256xf32>
    %37 = arith.addf %34, %36 : vector<256x256xf32>
    %38 = vector.extract_strided_slice %37 {offsets = [0, 0], sizes = [256, 128], strides = [1, 1]} : vector<256x256xf32> to vector<256x128xf32>
    %cst_51 = arith.constant dense<0.000000e+00> : vector<128xf32>
    %39 = vector.multi_reduction <add>, %38, %cst_51 [0] : vector<256x128xf32> to vector<128xf32>
    %40 = vector.shape_cast %39 : vector<128xf32> to vector<1x1x128xf32>
    %c0_52 = arith.constant 0 : index
    %c0_53 = arith.constant 0 : index
    %c0_54 = arith.constant 0 : index
    %41 = vector.load %arg5[%c0_52, %c0_53, %c0_54] : memref<1x1x128xf32, #tpu.memory_space<vmem>>, vector<1x1x128xf32>
    tpu.vector_store %arg5[%c0_52, %c0_53, %c0_54], %40 {strides = array<i32>} : memref<1x1x128xf32, #tpu.memory_space<vmem>>, vector<1x1x128xf32>,
    %42 = arith.mulf %38, %38 : vector<256x128xf32>
    %cst_55 = arith.constant dense<0.000000e+00> : vector<128xf32>
    %43 = vector.multi_reduction <add>, %42, %cst_55 [0] : vector<256x128xf32> to vector<128xf32>
    %44 = vector.shape_cast %43 : vector<128xf32> to vector<1x1x128xf32>
    %c0_56 = arith.constant 0 : index
    %c0_57 = arith.constant 0 : index
    %c0_58 = arith.constant 0 : index
    %45 = vector.load %arg6[%c0_56, %c0_57, %c0_58] : memref<1x1x128xf32, #tpu.memory_space<vmem>>, vector<1x1x128xf32>
    tpu.vector_store %arg6[%c0_56, %c0_57, %c0_58], %44 {strides = array<i32>} : memref<1x1x128xf32, #tpu.memory_space<vmem>>, vector<1x1x128xf32>,
    %46 = vector.shape_cast %37 : vector<256x256xf32> to vector<1x16x16x256xf32>
    %c0_59 = arith.constant 0 : index
    %c0_60 = arith.constant 0 : index
    %c0_61 = arith.constant 0 : index
    %c0_62 = arith.constant 0 : index
    %47 = vector.load %arg4[%c0_59, %c0_60, %c0_61, %c0_62] : memref<1x16x16x256xf32, #tpu.memory_space<vmem>>, vector<1x16x16x256xf32>
    tpu.vector_store %arg4[%c0_59, %c0_60, %c0_61, %c0_62], %46 {strides = array<i32>} : memref<1x16x16x256xf32, #tpu.memory_space<vmem>>, vector<1x16x16x256xf32>,
    return
  }
  func.func @transform_0(%arg0: i32) -> (i32, i32, i32, i32) {
    %c0_i32 = arith.constant 0 : i32
    %c0_i32_0 = arith.constant 0 : i32
    %c0_i32_1 = arith.constant 0 : i32
    %c0_i32_2 = arith.constant 0 : i32
    return %arg0, %c0_i32, %c0_i32_0, %c0_i32_1 : i32, i32, i32, i32
  }
  func.func @transform_1(%arg0: i32) -> (i32, i32) {
    %c0_i32 = arith.constant 0 : i32
    %c0_i32_0 = arith.constant 0 : i32
    %c0_i32_1 = arith.constant 0 : i32
    return %c0_i32, %c0_i32_0 : i32, i32
  }
  func.func @transform_2(%arg0: i32) -> (i32, i32) {
    %c0_i32 = arith.constant 0 : i32
    %c0_i32_0 = arith.constant 0 : i32
    %c0_i32_1 = arith.constant 0 : i32
    return %c0_i32, %c0_i32_0 : i32, i32
  }
  func.func @transform_3(%arg0: i32) -> (i32, i32, i32, i32) {
    %c0_i32 = arith.constant 0 : i32
    %c0_i32_0 = arith.constant 0 : i32
    %c0_i32_1 = arith.constant 0 : i32
    %c0_i32_2 = arith.constant 0 : i32
    return %arg0, %c0_i32, %c0_i32_0, %c0_i32_1 : i32, i32, i32, i32
  }
  func.func @transform_4(%arg0: i32) -> (i32, i32, i32) {
    %c0_i32 = arith.constant 0 : i32
    %c0_i32_0 = arith.constant 0 : i32
    %c0_i32_1 = arith.constant 0 : i32
    return %arg0, %c0_i32, %c0_i32_0 : i32, i32, i32
  }
  func.func @transform_5(%arg0: i32) -> (i32, i32, i32) {
    %c0_i32 = arith.constant 0 : i32
    %c0_i32_0 = arith.constant 0 : i32
    %c0_i32_1 = arith.constant 0 : i32
    return %arg0, %c0_i32, %c0_i32_0 : i32, i32, i32
  }
}

module attributes {stable_mosaic.version = 11 : i64} {
  func.func @_conv3x3_kernel(%arg0: i32, %arg1: memref<1x16x16x128xf32, #tpu.memory_space<vmem>>, %arg2: memref<1152x128xbf16, #tpu.memory_space<vmem>>, %arg3: memref<1x128xf32, #tpu.memory_space<vmem>>, %arg4: memref<1x128xf32, #tpu.memory_space<vmem>>, %arg5: memref<1x16x16x128xf32, #tpu.memory_space<vmem>>, %arg6: memref<1x1x128xf32, #tpu.memory_space<vmem>>, %arg7: memref<1x1x128xf32, #tpu.memory_space<vmem>>, %arg8: memref<18x18x128xbf16, #tpu.memory_space<vmem>>, %arg9: memref<256x1152xbf16, #tpu.memory_space<vmem>>) attributes {dimension_semantics = [#tpu.dimension_semantics<parallel>], iteration_bounds = array<i64: 2>, scalar_prefetch = 0 : i64, scratch_operands = 2 : i64, tpu.core_type = #tpu.core_type<tc>, window_params = [{transform_indices = @transform_0, window_bounds = array<i64: 1, 16, 16, 128>}, {pipeline_mode = #tpu.pipeline_mode<synchronous>, transform_indices = @transform_1, window_bounds = array<i64: 1152, 128>}, {pipeline_mode = #tpu.pipeline_mode<synchronous>, transform_indices = @transform_2, window_bounds = array<i64: 1, 128>}, {pipeline_mode = #tpu.pipeline_mode<synchronous>, transform_indices = @transform_3, window_bounds = array<i64: 1, 128>}, {transform_indices = @transform_4, window_bounds = array<i64: 1, 16, 16, 128>}, {transform_indices = @transform_5, window_bounds = array<i64: 1, 1, 128>}, {transform_indices = @transform_6, window_bounds = array<i64: 1, 1, 128>}]} {
    %c0 = arith.constant 0 : index
    %c0_0 = arith.constant 0 : index
    %c0_1 = arith.constant 0 : index
    %c0_2 = arith.constant 0 : index
    %0 = vector.load %arg1[%c0, %c0_0, %c0_1, %c0_2] : memref<1x16x16x128xf32, #tpu.memory_space<vmem>>, vector<1x16x16x128xf32>
    %1 = vector.shape_cast %0 : vector<1x16x16x128xf32> to vector<16x16x128xf32>
    %c0_3 = arith.constant 0 : index
    %c0_4 = arith.constant 0 : index
    %2 = vector.load %arg3[%c0_3, %c0_4] : memref<1x128xf32, #tpu.memory_space<vmem>>, vector<1x128xf32>
    %3 = vector.shape_cast %2 : vector<1x128xf32> to vector<1x1x128xf32>
    %4 = vector.broadcast %3 : vector<1x1x128xf32> to vector<16x16x128xf32>
    %5 = arith.mulf %1, %4 : vector<16x16x128xf32>
    %c0_5 = arith.constant 0 : index
    %c0_6 = arith.constant 0 : index
    %6 = vector.load %arg4[%c0_5, %c0_6] : memref<1x128xf32, #tpu.memory_space<vmem>>, vector<1x128xf32>
    %7 = vector.shape_cast %6 : vector<1x128xf32> to vector<1x1x128xf32>
    %8 = vector.broadcast %7 : vector<1x1x128xf32> to vector<16x16x128xf32>
    %9 = arith.addf %5, %8 : vector<16x16x128xf32>
    %cst = arith.constant 0.000000e+00 : f32
    %10 = vector.broadcast %cst : f32 to vector<16x16x128xf32>
    %11 = arith.maximumf %9, %10 : vector<16x16x128xf32>
    %12 = arith.truncf %11 : vector<16x16x128xf32> to vector<16x16x128xbf16>
    %cst_7 = arith.constant 0.000000e+00 : bf16
    %13 = vector.broadcast %cst_7 : bf16 to vector<18x18x128xbf16>
    %c0_8 = arith.constant 0 : index
    %c0_9 = arith.constant 0 : index
    %c0_10 = arith.constant 0 : index
    %14 = vector.load %arg8[%c0_8, %c0_9, %c0_10] : memref<18x18x128xbf16, #tpu.memory_space<vmem>>, vector<18x18x128xbf16>
    tpu.vector_store %arg8[%c0_8, %c0_9, %c0_10], %13 {strides = array<i32>} : memref<18x18x128xbf16, #tpu.memory_space<vmem>>, vector<18x18x128xbf16>,
    %c1 = arith.constant 1 : index
    %c1_11 = arith.constant 1 : index
    %c0_12 = arith.constant 0 : index
    %15 = vector.load %arg8[%c1, %c1_11, %c0_12] : memref<18x18x128xbf16, #tpu.memory_space<vmem>>, vector<16x16x128xbf16>
    tpu.vector_store %arg8[%c1, %c1_11, %c0_12], %12 {strides = array<i32>} : memref<18x18x128xbf16, #tpu.memory_space<vmem>>, vector<16x16x128xbf16>,
    %c0_13 = arith.constant 0 : index
    %c0_14 = arith.constant 0 : index
    %c0_15 = arith.constant 0 : index
    %16 = vector.load %arg8[%c0_13, %c0_14, %c0_15] : memref<18x18x128xbf16, #tpu.memory_space<vmem>>, vector<16x16x128xbf16>
    %17 = vector.shape_cast %16 : vector<16x16x128xbf16> to vector<256x128xbf16>
    %c0_16 = arith.constant 0 : index
    %c0_17 = arith.constant 0 : index
    %18 = vector.load %arg9[%c0_16, %c0_17] : memref<256x1152xbf16, #tpu.memory_space<vmem>>, vector<256x128xbf16>
    tpu.vector_store %arg9[%c0_16, %c0_17], %17 {strides = array<i32>} : memref<256x1152xbf16, #tpu.memory_space<vmem>>, vector<256x128xbf16>,
    %c0_18 = arith.constant 0 : index
    %c1_19 = arith.constant 1 : index
    %c0_20 = arith.constant 0 : index
    %19 = vector.load %arg8[%c0_18, %c1_19, %c0_20] : memref<18x18x128xbf16, #tpu.memory_space<vmem>>, vector<16x16x128xbf16>
    %20 = vector.shape_cast %19 : vector<16x16x128xbf16> to vector<256x128xbf16>
    %c0_21 = arith.constant 0 : index
    %c128 = arith.constant 128 : index
    %21 = vector.load %arg9[%c0_21, %c128] : memref<256x1152xbf16, #tpu.memory_space<vmem>>, vector<256x128xbf16>
    tpu.vector_store %arg9[%c0_21, %c128], %20 {strides = array<i32>} : memref<256x1152xbf16, #tpu.memory_space<vmem>>, vector<256x128xbf16>,
    %c0_22 = arith.constant 0 : index
    %c2 = arith.constant 2 : index
    %c0_23 = arith.constant 0 : index
    %22 = vector.load %arg8[%c0_22, %c2, %c0_23] : memref<18x18x128xbf16, #tpu.memory_space<vmem>>, vector<16x16x128xbf16>
    %23 = vector.shape_cast %22 : vector<16x16x128xbf16> to vector<256x128xbf16>
    %c0_24 = arith.constant 0 : index
    %c256 = arith.constant 256 : index
    %24 = vector.load %arg9[%c0_24, %c256] : memref<256x1152xbf16, #tpu.memory_space<vmem>>, vector<256x128xbf16>
    tpu.vector_store %arg9[%c0_24, %c256], %23 {strides = array<i32>} : memref<256x1152xbf16, #tpu.memory_space<vmem>>, vector<256x128xbf16>,
    %c1_25 = arith.constant 1 : index
    %c0_26 = arith.constant 0 : index
    %c0_27 = arith.constant 0 : index
    %25 = vector.load %arg8[%c1_25, %c0_26, %c0_27] : memref<18x18x128xbf16, #tpu.memory_space<vmem>>, vector<16x16x128xbf16>
    %26 = vector.shape_cast %25 : vector<16x16x128xbf16> to vector<256x128xbf16>
    %c0_28 = arith.constant 0 : index
    %c384 = arith.constant 384 : index
    %27 = vector.load %arg9[%c0_28, %c384] : memref<256x1152xbf16, #tpu.memory_space<vmem>>, vector<256x128xbf16>
    tpu.vector_store %arg9[%c0_28, %c384], %26 {strides = array<i32>} : memref<256x1152xbf16, #tpu.memory_space<vmem>>, vector<256x128xbf16>,
    %c1_29 = arith.constant 1 : index
    %c1_30 = arith.constant 1 : index
    %c0_31 = arith.constant 0 : index
    %28 = vector.load %arg8[%c1_29, %c1_30, %c0_31] : memref<18x18x128xbf16, #tpu.memory_space<vmem>>, vector<16x16x128xbf16>
    %29 = vector.shape_cast %28 : vector<16x16x128xbf16> to vector<256x128xbf16>
    %c0_32 = arith.constant 0 : index
    %c512 = arith.constant 512 : index
    %30 = vector.load %arg9[%c0_32, %c512] : memref<256x1152xbf16, #tpu.memory_space<vmem>>, vector<256x128xbf16>
    tpu.vector_store %arg9[%c0_32, %c512], %29 {strides = array<i32>} : memref<256x1152xbf16, #tpu.memory_space<vmem>>, vector<256x128xbf16>,
    %c1_33 = arith.constant 1 : index
    %c2_34 = arith.constant 2 : index
    %c0_35 = arith.constant 0 : index
    %31 = vector.load %arg8[%c1_33, %c2_34, %c0_35] : memref<18x18x128xbf16, #tpu.memory_space<vmem>>, vector<16x16x128xbf16>
    %32 = vector.shape_cast %31 : vector<16x16x128xbf16> to vector<256x128xbf16>
    %c0_36 = arith.constant 0 : index
    %c640 = arith.constant 640 : index
    %33 = vector.load %arg9[%c0_36, %c640] : memref<256x1152xbf16, #tpu.memory_space<vmem>>, vector<256x128xbf16>
    tpu.vector_store %arg9[%c0_36, %c640], %32 {strides = array<i32>} : memref<256x1152xbf16, #tpu.memory_space<vmem>>, vector<256x128xbf16>,
    %c2_37 = arith.constant 2 : index
    %c0_38 = arith.constant 0 : index
    %c0_39 = arith.constant 0 : index
    %34 = vector.load %arg8[%c2_37, %c0_38, %c0_39] : memref<18x18x128xbf16, #tpu.memory_space<vmem>>, vector<16x16x128xbf16>
    %35 = vector.shape_cast %34 : vector<16x16x128xbf16> to vector<256x128xbf16>
    %c0_40 = arith.constant 0 : index
    %c768 = arith.constant 768 : index
    %36 = vector.load %arg9[%c0_40, %c768] : memref<256x1152xbf16, #tpu.memory_space<vmem>>, vector<256x128xbf16>
    tpu.vector_store %arg9[%c0_40, %c768], %35 {strides = array<i32>} : memref<256x1152xbf16, #tpu.memory_space<vmem>>, vector<256x128xbf16>,
    %c2_41 = arith.constant 2 : index
    %c1_42 = arith.constant 1 : index
    %c0_43 = arith.constant 0 : index
    %37 = vector.load %arg8[%c2_41, %c1_42, %c0_43] : memref<18x18x128xbf16, #tpu.memory_space<vmem>>, vector<16x16x128xbf16>
    %38 = vector.shape_cast %37 : vector<16x16x128xbf16> to vector<256x128xbf16>
    %c0_44 = arith.constant 0 : index
    %c896 = arith.constant 896 : index
    %39 = vector.load %arg9[%c0_44, %c896] : memref<256x1152xbf16, #tpu.memory_space<vmem>>, vector<256x128xbf16>
    tpu.vector_store %arg9[%c0_44, %c896], %38 {strides = array<i32>} : memref<256x1152xbf16, #tpu.memory_space<vmem>>, vector<256x128xbf16>,
    %c2_45 = arith.constant 2 : index
    %c2_46 = arith.constant 2 : index
    %c0_47 = arith.constant 0 : index
    %40 = vector.load %arg8[%c2_45, %c2_46, %c0_47] : memref<18x18x128xbf16, #tpu.memory_space<vmem>>, vector<16x16x128xbf16>
    %41 = vector.shape_cast %40 : vector<16x16x128xbf16> to vector<256x128xbf16>
    %c0_48 = arith.constant 0 : index
    %c1024 = arith.constant 1024 : index
    %42 = vector.load %arg9[%c0_48, %c1024] : memref<256x1152xbf16, #tpu.memory_space<vmem>>, vector<256x128xbf16>
    tpu.vector_store %arg9[%c0_48, %c1024], %41 {strides = array<i32>} : memref<256x1152xbf16, #tpu.memory_space<vmem>>, vector<256x128xbf16>,
    %c0_49 = arith.constant 0 : index
    %c0_50 = arith.constant 0 : index
    %43 = vector.load %arg9[%c0_49, %c0_50] : memref<256x1152xbf16, #tpu.memory_space<vmem>>, vector<256x1152xbf16>
    %c0_51 = arith.constant 0 : index
    %c0_52 = arith.constant 0 : index
    %44 = vector.load %arg2[%c0_51, %c0_52] : memref<1152x128xbf16, #tpu.memory_space<vmem>>, vector<1152x128xbf16>
    %cst_53 = arith.constant dense<0.000000e+00> : vector<256x128xf32>
    %45 = tpu.matmul %43, %44, %cst_53 {dimension_numbers = #tpu.dot_dimension_numbers<[1], [0], [0], [1], [0, 0, 1, 1], [], []>} : vector<256x1152xbf16>, vector<1152x128xbf16>, vector<256x128xf32> -> vector<256x128xf32>
    %cst_54 = arith.constant dense<0.000000e+00> : vector<128xf32>
    %46 = vector.multi_reduction <add>, %45, %cst_54 [0] : vector<256x128xf32> to vector<128xf32>
    %47 = vector.shape_cast %46 : vector<128xf32> to vector<1x1x128xf32>
    %c0_55 = arith.constant 0 : index
    %c0_56 = arith.constant 0 : index
    %c0_57 = arith.constant 0 : index
    %48 = vector.load %arg6[%c0_55, %c0_56, %c0_57] : memref<1x1x128xf32, #tpu.memory_space<vmem>>, vector<1x1x128xf32>
    tpu.vector_store %arg6[%c0_55, %c0_56, %c0_57], %47 {strides = array<i32>} : memref<1x1x128xf32, #tpu.memory_space<vmem>>, vector<1x1x128xf32>,
    %49 = arith.mulf %45, %45 : vector<256x128xf32>
    %cst_58 = arith.constant dense<0.000000e+00> : vector<128xf32>
    %50 = vector.multi_reduction <add>, %49, %cst_58 [0] : vector<256x128xf32> to vector<128xf32>
    %51 = vector.shape_cast %50 : vector<128xf32> to vector<1x1x128xf32>
    %c0_59 = arith.constant 0 : index
    %c0_60 = arith.constant 0 : index
    %c0_61 = arith.constant 0 : index
    %52 = vector.load %arg7[%c0_59, %c0_60, %c0_61] : memref<1x1x128xf32, #tpu.memory_space<vmem>>, vector<1x1x128xf32>
    tpu.vector_store %arg7[%c0_59, %c0_60, %c0_61], %51 {strides = array<i32>} : memref<1x1x128xf32, #tpu.memory_space<vmem>>, vector<1x1x128xf32>,
    %53 = vector.shape_cast %45 : vector<256x128xf32> to vector<1x16x16x128xf32>
    %c0_62 = arith.constant 0 : index
    %c0_63 = arith.constant 0 : index
    %c0_64 = arith.constant 0 : index
    %c0_65 = arith.constant 0 : index
    %54 = vector.load %arg5[%c0_62, %c0_63, %c0_64, %c0_65] : memref<1x16x16x128xf32, #tpu.memory_space<vmem>>, vector<1x16x16x128xf32>
    tpu.vector_store %arg5[%c0_62, %c0_63, %c0_64, %c0_65], %53 {strides = array<i32>} : memref<1x16x16x128xf32, #tpu.memory_space<vmem>>, vector<1x16x16x128xf32>,
    return
  }
  func.func @transform_0(%arg0: i32) -> (i32, i32, i32, i32) {
    %c0_i32 = arith.constant 0 : i32
    %c0_i32_0 = arith.constant 0 : i32
    %c0_i32_1 = arith.constant 0 : i32
    %c0_i32_2 = arith.constant 0 : i32
    return %arg0, %c0_i32, %c0_i32_0, %c0_i32_1 : i32, i32, i32, i32
  }
  func.func @transform_1(%arg0: i32) -> (i32, i32) {
    %c0_i32 = arith.constant 0 : i32
    %c0_i32_0 = arith.constant 0 : i32
    %c0_i32_1 = arith.constant 0 : i32
    return %c0_i32, %c0_i32_0 : i32, i32
  }
  func.func @transform_2(%arg0: i32) -> (i32, i32) {
    %c0_i32 = arith.constant 0 : i32
    %c0_i32_0 = arith.constant 0 : i32
    %c0_i32_1 = arith.constant 0 : i32
    return %c0_i32, %c0_i32_0 : i32, i32
  }
  func.func @transform_3(%arg0: i32) -> (i32, i32) {
    %c0_i32 = arith.constant 0 : i32
    %c0_i32_0 = arith.constant 0 : i32
    %c0_i32_1 = arith.constant 0 : i32
    return %c0_i32, %c0_i32_0 : i32, i32
  }
  func.func @transform_4(%arg0: i32) -> (i32, i32, i32, i32) {
    %c0_i32 = arith.constant 0 : i32
    %c0_i32_0 = arith.constant 0 : i32
    %c0_i32_1 = arith.constant 0 : i32
    %c0_i32_2 = arith.constant 0 : i32
    return %arg0, %c0_i32, %c0_i32_0, %c0_i32_1 : i32, i32, i32, i32
  }
  func.func @transform_5(%arg0: i32) -> (i32, i32, i32) {
    %c0_i32 = arith.constant 0 : i32
    %c0_i32_0 = arith.constant 0 : i32
    %c0_i32_1 = arith.constant 0 : i32
    return %arg0, %c0_i32, %c0_i32_0 : i32, i32, i32
  }
  func.func @transform_6(%arg0: i32) -> (i32, i32, i32) {
    %c0_i32 = arith.constant 0 : i32
    %c0_i32_0 = arith.constant 0 : i32
    %c0_i32_1 = arith.constant 0 : i32
    return %arg0, %c0_i32, %c0_i32_0 : i32, i32, i32
  }
}

module attributes {stable_mosaic.version = 11 : i64} {
  func.func @_bn_add_relu_kernel(%arg0: i32, %arg1: memref<1x16x16x128xf32, #tpu.memory_space<vmem>>, %arg2: memref<1x16x16x128xf32, #tpu.memory_space<vmem>>, %arg3: memref<1x1x1x128xf32, #tpu.memory_space<vmem>>, %arg4: memref<1x1x1x128xf32, #tpu.memory_space<vmem>>, %arg5: memref<1x16x16x128xf32, #tpu.memory_space<vmem>>) attributes {dimension_semantics = [#tpu.dimension_semantics<parallel>], iteration_bounds = array<i64: 2>, scalar_prefetch = 0 : i64, scratch_operands = 0 : i64, tpu.core_type = #tpu.core_type<tc>, window_params = [{transform_indices = @transform_0, window_bounds = array<i64: 1, 16, 16, 128>}, {transform_indices = @transform_1, window_bounds = array<i64: 1, 16, 16, 128>}, {pipeline_mode = #tpu.pipeline_mode<synchronous>, transform_indices = @transform_2, window_bounds = array<i64: 1, 1, 1, 128>}, {pipeline_mode = #tpu.pipeline_mode<synchronous>, transform_indices = @transform_3, window_bounds = array<i64: 1, 1, 1, 128>}, {transform_indices = @transform_4, window_bounds = array<i64: 1, 16, 16, 128>}]} {
    %c0 = arith.constant 0 : index
    %c0_0 = arith.constant 0 : index
    %c0_1 = arith.constant 0 : index
    %c0_2 = arith.constant 0 : index
    %0 = vector.load %arg1[%c0, %c0_0, %c0_1, %c0_2] : memref<1x16x16x128xf32, #tpu.memory_space<vmem>>, vector<1x16x16x128xf32>
    %c0_3 = arith.constant 0 : index
    %c0_4 = arith.constant 0 : index
    %c0_5 = arith.constant 0 : index
    %c0_6 = arith.constant 0 : index
    %1 = vector.load %arg3[%c0_3, %c0_4, %c0_5, %c0_6] : memref<1x1x1x128xf32, #tpu.memory_space<vmem>>, vector<1x1x1x128xf32>
    %2 = vector.broadcast %1 : vector<1x1x1x128xf32> to vector<1x16x16x128xf32>
    %3 = arith.mulf %0, %2 : vector<1x16x16x128xf32>
    %c0_7 = arith.constant 0 : index
    %c0_8 = arith.constant 0 : index
    %c0_9 = arith.constant 0 : index
    %c0_10 = arith.constant 0 : index
    %4 = vector.load %arg4[%c0_7, %c0_8, %c0_9, %c0_10] : memref<1x1x1x128xf32, #tpu.memory_space<vmem>>, vector<1x1x1x128xf32>
    %5 = vector.broadcast %4 : vector<1x1x1x128xf32> to vector<1x16x16x128xf32>
    %6 = arith.addf %3, %5 : vector<1x16x16x128xf32>
    %c0_11 = arith.constant 0 : index
    %c0_12 = arith.constant 0 : index
    %c0_13 = arith.constant 0 : index
    %c0_14 = arith.constant 0 : index
    %7 = vector.load %arg2[%c0_11, %c0_12, %c0_13, %c0_14] : memref<1x16x16x128xf32, #tpu.memory_space<vmem>>, vector<1x16x16x128xf32>
    %8 = arith.addf %6, %7 : vector<1x16x16x128xf32>
    %cst = arith.constant 0.000000e+00 : f32
    %9 = vector.broadcast %cst : f32 to vector<1x16x16x128xf32>
    %10 = arith.maximumf %8, %9 : vector<1x16x16x128xf32>
    %c0_15 = arith.constant 0 : index
    %c0_16 = arith.constant 0 : index
    %c0_17 = arith.constant 0 : index
    %c0_18 = arith.constant 0 : index
    %11 = vector.load %arg5[%c0_15, %c0_16, %c0_17, %c0_18] : memref<1x16x16x128xf32, #tpu.memory_space<vmem>>, vector<1x16x16x128xf32>
    tpu.vector_store %arg5[%c0_15, %c0_16, %c0_17, %c0_18], %10 {strides = array<i32>} : memref<1x16x16x128xf32, #tpu.memory_space<vmem>>, vector<1x16x16x128xf32>,
    return
  }
  func.func @transform_0(%arg0: i32) -> (i32, i32, i32, i32) {
    %c0_i32 = arith.constant 0 : i32
    %c0_i32_0 = arith.constant 0 : i32
    %c0_i32_1 = arith.constant 0 : i32
    %c0_i32_2 = arith.constant 0 : i32
    return %arg0, %c0_i32, %c0_i32_0, %c0_i32_1 : i32, i32, i32, i32
  }
  func.func @transform_1(%arg0: i32) -> (i32, i32, i32, i32) {
    %c0_i32 = arith.constant 0 : i32
    %c0_i32_0 = arith.constant 0 : i32
    %c1_i32 = arith.constant 1 : i32
    %c0_i32_1 = arith.constant 0 : i32
    return %arg0, %c0_i32, %c0_i32_0, %c1_i32 : i32, i32, i32, i32
  }
  func.func @transform_2(%arg0: i32) -> (i32, i32, i32, i32) {
    %c0_i32 = arith.constant 0 : i32
    %c0_i32_0 = arith.constant 0 : i32
    %c0_i32_1 = arith.constant 0 : i32
    %c0_i32_2 = arith.constant 0 : i32
    %c0_i32_3 = arith.constant 0 : i32
    return %c0_i32, %c0_i32_0, %c0_i32_1, %c0_i32_2 : i32, i32, i32, i32
  }
  func.func @transform_3(%arg0: i32) -> (i32, i32, i32, i32) {
    %c0_i32 = arith.constant 0 : i32
    %c0_i32_0 = arith.constant 0 : i32
    %c0_i32_1 = arith.constant 0 : i32
    %c0_i32_2 = arith.constant 0 : i32
    %c0_i32_3 = arith.constant 0 : i32
    return %c0_i32, %c0_i32_0, %c0_i32_1, %c0_i32_2 : i32, i32, i32, i32
  }
  func.func @transform_4(%arg0: i32) -> (i32, i32, i32, i32) {
    %c0_i32 = arith.constant 0 : i32
    %c0_i32_0 = arith.constant 0 : i32
    %c0_i32_1 = arith.constant 0 : i32
    %c0_i32_2 = arith.constant 0 : i32
    return %arg0, %c0_i32, %c0_i32_0, %c0_i32_1 : i32, i32, i32, i32
  }
}

</mosaic_0001>

<bundles_post_ra>
// kernel: resblock_forward.5
= control target key start
LH: loop header
LB: loop body
LE: loop exit
PB: predicated region body
PF: predicated region fallthrough
CT: control target
= control target key end

     0   :  { %9 = vsyncpa [#allocation4], 0  ;;  %s1260_s0 = inlined_call_operand.vmem [shape: f32[2,16,16,128], index: 0, kind: input, shape index: {}]   ;;  %s1261_s1 = inlined_call_operand.vmem [shape: f32[2,16,16,256], index: 1, kind: input, shape index: {}]   ;;  %s1262_s2 = inlined_call_operand.vmem [shape: f32[1,1,1,128], index: 2, kind: input, shape index: {}]   ;;  %s1263_s3 = inlined_call_operand.vmem [shape: f32[1,1,1,128], index: 3, kind: input, shape index: {}]   ;;  %s1264_s4 = inlined_call_operand.hbm [shape: f32[2,16,16,128], index: 4, kind: output, shape index: {}]  }
   0x1   :  { %11 = vsyncpa [#allocation4 + $0x1], 0  ;;  %s895_s15 = smov 0   ;;  %s897_s16 = smov 0  }
   0x2   :  { %s899_s17 = smov 0   ;;  %s901_s18 = smov 0  }
   0x3 LB: > { %s916_s19 = sadd.s32 4294967295, %s865_s18   ;;  %s711_s20 = sadd.s32 4294967294, %s865_s18   ;;  %s865_s18 = sphi %s901_s18, %s1270_s18   ;;  %s861_s17 = sphi %s899_s17, %s1269_s17   ;;  %s857_s16 = sphi %s897_s16, %s1268_s16   ;;  %s853_s15 = sphi %s895_s15, %s1267_s15  }
   0x4   : > { %s920_s21 = sadd.s32 1, %s865_s18   ;;  %s50_s22 = sadd.s32 1, %s861_s17 }
   0x5   : > { %s47_s23 = ssub.s32 %s865_s18, %s920_s21  ;;  %p57_p0 = scmp.ne.s32.totalorder %s861_s17, %s857_s16 }
   0x6   : > { %p48_p1 = scmp.eq.s32.totalorder %s47_s23, 0  ;;  %p58_p2 = scmp.eq.s32.totalorder %s865_s18, 0 }
   0x7   : > { %p129_p3 = scmp.eq.s32.totalorder %s916_s19, 1  ;;  %p134_p4 = scmp.ne.s32.totalorder %s857_s16, %s853_s15 }
   0x8   : > { %s932_s24 = scalar_select %p48_p1, %s861_s17, %s50_s22  }
   0x9   : > { %p59_p5 = por %p58_p2, %p57_p0  ;;  %p934_p6 = por %p129_p3, %p57_p0 }
   0xa   : > { %p135_p7 = scmp.eq.s32.totalorder %s711_s20, 1  ;;  %p713_p9 = scmp.ge.s32.totalorder %s865_s18, 2 }
   0xc   : > { %p938_p8 = por %p135_p7, %p134_p4  ;;  %157 = sbr.rel (%p713_p9) target bundleno = 37 (0x25), region = 24 }
  0x11   : > { %168 = sbr.rel (!%p59_p5) target bundleno = 37 (0x25), region = 32  ;;  %s170_s27 = sand.u32 (%p59_p5), 1, %s861_s17  }
  0x12   : > { %s761_s28 = sshll.u32 (%p59_p5), %s865_s18, 9  ;;  %s714_s29 = sshll.u32 (%p59_p5), %s170_s27, 8 }
  0x13   : > { %s950_s6 = scalar_lea.vmem (%p59_p5), %s1261_s1, %s761_s28  ;;  %s955_s7 = scalar_lea.vmem (%p59_p5), [#allocation2], %s714_s29 }
  0x14   : > { %v717_v0 = vld [vmem:[%s950_s6 + $0x8] sm:$0xff] (%p59_p5)  ;;  %v718_v1 = vld [vmem:[%s950_s6 + $0x18] sm:$0xff] (%p59_p5) }
  0x15   : > { %v719_v2 = vld [vmem:[%s950_s6 + $0x28] sm:$0xff] (%p59_p5)  ;;  %268 = vst [vmem:[%s955_s7] sm:$0xff] (%p59_p5), %v717_v0  ;;  %270 = vst [vmem:[%s955_s7 + $0x8] sm:$0xff] (%p59_p5), %v718_v1  ;;  %v720_v3 = vld [vmem:[%s950_s6 + $0x38] sm:$0xff] (%p59_p5) }
  0x16   : > { %272 = vst [vmem:[%s955_s7 + $0x10] sm:$0xff] %v719_v2  ;;  %v721_v4 = vld [vmem:[%s950_s6 + $0x48] sm:$0xff]  ;;  %v722_v5 = vld [vmem:[%s950_s6 + $0x58] sm:$0xff]  ;;  %274 = vst [vmem:[%s955_s7 + $0x18] sm:$0xff] %v720_v3 }
  0x17   : > { %276 = vst [vmem:[%s955_s7 + $0x20] sm:$0xff] %v721_v4  ;;  %278 = vst [vmem:[%s955_s7 + $0x28] sm:$0xff] %v722_v5  ;;  %v723_v6 = vld [vmem:[%s950_s6 + $0x68] sm:$0xff]  ;;  %v724_v7 = vld [vmem:[%s950_s6 + $0x78] sm:$0xff] }
  0x18   : > { %v725_v8 = vld [vmem:[%s950_s6 + $0x88] sm:$0xff]  ;;  %280 = vst [vmem:[%s955_s7 + $0x30] sm:$0xff] %v723_v6  ;;  %282 = vst [vmem:[%s955_s7 + $0x38] sm:$0xff] %v724_v7  ;;  %v726_v9 = vld [vmem:[%s950_s6 + $0x98] sm:$0xff] }
  0x19   : > { %284 = vst [vmem:[%s955_s7 + $0x40] sm:$0xff] %v725_v8  ;;  %v727_v10 = vld [vmem:[%s950_s6 + $0xa8] sm:$0xff]  ;;  %v728_v11 = vld [vmem:[%s950_s6 + $0xb8] sm:$0xff]  ;;  %286 = vst [vmem:[%s955_s7 + $0x48] sm:$0xff] %v726_v9 }
  0x1a   : > { %288 = vst [vmem:[%s955_s7 + $0x50] sm:$0xff] %v727_v10  ;;  %290 = vst [vmem:[%s955_s7 + $0x58] sm:$0xff] %v728_v11  ;;  %v729_v12 = vld [vmem:[%s950_s6 + $0xc8] sm:$0xff]  ;;  %v730_v13 = vld [vmem:[%s950_s6 + $0xd8] sm:$0xff] }
  0x1b   : > { %v731_v14 = vld [vmem:[%s950_s6 + $0xe8] sm:$0xff]  ;;  %292 = vst [vmem:[%s955_s7 + $0x60] sm:$0xff] %v729_v12  ;;  %294 = vst [vmem:[%s955_s7 + $0x68] sm:$0xff] %v730_v13  ;;  %v732_v15 = vld [vmem:[%s950_s6 + $0xf8] sm:$0xff] }
  0x1c   : > { %296 = vst [vmem:[%s955_s7 + $0x70] sm:$0xff] %v731_v14  ;;  %v733_v16 = vld [vmem:[%s950_s6 + $0x108] sm:$0xff]  ;;  %v734_v17 = vld [vmem:[%s950_s6 + $0x118] sm:$0xff]  ;;  %298 = vst [vmem:[%s955_s7 + $0x78] sm:$0xff] %v732_v15 }
  0x1d   : > { %300 = vst [vmem:[%s955_s7 + $0x80] sm:$0xff] %v733_v16  ;;  %302 = vst [vmem:[%s955_s7 + $0x88] sm:$0xff] %v734_v17  ;;  %v735_v18 = vld [vmem:[%s950_s6 + $0x128] sm:$0xff]  ;;  %v736_v19 = vld [vmem:[%s950_s6 + $0x138] sm:$0xff] }
  0x1e   : > { %v737_v20 = vld [vmem:[%s950_s6 + $0x148] sm:$0xff]  ;;  %304 = vst [vmem:[%s955_s7 + $0x90] sm:$0xff] %v735_v18  ;;  %306 = vst [vmem:[%s955_s7 + $0x98] sm:$0xff] %v736_v19  ;;  %v738_v21 = vld [vmem:[%s950_s6 + $0x158] sm:$0xff] }
  0x1f   : > { %308 = vst [vmem:[%s955_s7 + $0xa0] sm:$0xff] %v737_v20  ;;  %v739_v22 = vld [vmem:[%s950_s6 + $0x168] sm:$0xff]  ;;  %v740_v23 = vld [vmem:[%s950_s6 + $0x178] sm:$0xff]  ;;  %310 = vst [vmem:[%s955_s7 + $0xa8] sm:$0xff] %v738_v21 }
  0x20   : > { %312 = vst [vmem:[%s955_s7 + $0xb0] sm:$0xff] %v739_v22  ;;  %314 = vst [vmem:[%s955_s7 + $0xb8] sm:$0xff] %v740_v23  ;;  %v741_v24 = vld [vmem:[%s950_s6 + $0x188] sm:$0xff]  ;;  %v742_v25 = vld [vmem:[%s950_s6 + $0x198] sm:$0xff] }
  0x21   : > { %v743_v26 = vld [vmem:[%s950_s6 + $0x1a8] sm:$0xff]  ;;  %316 = vst [vmem:[%s955_s7 + $0xc0] sm:$0xff] %v741_v24  ;;  %318 = vst [vmem:[%s955_s7 + $0xc8] sm:$0xff] %v742_v25  ;;  %v744_v27 = vld [vmem:[%s950_s6 + $0x1b8] sm:$0xff] }
  0x22   : > { %320 = vst [vmem:[%s955_s7 + $0xd0] sm:$0xff] %v743_v26  ;;  %v745_v28 = vld [vmem:[%s950_s6 + $0x1c8] sm:$0xff]  ;;  %v746_v29 = vld [vmem:[%s950_s6 + $0x1d8] sm:$0xff]  ;;  %322 = vst [vmem:[%s955_s7 + $0xd8] sm:$0xff] %v744_v27 }
  0x23   : > { %324 = vst [vmem:[%s955_s7 + $0xe0] sm:$0xff] %v745_v28  ;;  %326 = vst [vmem:[%s955_s7 + $0xe8] sm:$0xff] %v746_v29  ;;  %v747_v30 = vld [vmem:[%s950_s6 + $0x1e8] sm:$0xff]  ;;  %v748_v31 = vld [vmem:[%s950_s6 + $0x1f8] sm:$0xff] }
  0x24   : > { %328 = vst [vmem:[%s955_s7 + $0xf0] sm:$0xff] %v747_v30  ;;  %330 = vst [vmem:[%s955_s7 + $0xf8] sm:$0xff] %v748_v31 }
  0x25 PF: > { %p749_p10 = scmp.ge.s32.totalorder %s865_s18, 1  ;;  %p335_p11 = scmp.lt.s32.totalorder %s865_s18, 3 }
  0x27   : > { %p336_p12 = pnand %p749_p10, %p335_p11 }
  0x28   : > { %s342_s8 = sand.u32 (!%p336_p12), 1, %s857_s16   ;;  %p372_p13 = scmp.lt.s32.totalorder (!%p336_p12), %s916_s19, 1 }
  0x29   : > { %339 = sbr.rel (%p336_p12) target bundleno = 101 (0x65), region = 70  ;;  %s1024_s9 = sshll.u32 (!%p336_p12), %s342_s8, 8 }
  0x2a   : > { %s1044_s28 = scalar_lea.vmem (!%p336_p12), [#allocation2], %s1024_s9  ;;  %s1085_s29 = scalar_lea.vmem (!%p336_p12), [#allocation3], %s1024_s9 }
  0x2b   : > { %s763_s30 = sshll.u32 (!%p336_p12), %s916_s19, 12  ;;  %s629_s5 = sshll.u32 (!%p336_p12), %s1085_s29, 4  ;;  %s1210_s5 = int_to_ptr.vmem [resolvable:$true] %s629_s5 }
  0x2c   : > { %s1208_s7 = scalar_lea.hbm (!%p336_p12), %s1264_s4, %s763_s30  ;;  %s1219_s9 = scalar_lea.sflag (!%p336_p12), [#allocation4], %s342_s8 }
  0x2e   : > { %s373_s10 = scalar_select %p372_p13, %s916_s19, 1  ;;  %v1030_v32 = vld [vmem:[%s1262_s2] ss:$0 sm:$0xff]  ;;  %v488_v37 = vld [vmem:[%s1044_s28 + $0x8] sm:$0xff]  ;;  %v489_v45 = vld [vmem:[%s1044_s28 + $0x10] sm:$0xff] }
  0x2f   : > { %v1040_v33 = vld [vmem:[%s1263_s3] ss:$0 sm:$0xff]  ;;  %v490_v54 = vld [vmem:[%s1044_s28 + $0x18] sm:$0xff]  ;;  %v492_v56 = vld [vmem:[%s1044_s28 + $0x28] sm:$0xff] }
  0x30   : > { %s762_s11 = sshll.u32 %s373_s10, 8  ;;  %v487_v35 = vld [vmem:[%s1044_s28] sm:$0xff]  ;;  %v493_v61 = vld [vmem:[%s1044_s28 + $0x30] sm:$0xff]  ;;  %v494_v3 = vld [vmem:[%s1044_s28 + $0x38] sm:$0xff]  ;;  %s805_s10 = scalar_lea.vmem %s1210_s5, 4096 }
  0x31   : > { %s1035_s22 = scalar_lea.vmem %s1260_s0, %s762_s11  ;;  %v491_v55 = vld [vmem:[%s1044_s28 + $0x20] sm:$0xff]  ;;  %v496_v30 = vld [vmem:[%s1044_s28 + $0x48] sm:$0xff]  ;;  %v497_v31 = vld [vmem:[%s1044_s28 + $0x50] sm:$0xff]  ;;  %p806_p0 = scmp.ne.s32.totalorder %s1210_s5, %s805_s10 }
  0x32   : > { %v377_v34 = vld [vmem:[%s1035_s22] sm:$0xff]  ;;  %v378_v36 = vld [vmem:[%s1035_s22 + $0x8] sm:$0xff]  ;;  %v379_v38 = vld [vmem:[%s1035_s22 + $0x10] sm:$0xff]  ;;  %s867_s11 = smov [#allocation3]  }
  0x33   : > { %v416_v39 = vmul.f32 %v1030_v32, %v377_v34  ;;  %v417_v40 = vmul.f32 %v1030_v32, %v378_v36  ;;  %v418_v41 = vmul.f32 %v1030_v32, %v379_v38  ;;  %v380_v42 = vld [vmem:[%s1035_s22 + $0x18] sm:$0xff]  ;;  %v381_v43 = vld [vmem:[%s1035_s22 + $0x20] sm:$0xff]  ;;  %v382_v44 = vld [vmem:[%s1035_s22 + $0x28] sm:$0xff]  ;;  %p807_p1 = pnand %p806_p0, %p934_p6  ;;  %s809_s12 = sshll.u32 %s867_s11, 4  ;;  %s810_s12 = int_to_ptr.vmem [resolvable:$false] %s809_s12 }
  0x34   : > { %v419_v46 = vmul.f32 %v1030_v32, %v380_v42  ;;  %v420_v47 = vmul.f32 %v1030_v32, %v381_v43  ;;  %v421_v48 = vmul.f32 %v1030_v32, %v382_v44  ;;  %v383_v49 = vld [vmem:[%s1035_s22 + $0x30] sm:$0xff]  ;;  %v384_v50 = vld [vmem:[%s1035_s22 + $0x38] sm:$0xff]  ;;  %v385_v8 = vld [vmem:[%s1035_s22 + $0x40] sm:$0xff]  ;;  %s811_s13 = scalar_lea.vmem %s810_s12, 8192  ;;  %p812_p3 = scmp.lt.s32.totalorder %s1210_s5, %s810_s12 }
  0x35   : > { %v455_v51 = vadd.f32 %v1040_v33, %v416_v39  ;;  %v456_v52 = vadd.f32 %v1040_v33, %v417_v40  ;;  %v457_v53 = vadd.f32 %v1040_v33, %v418_v41  ;;  %v422_v57 = vmul.f32 %v1030_v32, %v383_v49  ;;  %v386_v9 = vld [vmem:[%s1035_s22 + $0x48] sm:$0xff]  ;;  %v387_v10 = vld [vmem:[%s1035_s22 + $0x50] sm:$0xff]  ;;  %v388_v15 = vld [vmem:[%s1035_s22 + $0x58] sm:$0xff]  ;;  %p808_p2 = pneg %p807_p1  ;;  %p813_p4 = scmp.lt.s32.totalorder %s811_s13, %s805_s10 }
  0x36   : > { %v458_v58 = vadd.f32 %v1040_v33, %v419_v46  ;;  %v459_v59 = vadd.f32 %v1040_v33, %v420_v47  ;;  %v460_v60 = vadd.f32 %v1040_v33, %v421_v48  ;;  %v423_v62 = vmul.f32 %v1030_v32, %v384_v50  ;;  %v389_v16 = vld [vmem:[%s1035_s22 + $0x60] sm:$0xff]  ;;  %v390_v17 = vld [vmem:[%s1035_s22 + $0x68] sm:$0xff]  ;;  %v391_v22 = vld [vmem:[%s1035_s22 + $0x70] sm:$0xff] }
  0x37   : > { %v519_v63 = vadd.f32 %v487_v35, %v455_v51  ;;  %v520_v0 = vadd.f32 %v488_v37, %v456_v52  ;;  %v521_v1 = vadd.f32 %v489_v45, %v457_v53  ;;  %v461_v2 = vadd.f32 %v1040_v33, %v422_v57  ;;  %v392_v27 = vld [vmem:[%s1035_s22 + $0x78] sm:$0xff]  ;;  %v495_v29 = vld [vmem:[%s1044_s28 + $0x40] sm:$0xff]  ;;  %v500_v42 = vld [vmem:[%s1044_s28 + $0x68] sm:$0xff]  ;;  %p814_p5 = por %p813_p4, %p812_p3 }
  0x38   : > { %v522_v4 = vadd.f32 %v490_v54, %v458_v58  ;;  %v523_v5 = vadd.f32 %v491_v55, %v459_v59  ;;  %v524_v6 = vadd.f32 %v492_v56, %v460_v60  ;;  %v462_v7 = vadd.f32 %v1040_v33, %v423_v62  ;;  %v498_v40 = vld [vmem:[%s1044_s28 + $0x58] sm:$0xff]  ;;  %v499_v41 = vld [vmem:[%s1044_s28 + $0x60] sm:$0xff]  ;;  %v501_v47 = vld [vmem:[%s1044_s28 + $0x70] sm:$0xff] }
  0x39   : > { %v551_v11 = vmax.f32 %v519_v63, 0.0  ;;  %v552_v12 = vmax.f32 %v520_v0, 0.0  ;;  %v553_v13 = vmax.f32 %v521_v1, 0.0  ;;  %v525_v14 = vadd.f32 %v493_v61, %v461_v2  ;;  %v502_v53 = vld [vmem:[%s1044_s28 + $0x78] sm:$0xff]  ;;  %v393_v58 = vld [vmem:[%s1035_s22 + $0x80] sm:$0xff]  ;;  %v394_v59 = vld [vmem:[%s1035_s22 + $0x88] sm:$0xff]  ;;  %p815_p7 = pnand %p814_p5, %p808_p2 }
  0x3a   : > { %v554_v18 = vmax.f32 %v522_v4, 0.0  ;;  %v555_v19 = vmax.f32 %v523_v5, 0.0  ;;  %v556_v20 = vmax.f32 %v524_v6, 0.0  ;;  %v526_v21 = vadd.f32 %v494_v3, %v462_v7  ;;  %v395_v60 = vld [vmem:[%s1035_s22 + $0x90] sm:$0xff]  ;;  %v396_v1 = vld [vmem:[%s1035_s22 + $0x98] sm:$0xff]  ;;  %v397_v2 = vld [vmem:[%s1035_s22 + $0xa0] sm:$0xff] }
  0x3b   : > { %583 = vst [vmem:[%s1085_s29] sm:$0xff] %v551_v11  ;;  %584 = vst [vmem:[%s1085_s29 + $0x8] sm:$0xff] %v552_v12  ;;  %v557_v23 = vmax.f32 %v525_v14, 0.0  ;;  %v424_v24 = vmul.f32 %v1030_v32, %v385_v8  ;;  %v425_v25 = vmul.f32 %v1030_v32, %v386_v9  ;;  %v426_v26 = vmul.f32 %v1030_v32, %v387_v10  ;;  %v398_v3 = vld [vmem:[%s1035_s22 + $0xa8] sm:$0xff]  ;;  %v399_v8 = vld [vmem:[%s1035_s22 + $0xb0] sm:$0xff] }
  0x3c   : > { %585 = vst [vmem:[%s1085_s29 + $0x10] sm:$0xff] %v553_v13  ;;  %586 = vst [vmem:[%s1085_s29 + $0x18] sm:$0xff] %v554_v18  ;;  %v558_v28 = vmax.f32 %v526_v21, 0.0  ;;  %v427_v34 = vmul.f32 %v1030_v32, %v388_v15  ;;  %v428_v35 = vmul.f32 %v1030_v32, %v389_v16  ;;  %v429_v36 = vmul.f32 %v1030_v32, %v390_v17  ;;  %v400_v13 = vld [vmem:[%s1035_s22 + $0xb8] sm:$0xff]  ;;  %v503_v15 = vld [vmem:[%s1044_s28 + $0x80] sm:$0xff] }
  0x3d   : > { %587 = vst [vmem:[%s1085_s29 + $0x20] sm:$0xff] %v555_v19  ;;  %588 = vst [vmem:[%s1085_s29 + $0x28] sm:$0xff] %v556_v20  ;;  %v463_v37 = vadd.f32 %v1040_v33, %v424_v24  ;;  %v464_v38 = vadd.f32 %v1040_v33, %v425_v25  ;;  %v465_v39 = vadd.f32 %v1040_v33, %v426_v26  ;;  %v504_v16 = vld [vmem:[%s1044_s28 + $0x88] sm:$0xff]  ;;  %v505_v17 = vld [vmem:[%s1044_s28 + $0x90] sm:$0xff] }
  0x3e   : > { %589 = vst [vmem:[%s1085_s29 + $0x30] sm:$0xff] %v557_v23  ;;  %v430_v43 = vmul.f32 %v1030_v32, %v391_v22  ;;  %590 = vst [vmem:[%s1085_s29 + $0x38] sm:$0xff] %v558_v28  ;;  %v466_v44 = vadd.f32 %v1040_v33, %v427_v34  ;;  %v467_v45 = vadd.f32 %v1040_v33, %v428_v35  ;;  %v506_v24 = vld [vmem:[%s1044_s28 + $0x98] sm:$0xff]  ;;  %v507_v25 = vld [vmem:[%s1044_s28 + $0xa0] sm:$0xff] }
  0x3f   : > { %v468_v46 = vadd.f32 %v1040_v33, %v429_v36  ;;  %v431_v48 = vmul.f32 %v1030_v32, %v392_v27  ;;  %v527_v49 = vadd.f32 %v495_v29, %v463_v37  ;;  %v528_v50 = vadd.f32 %v496_v30, %v464_v38  ;;  %v508_v26 = vld [vmem:[%s1044_s28 + $0xa8] sm:$0xff] }
  0x40   : > { %v529_v51 = vadd.f32 %v497_v31, %v465_v39  ;;  %v469_v52 = vadd.f32 %v1040_v33, %v430_v43  ;;  %v530_v54 = vadd.f32 %v498_v40, %v466_v44  ;;  %v531_v55 = vadd.f32 %v499_v41, %v467_v45  ;;  %v509_v31 = vld [vmem:[%s1044_s28 + $0xb0] sm:$0xff]  ;;  %v510_v39 = vld [vmem:[%s1044_s28 + $0xb8] sm:$0xff]  ;;  %v401_v44 = vld [vmem:[%s1035_s22 + $0xc0] sm:$0xff] }
  0x41   : > { %v532_v56 = vadd.f32 %v500_v42, %v468_v46  ;;  %v470_v57 = vadd.f32 %v1040_v33, %v431_v48  ;;  %v559_v61 = vmax.f32 %v527_v49, 0.0  ;;  %v560_v62 = vmax.f32 %v528_v50, 0.0  ;;  %v402_v45 = vld [vmem:[%s1035_s22 + $0xc8] sm:$0xff]  ;;  %v403_v46 = vld [vmem:[%s1035_s22 + $0xd0] sm:$0xff] }
  0x42   : > { %v561_v63 = vmax.f32 %v529_v51, 0.0  ;;  %v533_v0 = vadd.f32 %v501_v47, %v469_v52  ;;  %v562_v4 = vmax.f32 %v530_v54, 0.0  ;;  %v563_v5 = vmax.f32 %v531_v55, 0.0  ;;  %v404_v51 = vld [vmem:[%s1035_s22 + $0xd8] sm:$0xff]  ;;  %v405_v52 = vld [vmem:[%s1035_s22 + $0xe0] sm:$0xff] }
  0x43   : > { %v564_v6 = vmax.f32 %v532_v56, 0.0  ;;  %v534_v7 = vadd.f32 %v502_v53, %v470_v57  ;;  %591 = vst [vmem:[%s1085_s29 + $0x40] sm:$0xff] %v559_v61  ;;  %592 = vst [vmem:[%s1085_s29 + $0x48] sm:$0xff] %v560_v62  ;;  %v432_v10 = vmul.f32 %v1030_v32, %v393_v58  ;;  %v433_v11 = vmul.f32 %v1030_v32, %v394_v59  ;;  %v406_v53 = vld [vmem:[%s1035_s22 + $0xe8] sm:$0xff]  ;;  %v407_v58 = vld [vmem:[%s1035_s22 + $0xf0] sm:$0xff] }
  0x44   : > { %593 = vst [vmem:[%s1085_s29 + $0x50] sm:$0xff] %v561_v63  ;;  %v565_v9 = vmax.f32 %v533_v0, 0.0  ;;  %v434_v12 = vmul.f32 %v1030_v32, %v395_v60  ;;  %594 = vst [vmem:[%s1085_s29 + $0x58] sm:$0xff] %v562_v4  ;;  %v435_v18 = vmul.f32 %v1030_v32, %v396_v1  ;;  %v436_v19 = vmul.f32 %v1030_v32, %v397_v2  ;;  %v408_v63 = vld [vmem:[%s1035_s22 + $0xf8] sm:$0xff]  ;;  %v511_v1 = vld [vmem:[%s1044_s28 + $0xc0] sm:$0xff] }
  0x45   : > { %595 = vst [vmem:[%s1085_s29 + $0x60] sm:$0xff] %v563_v5  ;;  %596 = vst [vmem:[%s1085_s29 + $0x68] sm:$0xff] %v564_v6  ;;  %v566_v14 = vmax.f32 %v534_v7, 0.0  ;;  %v437_v20 = vmul.f32 %v1030_v32, %v398_v3  ;;  %v471_v21 = vadd.f32 %v1040_v33, %v432_v10  ;;  %v472_v22 = vadd.f32 %v1040_v33, %v433_v11  ;;  %v512_v2 = vld [vmem:[%s1044_s28 + $0xc8] sm:$0xff]  ;;  %v513_v3 = vld [vmem:[%s1044_s28 + $0xd0] sm:$0xff] }
  0x46   : > { %597 = vst [vmem:[%s1085_s29 + $0x70] sm:$0xff] %v565_v9  ;;  %v473_v23 = vadd.f32 %v1040_v33, %v434_v12  ;;  %v438_v27 = vmul.f32 %v1030_v32, %v399_v8  ;;  %v474_v28 = vadd.f32 %v1040_v33, %v435_v18  ;;  %v475_v29 = vadd.f32 %v1040_v33, %v436_v19  ;;  %v514_v10 = vld [vmem:[%s1044_s28 + $0xd8] sm:$0xff]  ;;  %v515_v11 = vld [vmem:[%s1044_s28 + $0xe0] sm:$0xff]  ;;  %v516_v12 = vld [vmem:[%s1044_s28 + $0xe8] sm:$0xff] }
  0x47   : > { %598 = vst [vmem:[%s1085_s29 + $0x78] sm:$0xff] %v566_v14  ;;  %v476_v30 = vadd.f32 %v1040_v33, %v437_v20  ;;  %v439_v34 = vmul.f32 %v1030_v32, %v400_v13  ;;  %v535_v35 = vadd.f32 %v503_v15, %v471_v21  ;;  %v536_v36 = vadd.f32 %v504_v16, %v472_v22 }
  0x48   : > { %v537_v37 = vadd.f32 %v505_v17, %v473_v23  ;;  %v477_v38 = vadd.f32 %v1040_v33, %v438_v27  ;;  %v538_v40 = vadd.f32 %v506_v24, %v474_v28  ;;  %v539_v41 = vadd.f32 %v507_v25, %v475_v29  ;;  %v517_v17 = vld [vmem:[%s1044_s28 + $0xf0] sm:$0xff]  ;;  %v518_v23 = vld [vmem:[%s1044_s28 + $0xf8] sm:$0xff] }
  0x49   : > { %v540_v42 = vadd.f32 %v508_v26, %v476_v30  ;;  %v478_v43 = vadd.f32 %v1040_v33, %v439_v34  ;;  %v567_v47 = vmax.f32 %v535_v35, 0.0  ;;  %v568_v48 = vmax.f32 %v536_v36, 0.0 }
  0x4a   : > { %v569_v49 = vmax.f32 %v537_v37, 0.0  ;;  %v541_v50 = vadd.f32 %v509_v31, %v477_v38  ;;  %v570_v54 = vmax.f32 %v538_v40, 0.0  ;;  %v571_v55 = vmax.f32 %v539_v41, 0.0 }
  0x4b   : > { %v572_v56 = vmax.f32 %v540_v42, 0.0  ;;  %v542_v57 = vadd.f32 %v510_v39, %v478_v43  ;;  %599 = vst [vmem:[%s1085_s29 + $0x80] sm:$0xff] %v567_v47  ;;  %600 = vst [vmem:[%s1085_s29 + $0x88] sm:$0xff] %v568_v48  ;;  %v440_v60 = vmul.f32 %v1030_v32, %v401_v44  ;;  %v441_v61 = vmul.f32 %v1030_v32, %v402_v45 }
  0x4c   : > { %601 = vst [vmem:[%s1085_s29 + $0x90] sm:$0xff] %v569_v49  ;;  %v573_v59 = vmax.f32 %v541_v50, 0.0  ;;  %v442_v62 = vmul.f32 %v1030_v32, %v403_v46  ;;  %602 = vst [vmem:[%s1085_s29 + $0x98] sm:$0xff] %v570_v54  ;;  %v443_v4 = vmul.f32 %v1030_v32, %v404_v51  ;;  %v444_v5 = vmul.f32 %v1030_v32, %v405_v52 }
  0x4d   : > { %603 = vst [vmem:[%s1085_s29 + $0xa0] sm:$0xff] %v571_v55  ;;  %604 = vst [vmem:[%s1085_s29 + $0xa8] sm:$0xff] %v572_v56  ;;  %v574_v0 = vmax.f32 %v542_v57, 0.0  ;;  %v445_v6 = vmul.f32 %v1030_v32, %v406_v53  ;;  %v479_v7 = vadd.f32 %v1040_v33, %v440_v60  ;;  %v480_v8 = vadd.f32 %v1040_v33, %v441_v61 }
  0x4e   : > { %605 = vst [vmem:[%s1085_s29 + $0xb0] sm:$0xff] %v573_v59  ;;  %v481_v9 = vadd.f32 %v1040_v33, %v442_v62  ;;  %v446_v13 = vmul.f32 %v1030_v32, %v407_v58  ;;  %v482_v14 = vadd.f32 %v1040_v33, %v443_v4  ;;  %v483_v15 = vadd.f32 %v1040_v33, %v444_v5 }
  0x4f   : > { %606 = vst [vmem:[%s1085_s29 + $0xb8] sm:$0xff] %v574_v0  ;;  %v484_v16 = vadd.f32 %v1040_v33, %v445_v6  ;;  %v447_v18 = vmul.f32 %v1030_v32, %v408_v63  ;;  %v543_v19 = vadd.f32 %v511_v1, %v479_v7  ;;  %v544_v20 = vadd.f32 %v512_v2, %v480_v8 }
  0x50   : > { %v545_v21 = vadd.f32 %v513_v3, %v481_v9  ;;  %v485_v22 = vadd.f32 %v1040_v33, %v446_v13  ;;  %v546_v24 = vadd.f32 %v514_v10, %v482_v14  ;;  %v547_v25 = vadd.f32 %v515_v11, %v483_v15 }
  0x51   : > { %v548_v26 = vadd.f32 %v516_v12, %v484_v16  ;;  %v486_v27 = vadd.f32 %v1040_v33, %v447_v18  ;;  %v575_v28 = vmax.f32 %v543_v19, 0.0  ;;  %v576_v32 = vmax.f32 %v544_v20, 0.0 }
  0x52   : > { %v577_v29 = vmax.f32 %v545_v21, 0.0  ;;  %v549_v30 = vadd.f32 %v517_v17, %v485_v22  ;;  %v578_v31 = vmax.f32 %v546_v24, 0.0  ;;  %v579_v34 = vmax.f32 %v547_v25, 0.0 }
  0x53   : > { %v580_v35 = vmax.f32 %v548_v26, 0.0  ;;  %v550_v36 = vadd.f32 %v518_v23, %v486_v27  ;;  %607 = vst [vmem:[%s1085_s29 + $0xc0] sm:$0xff] %v575_v28  ;;  %608 = vst [vmem:[%s1085_s29 + $0xc8] sm:$0xff] %v576_v32 }
  0x54   : > { %609 = vst [vmem:[%s1085_s29 + $0xd0] sm:$0xff] %v577_v29  ;;  %v581_v33 = vmax.f32 %v549_v30, 0.0  ;;  %610 = vst [vmem:[%s1085_s29 + $0xd8] sm:$0xff] %v578_v31 }
  0x55   : > { %611 = vst [vmem:[%s1085_s29 + $0xe0] sm:$0xff] %v579_v34  ;;  %612 = vst [vmem:[%s1085_s29 + $0xe8] sm:$0xff] %v580_v35  ;;  %v582_v37 = vmax.f32 %v550_v36, 0.0 }
  0x56   : > { %613 = vst [vmem:[%s1085_s29 + $0xf0] sm:$0xff] %v581_v33 }
  0x57   : > { %614 = vst [vmem:[%s1085_s29 + $0xf8] sm:$0xff] %v582_v37 }
  0x58   : > { %818 = shalt.err (!%p815_p7)
}
  0x59   : > { %s819_s8 = scalar_lea.hbm %s1208_s7, 4096  ;;  %s823_s22 = scalar_lea.hbm %s1264_s4, 8192 }
  0x5a   : > { %p820_p10 = scmp.ne.s32.totalorder %s1208_s7, %s819_s8  ;;  %p824_p13 = scmp.lt.s32.totalorder %s1208_s7, %s1264_s4 }
  0x5b   : > { %p825_p0 = scmp.lt.s32.totalorder %s823_s22, %s819_s8 }
  0x5c   : > { %p821_p11 = pnand %p820_p10, %p934_p6 }
  0x5d   : > { %p826_p1 = por %p825_p0, %p824_p13 }
  0x5e   : > { %p822_p12 = pneg %p821_p11 }
  0x60   : > { %p827_p2 = pnand %p826_p1, %p822_p12 }
  0x62   : > { %830 = shalt.err (!%p827_p2)
}
  0x63   : > { %s868_s28 = smov 128   ;;  %s869_s29 = smov 8  }
  0x64   : > { %764 = dma.vmem_to_hbm [thread:$0]  (%p934_p6), %s1210_s5, 4096, %s1208_s7, %s1219_s9, %s868_s28, %s868_s28, %s869_s29  }
  0x65 PF: > { %s644_s30 = sand.u32 1, %s853_s15   ;;  %p767_p3 = pnand %p713_p9, %p938_p8 }
  0x66   : > { %s645_s19 = scalar_lea.sflag [#allocation4], %s644_s30 }
  0x67   : > { %p768_p4 = pneg %p767_p3 }
  0x69   : > { %848 = dma.done.wait (%p768_p4), %s645_s19, 4096  }
  0x6a   : > { %850 = vsyncadd (%p768_p4), %s645_s19, 4294963200  ;;  %p14_p5 = scmp.ge.s32.totalorder %s920_s21, 4   ;;  %s1267_s15 = smov %s857_s16 }
  0x6b   : > { %s1268_s16 = smov %s861_s17  ;;  %s1269_s17 = smov %s932_s24 }
  0x6c   : > { %s1270_s18 = smov %s920_s21  ;;  %16 = sbr.rel (!%p14_p5) target bundleno = 3 (0x3), region = 117 }
  0x71   :  { %650 = vsyncpa [#allocation4], 1 }
  0x72   :  { %652 = vsyncpa [#allocation4 + $0x1], 1 }

// kernel: resblock_forward.3
= control target key start
LH: loop header
LB: loop body
LE: loop exit
PB: predicated region body
PF: predicated region fallthrough
CT: control target
= control target key end

     0   :  { %s5939_s18 = smov 0   ;;  %s8474_s0 = inlined_call_operand.vmem [shape: bf16[2,16,16,64], index: 0, kind: input, shape index: {}]   ;;  %s8475_s1 = inlined_call_operand.vmem [shape: bf16[576,256], index: 1, kind: input, shape index: {}]   ;;  %s8476_s2 = inlined_call_operand.vmem [shape: f32[1,256], index: 2, kind: input, shape index: {}]   ;;  %s8477_s3 = inlined_call_operand.vmem [shape: f32[2,16,16,256], index: 3, kind: output, shape index: {0}]   ;;  %s8478_s4 = inlined_call_operand.vmem [shape: f32[2,1,128], index: 4, kind: output, shape index: {1}]   ;;  %s8479_s5 = inlined_call_operand.vmem [shape: f32[2,1,128], index: 5, kind: output, shape index: {2}]  }
   0x1 LB: > { %s5441_s19 = sadd.s32 4294967295, %s5905_s18   ;;  %p5445_p0 = scmp.ge.s32.totalorder %s5905_s18, 1  ;;  %s5905_s18 = sphi %s5939_s18, %s16_s18  }
   0x2   : > { %p192_p1 = scmp.lt.s32.totalorder %s5905_s18, 3 }
   0x4   : > { %p193_p2 = pnand %p5445_p0, %p192_p1 }
   0x6   : > { %196 = sbr.rel (%p193_p2) target bundleno = 737 (0x2e1), region = 32 }
   0xb   : > { %vm275_vm0 = vcmask 519168   ;;  %vm278_vm1 = vcmask 516096   ;;  %v5907_v0 = vmov 0   ;;  %p226_p3 = scmp.lt.s32.totalorder %s5441_s19, 1  ;;  %vm884_vm2 = vsmask.f32 3328 }
   0xc   : > { %277 = vst.msk [vmem:[#allocation2 + $0x4] sm:$0xf] %vm275_vm0, %v5907_v0  ;;  %276 = vst.msk [vmem:[#allocation2] sm:$0xf] %vm275_vm0, %v5907_v0  ;;  %v5712_v1 = vld [vmem:[%s8475_s1 + $0x74] ss:$8 sps:$4 sm:$0xff]  }
   0xd   : > { %279 = vst.msk [vmem:[#allocation2 + $0x8] sm:$0x1] %vm278_vm1, %v5907_v0  ;;  %282 = vst.msk [vmem:[#allocation2 + $0x14] sm:$0x1] %vm278_vm1, %v5907_v0  ;;  %s8527_s19 = smov (!%p226_p3, %s5441_s19), 1  ;;  %4585 = vmatprep.subr.bf16.mxu0 %v5712_v1  ;;  %5670 = vmatprep.subr.bf16.mxu1 %v5712_v1  ;;  %s5908_s11 = smov 64  }
   0xe   : > { %280 = vst.msk [vmem:[#allocation2 + $0xc] sm:$0xf] %vm275_vm0, %v5907_v0  ;;  %281 = vst.msk [vmem:[#allocation2 + $0x10] sm:$0xf] %vm275_vm0, %v5907_v0  ;;  %v5714_v2 = vld [vmem:[%s8475_s1 + $0x70] ss:$8 sps:$4 sm:$0xff]   ;;  %s238_s10 = scalar_lea.vmem %s8478_s4, %s8527_s19  ;;  %s241_s14 = scalar_lea.vmem %s8479_s5, %s8527_s19 }
   0xf   : > { %283 = vst.msk [vmem:[#allocation2 + $0x18] sm:$0xf] %vm275_vm0, %v5907_v0  ;;  %284 = vst.msk [vmem:[#allocation2 + $0x1c] sm:$0xf] %vm275_vm0, %v5907_v0  ;;  %vm885_vm3 = vsmask.f32 7440  ;;  %4586 = vmatpush1.bf16.msra.mxu0 %v5714_v2  ;;  %5686 = vmatpush1.bf16.msra.mxu1 %v5714_v2 }
  0x10   : > { %285 = vst.msk [vmem:[#allocation2 + $0x20] sm:$0x1] %vm278_vm1, %v5907_v0  ;;  %288 = vst.msk [vmem:[#allocation2 + $0x2c] sm:$0x1] %vm278_vm1, %v5907_v0  ;;  %v5715_v3 = vld [vmem:[%s8475_s1 + $0x64] ss:$8 sps:$4 sm:$0xff]  }
  0x11   : > { %286 = vst.msk [vmem:[#allocation2 + $0x24] sm:$0xf] %vm275_vm0, %v5907_v0  ;;  %287 = vst.msk [vmem:[#allocation2 + $0x28] sm:$0xf] %vm275_vm0, %v5907_v0  ;;  %s5668_s26 = sshll.u32 %s8527_s19, 7  ;;  %4587 = vmatprep.subr.bf16.mxu0 %v5715_v3  ;;  %5671 = vmatprep.subr.bf16.mxu1 %v5715_v3  ;;  %vm1496_vm11 = vcmask 1042432  }
  0x12   : > { %289 = vst.msk [vmem:[#allocation2 + $0x30] sm:$0xf] %vm275_vm0, %v5907_v0  ;;  %290 = vst.msk [vmem:[#allocation2 + $0x34] sm:$0xf] %vm275_vm0, %v5907_v0  ;;  %vm656_vm4 = vsmask.f32 7938  ;;  %s6074_s29 = scalar_lea.vmem %s8474_s0, %s5668_s26 }
  0x13   : > { %291 = vst.msk [vmem:[#allocation2 + $0x38] sm:$0x1] %vm278_vm1, %v5907_v0  ;;  %294 = vst.msk [vmem:[#allocation2 + $0x44] sm:$0x1] %vm278_vm1, %v5907_v0  ;;  %vm331_vm5 = vsmask.f32 256 }
  0x14   : > { %292 = vst.msk [vmem:[#allocation2 + $0x3c] sm:$0xf] %vm275_vm0, %v5907_v0  ;;  %293 = vst.msk [vmem:[#allocation2 + $0x40] sm:$0xf] %vm275_vm0, %v5907_v0  ;;  %vm332_vm6 = vsmask.f32 4368 }
  0x15   : > { %295 = vst.msk [vmem:[#allocation2 + $0x48] sm:$0xf] %vm275_vm0, %v5907_v0  ;;  %296 = vst.msk [vmem:[#allocation2 + $0x4c] sm:$0xf] %vm275_vm0, %v5907_v0  ;;  %v5717_v4 = vld [vmem:[%s8475_s1 + $0x60] ss:$8 sps:$4 sm:$0xff]  }
  0x16   : > { %297 = vst.msk [vmem:[#allocation2 + $0x50] sm:$0x1] %vm278_vm1, %v5907_v0  ;;  %300 = vst.msk [vmem:[#allocation2 + $0x5c] sm:$0x1] %vm278_vm1, %v5907_v0  ;;  %v259_v5 = vld [vmem:[%s6074_s29 + $0x40] sm:$0xf]  ;;  %4588 = vmatpush1.bf16.msra.mxu0 %v5717_v4  ;;  %5687 = vmatpush1.bf16.msra.mxu1 %v5717_v4 }
  0x17   : > { %298 = vst.msk [vmem:[#allocation2 + $0x54] sm:$0xf] %vm275_vm0, %v5907_v0  ;;  %299 = vst.msk [vmem:[#allocation2 + $0x58] sm:$0xf] %vm275_vm0, %v5907_v0  ;;  %v243_v6 = vld [vmem:[%s6074_s29] sm:$0xf] }
  0x18   : > { %301 = vst.msk [vmem:[#allocation2 + $0x60] sm:$0xf] %vm275_vm0, %v5907_v0  ;;  %302 = vst.msk [vmem:[#allocation2 + $0x64] sm:$0xf] %vm275_vm0, %v5907_v0  ;;  %v5718_v7 = vld [vmem:[%s8475_s1 + $0x54] ss:$8 sps:$4 sm:$0xff]  }
  0x19   : > { %303 = vst.msk [vmem:[#allocation2 + $0x68] sm:$0x1] %vm278_vm1, %v5907_v0  ;;  %306 = vst.msk [vmem:[#allocation2 + $0x74] sm:$0x1] %vm278_vm1, %v5907_v0  ;;  %v837_v8 = vld [vmem:[#allocation2 + $0x4] sm:$0xf]  ;;  %4589 = vmatprep.subr.bf16.mxu0 %v5718_v7  ;;  %5672 = vmatprep.subr.bf16.mxu1 %v5718_v7 }
  0x1a   : > { %304 = vst.msk [vmem:[#allocation2 + $0x6c] sm:$0xf] %vm275_vm0, %v5907_v0  ;;  %305 = vst.msk [vmem:[#allocation2 + $0x70] sm:$0xf] %vm275_vm0, %v5907_v0  ;;  %v838_v9 = vld [vmem:[#allocation2 + $0x8] sm:$0x1] }
  0x1b   : > { %307 = vst.msk [vmem:[#allocation2 + $0x78] sm:$0xf] %vm275_vm0, %v5907_v0  ;;  %308 = vst.msk [vmem:[#allocation2 + $0x7c] sm:$0xf] %vm275_vm0, %v5907_v0  ;;  %v836_v10 = vld [vmem:[#allocation2] sm:$0xf] }
  0x1c   : > { %309 = vst.msk [vmem:[#allocation2 + $0x80] sm:$0x1] %vm278_vm1, %v5907_v0  ;;  %312 = vst.msk [vmem:[#allocation2 + $0x8c] sm:$0x1] %vm278_vm1, %v5907_v0  ;;  %v897_v11 = vshll.u32 %v837_v8, 16  ;;  %v901_v12 = vshrl.u32 %v837_v8, 16 }
  0x1d   : > { %310 = vst.msk [vmem:[#allocation2 + $0x84] sm:$0xf] %vm275_vm0, %v5907_v0  ;;  %311 = vst.msk [vmem:[#allocation2 + $0x88] sm:$0xf] %vm275_vm0, %v5907_v0  ;;  %v907_v13 = vshll.u32 %v838_v9, 16  ;;  %v888_v14 = vshrl.u32 %v836_v10, 16 }
  0x1e   : > { %313 = vst.msk [vmem:[#allocation2 + $0x90] sm:$0xf] %vm275_vm0, %v5907_v0  ;;  %314 = vst.msk [vmem:[#allocation2 + $0x94] sm:$0xf] %vm275_vm0, %v5907_v0  ;;  %v5720_v15 = vld [vmem:[%s8475_s1 + $0x50] ss:$8 sps:$4 sm:$0xff]  }
  0x1f   : > { %315 = vst.msk [vmem:[#allocation2 + $0x98] sm:$0x1] %vm278_vm1, %v5907_v0  ;;  %318 = vst.msk [vmem:[#allocation2 + $0xa4] sm:$0x1] %vm278_vm1, %v5907_v0  ;;  %v891_v16 = vshll.u32 %v836_v10, 16  ;;  %v471_v17 = vshrl.u32 %v259_v5, 16  ;;  %4590 = vmatpush1.bf16.msra.mxu0 %v5720_v15  ;;  %5688 = vmatpush1.bf16.msra.mxu1 %v5720_v15 }
  0x20   : > { %316 = vst.msk [vmem:[#allocation2 + $0x9c] sm:$0xf] %vm275_vm0, %v5907_v0  ;;  %317 = vst.msk [vmem:[#allocation2 + $0xa0] sm:$0xf] %vm275_vm0, %v5907_v0  ;;  %v474_v18 = vshll.u32 %v259_v5, 16  ;;  %v335_v19 = vshrl.u32 %v243_v6, 16 }
  0x21   : > { %319 = vst.msk [vmem:[#allocation2 + $0xa8] sm:$0xf] %vm275_vm0, %v5907_v0  ;;  %320 = vst.msk [vmem:[#allocation2 + $0xac] sm:$0xf] %vm275_vm0, %v5907_v0  ;;  %v260_v20 = vld [vmem:[%s6074_s29 + $0x44] sm:$0xf] }
  0x22   : > { %321 = vst.msk [vmem:[#allocation2 + $0xb0] sm:$0x1] %vm278_vm1, %v5907_v0  ;;  %324 = vst.msk [vmem:[#allocation2 + $0xbc] sm:$0x1] %vm278_vm1, %v5907_v0  ;;  %v899_v21 = vrot.slane %v897_v11, 5  ;;  %v903_v22 = vrot.slane %v901_v12, 4 }
  0x23   : > { %322 = vst.msk [vmem:[#allocation2 + $0xb4] sm:$0xf] %vm275_vm0, %v5907_v0  ;;  %323 = vst.msk [vmem:[#allocation2 + $0xb8] sm:$0xf] %vm275_vm0, %v5907_v0  ;;  %v909_v23 = vrot.slane %v907_v13, 5  ;;  %v890_v24 = vrot.slane %v888_v14, 4 }
  0x24   : > { %325 = vst.msk [vmem:[#allocation2 + $0xc0] sm:$0xf] %vm275_vm0, %v5907_v0  ;;  %326 = vst.msk [vmem:[#allocation2 + $0xc4] sm:$0xf] %vm275_vm0, %v5907_v0  ;;  %v261_v25 = vld [vmem:[%s6074_s29 + $0x48] sm:$0xf]  ;;  %v904_v31 = vor.u32 %v903_v22, %v899_v21 }
  0x25   : > { %327 = vst.msk [vmem:[#allocation2 + $0xc8] sm:$0x1] %vm278_vm1, %v5907_v0  ;;  %330 = vst.msk [vmem:[#allocation2 + $0xd4] sm:$0x1] %vm278_vm1, %v5907_v0  ;;  %v893_v26 = vrot.slane %v891_v16, 5  ;;  %v473_v27 = vrot.slane %v471_v17, 7 }
  0x26   : > { %328 = vst.msk [vmem:[#allocation2 + $0xcc] sm:$0xf] %vm275_vm0, %v5907_v0  ;;  %329 = vst.msk [vmem:[#allocation2 + $0xd0] sm:$0xf] %vm275_vm0, %v5907_v0  ;;  %v716_v28 = vld [vmem:[#allocation2 + $0x6c] sm:$0xf] }
  0x27   : > { %v6089_v29 = vrot.slane %v335_v19, 7  ;;  %v338_v30 = vshll.u32 %v243_v6, 16  ;;  %vm6093_vm7 = vmand %vm275_vm0, %vm656_vm4  ;;  %v658_v33 = vld [vmem:[#allocation2 + $0xc] sm:$0xf]  ;;  %v479_v34 = vshrl.u32 %v260_v20, 16  ;;  %v482_v35 = vshll.u32 %v260_v20, 16 }
  0x28   : > { %v488_v36 = vshrl.u32 %v261_v25, 16  ;;  %vm6099_vm8 = vmor %vm884_vm2, %vm885_vm3  ;;  %v894_v38 = vor.u32 %v893_v26, %v890_v24  ;;  %v476_v39 = vor.u32 %v474_v18, %v473_v27  ;;  %v477_v41 = vrot.slane %v473_v27, 4  ;;  %v244_v42 = vld [vmem:[%s6074_s29 + $0x4] sm:$0xf]  ;;  %v245_v47 = vld [vmem:[%s6074_s29 + $0x8] sm:$0xf] }
  0x29   : > { %v340_v40 = vor.u32 %v338_v30, %v6089_v29  ;;  %v905_v43 = vrot.slane %v904_v31, 4  ;;  %v6105_v44 = vrot.slane %v479_v34, 7  ;;  %v491_v46 = vshll.u32 %v261_v25, 16  ;;  %vm6116_vm9 = vmor %vm331_vm5, %vm332_vm6  ;;  %v723_v52 = vld [vmem:[#allocation2 + $0x78] sm:$0xf]  ;;  %s5669_s28 = sshll.u32 %s8527_s19, 9 }
  0x2a   : > { %v6107_v45 = vrot.slane %v488_v36, 7  ;;  %v895_v48 = vrot.slane %v894_v38, 4  ;;  %v717_v49 = vsel %vm6093_vm7, %v476_v39, %v716_v28  ;;  %v341_v53 = vrot.slane %v6089_v29, 4  ;;  %v262_v58 = vld [vmem:[%s6074_s29 + $0x4c] sm:$0xf]  ;;  %vm6152_vm10 = vmand %vm278_vm1, %vm331_vm5  ;;  %s8215_s7 = scalar_lea.vmem %s8477_s3, %s5669_s28 }
  0x2b   : > { %v659_v50 = vsel %vm6093_vm7, %v340_v40, %v658_v33  ;;  %v910_v54 = vsel %vm6099_vm8, %v905_v43, %v909_v23  ;;  %718 = vst [vmem:[#allocation2 + $0x6c] sm:$0xf] %v717_v49  ;;  %v484_v55 = vor.u32 %v482_v35, %v6105_v44  ;;  %v486_v56 = vrot.slane %v6105_v44, 4  ;;  %v257_v59 = vld [vmem:[%s6074_s29 + $0x38] sm:$0xf] }
  0x2c   : > { %660 = vst [vmem:[#allocation2 + $0xc] sm:$0xf] %v659_v50  ;;  %v493_v57 = vor.u32 %v491_v46, %v6107_v45  ;;  %1273 = vrot.lane.b32.xlu1 %v910_v54, %s5908_s11  ;;  %v900_v60 = vsel %vm6099_vm8, %v895_v48, %v899_v21  ;;  %v343_v61 = vshrl.u32 %v244_v42, 16  ;;  %v346_v62 = vshll.u32 %v244_v42, 16  ;;  %v258_v1 = vld [vmem:[%s6074_s29 + $0x3c] sm:$0xf] }
  0x2d   : > { %v352_v63 = vshrl.u32 %v245_v47, 16  ;;  %1271 = vrot.lane.b32.xlu0 %v900_v60, %s5908_s11  ;;  %v485_v2 = vsel %vm6116_vm9, %v477_v41, %v484_v55  ;;  %v355_v4 = vshll.u32 %v245_v47, 16  ;;  %v494_v5 = vrot.slane %v6107_v45, 4  ;;  %v246_v10 = vld [vmem:[%s6074_s29 + $0xc] sm:$0xf] }
  0x2e   : > { %v724_v3 = vsel %vm6093_vm7, %v493_v57, %v723_v52  ;;  %719 = vst.msk [vmem:[#allocation2 + $0x70] sm:$0xf] %vm275_vm0, %v485_v2  ;;  %v345_v6 = vrot.slane %v343_v61, 7  ;;  %v496_v8 = vshrl.u32 %v262_v58, 16  ;;  %v499_v9 = vshll.u32 %v262_v58, 16 }
  0x2f   : > { %725 = vst [vmem:[#allocation2 + $0x78] sm:$0xf] %v724_v3  ;;  %v6139_v7 = vrot.slane %v352_v63, 7  ;;  %v667_v11 = vld [vmem:[#allocation2 + $0x18] sm:$0xf]  ;;  %v454_v12 = vshrl.u32 %v257_v59, 16 }
  0x30   : > { %v457_v13 = vshll.u32 %v257_v59, 16  ;;  %v462_v14 = vshrl.u32 %v258_v1, 16  ;;  %v465_v15 = vshll.u32 %v258_v1, 16  ;;  %v348_v16 = vor.u32 %v346_v62, %v345_v6  ;;  %v709_v20 = vld [vmem:[#allocation2 + $0x60] sm:$0xf] }
  0x31   : > { %v350_v17 = vrot.slane %v345_v6, 4  ;;  %v357_v18 = vor.u32 %v355_v4, %v6139_v7  ;;  %v498_v19 = vrot.slane %v496_v8, 7  ;;  %v456_v21 = vrot.slane %v454_v12, 7  ;;  %v713_v25 = vld [vmem:[#allocation2 + $0x68] sm:$0x1] }
  0x32   : > { %v464_v22 = vrot.slane %v462_v14, 7  ;;  %v358_v23 = vrot.slane %v6139_v7, 4  ;;  %v360_v24 = vshrl.u32 %v246_v10, 16  ;;  %v720_v26 = vld [vmem:[#allocation2 + $0x74] sm:$0x1]  ;;  %v349_v29 = vsel %vm6116_vm9, %v341_v53, %v348_v16 }
  0x33   : > { %v1691_v27 = vld [vmem:[#allocation2 + $0x6c] sm:$0xf]  ;;  %v668_v30 = vsel %vm6093_vm7, %v357_v18, %v667_v11  ;;  %v501_v31 = vor.u32 %v499_v9, %v498_v19  ;;  %v503_v33 = vrot.slane %v498_v19, 4  ;;  %661 = vst.msk [vmem:[#allocation2 + $0x10] sm:$0xf] %vm275_vm0, %v349_v29  ;;  %v459_v35 = vor.u32 %v457_v13, %v456_v21 }
  0x34   : > { %v1675_v28 = vld [vmem:[#allocation2 + $0xc] sm:$0xf]  ;;  %1771 = vrot.lane.b32.xlu1 %v1691_v27, %s5908_s11  ;;  %669 = vst [vmem:[#allocation2 + $0x18] sm:$0xf] %v668_v30  ;;  %v460_v36 = vrot.slane %v456_v21, 4  ;;  %v467_v38 = vor.u32 %v465_v15, %v464_v22  ;;  %v362_v39 = vrot.slane %v360_v24, 7  ;;  %v721_v45 = vsel %vm6152_vm10, %v486_v56, %v720_v26 }
  0x35   : > { %1739 = vrot.lane.b32.xlu0 %v1675_v28, %s5908_s11  ;;  %v863_v40 = vld [vmem:[#allocation2 + $0x6c] sm:$0xf]  ;;  %v664_v41 = vld [vmem:[#allocation2 + $0x14] sm:$0x1]  ;;  %v502_v42 = vsel %vm6116_vm9, %v494_v5, %v501_v31  ;;  %v363_v43 = vshll.u32 %v246_v10, 16  ;;  %v469_v44 = vrot.slane %v464_v22, 4  ;;  %v710_v52 = vsel %vm6093_vm7, %v459_v35, %v709_v20 }
  0x36   : > { %v839_v46 = vld [vmem:[#allocation2 + $0xc] sm:$0xf]  ;;  %v727_v47 = vld [vmem:[#allocation2 + $0x80] sm:$0x1]  ;;  %v1692_v48 = vld [vmem:[#allocation2 + $0x70] sm:$0xf]  ;;  %v468_v50 = vsel %vm6116_vm9, %v460_v36, %v467_v38  ;;  %v665_v59 = vsel %vm6152_vm10, %v350_v17, %v664_v41 }
  0x37   : > { %v1693_v49 = vld [vmem:[#allocation2 + $0x78] sm:$0xf]  ;;  %726 = vst.msk [vmem:[#allocation2 + $0x7c] sm:$0xf] %vm275_vm0, %v502_v42  ;;  %v367_v53 = vrot.slane %v362_v39, 4  ;;  %v1104_v54 = vshrl.u32 %v863_v40, 16  ;;  %v365_v55 = vor.u32 %v363_v43, %v362_v39  ;;  %v714_v56 = vsel %vm6152_vm10, %v469_v44, %v713_v25 }
  0x38   : > { %722 = vst [vmem:[#allocation2 + $0x74] sm:$0x1] %v721_v45  ;;  %711 = vst [vmem:[#allocation2 + $0x60] sm:$0xf] %v710_v52  ;;  %v864_v57 = vld [vmem:[#allocation2 + $0x70] sm:$0xf]  ;;  %1773 = vrot.lane.b32.xlu1 %v1692_v48, %s5908_s11  ;;  %v728_v6 = vsel %vm6152_vm10, %v503_v33, %v727_v47 }
  0x39   : > { %712 = vst.msk [vmem:[#allocation2 + $0x64] sm:$0xf] %vm275_vm0, %v468_v50  ;;  %v1107_v58 = vshll.u32 %v863_v40, 16  ;;  %v6171_v60 = vld [vmem:[#allocation2 + $0x78] sm:$0xf]  ;;  %1775 = vrot.lane.b32.xlu0 %v1693_v49, %s5908_s11  ;;  %v1113_v61 = vshll.u32 %v864_v57, 16  ;;  %v366_v3 = vsel %vm6116_vm9, %v358_v23, %v365_v55 }
  0x3a   : > { %715 = vst [vmem:[#allocation2 + $0x68] sm:$0x1] %v714_v56  ;;  %v1117_v62 = vshrl.u32 %v864_v57, 16  ;;  %v1106_v63 = vrot.slane %v1104_v54, 4  ;;  %666 = vst [vmem:[#allocation2 + $0x14] sm:$0x1] %v665_v59 }
  0x3b   : > { %v912_v1 = vshrl.u32 %v839_v46, 16  ;;  %v671_v2 = vld [vmem:[#allocation2 + $0x20] sm:$0x1]  ;;  %v1109_v4 = vrot.slane %v1107_v58, 5  ;;  %v915_v5 = vshll.u32 %v839_v46, 16  ;;  %v6180_v7 = vrot.slane %v1113_v61, 5 }
  0x3c   : > { %670 = vst.msk [vmem:[#allocation2 + $0x1c] sm:$0xf] %vm275_vm0, %v366_v3  ;;  %v1119_v8 = vrot.slane %v1117_v62, 4  ;;  %729 = vst [vmem:[#allocation2 + $0x80] sm:$0x1] %v728_v6  ;;  %v1128_v10 = vshrl.u32 %v6171_v60, 16  ;;  %v672_v15 = vsel %vm6152_vm10, %v367_v53, %v671_v2 }
  0x3d   : > { %v914_v9 = vrot.slane %v912_v1, 4  ;;  %v1676_v11 = vld [vmem:[#allocation2 + $0x10] sm:$0xf]  ;;  %v1677_v12 = vld [vmem:[#allocation2 + $0x18] sm:$0xf]  ;;  %v1110_v13 = vor.u32 %v1109_v4, %v1106_v63  ;;  %v917_v19 = vrot.slane %v915_v5, 5 }
  0x3e   : > { %v840_v14 = vld [vmem:[#allocation2 + $0x10] sm:$0xf]  ;;  %1741 = vrot.lane.b32.xlu1 %v1676_v11, %s5908_s11  ;;  %1743 = vrot.lane.b32.xlu0 %v1677_v12, %s5908_s11  ;;  %v1120_v16 = vor.u32 %v1119_v8, %v6180_v7  ;;  %673 = vst [vmem:[#allocation2 + $0x20] sm:$0x1] %v672_v15  ;;  %v1694_v20 = vld [vmem:[#allocation2 + $0x7c] sm:$0xf] }
  0x3f   : > { %v921_v17 = vshll.u32 %v840_v14, 16  ;;  %v925_v18 = vshrl.u32 %v840_v14, 16  ;;  %v865_v21 = vld [vmem:[#allocation2 + $0x74] sm:$0x1]  ;;  %v6188_v22 = vrot.slane %v1110_v13, 4  ;;  %v6190_v23 = vrot.slane %v1128_v10, 4 }
  0x40   : > { %v860_v24 = vld [vmem:[#allocation2 + $0x60] sm:$0xf]  ;;  %v861_v25 = vld [vmem:[#allocation2 + $0x64] sm:$0xf]  ;;  %v1121_v26 = vrot.slane %v1120_v16, 4  ;;  %v1123_v27 = vshll.u32 %v865_v21, 16  ;;  %v918_v40 = vor.u32 %v917_v19, %v914_v9 }
  0x41   : > { %v1080_v28 = vshrl.u32 %v860_v24, 16  ;;  %v1083_v29 = vshll.u32 %v860_v24, 16  ;;  %v1089_v30 = vshll.u32 %v861_v25, 16  ;;  %v1093_v31 = vshrl.u32 %v861_v25, 16  ;;  %v862_v33 = vld [vmem:[#allocation2 + $0x68] sm:$0x1] }
  0x42   : > { %1777 = vrot.lane.b32.xlu1 %v1694_v20, %s5908_s11  ;;  %v1099_v35 = vshll.u32 %v862_v33, 16  ;;  %v1125_v36 = vrot.slane %v1123_v27, 5  ;;  %v841_v38 = vld [vmem:[#allocation2 + $0x14] sm:$0x1]  ;;  %v6193_v39 = vrot.slane %v921_v17, 5  ;;  %v1116_v47 = vsel %vm6099_vm8, %v6188_v22, %v6180_v7 }
  0x43   : > { %v1082_v41 = vrot.slane %v1080_v28, 4  ;;  %v1085_v42 = vrot.slane %v1083_v29, 5  ;;  %v1091_v43 = vrot.slane %v1089_v30, 5  ;;  %v1678_v44 = vld [vmem:[#allocation2 + $0x1c] sm:$0xf]  ;;  %v1095_v45 = vrot.slane %v1093_v31, 4 }
  0x44   : > { %v1101_v46 = vrot.slane %v1099_v35, 5  ;;  %v927_v48 = vrot.slane %v925_v18, 4  ;;  %v931_v49 = vshll.u32 %v841_v38, 16  ;;  %v867_v50 = vld [vmem:[#allocation2 + $0x7c] sm:$0xf]  ;;  %v1126_v54 = vsel %vm6099_vm8, %v1121_v26, %v1125_v36 }
  0x45   : > { %v1086_v52 = vor.u32 %v1085_v42, %v1082_v41  ;;  %v1096_v53 = vor.u32 %v1095_v45, %v1091_v43  ;;  %v868_v55 = vld [vmem:[#allocation2 + $0x80] sm:$0x1]  ;;  %v1137_v56 = vshll.u32 %v867_v50, 16  ;;  %v263_v57 = vld [vmem:[%s6074_s29 + $0x50] sm:$0xf]  ;;  %v1141_v61 = vshrl.u32 %v867_v50, 16 }
  0x46   : > { %1745 = vrot.lane.b32.xlu1 %v1678_v44, %s5908_s11  ;;  %v928_v58 = vor.u32 %v927_v48, %v6193_v39  ;;  %v933_v59 = vrot.slane %v931_v49, 5  ;;  %v1147_v62 = vshll.u32 %v868_v55, 16  ;;  %v264_v63 = vld [vmem:[%s6074_s29 + $0x54] sm:$0xf]  ;;  %v6205_v3 = vrot.slane %v918_v40, 4 }
  0x47   : > { %v1087_v1 = vrot.slane %v1086_v52, 4  ;;  %v1097_v2 = vrot.slane %v1096_v53, 4  ;;  %v6207_v4 = vrot.slane %v1137_v56, 5  ;;  %v1143_v6 = vrot.slane %v1141_v61, 4  ;;  %v843_v10 = vld [vmem:[#allocation2 + $0x1c] sm:$0xf] }
  0x48   : > { %v929_v5 = vrot.slane %v928_v58, 4  ;;  %v1149_v8 = vrot.slane %v1147_v62, 5  ;;  %v1131_v9 = vshll.u32 %v6171_v60, 16  ;;  %v505_v13 = vshrl.u32 %v263_v57, 16  ;;  %v844_v15 = vld [vmem:[#allocation2 + $0x20] sm:$0x1] }
  0x49   : > { %v1092_v11 = vsel %vm6099_vm8, %v1087_v1, %v1091_v43  ;;  %v1102_v12 = vsel %vm6099_vm8, %v1097_v2, %v1101_v46  ;;  %v513_v14 = vshrl.u32 %v264_v63, 16  ;;  %v1144_v17 = vor.u32 %v1143_v6, %v6207_v4  ;;  %v730_v24 = vld [vmem:[#allocation2 + $0x84] sm:$0xf]  ;;  %v842_v30 = vld [vmem:[#allocation2 + $0x18] sm:$0xf] }
  0x4a   : > { %1303 = vrot.lane.b32.xlu0 %v1092_v11, %s5908_s11  ;;  %1309 = vrot.lane.b32.xlu1 %v1126_v54, %s5908_s11  ;;  %v934_v16 = vsel %vm6099_vm8, %v929_v5, %v933_v59  ;;  %v1133_v60 = vrot.slane %v1131_v9, 5  ;;  %v516_v18 = vshll.u32 %v264_v63, 16  ;;  %v507_v19 = vrot.slane %v505_v13, 7  ;;  %v247_v38 = vld [vmem:[%s6074_s29 + $0x10] sm:$0xf] }
  0x4b   : > { %v515_v20 = vrot.slane %v513_v14, 7  ;;  %v508_v21 = vshll.u32 %v263_v57, 16  ;;  %v945_v25 = vshll.u32 %v843_v10, 16  ;;  %v1145_v26 = vrot.slane %v1144_v17, 4  ;;  %v248_v43 = vld [vmem:[%s6074_s29 + $0x14] sm:$0xf] }
  0x4c   : > { %v1134_v27 = vor.u32 %v1133_v60, %v6190_v23  ;;  %v949_v28 = vshrl.u32 %v843_v10, 16  ;;  %v955_v29 = vshll.u32 %v844_v15, 16  ;;  %v924_v31 = vsel %vm6099_vm8, %v6205_v3, %v6193_v39  ;;  %v734_v48 = vld [vmem:[#allocation2 + $0x8c] sm:$0x1]  ;;  %v6239_v49 = vld [vmem:[%s6074_s29 + $0x58] sm:$0xf] }
  0x4d   : > { %v511_v33 = vrot.slane %v507_v19, 4  ;;  %v518_v35 = vor.u32 %v516_v18, %v515_v20  ;;  %v510_v36 = vor.u32 %v508_v21, %v507_v19  ;;  %v1150_v23 = vsel %vm6099_vm8, %v1145_v26, %v1149_v8  ;;  %v266_v55 = vld [vmem:[%s6074_s29 + $0x5c] sm:$0xf]  ;;  %v674_v61 = vld [vmem:[#allocation2 + $0x24] sm:$0xf] }
  0x4e   : > { %1305 = vrot.lane.b32.xlu0 %v1102_v12, %s5908_s11  ;;  %1277 = vrot.lane.b32.xlu1 %v934_v16, %s5908_s11  ;;  %v520_v40 = vrot.slane %v515_v20, 4  ;;  %v6229_v41 = vrot.slane %v945_v25, 5  ;;  %v951_v42 = vrot.slane %v949_v28, 4  ;;  %v6232_v44 = vrot.slane %v1134_v27, 4  ;;  %v6258_v3 = vld [vmem:[%s6074_s29 + $0x18] sm:$0xf] }
  0x4f   : > { %v519_v39 = vsel %vm6116_vm9, %v511_v33, %v518_v35  ;;  %v731_v45 = vsel %vm6093_vm7, %v510_v36, %v730_v24  ;;  %v936_v46 = vshrl.u32 %v842_v30, 16  ;;  %v6243_v52 = vrot.slane %v955_v29, 5  ;;  %v5721_v7 = vld [vmem:[%s8475_s1 + $0x44] ss:$8 sps:$4 sm:$0xff]   ;;  %v5723_v13 = vld [vmem:[%s8475_s1 + $0x40] ss:$8 sps:$4 sm:$0xff]  }
  0x50   : > { %733 = vst.msk [vmem:[#allocation2 + $0x88] sm:$0xf] %vm275_vm0, %v519_v39  ;;  %732 = vst [vmem:[#allocation2 + $0x84] sm:$0xf] %v731_v45  ;;  %v952_v50 = vor.u32 %v951_v42, %v6229_v41  ;;  %v939_v53 = vshll.u32 %v842_v30, 16  ;;  %v369_v54 = vshrl.u32 %v247_v38, 16  ;;  %v735_v2 = vsel %vm6152_vm10, %v520_v40, %v734_v48  ;;  %4591 = vmatprep.subr.bf16.mxu0 %v5721_v7 }
  0x51   : > { %v938_v56 = vrot.slane %v936_v46, 4  ;;  %v377_v57 = vshrl.u32 %v248_v43, 16  ;;  %v380_v58 = vshll.u32 %v248_v43, 16  ;;  %v372_v59 = vshll.u32 %v247_v38, 16  ;;  %736 = vst [vmem:[#allocation2 + $0x8c] sm:$0x1] %v735_v2  ;;  %5673 = vmatprep.subr.bf16.mxu1 %v5721_v7  ;;  %4592 = vmatpush1.bf16.msra.mxu0 %v5723_v13 }
  0x52   : > { %1307 = vrot.lane.b32.xlu0 %v1116_v47, %s5908_s11  ;;  %1313 = vrot.lane.b32.xlu1 %v1150_v23, %s5908_s11  ;;  %v6253_v62 = vrot.slane %v952_v50, 4  ;;  %v941_v63 = vrot.slane %v939_v53, 5  ;;  %v371_v1 = vrot.slane %v369_v54, 7  ;;  %v522_v6 = vshrl.u32 %v6239_v49, 16  ;;  %v678_v12 = vld [vmem:[#allocation2 + $0x2c] sm:$0x1] }
  0x53   : > { %v379_v5 = vrot.slane %v377_v57, 7  ;;  %v530_v8 = vshrl.u32 %v266_v55, 16  ;;  %v533_v9 = vshll.u32 %v266_v55, 16  ;;  %v1140_v22 = vsel %vm6099_vm8, %v6232_v44, %v6207_v4  ;;  %v5724_v60 = vld [vmem:[%s8475_s1 + $0x34] ss:$8 sps:$4 sm:$0xff]   ;;  %5689 = vmatpush1.bf16.msra.mxu1 %v5723_v13 }
  0x54   : > { %v942_v47 = vor.u32 %v941_v63, %v938_v56  ;;  %v375_v10 = vrot.slane %v371_v1, 4  ;;  %v374_v11 = vor.u32 %v372_v59, %v371_v1  ;;  %v524_v16 = vrot.slane %v522_v6, 7  ;;  %v737_v20 = vld [vmem:[#allocation2 + $0x90] sm:$0xf]  ;;  %v6291_v30 = vld [vmem:[%s6074_s29 + $0x1c] sm:$0xf]  ;;  %4593 = vmatprep.subr.bf16.mxu0 %v5724_v60  ;;  %5674 = vmatprep.subr.bf16.mxu1 %v5724_v60 }
  0x55   : > { %v382_v14 = vor.u32 %v380_v58, %v379_v5  ;;  %v384_v15 = vrot.slane %v379_v5, 4  ;;  %v532_v17 = vrot.slane %v530_v8, 7  ;;  %v958_v4 = vsel %vm6099_vm8, %v6253_v62, %v6243_v52  ;;  %v5726_v24 = vld [vmem:[%s8475_s1 + $0x30] ss:$8 sps:$4 sm:$0xff]   ;;  %v5727_v1 = vld [vmem:[%s8475_s1 + $0x24] ss:$8 sps:$4 sm:$0xff]  }
  0x56   : > { %1275 = vrot.lane.b32.xlu0 %v924_v31, %s5908_s11  ;;  %v675_v18 = vsel %vm6093_vm7, %v374_v11, %v674_v61  ;;  %v525_v19 = vshll.u32 %v6239_v49, 16  ;;  %v386_v21 = vshrl.u32 %v6258_v3, 16  ;;  %v6294_v31 = vrot.slane %v942_v47, 4  ;;  %v741_v44 = vld [vmem:[#allocation2 + $0x98] sm:$0x1]  ;;  %4594 = vmatpush1.bf16.msra.mxu0 %v5726_v24 }
  0x57   : > { %v1696_v25 = vld [vmem:[#allocation2 + $0x88] sm:$0xf]  ;;  %v383_v26 = vsel %vm6116_vm9, %v375_v10, %v382_v14  ;;  %676 = vst [vmem:[#allocation2 + $0x24] sm:$0xf] %v675_v18  ;;  %v535_v28 = vor.u32 %v533_v9, %v532_v17  ;;  %v679_v29 = vsel %vm6152_vm10, %v384_v15, %v678_v12  ;;  %v869_v36 = vld [vmem:[#allocation2 + $0x84] sm:$0xf]  ;;  %5690 = vmatpush1.bf16.msra.mxu1 %v5726_v24 }
  0x58   : > { %v870_v27 = vld [vmem:[#allocation2 + $0x88] sm:$0xf]  ;;  %1781 = vrot.lane.b32.xlu1 %v1696_v25, %s5908_s11  ;;  %677 = vst.msk [vmem:[#allocation2 + $0x28] sm:$0xf] %vm275_vm0, %v383_v26  ;;  %v528_v38 = vrot.slane %v524_v16, 4  ;;  %v1152_v23 = vshrl.u32 %v869_v36, 16  ;;  %v527_v43 = vor.u32 %v525_v19, %v524_v16  ;;  %4595 = vmatprep.subr.bf16.mxu0 %v5727_v1 }
  0x59   : > { %v1161_v33 = vshll.u32 %v870_v27, 16  ;;  %v1165_v35 = vshrl.u32 %v870_v27, 16  ;;  %680 = vst [vmem:[#allocation2 + $0x2c] sm:$0x1] %v679_v29  ;;  %v1155_v40 = vshll.u32 %v869_v36, 16  ;;  %v537_v42 = vrot.slane %v532_v17, 4  ;;  %5675 = vmatprep.subr.bf16.mxu1 %v5727_v1 }
  0x5a   : > { %1311 = vrot.lane.b32.xlu0 %v1140_v22, %s5908_s11  ;;  %v871_v39 = vld [vmem:[#allocation2 + $0x8c] sm:$0x1]  ;;  %v536_v48 = vsel %vm6116_vm9, %v528_v38, %v535_v28  ;;  %v388_v49 = vrot.slane %v386_v21, 7  ;;  %v1695_v50 = vld [vmem:[#allocation2 + $0x84] sm:$0xf]  ;;  %v1154_v53 = vrot.slane %v1152_v23, 4  ;;  %v738_v55 = vsel %vm6093_vm7, %v527_v43, %v737_v20 }
  0x5b   : > { %v6298_v45 = vrot.slane %v1161_v33, 5  ;;  %v1167_v46 = vrot.slane %v1165_v35, 4  ;;  %v1171_v52 = vshll.u32 %v871_v39, 16  ;;  %v1157_v54 = vrot.slane %v1155_v40, 5  ;;  %740 = vst.msk [vmem:[#allocation2 + $0x94] sm:$0xf] %vm275_vm0, %v536_v48 }
  0x5c   : > { %1281 = vrot.lane.b32.xlu1 %v958_v4, %s5908_s11  ;;  %739 = vst [vmem:[#allocation2 + $0x90] sm:$0xf] %v738_v55  ;;  %v394_v57 = vshrl.u32 %v6291_v30, 16  ;;  %v397_v58 = vshll.u32 %v6291_v30, 16  ;;  %v389_v62 = vshll.u32 %v6258_v3, 16  ;;  %v742_v63 = vsel %vm6152_vm10, %v537_v42, %v741_v44 }
  0x5d   : > { %v1168_v56 = vor.u32 %v1167_v46, %v6298_v45  ;;  %v1173_v59 = vrot.slane %v1171_v52, 5  ;;  %v1158_v61 = vor.u32 %v1157_v54, %v1154_v53  ;;  %v5729_v2 = vld [vmem:[%s8475_s1 + $0x20] ss:$8 sps:$4 sm:$0xff]   ;;  %v392_v8 = vrot.slane %v388_v49, 4  ;;  %v681_v7 = vld [vmem:[#allocation2 + $0x30] sm:$0xf] }
  0x5e   : > { %1779 = vrot.lane.b32.xlu0 %v1695_v50, %s5908_s11  ;;  %v845_v6 = vld [vmem:[#allocation2 + $0x24] sm:$0xf]  ;;  %v6319_v9 = vrot.slane %v394_v57, 7  ;;  %743 = vst [vmem:[#allocation2 + $0x98] sm:$0x1] %v742_v63  ;;  %v948_v22 = vsel %vm6099_vm8, %v6294_v31, %v6229_v41  ;;  %v391_v13 = vor.u32 %v389_v62, %v388_v49  ;;  %4596 = vmatpush1.bf16.msra.mxu0 %v5729_v2  ;;  %vm1497_vm12 = vcmask 1046532  }
  0x5f   : > { %v1169_v5 = vrot.slane %v1168_v56, 4  ;;  %v6322_v3 = vld [vmem:[%s6074_s29 + $0x60] sm:$0xf]  ;;  %v1680_v47 = vld [vmem:[#allocation2 + $0x28] sm:$0xf]  ;;  %v6328_v10 = vrot.slane %v1158_v61, 4  ;;  %5691 = vmatpush1.bf16.msra.mxu1 %v5729_v2  ;;  %vm6681_vm13 = vmor %vm1496_vm11, %vm1497_vm12 }
  0x60   : > { %v846_v11 = vld [vmem:[#allocation2 + $0x28] sm:$0xf]  ;;  %v960_v12 = vshrl.u32 %v845_v6, 16  ;;  %1749 = vrot.lane.b32.xlu1 %v1680_v47, %s5908_s11  ;;  %v847_v14 = vld [vmem:[#allocation2 + $0x2c] sm:$0x1]  ;;  %v963_v17 = vshll.u32 %v845_v6, 16  ;;  %v399_v18 = vor.u32 %v397_v58, %v6319_v9  ;;  %v682_v31 = vsel %vm6093_vm7, %v391_v13, %v681_v7 }
  0x61   : > { %v969_v15 = vshll.u32 %v846_v11, 16  ;;  %v973_v16 = vshrl.u32 %v846_v11, 16  ;;  %v1174_v60 = vsel %vm6099_vm8, %v1169_v5, %v1173_v59  ;;  %v979_v41 = vshll.u32 %v847_v14, 16  ;;  %v6335_v19 = vld [vmem:[%s6074_s29 + $0x64] sm:$0xf] }
  0x62   : > { %v962_v4 = vrot.slane %v960_v12, 4  ;;  %v5730_v20 = vld [vmem:[%s8475_s1 + $0x14] ss:$8 sps:$4 sm:$0xff]   ;;  %1279 = vrot.lane.b32.xlu0 %v948_v22, %s5908_s11  ;;  %v1679_v21 = vld [vmem:[#allocation2 + $0x24] sm:$0xf]  ;;  %v1164_v24 = vsel %vm6099_vm8, %v6328_v10, %v6298_v45  ;;  %v965_v27 = vrot.slane %v963_v17, 5  ;;  %v400_v30 = vsel %vm6116_vm9, %v392_v8, %v399_v18 }
  0x63   : > { %v6345_v25 = vrot.slane %v969_v15, 5  ;;  %v975_v26 = vrot.slane %v973_v16, 4  ;;  %v1698_v28 = vld [vmem:[#allocation2 + $0x94] sm:$0xf]  ;;  %v6347_v29 = vrot.slane %v979_v41, 5  ;;  %v539_v35 = vshrl.u32 %v6322_v3, 16  ;;  %4597 = vmatprep.subr.bf16.mxu0 %v5730_v20  ;;  %5676 = vmatprep.subr.bf16.mxu1 %v5730_v20 }
  0x64   : > { %v873_v33 = vld [vmem:[#allocation2 + $0x94] sm:$0xf]  ;;  %1317 = vrot.lane.b32.xlu1 %v1174_v60, %s5908_s11  ;;  %v966_v38 = vor.u32 %v965_v27, %v962_v4  ;;  %684 = vst.msk [vmem:[#allocation2 + $0x34] sm:$0xf] %vm275_vm0, %v400_v30  ;;  %683 = vst [vmem:[#allocation2 + $0x30] sm:$0xf] %v682_v31 }
  0x65   : > { %v976_v36 = vor.u32 %v975_v26, %v6345_v25  ;;  %v1185_v23 = vshll.u32 %v873_v33, 16  ;;  %v1189_v40 = vshrl.u32 %v873_v33, 16  ;;  %v872_v42 = vld [vmem:[#allocation2 + $0x90] sm:$0xf]  ;;  %v874_v44 = vld [vmem:[#allocation2 + $0x98] sm:$0x1] }
  0x66   : > { %v5732_v43 = vld [vmem:[%s8475_s1 + $0x10] ss:$8 sps:$4 sm:$0xff]   ;;  %v1176_v39 = vshrl.u32 %v872_v42, 16  ;;  %v1179_v45 = vshll.u32 %v872_v42, 16  ;;  %v541_v46 = vrot.slane %v539_v35, 7  ;;  %v547_v48 = vshrl.u32 %v6335_v19, 16  ;;  %1747 = vrot.lane.b32.xlu0 %v1679_v21, %s5908_s11 }
  0x67   : > { %v685_v49 = vld [vmem:[#allocation2 + $0x38] sm:$0x1]  ;;  %v977_v50 = vrot.slane %v976_v36, 4  ;;  %v401_v52 = vrot.slane %v6319_v9, 4  ;;  %v6363_v53 = vrot.slane %v1185_v23, 5  ;;  %v1191_v54 = vrot.slane %v1189_v40, 4  ;;  %4598 = vmatpush1.bf16.msra.mxu0 %v5732_v43  ;;  %5692 = vmatpush1.bf16.msra.mxu1 %v5732_v43 }
  0x68   : > { %v6366_v55 = vld [vmem:[%s6074_s29 + $0x20] sm:$0xf]  ;;  %v6368_v56 = vrot.slane %v966_v38, 4  ;;  %v1195_v57 = vshll.u32 %v874_v44, 16  ;;  %v1178_v58 = vrot.slane %v1176_v39, 4  ;;  %v1181_v59 = vrot.slane %v1179_v45, 5  ;;  %1785 = vrot.lane.b32.xlu1 %v1698_v28, %s5908_s11 }
  0x69   : > { %v6371_v61 = vld [vmem:[%s6074_s29 + $0x24] sm:$0xf]  ;;  %v982_v62 = vsel %vm6099_vm8, %v977_v50, %v6347_v29  ;;  %v1192_v63 = vor.u32 %v1191_v54, %v6363_v53  ;;  %v545_v1 = vrot.slane %v541_v46, 4  ;;  %v549_v2 = vrot.slane %v547_v48, 7  ;;  %v744_v5 = vld [vmem:[#allocation2 + $0x9c] sm:$0xf] }
  0x6a   : > { %v748_v6 = vld [vmem:[#allocation2 + $0xa4] sm:$0x1]  ;;  %v6381_v9 = vrot.slane %v1195_v57, 5  ;;  %v1182_v7 = vor.u32 %v1181_v59, %v1178_v58  ;;  %v550_v22 = vshll.u32 %v6335_v19, 16  ;;  %v542_v47 = vshll.u32 %v6322_v3, 16  ;;  %1315 = vrot.lane.b32.xlu0 %v1164_v24, %s5908_s11  ;;  %v3719_v54 = vld [vmem:[%s8475_s1 + $0xd8] sm:$0xff] }
  0x6b   : > { %v5733_v8 = vld [vmem:[%s8475_s1 + $0x4] ss:$8 sps:$4 sm:$0xff]   ;;  %v5735_v10 = vld [vmem:[%s8475_s1] ss:$8 sps:$4 sm:$0xff]   ;;  %v6389_v11 = vrot.slane %v1192_v63, 4  ;;  %v554_v12 = vrot.slane %v549_v2, 4  ;;  %v686_v13 = vsel %vm6152_vm10, %v401_v52, %v685_v49  ;;  %v972_v19 = vsel %vm6099_vm8, %v6368_v56, %v6345_v25 }
  0x6c   : > { %v403_v14 = vshrl.u32 %v6366_v55, 16  ;;  %v6395_v15 = vld [vmem:[%s6074_s29 + $0x68] sm:$0xf]  ;;  %4599 = vmatprep.subr.bf16.mxu0 %v5733_v8  ;;  %v1697_v16 = vld [vmem:[#allocation2 + $0x90] sm:$0xf]  ;;  %v6397_v17 = vrot.slane %v1182_v7, 4  ;;  %v552_v60 = vor.u32 %v550_v22, %v549_v2  ;;  %v544_v41 = vor.u32 %v542_v47, %v541_v46  ;;  %5677 = vmatprep.subr.bf16.mxu1 %v5733_v8 }
  0x6d   : > { %v1682_v3 = vld [vmem:[#allocation2 + $0x34] sm:$0xf]  ;;  %687 = vst [vmem:[#allocation2 + $0x38] sm:$0x1] %v686_v13  ;;  %v411_v4 = vshrl.u32 %v6371_v61, 16  ;;  %4600 = vmatpush1.bf16.msra.mxu0 %v5735_v10  ;;  %1285 = vrot.lane.b32.xlu1 %v982_v62, %s5908_s11  ;;  %v414_v26 = vshll.u32 %v6371_v61, 16  ;;  %v749_v27 = vsel %vm6152_vm10, %v554_v12, %v748_v6  ;;  %v1198_v28 = vsel %vm6099_vm8, %v6389_v11, %v6381_v9 }
  0x6e   : > { %v6401_v18 = vld [vmem:[%s6074_s29 + $0x6c] sm:$0xf]  ;;  %v849_v20 = vld [vmem:[#allocation2 + $0x34] sm:$0xf]  ;;  %v848_v21 = vld [vmem:[#allocation2 + $0x30] sm:$0xf]  ;;  %5693 = vmatpush1.bf16.msra.mxu1 %v5735_v10  ;;  %v553_v29 = vsel %vm6116_vm9, %v545_v1, %v552_v60  ;;  %v745_v25 = vsel %vm6093_vm7, %v544_v41, %v744_v5  ;;  %1783 = vrot.lane.b32.xlu0 %v1697_v16, %s5908_s11 }
  0x6f   : > { %v405_v24 = vrot.slane %v403_v14, 7  ;;  %v993_v30 = vshll.u32 %v849_v20, 16  ;;  %750 = vst [vmem:[#allocation2 + $0xa4] sm:$0x1] %v749_v27  ;;  %v5736_v31 = vld [vmem:[%s8475_s1 + $0xf4] ss:$8 sps:$4 sm:$0xff]  }
  0x70   : > { %v5738_v33 = vld [vmem:[%s8475_s1 + $0xf0] ss:$8 sps:$4 sm:$0xff]   ;;  %747 = vst.msk [vmem:[#allocation2 + $0xa0] sm:$0xf] %vm275_vm0, %v553_v29  ;;  %746 = vst [vmem:[#allocation2 + $0x9c] sm:$0xf] %v745_v25  ;;  %4601 = vmatprep.subr.bf16.mxu0 %v5736_v31  ;;  %5678 = vmatprep.subr.bf16.mxu1 %v5736_v31  ;;  %v1188_v29 = vsel %vm6099_vm8, %v6397_v17, %v6363_v53 }
  0x71   : > { %v997_v35 = vshrl.u32 %v849_v20, 16  ;;  %v984_v36 = vshrl.u32 %v848_v21, 16  ;;  %v987_v38 = vshll.u32 %v848_v21, 16  ;;  %v409_v23 = vrot.slane %v405_v24, 4  ;;  %v688_v44 = vld [vmem:[#allocation2 + $0x3c] sm:$0xf]  ;;  %1753 = vrot.lane.b32.xlu1 %v1682_v3, %s5908_s11  ;;  %4602 = vmatpush2.bf16.msra.mxu0 %v5738_v33 }
  0x72   : > { %v6427_v40 = vrot.slane %v993_v30, 5  ;;  %v413_v42 = vrot.slane %v411_v4, 7  ;;  %v406_v43 = vshll.u32 %v6366_v55, 16  ;;  %v556_v39 = vshrl.u32 %v6395_v15, 16  ;;  %v692_v50 = vld [vmem:[#allocation2 + $0x44] sm:$0x1]  ;;  %5694 = vmatpush2.bf16.msra.mxu1 %v5738_v33  ;;  %1283 = vrot.lane.b32.xlu0 %v972_v19, %s5908_s11 }
  0x73   : > { %v999_v45 = vrot.slane %v997_v35, 4  ;;  %v986_v46 = vrot.slane %v984_v36, 4  ;;  %v989_v48 = vrot.slane %v987_v38, 5  ;;  %v564_v49 = vshrl.u32 %v6401_v18, 16  ;;  %v3718_v52 = vld [vmem:[%s8475_s1 + $0xd0] sm:$0xff] }
  0x74   : > { %v416_v55 = vor.u32 %v414_v26, %v413_v42  ;;  %v418_v56 = vrot.slane %v413_v42, 4  ;;  %v408_v57 = vor.u32 %v406_v43, %v405_v24  ;;  %v558_v58 = vrot.slane %v556_v39, 7  ;;  %v6440_v59 = vld [vmem:[%s6074_s29 + $0x28] sm:$0xf]  ;;  %v5739_v61 = vld [vmem:[%s8475_s1 + $0xe4] ss:$8 sps:$4 sm:$0xff]  }
  0x75   : > { %v5741_v62 = vld [vmem:[%s8475_s1 + $0xe0] ss:$8 sps:$4 sm:$0xff]   ;;  %v1681_v63 = vld [vmem:[#allocation2 + $0x30] sm:$0xf]  ;;  %v850_v1 = vld [vmem:[#allocation2 + $0x38] sm:$0x1]  ;;  %v1000_v2 = vor.u32 %v999_v45, %v6427_v40  ;;  %v990_v5 = vor.u32 %v989_v48, %v986_v46  ;;  %4603 = vmatprep.subr.bf16.mxu0 %v5739_v61  ;;  %5679 = vmatprep.subr.bf16.mxu1 %v5739_v61  ;;  %v5604_v3 = vcombine.low %v3718_v52, %v3719_v54 }
  0x76   : > { %v6450_v6 = vrot.slane %v564_v49, 7  ;;  %v567_v8 = vshll.u32 %v6401_v18, 16  ;;  %v1003_v9 = vshll.u32 %v850_v1, 16  ;;  %v417_v7 = vsel %vm6116_vm9, %v409_v23, %v416_v55  ;;  %v5742_v10 = vld [vmem:[%s8475_s1 + $0xd4] ss:$8 sps:$4 sm:$0xff]   ;;  %1321 = vrot.lane.b32.xlu1 %v1198_v28, %s5908_s11  ;;  %4604 = vmatpush2.bf16.msra.mxu0 %v5741_v62  ;;  %v3717_v39 = vld [vmem:[%s8475_s1 + $0xc8] sm:$0xff] }
  0x77   : > { %v689_v22 = vsel %vm6093_vm7, %v408_v57, %v688_v44  ;;  %v562_v47 = vrot.slane %v558_v58, 4  ;;  %v773_v11 = vld [vmem:[#allocation2 + $0x4] sm:$0xf]  ;;  %v1001_v12 = vrot.slane %v1000_v2, 4  ;;  %691 = vst.msk [vmem:[#allocation2 + $0x40] sm:$0xf] %vm275_vm0, %v417_v7  ;;  %v693_v20 = vsel %vm6152_vm10, %v418_v56, %v692_v50  ;;  %4605 = vmatprep.subr.bf16.mxu0 %v5742_v10  ;;  %5695 = vmatpush2.bf16.msra.mxu1 %v5741_v62 }
  0x78   : > { %690 = vst [vmem:[#allocation2 + $0x3c] sm:$0xf] %v689_v22  ;;  %v877_v13 = vld [vmem:[#allocation2 + $0xa4] sm:$0x1]  ;;  %v569_v14 = vor.u32 %v567_v8, %v6450_v6  ;;  %v6464_v16 = vld [vmem:[%s6074_s29 + $0x2c] sm:$0xf]  ;;  %1751 = vrot.lane.b32.xlu0 %v1681_v63, %s5908_s11  ;;  %5680 = vmatprep.subr.bf16.mxu1 %v5742_v10 }
  0x79   : > { %805 = vst.msk [vmem:[#allocation3 + $0x14] sm:$0xf] %vm275_vm0, %v773_v11  ;;  %v1700_v60 = vld [vmem:[#allocation2 + $0xa0] sm:$0xf]  ;;  %v1005_v41 = vrot.slane %v1003_v9, 5  ;;  %v6467_v4 = vrot.slane %v990_v5, 4 }
  0x7a   : > { %v1219_v18 = vshll.u32 %v877_v13, 16  ;;  %v751_v19 = vld [vmem:[#allocation2 + $0xa8] sm:$0xf]  ;;  %v876_v21 = vld [vmem:[#allocation2 + $0xa0] sm:$0xf]  ;;  %v570_v26 = vsel %vm6116_vm9, %v562_v47, %v569_v14  ;;  %v559_v27 = vshll.u32 %v6395_v15, 16  ;;  %1789 = vrot.lane.b32.xlu1 %v1700_v60, %s5908_s11  ;;  %4606 = vmatpush2.bf16.msra.mxu0 %v5604_v3 }
  0x7b   : > { %v875_v24 = vld [vmem:[#allocation2 + $0x9c] sm:$0xf]  ;;  %694 = vst [vmem:[#allocation2 + $0x44] sm:$0x1] %v693_v20  ;;  %v420_v28 = vshrl.u32 %v6440_v59, 16  ;;  %v1209_v25 = vshll.u32 %v876_v21, 16  ;;  %v1006_v53 = vsel %vm6099_vm8, %v1001_v12, %v1005_v41  ;;  %5696 = vmatpush2.bf16.msra.mxu1 %v5604_v3 }
  0x7c   : > { %v1213_v30 = vshrl.u32 %v876_v21, 16  ;;  %v571_v31 = vrot.slane %v6450_v6, 4  ;;  %754 = vst.msk [vmem:[#allocation2 + $0xac] sm:$0xf] %vm275_vm0, %v570_v26  ;;  %v772_v33 = vld [vmem:[#allocation2] sm:$0xf]  ;;  %v561_v36 = vor.u32 %v559_v27, %v558_v58  ;;  %1319 = vrot.lane.b32.xlu0 %v1188_v29, %s5908_s11 }
  0x7d   : > { %v1200_v35 = vshrl.u32 %v875_v24, 16  ;;  %v1203_v15 = vshll.u32 %v875_v24, 16  ;;  %v422_v38 = vrot.slane %v420_v28, 7  ;;  %v755_v23 = vld [vmem:[#allocation2 + $0xb0] sm:$0x1]  ;;  %v6486_v17 = vrot.slane %v1209_v25, 5 }
  0x7e   : > { %804 = vst.msk [vmem:[#allocation3] sm:$0xf] %vm275_vm0, %v772_v33  ;;  %v1215_v42 = vrot.slane %v1213_v30, 4  ;;  %v428_v43 = vshrl.u32 %v6464_v16, 16  ;;  %v3716_v44 = vld [vmem:[%s8475_s1 + $0xc0] sm:$0xff]  ;;  %v6496_v46 = vrot.slane %v1219_v18, 5  ;;  %v752_v50 = vsel %vm6093_vm7, %v561_v36, %v751_v19  ;;  %1289 = vrot.lane.b32.xlu1 %v1006_v53, %s5908_s11 }
  0x7f   : > { %v1699_v45 = vld [vmem:[#allocation2 + $0x9c] sm:$0xf]  ;;  %v1202_v48 = vrot.slane %v1200_v35, 4  ;;  %v1205_v49 = vrot.slane %v1203_v15, 5  ;;  %v1684_v52 = vld [vmem:[#allocation2 + $0x40] sm:$0xf]  ;;  %v756_v58 = vsel %vm6152_vm10, %v571_v31, %v755_v23  ;;  %v5602_v6 = vcombine.low %v3716_v44, %v3717_v39 }
  0x80   : > { %v1216_v54 = vor.u32 %v1215_v42, %v6486_v17  ;;  %753 = vst [vmem:[#allocation2 + $0xa8] sm:$0xf] %v752_v50  ;;  %v852_v55 = vld [vmem:[#allocation2 + $0x40] sm:$0xf]  ;;  %v426_v56 = vrot.slane %v422_v38, 4  ;;  %v431_v57 = vshll.u32 %v6464_v16, 16  ;;  %1787 = vrot.lane.b32.xlu0 %v1699_v45, %s5908_s11  ;;  %v996_v16 = vsel %vm6099_vm8, %v6467_v4, %v6427_v40 }
  0x81   : > { %v3714_v61 = vld [vmem:[%s8475_s1 + $0xb0] sm:$0xff]  ;;  %v3715_v62 = vld [vmem:[%s8475_s1 + $0xb8] sm:$0xff]  ;;  %v1017_v63 = vshll.u32 %v852_v55, 16  ;;  %v1021_v1 = vshrl.u32 %v852_v55, 16  ;;  %v430_v5 = vrot.slane %v428_v43, 7  ;;  %v423_v47 = vshll.u32 %v6440_v59, 16 }
  0x82   : > { %v851_v2 = vld [vmem:[#allocation2 + $0x3c] sm:$0xf]  ;;  %757 = vst [vmem:[#allocation2 + $0xb0] sm:$0x1] %v756_v58  ;;  %v1217_v8 = vrot.slane %v1216_v54, 4  ;;  %v1206_v10 = vor.u32 %v1205_v49, %v1202_v48  ;;  %1757 = vrot.lane.b32.xlu1 %v1684_v52, %s5908_s11  ;;  %v6524_v24 = vcombine.low %v3714_v61, %v3715_v62  ;;  %v3712_v40 = vld [vmem:[%s8475_s1 + $0xa0] sm:$0xff] }
  0x83   : > { %v853_v9 = vld [vmem:[#allocation2 + $0x44] sm:$0x1]  ;;  %v1008_v7 = vshrl.u32 %v851_v2, 16  ;;  %v1011_v22 = vshll.u32 %v851_v2, 16  ;;  %v6513_v11 = vrot.slane %v1017_v63, 5  ;;  %v1023_v12 = vrot.slane %v1021_v1, 4 }
  0x84   : > { %v1027_v13 = vshll.u32 %v853_v9, 16  ;;  %v699_v14 = vld [vmem:[#allocation2 + $0x50] sm:$0x1]  ;;  %v433_v41 = vor.u32 %v431_v57, %v430_v5  ;;  %v879_v18 = vld [vmem:[#allocation2 + $0xac] sm:$0xf]  ;;  %v435_v20 = vrot.slane %v430_v5, 4  ;;  %v1222_v26 = vsel %vm6099_vm8, %v1217_v8, %v6496_v46  ;;  %1287 = vrot.lane.b32.xlu0 %v996_v16, %s5908_s11 }
  0x85   : > { %v1010_v3 = vrot.slane %v1008_v7, 4  ;;  %v1013_v60 = vrot.slane %v1011_v22, 5  ;;  %v5744_v59 = vld [vmem:[%s8475_s1 + $0xc4] ss:$8 sps:$4 sm:$0xff]   ;;  %v1024_v19 = vor.u32 %v1023_v12, %v6513_v11  ;;  %v695_v21 = vld [vmem:[#allocation2 + $0x48] sm:$0xf]  ;;  %v425_v28 = vor.u32 %v423_v47, %v422_v38 }
  0x86   : > { %v3713_v4 = vld [vmem:[%s8475_s1 + $0xa8] sm:$0xff]  ;;  %v434_v27 = vsel %vm6116_vm9, %v426_v56, %v433_v41  ;;  %v1233_v29 = vshll.u32 %v879_v18, 16  ;;  %v271_v25 = vld [vmem:[%s6074_s29 + $0x70] sm:$0xf]  ;;  %v272_v30 = vld [vmem:[%s6074_s29 + $0x74] sm:$0xf]  ;;  %4607 = vmatprep.subr.bf16.mxu0 %v5744_v59  ;;  %5681 = vmatprep.subr.bf16.mxu1 %v5744_v59  ;;  %v700_v23 = vsel %vm6152_vm10, %v435_v20, %v699_v14 }
  0x87   : > { %v1683_v31 = vld [vmem:[#allocation2 + $0x3c] sm:$0xf]  ;;  %v1207_v33 = vrot.slane %v1206_v10, 4  ;;  %v1014_v35 = vor.u32 %v1013_v60, %v1010_v3  ;;  %698 = vst.msk [vmem:[#allocation2 + $0x4c] sm:$0xf] %vm275_vm0, %v434_v27  ;;  %v1237_v15 = vshrl.u32 %v879_v18, 16  ;;  %4608 = vmatpush2.bf16.msra.mxu0 %v5602_v6  ;;  %v696_v44 = vsel %vm6093_vm7, %v425_v28, %v695_v21  ;;  %5697 = vmatpush2.bf16.msra.mxu1 %v5602_v6 }
  0x88   : > { %v878_v36 = vld [vmem:[#allocation2 + $0xa8] sm:$0xf]  ;;  %v6544_v53 = vld [vmem:[%s6074_s29 + $0x30] sm:$0xf]  ;;  %v1702_v38 = vld [vmem:[#allocation2 + $0xac] sm:$0xf]  ;;  %1325 = vrot.lane.b32.xlu1 %v1222_v26, %s5908_s11  ;;  %v6554_v56 = vcombine.low %v3712_v40, %v3713_v4  ;;  %1755 = vrot.lane.b32.xlu0 %v1683_v31, %s5908_s11 }
  0x89   : > { %v1025_v42 = vrot.slane %v1024_v19, 4  ;;  %v1029_v43 = vrot.slane %v1027_v13, 5  ;;  %v880_v39 = vld [vmem:[#allocation2 + $0xb0] sm:$0x1]  ;;  %v6548_v45 = vrot.slane %v1233_v29, 5  ;;  %v1239_v46 = vrot.slane %v1237_v15, 4 }
  0x8a   : > { %701 = vst [vmem:[#allocation2 + $0x50] sm:$0x1] %v700_v23  ;;  %697 = vst [vmem:[#allocation2 + $0x48] sm:$0xf] %v696_v44  ;;  %v1243_v48 = vshll.u32 %v880_v39, 16  ;;  %v1224_v49 = vshrl.u32 %v878_v36, 16  ;;  %v1212_v57 = vsel %vm6099_vm8, %v1207_v33, %v6486_v17 }
  0x8b   : > { %v1227_v50 = vshll.u32 %v878_v36, 16  ;;  %v573_v52 = vshrl.u32 %v271_v25, 16  ;;  %v581_v54 = vshrl.u32 %v272_v30, 16  ;;  %v5746_v55 = vld [vmem:[%s8475_s1 + $0xb4] ss:$8 sps:$4 sm:$0xff]   ;;  %v6560_v58 = vrot.slane %v1014_v35, 4 }
  0x8c   : > { %v1240_v61 = vor.u32 %v1239_v46, %v6548_v45  ;;  %v584_v62 = vshll.u32 %v272_v30, 16  ;;  %v256_v63 = vld [vmem:[%s6074_s29 + $0x34] sm:$0xf]  ;;  %v576_v5 = vshll.u32 %v271_v25, 16  ;;  %v437_v8 = vshrl.u32 %v6544_v53, 16  ;;  %4609 = vmatprep.subr.bf16.mxu0 %v5746_v55  ;;  %5682 = vmatprep.subr.bf16.mxu1 %v5746_v55  ;;  %v3711_v10 = vld [vmem:[%s8475_s1 + $0x98] sm:$0xff] }
  0x8d   : > { %v575_v1 = vrot.slane %v573_v52, 7  ;;  %v583_v2 = vrot.slane %v581_v54, 7  ;;  %v758_v6 = vld [vmem:[#allocation2 + $0xb4] sm:$0xf]  ;;  %1793 = vrot.lane.b32.xlu1 %v1702_v38, %s5908_s11  ;;  %v1030_v9 = vsel %vm6099_vm8, %v1025_v42, %v1029_v43  ;;  %v6568_v17 = vrot.slane %v1243_v48, 5  ;;  %4610 = vmatpush2.bf16.msra.mxu0 %v6524_v24  ;;  %v3708_v46 = vld [vmem:[%s8475_s1 + $0x80] sm:$0xff] }
  0x8e   : > { %v6570_v7 = vrot.slane %v1224_v49, 4  ;;  %v6572_v22 = vrot.slane %v1227_v50, 5  ;;  %v3710_v47 = vld [vmem:[%s8475_s1 + $0x90] sm:$0xff]  ;;  %v855_v16 = vld [vmem:[#allocation2 + $0x4c] sm:$0xf]  ;;  %v445_v3 = vshrl.u32 %v256_v63, 16  ;;  %5698 = vmatpush2.bf16.msra.mxu1 %v6524_v24  ;;  %1323 = vrot.lane.b32.xlu0 %v1212_v57, %s5908_s11  ;;  %v1020_v35 = vsel %vm6099_vm8, %v6560_v58, %v6513_v11 }
  0x8f   : > { %v579_v12 = vrot.slane %v575_v1, 4  ;;  %v586_v13 = vor.u32 %v584_v62, %v583_v2  ;;  %v578_v14 = vor.u32 %v576_v5, %v575_v1  ;;  %v762_v60 = vld [vmem:[#allocation2 + $0xbc] sm:$0x1]  ;;  %v6583_v41 = vrot.slane %v1240_v61, 4  ;;  %v1701_v20 = vld [vmem:[#allocation2 + $0xa8] sm:$0xf] }
  0x90   : > { %v588_v18 = vrot.slane %v583_v2, 4  ;;  %v1041_v59 = vshll.u32 %v855_v16, 16  ;;  %v1045_v19 = vshrl.u32 %v855_v16, 16  ;;  %v439_v26 = vrot.slane %v437_v8, 7  ;;  %v6590_v28 = vld [vmem:[%s6074_s29 + $0x78] sm:$0xf] }
  0x91   : > { %v587_v21 = vsel %vm6116_vm9, %v579_v12, %v586_v13  ;;  %v759_v40 = vsel %vm6093_vm7, %v578_v14, %v758_v6  ;;  %v854_v4 = vld [vmem:[#allocation2 + $0x48] sm:$0xf]  ;;  %v448_v27 = vshll.u32 %v256_v63, 16  ;;  %v6593_v24 = vld [vmem:[%s6074_s29 + $0x7c] sm:$0xf]  ;;  %1293 = vrot.lane.b32.xlu1 %v1030_v9, %s5908_s11  ;;  %v6599_v33 = vcombine.low %v3710_v47, %v3711_v10 }
  0x92   : > { %761 = vst.msk [vmem:[#allocation2 + $0xb8] sm:$0xf] %vm275_vm0, %v587_v21  ;;  %760 = vst [vmem:[#allocation2 + $0xb4] sm:$0xf] %v759_v40  ;;  %v856_v29 = vld [vmem:[#allocation2 + $0x50] sm:$0x1]  ;;  %1791 = vrot.lane.b32.xlu0 %v1701_v20, %s5908_s11  ;;  %v1246_v42 = vsel %vm6099_vm8, %v6583_v41, %v6568_v17  ;;  %v1230_v43 = vor.u32 %v6572_v22, %v6570_v7  ;;  %v763_v39 = vsel %vm6152_vm10, %v588_v18, %v762_v60 }
  0x93   : > { %v6597_v25 = vrot.slane %v1041_v59, 5  ;;  %v1047_v30 = vrot.slane %v1045_v19, 4  ;;  %v1032_v31 = vshrl.u32 %v854_v4, 16  ;;  %v1686_v15 = vld [vmem:[#allocation2 + $0x4c] sm:$0xf]  ;;  %v1035_v36 = vshll.u32 %v854_v4, 16 }
  0x94   : > { %v443_v23 = vrot.slane %v439_v26, 4  ;;  %v447_v38 = vrot.slane %v445_v3, 7  ;;  %v440_v44 = vshll.u32 %v6544_v53, 16  ;;  %v5748_v11 = vld [vmem:[%s8475_s1 + $0xa4] ss:$8 sps:$4 sm:$0xff]   ;;  %v1051_v49 = vshll.u32 %v856_v29, 16 }
  0x95   : > { %v1048_v48 = vor.u32 %v1047_v30, %v6597_v25  ;;  %v702_v54 = vld [vmem:[#allocation2 + $0x54] sm:$0xf]  ;;  %764 = vst [vmem:[#allocation2 + $0xbc] sm:$0x1] %v763_v39  ;;  %v3709_v53 = vld [vmem:[%s8475_s1 + $0x88] sm:$0xff]  ;;  %1761 = vrot.lane.b32.xlu1 %v1686_v15, %s5908_s11  ;;  %v6626_v55 = vrot.slane %v1032_v31, 4  ;;  %4611 = vmatprep.subr.bf16.mxu0 %v5748_v11 }
  0x96   : > { %v450_v50 = vor.u32 %v448_v27, %v447_v38  ;;  %v452_v52 = vrot.slane %v447_v38, 4  ;;  %v442_v57 = vor.u32 %v440_v44, %v439_v26  ;;  %v590_v58 = vshrl.u32 %v6590_v28, 16  ;;  %v706_v62 = vld [vmem:[#allocation2 + $0x5c] sm:$0x1]  ;;  %4612 = vmatpush2.bf16.msra.mxu0 %v6554_v56  ;;  %5683 = vmatprep.subr.bf16.mxu1 %v5748_v11  ;;  %v765_v17 = vld [vmem:[#allocation2 + $0xc0] sm:$0xf] }
  0x97   : > { %v598_v61 = vshrl.u32 %v6593_v24, 16  ;;  %v6630_v63 = vrot.slane %v1035_v36, 5  ;;  %v601_v2 = vshll.u32 %v6593_v24, 16  ;;  %v593_v5 = vshll.u32 %v6590_v28, 16  ;;  %1291 = vrot.lane.b32.xlu0 %v1020_v35, %s5908_s11  ;;  %v5750_v7 = vld [vmem:[%s8475_s1 + $0x94] ss:$8 sps:$4 sm:$0xff]   ;;  %5699 = vmatpush2.bf16.msra.mxu1 %v6554_v56 }
  0x98   : > { %v451_v1 = vsel %vm6116_vm9, %v443_v23, %v450_v50  ;;  %v703_v6 = vsel %vm6093_vm7, %v442_v57, %v702_v54  ;;  %v592_v8 = vrot.slane %v590_v58, 7  ;;  %v6647_v22 = vcombine.low %v3708_v46, %v3709_v53  ;;  %v1685_v47 = vld [vmem:[#allocation2 + $0x48] sm:$0xf]  ;;  %v1424_v14 = vld [vmem:[#allocation2 + $0x60] sm:$0xe]  ;;  %4613 = vmatprep.subr.bf16.mxu0 %v5750_v7  ;;  %5684 = vmatprep.subr.bf16.mxu1 %v5750_v7 }
  0x99   : > { %705 = vst.msk [vmem:[#allocation2 + $0x58] sm:$0xf] %vm275_vm0, %v451_v1  ;;  %v6641_v9 = vrot.slane %v598_v61, 7  ;;  %v1231_v10 = vrot.slane %v1230_v43, 4  ;;  %v6649_v12 = vrot.slane %v1048_v48, 4  ;;  %v6651_v13 = vrot.slane %v1051_v49, 5  ;;  %1329 = vrot.lane.b32.xlu1 %v1246_v42, %s5908_s11 }
  0x9a   : > { %704 = vst [vmem:[#allocation2 + $0x54] sm:$0xf] %v703_v6  ;;  %v6653_v16 = vld [vmem:[#allocation2 + $0x64] sm:$0xf]  ;;  %v1400_v3 = vld [vmem:[#allocation2] sm:$0xe]  ;;  %v707_v60 = vsel %vm6152_vm10, %v452_v52, %v706_v62  ;;  %v595_v19 = vor.u32 %v593_v5, %v592_v8  ;;  %v1038_v40 = vor.u32 %v6630_v63, %v6626_v55  ;;  %4614 = vmatpush2.bf16.msra.mxu0 %v6599_v33 }
  0x9b   : > { %v882_v41 = vld [vmem:[#allocation2 + $0xb8] sm:$0xf]  ;;  %v881_v56 = vld [vmem:[#allocation2 + $0xb4] sm:$0xf]  ;;  %v596_v18 = vrot.slane %v592_v8, 4  ;;  %v603_v59 = vor.u32 %v601_v2, %v6641_v9  ;;  %1759 = vrot.lane.b32.xlu0 %v1685_v47, %s5908_s11  ;;  %5700 = vmatpush2.bf16.msra.mxu1 %v6599_v33  ;;  %v1236_v35 = vsel %vm6099_vm8, %v1231_v10, %v6548_v45  ;;  %v1054_v15 = vsel %vm6099_vm8, %v6649_v12, %v6651_v13 }
  0x9c   : > { %v6659_v20 = vld [vmem:[#allocation2 + $0x4] sm:$0xf]  ;;  %708 = vst [vmem:[#allocation2 + $0x5c] sm:$0x1] %v707_v60  ;;  %v1704_v21 = vld [vmem:[#allocation2 + $0xb8] sm:$0xf]  ;;  %v766_v30 = vsel %vm6093_vm7, %v595_v19, %v765_v17 }
  0x9d   : > { %v1257_v4 = vshll.u32 %v882_v41, 16  ;;  %v1261_v26 = vshrl.u32 %v882_v41, 16  ;;  %v1248_v27 = vshrl.u32 %v881_v56, 16  ;;  %v883_v28 = vld [vmem:[#allocation2 + $0xbc] sm:$0x1]  ;;  %v1251_v24 = vshll.u32 %v881_v56, 16  ;;  %1797 = vrot.lane.b32.xlu1 %v1704_v21, %s5908_s11 }
  0x9e   : > { %v604_v29 = vsel %vm6116_vm9, %v596_v18, %v603_v59  ;;  %v788_v31 = vld [vmem:[#allocation2 + $0x60] sm:$0xf]  ;;  %767 = vst [vmem:[#allocation2 + $0xc0] sm:$0xf] %v766_v30  ;;  %v1267_v45 = vshll.u32 %v883_v28, 16  ;;  %v5458_v33 = vrot.slane %v1424_v14, 9 }
  0x9f   : > { %v6677_v36 = vrot.slane %v1257_v4, 5  ;;  %v1263_v51 = vrot.slane %v1261_v26, 4  ;;  %768 = vst.msk [vmem:[#allocation2 + $0xc4] sm:$0xf] %vm275_vm0, %v604_v29  ;;  %820 = vst.msk [vmem:[#allocation3 + $0x140] sm:$0xf] %vm275_vm0, %v788_v31  ;;  %1327 = vrot.lane.b32.xlu0 %v1236_v35, %s5908_s11 }
  0xa0   : > { %v1557_v23 = vrot.slane %v6653_v16, 5  ;;  %v5450_v38 = vrot.slane %v1400_v3, 9  ;;  %v1703_v42 = vld [vmem:[#allocation2 + $0xb4] sm:$0xf]  ;;  %v1250_v44 = vrot.slane %v1248_v27, 4  ;;  %v1253_v39 = vrot.slane %v1251_v24, 5 }
  0xa1   : > { %v1264_v43 = vor.u32 %v1263_v51, %v6677_v36  ;;  %v1501_v11 = vrot.slane %v6659_v20, 5  ;;  %v858_v46 = vld [vmem:[#allocation2 + $0x58] sm:$0xf]  ;;  %v1426_v48 = vld [vmem:[#allocation2 + $0x68] sm:$0x1]  ;;  %v1039_v49 = vrot.slane %v1038_v40, 4  ;;  %1297 = vrot.lane.b32.xlu1 %v1054_v15, %s5908_s11  ;;  %v1274_v15 = vpop.permute.xlu1 %1273 }
  0xa2   : > { %v1558_v50 = vsel %vm6681_vm13, %v5458_v33, %v1557_v23  ;;  %v1065_v52 = vshll.u32 %v858_v46, 16  ;;  %v1069_v54 = vshrl.u32 %v858_v46, 16  ;;  %v857_v53 = vld [vmem:[#allocation2 + $0x54] sm:$0xf]  ;;  %v1427_v55 = vld [vmem:[#allocation2 + $0x6c] sm:$0xe]  ;;  %v1254_v47 = vor.u32 %v1253_v39, %v1250_v44 }
  0xa3   : > { %v6693_v57 = vld [vmem:[#allocation2 + $0x70] sm:$0xf]  ;;  %vm1367_vm14 = vcmask 1043968   ;;  %1659 = vst.msk [vmem:[#allocation3 + $0x144] sm:$0xf] %vm275_vm0, %v1558_v50  ;;  %v1502_v58 = vsel %vm6681_vm13, %v5450_v38, %v1501_v11  ;;  %v1056_v62 = vshrl.u32 %v857_v53, 16  ;;  %1795 = vrot.lane.b32.xlu0 %v1703_v42, %s5908_s11  ;;  %v1044_v16 = vsel %vm6099_vm8, %v1039_v49, %v6597_v25 }
  0xa4   : > { %v859_v61 = vld [vmem:[#allocation2 + $0x5c] sm:$0x1]  ;;  %v1059_v63 = vshll.u32 %v857_v53, 16  ;;  %v1402_v1 = vld [vmem:[#allocation2 + $0x8] sm:$0x1]  ;;  %v1265_v6 = vrot.slane %v1264_v43, 4 }
  0xa5   : > { %v6698_v2 = vld [vmem:[#allocation2 + $0x10] sm:$0xf]  ;;  %v1688_v5 = vld [vmem:[#allocation2 + $0x58] sm:$0xf]  ;;  %v1269_v8 = vrot.slane %v1267_v45, 5  ;;  %v6702_v17 = vrot.slane %v1065_v52, 5 }
  0xa6   : > { %1643 = vst.msk [vmem:[#allocation3 + $0x4] sm:$0xf] %vm275_vm0, %v1502_v58  ;;  %v1071_v7 = vrot.slane %v1069_v54, 4  ;;  %v1058_v10 = vrot.slane %v1056_v62, 4  ;;  %v1061_v12 = vrot.slane %v1059_v63, 5  ;;  %v1559_v13 = vrot.slane %v1557_v23, 4  ;;  %1765 = vrot.lane.b32.xlu1 %v1688_v5, %s5908_s11  ;;  %v1272_v23 = vpop.permute.xlu0 %1271 }
  0xa7   : > { %v5752_v14 = vld [vmem:[%s8475_s1 + $0x84] ss:$8 sps:$4 sm:$0xff]   ;;  %v1075_v60 = vshll.u32 %v859_v61, 16  ;;  %v1560_v41 = vrot.slane %v1426_v48, 5  ;;  %v6712_v18 = vld [vmem:[#allocation2 + $0x10] sm:$0xf]  ;;  %v1270_v31 = vsel %vm6099_vm8, %v1265_v6, %v1269_v8  ;;  %1295 = vrot.lane.b32.xlu0 %v1044_v16, %s5908_s11 }
  0xa8   : > { %v1072_v3 = vor.u32 %v1071_v7, %v6702_v17  ;;  %v1403_v56 = vld [vmem:[#allocation2 + $0xc] sm:$0xe]  ;;  %v1062_v59 = vor.u32 %v1061_v12, %v1058_v10  ;;  %v5459_v19 = vrot.slane %v1427_v55, 9  ;;  %v1564_v20 = vrot.slane %v6693_v57, 5  ;;  %v6715_v40 = vld [vmem:[#allocation2 + $0x14] sm:$0x1]  ;;  %4615 = vmatprep.subr.bf16.mxu0 %v5752_v14  ;;  %5685 = vmatprep.subr.bf16.mxu1 %v5752_v14 }
  0xa9   : > { %v1503_v21 = vrot.slane %v1501_v11, 4  ;;  %v1429_v4 = vld [vmem:[#allocation2 + $0x74] sm:$0x1]  ;;  %v2765_v26 = vld [vmem:[#allocation2 + $0x1c] sm:$0xf]  ;;  %v1561_v25 = vsel %vm6681_vm13, %v1559_v13, %v1560_v41  ;;  %v1504_v27 = vrot.slane %v1402_v1, 5  ;;  %4616 = vmatpush2.bf16.msra.mxu0 %v6647_v22  ;;  %5701 = vmatpush2.bf16.msra.mxu1 %v6647_v22 }
  0xaa   : > { %v1508_v28 = vrot.slane %v6698_v2, 5  ;;  %v6721_v24 = vld [vmem:[#allocation2 + $0x20] sm:$0x1]  ;;  %v789_v29 = vld [vmem:[#allocation2 + $0x64] sm:$0xf]  ;;  %v6726_v35 = vrot.slane %v1254_v47, 4  ;;  %v1565_v51 = vsel %vm6681_vm13, %v5459_v19, %v1564_v20  ;;  %1333 = vrot.lane.b32.xlu1 %v1270_v31, %s5908_s11 }
  0xab   : > { %v1687_v30 = vld [vmem:[#allocation2 + $0x54] sm:$0xf]  ;;  %1660 = vst.msk [vmem:[#allocation3 + $0x158] sm:$0xf] %vm275_vm0, %v1561_v25  ;;  %v5451_v45 = vrot.slane %v1403_v56, 9  ;;  %v6735_v38 = vrot.slane %v1072_v3, 4  ;;  %v1505_v44 = vsel %vm6681_vm13, %v1503_v21, %v1504_v27  ;;  %v1772_v3 = vpop.permute.xlu1 %1771 }
  0xac   : > { %v2764_v33 = vld [vmem:[#allocation2 + $0x18] sm:$0xf]  ;;  %821 = vst.msk [vmem:[#allocation3 + $0x154] sm:$0xf] %vm275_vm0, %v789_v29  ;;  %v6737_v42 = vrot.slane %v1075_v60, 5  ;;  %v6739_v43 = vrot.slane %v1062_v59, 4  ;;  %v1260_v61 = vsel %vm6099_vm8, %v6726_v35, %v6677_v36  ;;  %1763 = vrot.lane.b32.xlu0 %v1687_v30, %s5908_s11  ;;  %v1740_v60 = vpop.permute.xlu0 %1739 }
  0xad   : > { %1369 = vst.msk [vmem:[#allocation3 + $0x14] sm:$0xf] %vm1367_vm14, %v1274_v15  ;;  %v6744_v39 = vld [vmem:[#allocation2 + $0xc] sm:$0xe]  ;;  %v1405_v11 = vld [vmem:[#allocation2 + $0x14] sm:$0x1]  ;;  %v1509_v46 = vsel %vm6681_vm13, %v5451_v45, %v1508_v28 }
  0xae   : > { %1661 = vst.msk [vmem:[#allocation3 + $0x16c] sm:$0xf] %vm275_vm0, %v1565_v51  ;;  %v1706_v22 = vld [vmem:[#allocation2 + $0xc4] sm:$0xf]  ;;  %1644 = vst.msk [vmem:[#allocation3 + $0x18] sm:$0xf] %vm275_vm0, %v1505_v44  ;;  %v1078_v41 = vsel %vm6099_vm8, %v6735_v38, %v6737_v42 }
  0xaf   : > { %1368 = vst.msk [vmem:[#allocation3] sm:$0xf] %vm1367_vm14, %v1272_v23  ;;  %v2461_v48 = vrot.slane %v6712_v18, 5  ;;  %v1566_v49 = vrot.slane %v1564_v20, 4  ;;  %v6751_v50 = vld [vmem:[#allocation2 + $0x1c] sm:$0xf]  ;;  %1801 = vrot.lane.b32.xlu1 %v1706_v22, %s5908_s11  ;;  %v1774_v38 = vpop.permute.xlu1 %1773 }
  0xb0   : > { %v791_v52 = vld [vmem:[#allocation2 + $0x70] sm:$0xf]  ;;  %v790_v54 = vld [vmem:[#allocation2 + $0x6c] sm:$0xf]  ;;  %1645 = vst.msk [vmem:[#allocation3 + $0x2c] sm:$0xf] %vm275_vm0, %v1509_v46  ;;  %1331 = vrot.lane.b32.xlu0 %v1260_v61, %s5908_s11  ;;  %v1776_v42 = vpop.permute.xlu0 %1775 }
  0xb1   : > { %v2464_v53 = vrot.slane %v6715_v40, 5  ;;  %v1567_v55 = vrot.slane %v1429_v4, 5  ;;  %v2822_v57 = vshll.u32 %v2765_v26, 16  ;;  %v2826_v58 = vshrl.u32 %v2765_v26, 16  ;;  %823 = vst.msk [vmem:[#allocation3 + $0x17c] sm:$0xf] %vm275_vm0, %v791_v52 }
  0xb2   : > { %822 = vst.msk [vmem:[#allocation3 + $0x168] sm:$0xf] %vm275_vm0, %v790_v54  ;;  %v2832_v62 = vshll.u32 %v6721_v24, 16  ;;  %v2813_v63 = vshrl.u32 %v2764_v33, 16  ;;  %v2816_v1 = vshll.u32 %v2764_v33, 16  ;;  %v1511_v7 = vrot.slane %v1405_v11, 5 }
  0xb3   : > { %v6763_v2 = vld [vmem:[#allocation2 + $0x20] sm:$0x1]  ;;  %v1568_v5 = vsel %vm6681_vm13, %v1566_v49, %v1567_v55  ;;  %v6768_v6 = vrot.slane %v2822_v57, 5  ;;  %v2828_v8 = vrot.slane %v2826_v58, 4  ;;  %v6770_v47 = vld [vmem:[#allocation2 + $0x18] sm:$0xe]  ;;  %1301 = vrot.lane.b32.xlu1 %v1078_v41, %s5908_s11 }
  0xb4   : > { %v2768_v10 = vld [vmem:[#allocation2 + $0x28] sm:$0xf]  ;;  %v5466_v36 = vrot.slane %v6744_v39, 9  ;;  %1662 = vst.msk [vmem:[#allocation3 + $0x180] sm:$0xf] %vm275_vm0, %v1568_v5  ;;  %v2815_v12 = vrot.slane %v2813_v63, 4 }
  0xb5   : > { %v2818_v13 = vrot.slane %v2816_v1, 5  ;;  %v1510_v14 = vrot.slane %v1508_v28, 4  ;;  %v775_v16 = vld [vmem:[#allocation2 + $0x10] sm:$0xf]  ;;  %v2829_v56 = vor.u32 %v2828_v8, %v6768_v6  ;;  %v2468_v59 = vrot.slane %v6751_v50, 5 }
  0xb6   : > { %v2767_v19 = vld [vmem:[#allocation2 + $0x24] sm:$0xf]  ;;  %807 = vst.msk [vmem:[#allocation3 + $0x3c] sm:$0xf] %vm275_vm0, %v775_v16  ;;  %v774_v20 = vld [vmem:[#allocation2 + $0xc] sm:$0xf]  ;;  %v1068_v8 = vsel %vm6099_vm8, %v6739_v43, %v6702_v17 }
  0xb7   : > { %v1705_v21 = vld [vmem:[#allocation2 + $0xc0] sm:$0xf]  ;;  %1851 = vst.msk [vmem:[#allocation3 + $0x144] sm:$0xf] %vm1367_vm14, %v1772_v3  ;;  %1835 = vst.msk [vmem:[#allocation3 + $0x4] sm:$0xf] %vm1367_vm14, %v1740_v60  ;;  %v2819_v4 = vor.u32 %v2818_v13, %v2815_v12  ;;  %v1512_v26 = vsel %vm6681_vm13, %v1510_v14, %v1511_v7  ;;  %v1742_v13 = vpop.permute.xlu1 %1741  ;;  %v1744_v14 = vpop.permute.xlu0 %1743 }
  0xb8   : > { %v2769_v25 = vld [vmem:[#allocation2 + $0x2c] sm:$0x1]  ;;  %v2846_v27 = vshll.u32 %v2768_v10, 16  ;;  %v2850_v28 = vshrl.u32 %v2768_v10, 16  ;;  %806 = vst.msk [vmem:[#allocation3 + $0x28] sm:$0xf] %vm275_vm0, %v774_v20  ;;  %1799 = vrot.lane.b32.xlu0 %v1705_v21, %s5908_s11 }
  0xb9   : > { %v2463_v24 = vrot.slane %v2461_v48, 4  ;;  %v6790_v29 = vrot.slane %v2832_v62, 5  ;;  %1646 = vst.msk [vmem:[#allocation3 + $0x40] sm:$0xf] %vm275_vm0, %v1512_v26  ;;  %v2471_v30 = vrot.slane %v6763_v2, 5  ;;  %v5467_v15 = vrot.slane %v6770_v47, 9 }
  0xba   : > { %v6794_v31 = vld [vmem:[#allocation2 + $0x28] sm:$0xf]  ;;  %v1690_v35 = vld [vmem:[#allocation2 + $0x64] sm:$0xf]  ;;  %v6797_v51 = vrot.slane %v2846_v27, 5  ;;  %v2852_v45 = vrot.slane %v2850_v28, 4 }
  0xbb   : > { %v2837_v33 = vshrl.u32 %v2767_v19, 16  ;;  %v793_v23 = vld [vmem:[#allocation2 + $0x7c] sm:$0xf]  ;;  %v6800_v44 = vrot.slane %v2829_v56, 4  ;;  %v2840_v11 = vshll.u32 %v2767_v19, 16  ;;  %v6807_v52 = vrot.slane %v2819_v4, 4  ;;  %1769 = vrot.lane.b32.xlu1 %v1690_v35, %s5908_s11 }
  0xbc   : > { %v6802_v22 = vld [vmem:[#allocation2 + $0x2c] sm:$0x1]  ;;  %825 = vst.msk [vmem:[#allocation3 + $0x1a4] sm:$0xf] %vm275_vm0, %v793_v23  ;;  %v792_v46 = vld [vmem:[#allocation2 + $0x78] sm:$0xf]  ;;  %v2853_v55 = vor.u32 %v2852_v45, %v6797_v51  ;;  %v2465_v16 = vsel %vm6681_vm13, %v2463_v24, %v2464_v53  ;;  %1299 = vrot.lane.b32.xlu0 %v1068_v8, %s5908_s11  ;;  %v1778_v24 = vpop.permute.xlu1 %1777 }
  0xbd   : > { %v2771_v49 = vld [vmem:[#allocation2 + $0x34] sm:$0xf]  ;;  %1852 = vst.msk [vmem:[#allocation3 + $0x158] sm:$0xf] %vm1367_vm14, %v1774_v38  ;;  %1853 = vst.msk [vmem:[#allocation3 + $0x16c] sm:$0xf] %vm1367_vm14, %v1776_v42  ;;  %v2835_v38 = vsel %vm6099_vm8, %v6800_v44, %v6790_v29  ;;  %v2825_v18 = vsel %vm6099_vm8, %v6807_v52, %v6768_v6 }
  0xbe   : > { %v6811_v54 = vrot.slane %v2468_v59, 4  ;;  %v2856_v57 = vshll.u32 %v2769_v25, 16  ;;  %824 = vst.msk [vmem:[#allocation3 + $0x190] sm:$0xf] %vm275_vm0, %v792_v46  ;;  %v2772_v58 = vld [vmem:[#allocation2 + $0x38] sm:$0x1] }
  0xbf   : > { %v2839_v61 = vrot.slane %v2837_v33, 4  ;;  %v2842_v62 = vrot.slane %v2840_v11, 5  ;;  %v2475_v63 = vrot.slane %v6794_v31, 5  ;;  %v6817_v1 = vld [vmem:[#allocation2 + $0x24] sm:$0xe]  ;;  %v2870_v5 = vshll.u32 %v2771_v49, 16  ;;  %2573 = vrot.lane.b32.xlu1 %v2465_v16, %s5908_s11 }
  0xc0   : > { %v2770_v7 = vld [vmem:[#allocation2 + $0x30] sm:$0xf]  ;;  %v1431_v10 = vld [vmem:[#allocation2 + $0x7c] sm:$0xf]  ;;  %v1432_v12 = vld [vmem:[#allocation2 + $0x80] sm:$0x1]  ;;  %v2472_v39 = vsel %vm6681_vm13, %v6811_v54, %v2471_v30  ;;  %v1304_v54 = vpop.permute.xlu0 %1303 }
  0xc1   : > { %v2874_v3 = vshrl.u32 %v2771_v49, 16  ;;  %v2880_v60 = vshll.u32 %v2772_v58, 16  ;;  %v1430_v41 = vld [vmem:[#allocation2 + $0x78] sm:$0xe]  ;;  %1836 = vst.msk [vmem:[#allocation3 + $0x18] sm:$0xf] %vm1367_vm14, %v1742_v13  ;;  %v2843_v20 = vor.u32 %v2842_v62, %v2839_v61  ;;  %v2462_v61 = vsel %vm6681_vm13, %v5466_v36, %v2461_v48 }
  0xc2   : > { %1837 = vst.msk [vmem:[#allocation3 + $0x2c] sm:$0xf] %vm1367_vm14, %v1744_v14  ;;  %v6830_v17 = vrot.slane %v2853_v55, 4  ;;  %v6832_v43 = vrot.slane %v2856_v57, 5  ;;  %v2478_v56 = vrot.slane %v6802_v22, 5  ;;  %v5468_v19 = vrot.slane %v6817_v1, 9 }
  0xc3   : > { %v1689_v40 = vld [vmem:[#allocation2 + $0x60] sm:$0xf]  ;;  %v6839_v53 = vrot.slane %v2475_v63, 4  ;;  %v6841_v21 = vrot.slane %v2870_v5, 5  ;;  %v1571_v4 = vrot.slane %v1431_v10, 5  ;;  %v2861_v26 = vshrl.u32 %v2770_v7, 16  ;;  %3198 = vrot.lane.b32.xlu1 %v2835_v38, %s5908_s11 }
  0xc4   : > { %v1574_v25 = vrot.slane %v1432_v12, 5  ;;  %v5460_v27 = vrot.slane %v1430_v41, 9  ;;  %v777_v28 = vld [vmem:[#allocation2 + $0x1c] sm:$0xf]  ;;  %v2876_v35 = vrot.slane %v2874_v3, 4  ;;  %v6844_v45 = vrot.slane %v2880_v60, 5  ;;  %1767 = vrot.lane.b32.xlu0 %v1689_v40, %s5908_s11 }
  0xc5   : > { %v1573_v33 = vrot.slane %v1571_v4, 4  ;;  %809 = vst.msk [vmem:[#allocation3 + $0x64] sm:$0xf] %vm275_vm0, %v777_v28  ;;  %v776_v23 = vld [vmem:[#allocation2 + $0x18] sm:$0xf]  ;;  %v2864_v42 = vshll.u32 %v2770_v7, 16  ;;  %v1746_v7 = vpop.permute.xlu1 %1745 }
  0xc6   : > { %1854 = vst.msk [vmem:[#allocation3 + $0x180] sm:$0xf] %vm1367_vm14, %v1778_v24  ;;  %v1572_v11 = vsel %vm6681_vm13, %v5460_v27, %v1571_v4  ;;  %v6854_v46 = vld [vmem:[#allocation2 + $0x34] sm:$0xf]  ;;  %v2774_v49 = vld [vmem:[#allocation2 + $0x40] sm:$0xf]  ;;  %v2877_v13 = vor.u32 %v2876_v35, %v6841_v21  ;;  %v2859_v35 = vsel %vm6099_vm8, %v6830_v17, %v6832_v43 }
  0xc7   : > { %808 = vst.msk [vmem:[#allocation3 + $0x50] sm:$0xf] %vm275_vm0, %v776_v23  ;;  %v6858_v55 = vrot.slane %v2843_v20, 4  ;;  %v1575_v57 = vsel %vm6681_vm13, %v1573_v33, %v1574_v25  ;;  %1663 = vst.msk [vmem:[#allocation3 + $0x194] sm:$0xf] %vm275_vm0, %v1572_v11  ;;  %v2894_v29 = vshll.u32 %v2774_v49, 16  ;;  %2577 = vrot.lane.b32.xlu1 %v2472_v39, %s5908_s11 }
  0xc8   : > { %v6863_v58 = vld [vmem:[#allocation2 + $0x38] sm:$0x1]  ;;  %v2773_v44 = vld [vmem:[#allocation2 + $0x3c] sm:$0xf]  ;;  %1664 = vst.msk [vmem:[#allocation3 + $0x1a8] sm:$0xf] %vm275_vm0, %v1575_v57  ;;  %2571 = vrot.lane.b32.xlu0 %v2462_v61, %s5908_s11 }
  0xc9   : > { %v2898_v62 = vshrl.u32 %v2774_v49, 16  ;;  %v1407_v5 = vld [vmem:[#allocation2 + $0x1c] sm:$0xf]  ;;  %v1408_v8 = vld [vmem:[#allocation2 + $0x20] sm:$0x1]  ;;  %v2482_v14 = vrot.slane %v6854_v46, 5  ;;  %v2849_v50 = vsel %vm6099_vm8, %v6858_v55, %v6797_v51 }
  0xca   : > { %v5754_v10 = vld [vmem:[#allocation3] ss:$20 sps:$4 sm:$0xff]   ;;  %v5756_v12 = vld [vmem:[#allocation3 + $0x4] ss:$20 sps:$4 sm:$0xff]   ;;  %1838 = vst.msk [vmem:[#allocation3 + $0x40] sm:$0xf] %vm1367_vm14, %v1746_v7 }
  0xcb   : > { %v2863_v48 = vrot.slane %v2861_v26, 4  ;;  %v2866_v36 = vrot.slane %v2864_v42, 5  ;;  %v2775_v16 = vld [vmem:[#allocation2 + $0x44] sm:$0x1]  ;;  %v1406_v3 = vld [vmem:[#allocation2 + $0x18] sm:$0xe]  ;;  %4617 = vmatprep.mubr.bf16.mxu0 %v5756_v12  ;;  %v1310_v26 = vpop.permute.xlu1 %1309  ;;  %3202 = vrot.lane.b32.xlu1 %v2859_v35, %s5908_s11 }
  0xcc   : > { %v6886_v60 = vld [vmem:[#allocation2 + $0x30] sm:$0xe]  ;;  %v2885_v41 = vshrl.u32 %v2773_v44, 16  ;;  %v2888_v40 = vshll.u32 %v2773_v44, 16  ;;  %v1515_v6 = vrot.slane %v1407_v5, 5  ;;  %v1518_v52 = vrot.slane %v1408_v8, 5  ;;  %4618 = vmatmul.mubr.bf16.vlgmr.msra.gmra.mxu0 %v5754_v10  ;;  %3196 = vrot.lane.b32.xlu0 %v2825_v18, %s5908_s11  ;;  %v1306_v10 = vpop.permute.xlu0 %1305 }
  0xcd   : > { %v2485_v2 = vrot.slane %v6863_v58, 5  ;;  %v6889_v20 = vrot.slane %v2894_v29, 5  ;;  %v2900_v4 = vrot.slane %v2898_v62, 4  ;;  %v5452_v30 = vrot.slane %v1406_v3, 9  ;;  %v6898_v24 = vld [vmem:[#allocation2 + $0x40] sm:$0xf] }
  0xce   : > { %v6892_v25 = vrot.slane %v2877_v13, 4  ;;  %v6896_v27 = vrot.slane %v2482_v14, 4  ;;  %v1517_v28 = vrot.slane %v1515_v6, 4  ;;  %1384 = vst.msk [vmem:[#allocation3 + $0x140] sm:$0xf] %vm1367_vm14, %v1304_v54  ;;  %v2867_v33 = vor.u32 %v2866_v36, %v2863_v48 }
  0xcf   : > { %1387 = vst.msk [vmem:[#allocation3 + $0x17c] sm:$0xf] %vm1367_vm14, %v1310_v26  ;;  %v2904_v23 = vshll.u32 %v2775_v16, 16  ;;  %v1516_v38 = vsel %vm6681_vm13, %v5452_v30, %v1515_v6  ;;  %v6908_v42 = vld [vmem:[#allocation2 + $0x44] sm:$0x1]  ;;  %v2887_v49 = vrot.slane %v2885_v41, 4  ;;  %v2469_v44 = vsel %vm6681_vm13, %v5467_v15, %v2468_v59  ;;  %v1278_v47 = vpop.permute.xlu1 %1277 }
  0xd0   : > { %v795_v11 = vld [vmem:[#allocation2 + $0x88] sm:$0xf]  ;;  %v2890_v57 = vrot.slane %v2888_v40, 5  ;;  %v1519_v29 = vsel %vm6681_vm13, %v1517_v28, %v1518_v52  ;;  %1647 = vst.msk [vmem:[#allocation3 + $0x54] sm:$0xf] %vm275_vm0, %v1516_v38  ;;  %v5469_v61 = vrot.slane %v6886_v60, 9  ;;  %v2901_v62 = vor.u32 %v2900_v4, %v6889_v20  ;;  %2575 = vrot.lane.b32.xlu0 %v2469_v44, %s5908_s11  ;;  %v1308_v52 = vpop.permute.xlu0 %1307 }
  0xd1   : > { %827 = vst.msk [vmem:[#allocation3 + $0x1cc] sm:$0xf] %vm275_vm0, %v795_v11  ;;  %v794_v17 = vld [vmem:[#allocation2 + $0x84] sm:$0xf]  ;;  %v2777_v43 = vld [vmem:[#allocation2 + $0x4c] sm:$0xf]  ;;  %v2479_v59 = vsel %vm6681_vm13, %v6839_v53, %v2478_v56  ;;  %v2883_v35 = vsel %vm6099_vm8, %v6892_v25, %v6844_v45  ;;  %v2486_v31 = vsel %vm6681_vm13, %v6896_v27, %v2485_v2 }
  0xd2   : > { %1648 = vst.msk [vmem:[#allocation3 + $0x68] sm:$0xf] %vm275_vm0, %v1519_v29  ;;  %v6924_v5 = vld [vmem:[#allocation2 + $0x3c] sm:$0xe]  ;;  %826 = vst.msk [vmem:[#allocation3 + $0x1b8] sm:$0xf] %vm275_vm0, %v794_v17  ;;  %v2891_v56 = vor.u32 %v2890_v57, %v2887_v49  ;;  %2581 = vrot.lane.b32.xlu1 %v2479_v59, %s5908_s11  ;;  %v2476_v17 = vsel %vm6681_vm13, %v5468_v19, %v2475_v63 }
  0xd3   : > { %v2778_v8 = vld [vmem:[#allocation2 + $0x50] sm:$0x1]  ;;  %v1434_v7 = vld [vmem:[#allocation2 + $0x88] sm:$0xf]  ;;  %v2489_v15 = vrot.slane %v6898_v24, 5  ;;  %v2918_v12 = vshll.u32 %v2777_v43, 16  ;;  %v1314_v4 = vpop.permute.xlu1 %1313 }
  0xd4   : > { %v2776_v13 = vld [vmem:[#allocation2 + $0x48] sm:$0xf]  ;;  %v1435_v18 = vld [vmem:[#allocation2 + $0x8c] sm:$0x1]  ;;  %1385 = vst.msk [vmem:[#allocation3 + $0x154] sm:$0xf] %vm1367_vm14, %v1306_v10  ;;  %3200 = vrot.lane.b32.xlu0 %v2849_v50, %s5908_s11 }
  0xd5   : > { %1371 = vst.msk [vmem:[#allocation3 + $0x3c] sm:$0xf] %vm1367_vm14, %v1278_v47  ;;  %v6940_v39 = vrot.slane %v2867_v33, 4  ;;  %v2922_v48 = vshrl.u32 %v2777_v43, 16  ;;  %v1578_v51 = vrot.slane %v1434_v7, 5  ;;  %v1581_v55 = vrot.slane %v1435_v18, 5 }
  0xd6   : > { %v1433_v36 = vld [vmem:[#allocation2 + $0x84] sm:$0xe]  ;;  %v6943_v22 = vrot.slane %v2904_v23, 5  ;;  %v2492_v53 = vrot.slane %v6908_v42, 5  ;;  %v2928_v16 = vshll.u32 %v2778_v8, 16  ;;  %v6946_v3 = vrot.slane %v2901_v62, 4  ;;  %v1276_v8 = vpop.permute.xlu0 %1275  ;;  %3206 = vrot.lane.b32.xlu1 %v2883_v35, %s5908_s11 }
  0xd7   : > { %v2909_v41 = vshrl.u32 %v2776_v13, 16  ;;  %v1580_v40 = vrot.slane %v1578_v51, 4  ;;  %v5461_v6 = vrot.slane %v1433_v36, 9  ;;  %v6951_v30 = vrot.slane %v2489_v15, 4  ;;  %1386 = vst.msk [vmem:[#allocation3 + $0x168] sm:$0xf] %vm1367_vm14, %v1308_v52 }
  0xd8   : > { %v5470_v54 = vrot.slane %v6924_v5, 9  ;;  %v6954_v26 = vrot.slane %v2918_v12, 5  ;;  %v2912_v28 = vshll.u32 %v2776_v13, 16  ;;  %1389 = vst.msk [vmem:[#allocation3 + $0x1a4] sm:$0xf] %vm1367_vm14, %v1314_v4  ;;  %v2924_v33 = vrot.slane %v2922_v48, 4  ;;  %2579 = vrot.lane.b32.xlu0 %v2476_v17, %s5908_s11  ;;  %v1782_v12 = vpop.permute.xlu1 %1781 }
  0xd9   : > { %v1582_v23 = vsel %vm6681_vm13, %v1580_v40, %v1581_v55  ;;  %v1579_v38 = vsel %vm6681_vm13, %v5461_v6, %v1578_v51  ;;  %v779_v11 = vld [vmem:[#allocation2 + $0x28] sm:$0xf]  ;;  %v778_v49 = vld [vmem:[#allocation2 + $0x24] sm:$0xf]  ;;  %v6967_v57 = vrot.slane %v2891_v56, 4  ;;  %v6969_v29 = vrot.slane %v2928_v16, 5 }
  0xda   : > { %1666 = vst.msk [vmem:[#allocation3 + $0x1d0] sm:$0xf] %vm275_vm0, %v1582_v23  ;;  %1665 = vst.msk [vmem:[#allocation3 + $0x1bc] sm:$0xf] %vm275_vm0, %v1579_v38  ;;  %v6973_v45 = vld [vmem:[#allocation2 + $0x4c] sm:$0xf]  ;;  %v2925_v63 = vor.u32 %v2924_v33, %v6954_v26  ;;  %v2873_v18 = vsel %vm6099_vm8, %v6940_v39, %v6841_v21  ;;  %v2907_v48 = vsel %vm6099_vm8, %v6946_v3, %v6943_v22  ;;  %v1312_v16 = vpop.permute.xlu0 %1311  ;;  %2585 = vrot.lane.b32.xlu1 %v2486_v31, %s5908_s11 }
  0xdb   : > { %811 = vst.msk [vmem:[#allocation3 + $0x8c] sm:$0xf] %vm275_vm0, %v779_v11  ;;  %810 = vst.msk [vmem:[#allocation3 + $0x78] sm:$0xf] %vm275_vm0, %v778_v49  ;;  %v2780_v25 = vld [vmem:[#allocation2 + $0x58] sm:$0xf] }
  0xdc   : > { %v6983_v43 = vrot.slane %v2909_v41, 4  ;;  %v6985_v44 = vld [vmem:[#allocation2 + $0x50] sm:$0x1]  ;;  %v6987_v62 = vld [vmem:[#allocation2 + $0x54] sm:$0xf]  ;;  %v6995_v1 = vrot.slane %v2912_v28, 5  ;;  %3204 = vrot.lane.b32.xlu0 %v2873_v18, %s5908_s11  ;;  %v1282_v23 = vpop.permute.xlu1 %1281 }
  0xdd   : > { %v5757_v7 = vld [vmem:[#allocation3 + $0x140] ss:$20 sps:$4 sm:$0xff]   ;;  %v5759_v10 = vld [vmem:[#allocation3 + $0x144] ss:$20 sps:$4 sm:$0xff]   ;;  %1370 = vst.msk [vmem:[#allocation3 + $0x28] sm:$0xf] %vm1367_vm14, %v1276_v8 }
  0xde   : > { %v2496_v19 = vrot.slane %v6973_v45, 5  ;;  %v2942_v50 = vshll.u32 %v2780_v25, 16  ;;  %v2946_v47 = vshrl.u32 %v2780_v25, 16  ;;  %v1410_v59 = vld [vmem:[#allocation2 + $0x28] sm:$0xf]  ;;  %4697 = vmatprep.mubr.bf16.mxu1 %v5759_v10  ;;  %v2499_v58 = vrot.slane %v6985_v44, 5  ;;  %v1780_v60 = vpop.permute.xlu0 %1779  ;;  %3210 = vrot.lane.b32.xlu1 %v2907_v48, %s5908_s11 }
  0xdf   : > { %v7002_v13 = vld [vmem:[#allocation2 + $0x48] sm:$0xe]  ;;  %v1411_v2 = vld [vmem:[#allocation2 + $0x2c] sm:$0x1]  ;;  %v1522_v27 = vrot.slane %v1410_v59, 5  ;;  %4698 = vmatmul.mubr.bf16.vlgmr.msra.gmra.mxu1 %v5757_v7  ;;  %v2933_v55 = vshrl.u32 %v6987_v62, 16  ;;  %v2915_v40 = vor.u32 %v6995_v1, %v6983_v43  ;;  %v2483_v43 = vsel %vm6681_vm13, %v5469_v61, %v2482_v14 }
  0xe0   : > { %1856 = vst.msk [vmem:[#allocation3 + $0x1a8] sm:$0xf] %vm1367_vm14, %v1782_v12  ;;  %v2781_v51 = vld [vmem:[#allocation2 + $0x5c] sm:$0x1]  ;;  %v1525_v36 = vrot.slane %v1411_v2, 5  ;;  %v2936_v21 = vshll.u32 %v6987_v62, 16  ;;  %v2493_v61 = vsel %vm6681_vm13, %v6951_v30, %v2492_v53  ;;  %2583 = vrot.lane.b32.xlu0 %v2483_v43, %s5908_s11  ;;  %v1750_v42 = vpop.permute.xlu1 %1749 }
  0xe1   : > { %v1409_v56 = vld [vmem:[#allocation2 + $0x24] sm:$0xe]  ;;  %v1524_v39 = vrot.slane %v1522_v27, 4  ;;  %1388 = vst.msk [vmem:[#allocation3 + $0x190] sm:$0xf] %vm1367_vm14, %v1312_v16  ;;  %v3653_v52 = vld [vmem:[#allocation3 + $0x17c] sm:$0xff] }
  0xe2   : > { %v5760_v41 = vld [vmem:[#allocation3 + $0x16c] ss:$20 sps:$4 sm:$0xff]   ;;  %v5453_v6 = vrot.slane %v1409_v56, 9  ;;  %v7019_v3 = vrot.slane %v2925_v63, 4  ;;  %v7023_v4 = vrot.slane %v2496_v19, 4  ;;  %v7025_v28 = vrot.slane %v2942_v50, 5  ;;  %2589 = vrot.lane.b32.xlu1 %v2493_v61, %s5908_s11 }
  0xe3   : > { %v3605_v22 = vld [vmem:[#allocation3 + $0x3c] sm:$0xff]  ;;  %v2948_v35 = vrot.slane %v2946_v47, 4  ;;  %v3650_v33 = vld [vmem:[#allocation3 + $0x168] sm:$0xff]  ;;  %4707 = vmatprep.mubr.bf16.mxu1 %v5760_v41  ;;  %v2952_v38 = vshll.u32 %v2781_v51, 16  ;;  %v1526_v11 = vsel %vm6681_vm13, %v1524_v39, %v1525_v36  ;;  %v796_v17 = vld [vmem:[#allocation2 + $0x90] sm:$0xf]  ;;  %v2897_v51 = vsel %vm6099_vm8, %v6967_v57, %v6889_v20 }
  0xe4   : > { %v1523_v49 = vsel %vm6681_vm13, %v5453_v6, %v1522_v27  ;;  %v797_v25 = vld [vmem:[#allocation2 + $0x94] sm:$0xf]  ;;  %1373 = vst.msk [vmem:[#allocation3 + $0x64] sm:$0xf] %vm1367_vm14, %v1282_v23  ;;  %v5471_v62 = vrot.slane %v7002_v13, 9  ;;  %v7040_v8 = vrot.slane %v2933_v55, 4  ;;  %v5543_v50 = vcombine.low %v3650_v33, %v3653_v52  ;;  %3208 = vrot.lane.b32.xlu0 %v2897_v51, %s5908_s11  ;;  %v1318_v23 = vpop.permute.xlu1 %1317 }
  0xe5   : > { %1650 = vst.msk [vmem:[#allocation3 + $0x90] sm:$0xf] %vm275_vm0, %v1526_v11  ;;  %1649 = vst.msk [vmem:[#allocation3 + $0x7c] sm:$0xf] %vm275_vm0, %v1523_v49  ;;  %v7044_v7 = vld [vmem:[#allocation2 + $0x58] sm:$0xf]  ;;  %v2949_v12 = vor.u32 %v2948_v35, %v7025_v28  ;;  %v2931_v55 = vsel %vm6099_vm8, %v7019_v3, %v6969_v29  ;;  %v2490_v35 = vsel %vm6681_vm13, %v5470_v54, %v2489_v15 }
  0xe6   : > { %829 = vst.msk [vmem:[#allocation3 + $0x1f4] sm:$0xf] %vm275_vm0, %v797_v25  ;;  %828 = vst.msk [vmem:[#allocation3 + $0x1e0] sm:$0xf] %vm275_vm0, %v796_v17  ;;  %v2783_v46 = vld [vmem:[#allocation2 + $0x64] sm:$0xf]  ;;  %3214 = vrot.lane.b32.xlu1 %v2931_v55, %s5908_s11 }
  0xe7   : > { %v3602_v10 = vld [vmem:[#allocation3 + $0x28] sm:$0xff]  ;;  %v2938_v31 = vrot.slane %v2936_v21, 5  ;;  %v2966_v1 = vshll.u32 %v2783_v46, 16  ;;  %v2970_v63 = vshrl.u32 %v2783_v46, 16  ;;  %1855 = vst.msk [vmem:[#allocation3 + $0x194] sm:$0xf] %vm1367_vm14, %v1780_v60  ;;  %4708 = vmatmul.mubr.bf16.gmra.mxu1 %v5543_v50 }
  0xe8   : > { %v5762_v14 = vld [vmem:[#allocation3 + $0x2c] ss:$20 sps:$4 sm:$0xff]   ;;  %v5503_v47 = vcombine.low %v3602_v10, %v3605_v22  ;;  %v7055_v59 = vrot.slane %v2915_v40, 4  ;;  %v7058_v2 = vld [vmem:[#allocation2 + $0x5c] sm:$0x1]  ;;  %v7061_v18 = vrot.slane %v2952_v38, 5  ;;  %v1280_v40 = vpop.permute.xlu0 %1279  ;;  %2587 = vrot.lane.b32.xlu0 %v2490_v35, %s5908_s11 }
  0xe9   : > { %v1437_v27 = vld [vmem:[#allocation2 + $0x94] sm:$0xf]  ;;  %4627 = vmatprep.mubr.bf16.mxu0 %v5762_v14  ;;  %v2503_v53 = vrot.slane %v7044_v7, 5  ;;  %v2782_v30 = vld [vmem:[#allocation2 + $0x60] sm:$0xf]  ;;  %v2939_v21 = vor.u32 %v2938_v31, %v7040_v8  ;;  %v7077_v6 = vrot.slane %v2966_v1, 5  ;;  %v2500_v31 = vsel %vm6681_vm13, %v7023_v4, %v2499_v58 }
  0xea   : > { %v1438_v48 = vld [vmem:[#allocation2 + $0x98] sm:$0x1]  ;;  %4628 = vmatmul.mubr.bf16.gmra.mxu0 %v5503_v47  ;;  %1840 = vst.msk [vmem:[#allocation3 + $0x68] sm:$0xf] %vm1367_vm14, %v1750_v42  ;;  %v7073_v36 = vld [vmem:[#allocation2 + $0x54] sm:$0xe]  ;;  %v2921_v58 = vsel %vm6099_vm8, %v7055_v59, %v6954_v26  ;;  %2593 = vrot.lane.b32.xlu1 %v2500_v31, %s5908_s11 }
  0xeb   : > { %v1585_v56 = vrot.slane %v1437_v27, 5  ;;  %v1588_v16 = vrot.slane %v1438_v48, 5  ;;  %v1436_v41 = vld [vmem:[#allocation2 + $0x90] sm:$0xe]  ;;  %v2784_v39 = vld [vmem:[#allocation2 + $0x68] sm:$0x1] }
  0xec   : > { %v2972_v20 = vrot.slane %v2970_v63, 4  ;;  %v5462_v57 = vrot.slane %v1436_v41, 9  ;;  %1372 = vst.msk [vmem:[#allocation3 + $0x50] sm:$0xf] %vm1367_vm14, %v1280_v40  ;;  %v7080_v52 = vrot.slane %v2949_v12, 4  ;;  %v2957_v29 = vshrl.u32 %v2782_v30, 16  ;;  %v1748_v43 = vpop.permute.xlu0 %1747  ;;  %v1786_v12 = vpop.permute.xlu1 %1785  ;;  %3212 = vrot.lane.b32.xlu0 %v2921_v58, %s5908_s11 }
  0xed   : > { %v2960_v22 = vshll.u32 %v2782_v30, 16  ;;  %v1587_v3 = vrot.slane %v1585_v56, 4  ;;  %v3659_v33 = vld [vmem:[#allocation3 + $0x1a4] sm:$0xff]  ;;  %v2506_v38 = vrot.slane %v7058_v2, 5  ;;  %v781_v49 = vld [vmem:[#allocation2 + $0x34] sm:$0xf] }
  0xee   : > { %v1586_v11 = vsel %vm6681_vm13, %v5462_v57, %v1585_v56  ;;  %v780_v25 = vld [vmem:[#allocation2 + $0x30] sm:$0xf]  ;;  %1391 = vst.msk [vmem:[#allocation3 + $0x1cc] sm:$0xf] %vm1367_vm14, %v1318_v23  ;;  %v7095_v17 = vrot.slane %v2503_v53, 4  ;;  %v5472_v24 = vrot.slane %v7073_v36, 9  ;;  %v2973_v10 = vor.u32 %v2972_v20, %v7077_v6 }
  0xef   : > { %v2976_v5 = vshll.u32 %v2784_v39, 16  ;;  %v1589_v15 = vsel %vm6681_vm13, %v1587_v3, %v1588_v16  ;;  %1667 = vst.msk [vmem:[#allocation3 + $0x1e4] sm:$0xf] %vm275_vm0, %v1586_v11  ;;  %813 = vst.msk [vmem:[#allocation3 + $0xb4] sm:$0xf] %vm275_vm0, %v781_v49  ;;  %v3656_v8 = vld [vmem:[#allocation3 + $0x190] sm:$0xff]  ;;  %v2955_v4 = vsel %vm6099_vm8, %v7080_v52, %v7061_v18  ;;  %v2497_v23 = vsel %vm6681_vm13, %v5471_v62, %v2496_v19 }
  0xf0   : > { %812 = vst.msk [vmem:[#allocation3 + $0xa0] sm:$0xf] %vm275_vm0, %v780_v25  ;;  %v2786_v54 = vld [vmem:[#allocation2 + $0x70] sm:$0xf]  ;;  %v5764_v46 = vld [vmem:[#allocation3 + $0x194] ss:$20 sps:$4 sm:$0xff]   ;;  %v5548_v61 = vcombine.low %v3656_v8, %v3659_v33  ;;  %v1316_v16 = vpop.permute.xlu0 %1315  ;;  %3218 = vrot.lane.b32.xlu1 %v2955_v4, %s5908_s11  ;;  %v2507_v8 = vsel %vm6681_vm13, %v7095_v17, %v2506_v38  ;;  %2591 = vrot.lane.b32.xlu0 %v2497_v23, %s5908_s11 }
  0xf1   : > { %v7104_v60 = vrot.slane %v2939_v21, 4  ;;  %1668 = vst.msk [vmem:[#allocation3 + $0x1f8] sm:$0xf] %vm275_vm0, %v1589_v15  ;;  %v7108_v14 = vld [vmem:[#allocation2 + $0x64] sm:$0xf]  ;;  %v7116_v1 = vrot.slane %v2957_v29, 4  ;;  %4717 = vmatprep.mubr.bf16.mxu1 %v5764_v46  ;;  %v1286_v29 = vpop.permute.xlu1 %1285 }
  0xf2   : > { %1839 = vst.msk [vmem:[#allocation3 + $0x54] sm:$0xf] %vm1367_vm14, %v1748_v43  ;;  %v7118_v63 = vrot.slane %v2960_v22, 5  ;;  %v7120_v50 = vld [vmem:[#allocation2 + $0x68] sm:$0x1]  ;;  %v2990_v42 = vshll.u32 %v2786_v54, 16  ;;  %4718 = vmatmul.mubr.bf16.gmra.mxu1 %v5548_v61 }
  0xf3   : > { %v1413_v47 = vld [vmem:[#allocation2 + $0x34] sm:$0xf]  ;;  %v7123_v27 = vld [vmem:[#allocation2 + $0x60] sm:$0xe]  ;;  %v2994_v30 = vshrl.u32 %v2786_v54, 16  ;;  %v7134_v48 = vrot.slane %v2976_v5, 5 }
  0xf4   : > { %v2785_v44 = vld [vmem:[#allocation2 + $0x6c] sm:$0xf]  ;;  %1858 = vst.msk [vmem:[#allocation3 + $0x1d0] sm:$0xf] %vm1367_vm14, %v1786_v12  ;;  %v1414_v51 = vld [vmem:[#allocation2 + $0x38] sm:$0x1]  ;;  %v2963_v18 = vor.u32 %v7118_v63, %v7116_v1  ;;  %v1784_v5 = vpop.permute.xlu0 %1783  ;;  %2597 = vrot.lane.b32.xlu1 %v2507_v8, %s5908_s11 }
  0xf5   : > { %v1529_v55 = vrot.slane %v1413_v47, 5  ;;  %v1412_v56 = vld [vmem:[#allocation2 + $0x30] sm:$0xe]  ;;  %v7137_v41 = vrot.slane %v2973_v10, 4  ;;  %v2510_v40 = vrot.slane %v7108_v14, 5  ;;  %v2513_v26 = vrot.slane %v7120_v50, 5  ;;  %v1754_v2 = vpop.permute.xlu1 %1753 }
  0xf6   : > { %v1532_v59 = vrot.slane %v1414_v51, 5  ;;  %1390 = vst.msk [vmem:[#allocation3 + $0x1b8] sm:$0xf] %vm1367_vm14, %v1316_v16  ;;  %v5473_v21 = vrot.slane %v7123_v27, 9  ;;  %v2787_v39 = vld [vmem:[#allocation2 + $0x74] sm:$0x1]  ;;  %v2945_v47 = vsel %vm6099_vm8, %v7104_v60, %v7025_v28 }
  0xf7   : > { %v1531_v20 = vrot.slane %v1529_v55, 4  ;;  %v5454_v57 = vrot.slane %v1412_v56, 9  ;;  %v3611_v52 = vld [vmem:[#allocation3 + $0x64] sm:$0xff]  ;;  %v7146_v22 = vrot.slane %v2990_v42, 5  ;;  %v7148_v3 = vrot.slane %v2994_v30, 4  ;;  %3216 = vrot.lane.b32.xlu0 %v2945_v47, %s5908_s11 }
  0xf8   : > { %v2981_v35 = vshrl.u32 %v2785_v44, 16  ;;  %v2984_v33 = vshll.u32 %v2785_v44, 16  ;;  %1375 = vst.msk [vmem:[#allocation3 + $0x8c] sm:$0xf] %vm1367_vm14, %v1286_v29  ;;  %v5774_v25 = vld [vmem:[%s8475_s1 + $0x170] ss:$8 sps:$4 sm:$0xff]   ;;  %v1284_v58 = vpop.permute.xlu0 %1283 }
  0xf9   : > { %v1533_v11 = vsel %vm6681_vm13, %v1531_v20, %v1532_v59  ;;  %v1530_v49 = vsel %vm6681_vm13, %v5454_v57, %v1529_v55  ;;  %v5776_v45 = vld [vmem:[%s8475_s1 + $0x174] ss:$8 sps:$4 sm:$0xff]   ;;  %v799_v13 = vld [vmem:[#allocation2 + $0xa0] sm:$0xf]  ;;  %v3608_v15 = vld [vmem:[#allocation3 + $0x50] sm:$0xff]  ;;  %v3000_v62 = vshll.u32 %v2787_v39, 16  ;;  %v2997_v12 = vor.u32 %v7148_v3, %v7146_v22  ;;  %v1322_v57 = vpop.permute.xlu1 %1321 }
  0xfa   : > { %v5766_v19 = vld [vmem:[#allocation3 + $0x54] ss:$20 sps:$4 sm:$0xff]   ;;  %1652 = vst.msk [vmem:[#allocation3 + $0xb8] sm:$0xf] %vm275_vm0, %v1533_v11  ;;  %1651 = vst.msk [vmem:[#allocation3 + $0xa4] sm:$0xf] %vm275_vm0, %v1530_v49  ;;  %v5508_v43 = vcombine.low %v3608_v15, %v3611_v52  ;;  %4778 = vmatprep.subr.bf16.mxu1 %v5776_v45  ;;  %v2979_v55 = vsel %vm6099_vm8, %v7137_v41, %v7134_v48  ;;  %v2504_v39 = vsel %vm6681_vm13, %v5472_v24, %v2503_v53 }
  0xfb   : > { %831 = vst.msk [vmem:[#allocation3 + $0x21c] sm:$0xf] %vm275_vm0, %v799_v13  ;;  %v798_v54 = vld [vmem:[#allocation2 + $0x9c] sm:$0xf]  ;;  %v7177_v46 = vld [vmem:[#allocation2 + $0x70] sm:$0xf]  ;;  %4637 = vmatprep.mubr.bf16.mxu0 %v5766_v19  ;;  %4779 = vmatpush1.bf16.msra.mxu1 %v5774_v25 }
  0xfc   : > { %1857 = vst.msk [vmem:[#allocation3 + $0x1bc] sm:$0xf] %vm1367_vm14, %v1784_v5  ;;  %v5777_v10 = vld [vmem:[%s8475_s1 + $0x230] ss:$8 sps:$4 sm:$0xff]   ;;  %v5779_v61 = vld [vmem:[%s8475_s1 + $0x234] ss:$8 sps:$4 sm:$0xff]   ;;  %4638 = vmatmul.mubr.bf16.gmra.mxu0 %v5508_v43  ;;  %v1752_v53 = vpop.permute.xlu0 %1751  ;;  %3222 = vrot.lane.b32.xlu1 %v2979_v55, %s5908_s11 }
  0xfd   : > { %830 = vst.msk [vmem:[#allocation3 + $0x208] sm:$0xf] %vm275_vm0, %v798_v54  ;;  %v7187_v31 = vrot.slane %v2963_v18, 4  ;;  %v2512_v38 = vrot.slane %v2510_v40, 4  ;;  %v7191_v17 = vrot.slane %v2981_v35, 4  ;;  %v7193_v1 = vrot.slane %v2984_v33, 5  ;;  %4979 = vmatprep.subr.bf16.mxu0 %v5779_v61  ;;  %2595 = vrot.lane.b32.xlu0 %v2504_v39, %s5908_s11 }
  0xfe   : > { %v2789_v63 = vld [vmem:[#allocation2 + $0x7c] sm:$0xf]  ;;  %1842 = vst.msk [vmem:[#allocation3 + $0x90] sm:$0xf] %vm1367_vm14, %v1754_v2  ;;  %v7202_v42 = vld [vmem:[#allocation2 + $0x74] sm:$0x1]  ;;  %4980 = vmatpush1.bf16.msra.mxu0 %v5777_v10 }
  0xff   : > { %v2788_v30 = vld [vmem:[#allocation2 + $0x78] sm:$0xf]  ;;  %v5780_v44 = vld [vmem:[%s8475_s1 + $0x160] ss:$8 sps:$4 sm:$0xff]   ;;  %v7208_v4 = vrot.slane %v3000_v62, 5  ;;  %v2517_v28 = vrot.slane %v7177_v46, 5  ;;  %v2987_v35 = vor.u32 %v7193_v1, %v7191_v17  ;;  %v2514_v11 = vsel %vm6681_vm13, %v2512_v38, %v2513_v26  ;;  %v1790_v26 = vpop.permute.xlu1 %1789 }
 0x100   : > { %v7211_v60 = vld [vmem:[#allocation2 + $0x80] sm:$0x1]  ;;  %v5782_v51 = vld [vmem:[%s8475_s1 + $0x164] ss:$8 sps:$4 sm:$0xff]   ;;  %1374 = vst.msk [vmem:[#allocation3 + $0x78] sm:$0xf] %vm1367_vm14, %v1284_v58  ;;  %v2969_v61 = vsel %vm6099_vm8, %v7187_v31, %v7077_v6  ;;  %2601 = vrot.lane.b32.xlu1 %v2514_v11, %s5908_s11 }
 0x101   : > { %v3014_v56 = vshll.u32 %v2789_v63, 16  ;;  %v3018_v16 = vshrl.u32 %v2789_v63, 16  ;;  %v1440_v59 = vld [vmem:[#allocation2 + $0xa0] sm:$0xf]  ;;  %v1441_v18 = vld [vmem:[#allocation2 + $0xa4] sm:$0x1]  ;;  %4780 = vmatprep.subr.bf16.mxu1 %v5782_v51  ;;  %v1320_v63 = vpop.permute.xlu0 %1319  ;;  %3220 = vrot.lane.b32.xlu0 %v2969_v61, %s5908_s11 }
 0x102   : > { %v3665_v20 = vld [vmem:[#allocation3 + $0x1cc] sm:$0xff]  ;;  %v3005_v52 = vshrl.u32 %v2788_v30, 16  ;;  %v3008_v29 = vshll.u32 %v2788_v30, 16  ;;  %v1592_v48 = vrot.slane %v1440_v59, 5  ;;  %v1439_v41 = vld [vmem:[#allocation2 + $0x9c] sm:$0xe]  ;;  %4781 = vmatpush1.bf16.msra.mxu1 %v5780_v44 }
 0x103   : > { %1393 = vst.msk [vmem:[#allocation3 + $0x1f4] sm:$0xf] %vm1367_vm14, %v1322_v57  ;;  %v7229_v3 = vrot.slane %v2997_v12, 4  ;;  %v7233_v7 = vld [vmem:[#allocation2 + $0x6c] sm:$0xe]  ;;  %v1595_v36 = vrot.slane %v1441_v18, 5 }
 0x104   : > { %v5463_v33 = vrot.slane %v1439_v41, 9  ;;  %v3662_v24 = vld [vmem:[#allocation3 + $0x1b8] sm:$0xff]  ;;  %v2520_v49 = vrot.slane %v7202_v42, 5  ;;  %v3024_v25 = vshll.u32 %v7211_v60, 16  ;;  %v1594_v45 = vrot.slane %v1592_v48, 4 }
 0x105   : > { %v5768_v23 = vld [vmem:[#allocation3 + $0x1bc] ss:$20 sps:$4 sm:$0xff]   ;;  %1841 = vst.msk [vmem:[#allocation3 + $0x7c] sm:$0xf] %vm1367_vm14, %v1752_v53  ;;  %v5553_v13 = vcombine.low %v3662_v24, %v3665_v20  ;;  %v7243_v5 = vrot.slane %v3014_v56, 5  ;;  %v7245_v15 = vrot.slane %v3018_v16, 4  ;;  %v3003_v47 = vsel %vm6099_vm8, %v7229_v3, %v7208_v4  ;;  %v1290_v16 = vpop.permute.xlu1 %1289 }
 0x106   : > { %v1593_v19 = vsel %vm6681_vm13, %v5463_v33, %v1592_v48  ;;  %v5785_v50 = vld [vmem:[%s8475_s1 + $0x150] ss:$8 sps:$4 sm:$0xff]   ;;  %4727 = vmatprep.mubr.bf16.mxu1 %v5768_v23  ;;  %v2519_v62 = vrot.slane %v2517_v28, 4  ;;  %v7255_v54 = vrot.slane %v3005_v52, 4  ;;  %v7257_v43 = vrot.slane %v3008_v29, 5  ;;  %v3617_v30 = vld [vmem:[#allocation3 + $0x8c] sm:$0xff]  ;;  %v1788_v48 = vpop.permute.xlu0 %1787  ;;  %3226 = vrot.lane.b32.xlu1 %v3003_v47, %s5908_s11 }
 0x107   : > { %v1596_v8 = vsel %vm6681_vm13, %v1594_v45, %v1595_v36  ;;  %1669 = vst.msk [vmem:[#allocation3 + $0x20c] sm:$0xf] %vm275_vm0, %v1593_v19  ;;  %v5787_v10 = vld [vmem:[%s8475_s1 + $0x154] ss:$8 sps:$4 sm:$0xff]   ;;  %4728 = vmatmul.mubr.bf16.gmra.mxu1 %v5553_v13  ;;  %v7270_v2 = vrot.slane %v2987_v35, 4  ;;  %v5474_v38 = vrot.slane %v7233_v7, 9  ;;  %v3021_v44 = vor.u32 %v7245_v15, %v7243_v5 }
 0x108   : > { %1860 = vst.msk [vmem:[#allocation3 + $0x1f8] sm:$0xf] %vm1367_vm14, %v1790_v26  ;;  %v783_v17 = vld [vmem:[#allocation2 + $0x40] sm:$0xf]  ;;  %v782_v1 = vld [vmem:[#allocation2 + $0x3c] sm:$0xf]  ;;  %4782 = vmatprep.subr.bf16.mxu1 %v5787_v10  ;;  %v2511_v56 = vsel %vm6681_vm13, %v5473_v21, %v2510_v40  ;;  %v3011_v59 = vor.u32 %v7257_v43, %v7255_v54  ;;  %v2521_v35 = vsel %vm6681_vm13, %v2519_v62, %v2520_v49 }
 0x109   : > { %1670 = vst.msk [vmem:[#allocation3 + $0x220] sm:$0xf] %vm275_vm0, %v1596_v8  ;;  %v7279_v12 = vld [vmem:[#allocation2 + $0x7c] sm:$0xf]  ;;  %815 = vst.msk [vmem:[#allocation3 + $0xdc] sm:$0xf] %vm275_vm0, %v783_v17  ;;  %4783 = vmatpush1.bf16.msra.mxu1 %v5785_v50  ;;  %v2993_v24 = vsel %vm6099_vm8, %v7270_v2, %v7146_v22  ;;  %2599 = vrot.lane.b32.xlu0 %v2511_v56, %s5908_s11  ;;  %v1758_v42 = vpop.permute.xlu1 %1757 }
 0x10a   : > { %814 = vst.msk [vmem:[#allocation3 + $0xc8] sm:$0xf] %vm275_vm0, %v782_v1  ;;  %v2792_v6 = vld [vmem:[#allocation2 + $0x88] sm:$0xf]  ;;  %v2791_v31 = vld [vmem:[#allocation2 + $0x84] sm:$0xf]  ;;  %v1288_v43 = vpop.permute.xlu0 %1287  ;;  %2605 = vrot.lane.b32.xlu1 %v2521_v35, %s5908_s11 }
 0x10b   : > { %1392 = vst.msk [vmem:[#allocation3 + $0x1e0] sm:$0xf] %vm1367_vm14, %v1320_v63  ;;  %v7286_v58 = vrot.slane %v3024_v25, 5  ;;  %v7288_v60 = vld [vmem:[#allocation2 + $0x80] sm:$0x1]  ;;  %v3038_v4 = vshll.u32 %v2792_v6, 16 }
 0x10c   : > { %v3042_v51 = vshrl.u32 %v2792_v6, 16  ;;  %v5788_v55 = vld [vmem:[%s8475_s1 + $0x140] ss:$8 sps:$4 sm:$0xff]   ;;  %v3029_v18 = vshrl.u32 %v2791_v31, 16  ;;  %v3032_v39 = vshll.u32 %v2791_v31, 16  ;;  %v2524_v14 = vrot.slane %v7279_v12, 5 }
 0x10d   : > { %v5790_v20 = vld [vmem:[%s8475_s1 + $0x144] ss:$8 sps:$4 sm:$0xff]   ;;  %v1416_v57 = vld [vmem:[#allocation2 + $0x40] sm:$0xf]  ;;  %1377 = vst.msk [vmem:[#allocation3 + $0xb4] sm:$0xf] %vm1367_vm14, %v1290_v16  ;;  %3224 = vrot.lane.b32.xlu0 %v2993_v24, %s5908_s11 }
 0x10e   : > { %v7307_v52 = vld [vmem:[#allocation2 + $0x78] sm:$0xe]  ;;  %v7309_v27 = vrot.slane %v3038_v4, 5  ;;  %v3044_v40 = vrot.slane %v3042_v51, 4  ;;  %v1417_v21 = vld [vmem:[#allocation2 + $0x44] sm:$0x1]  ;;  %4784 = vmatprep.subr.bf16.mxu1 %v5790_v20  ;;  %v1756_v16 = vpop.permute.xlu0 %1755 }
 0x10f   : > { %v1536_v29 = vrot.slane %v1416_v57, 5  ;;  %v3614_v41 = vld [vmem:[#allocation3 + $0x78] sm:$0xff]  ;;  %v2793_v36 = vld [vmem:[#allocation2 + $0x8c] sm:$0x1]  ;;  %v1539_v33 = vrot.slane %v1417_v21, 5  ;;  %v3022_v23 = vrot.slane %v3021_v44, 4  ;;  %4785 = vmatpush1.bf16.msra.mxu1 %v5788_v55  ;;  %v2518_v44 = vsel %vm6681_vm13, %v5474_v38, %v2517_v28 }
 0x110   : > { %v5770_v3 = vld [vmem:[#allocation3 + $0x7c] ss:$20 sps:$4 sm:$0xff]   ;;  %1859 = vst.msk [vmem:[#allocation3 + $0x1e4] sm:$0xf] %vm1367_vm14, %v1788_v48  ;;  %v5513_v53 = vcombine.low %v3614_v41, %v3617_v30  ;;  %v1415_v25 = vld [vmem:[#allocation2 + $0x3c] sm:$0xe]  ;;  %v3045_v22 = vor.u32 %v3044_v40, %v7309_v27 }
 0x111   : > { %v1538_v11 = vrot.slane %v1536_v29, 4  ;;  %v7321_v45 = vld [vmem:[#allocation2 + $0x88] sm:$0xf]  ;;  %4647 = vmatprep.mubr.bf16.mxu0 %v5770_v3  ;;  %v2527_v49 = vrot.slane %v7288_v60, 5  ;;  %v3031_v13 = vrot.slane %v3029_v18, 4  ;;  %v3034_v15 = vrot.slane %v3032_v39, 5  ;;  %2603 = vrot.lane.b32.xlu0 %v2518_v44, %s5908_s11 }
 0x112   : > { %v5455_v19 = vrot.slane %v1415_v25, 9  ;;  %4648 = vmatmul.mubr.bf16.gmra.mxu0 %v5513_v53  ;;  %1844 = vst.msk [vmem:[#allocation3 + $0xb8] sm:$0xf] %vm1367_vm14, %v1758_v42  ;;  %v7326_v50 = vrot.slane %v3011_v59, 4  ;;  %v3048_v26 = vshll.u32 %v2793_v36, 16  ;;  %v3671_v8 = vld [vmem:[#allocation3 + $0x1f4] sm:$0xff]  ;;  %v3027_v63 = vsel %vm6099_vm8, %v3022_v23, %v7286_v58  ;;  %v1326_v58 = vpop.permute.xlu1 %1325 }
 0x113   : > { %v1540_v62 = vsel %vm6681_vm13, %v1538_v11, %v1539_v33  ;;  %v5793_v54 = vld [vmem:[%s8475_s1 + $0x130] ss:$8 sps:$4 sm:$0xff]   ;;  %v2526_v10 = vrot.slane %v2524_v14, 4  ;;  %v5475_v61 = vrot.slane %v7307_v52, 9  ;;  %v2531_v17 = vrot.slane %v7321_v45, 5  ;;  %3230 = vrot.lane.b32.xlu1 %v3027_v63, %s5908_s11 }
 0x114   : > { %1654 = vst.msk [vmem:[#allocation3 + $0xe0] sm:$0xf] %vm275_vm0, %v1540_v62  ;;  %v1537_v2 = vsel %vm6681_vm13, %v5455_v19, %v1536_v29  ;;  %v5795_v1 = vld [vmem:[%s8475_s1 + $0x134] ss:$8 sps:$4 sm:$0xff]   ;;  %v7350_v47 = vld [vmem:[#allocation2 + $0x8c] sm:$0x1]  ;;  %v3035_v60 = vor.u32 %v3034_v15, %v3031_v13  ;;  %v3017_v23 = vsel %vm6099_vm8, %v7326_v50, %v7243_v5 }
 0x115   : > { %1376 = vst.msk [vmem:[#allocation3 + $0xa0] sm:$0xf] %vm1367_vm14, %v1288_v43  ;;  %v801_v6 = vld [vmem:[#allocation2 + $0xac] sm:$0xf]  ;;  %v800_v31 = vld [vmem:[#allocation2 + $0xa8] sm:$0xf]  ;;  %4786 = vmatprep.subr.bf16.mxu1 %v5795_v1  ;;  %v2528_v39 = vsel %vm6681_vm13, %v2526_v10, %v2527_v49  ;;  %v1324_v49 = vpop.permute.xlu0 %1323  ;;  %3228 = vrot.lane.b32.xlu0 %v3017_v23, %s5908_s11 }
 0x116   : > { %1653 = vst.msk [vmem:[#allocation3 + $0xcc] sm:$0xf] %vm275_vm0, %v1537_v2  ;;  %v5796_v30 = vld [vmem:[%s8475_s1 + $0x220] ss:$8 sps:$4 sm:$0xff]   ;;  %833 = vst.msk [vmem:[#allocation3 + $0x244] sm:$0xf] %vm275_vm0, %v801_v6  ;;  %4787 = vmatpush1.bf16.msra.mxu1 %v5793_v54  ;;  %v1794_v3 = vpop.permute.xlu1 %1793  ;;  %v2525_v6 = vsel %vm6681_vm13, %v5475_v61, %v2524_v14 }
 0x117   : > { %832 = vst.msk [vmem:[#allocation3 + $0x230] sm:$0xf] %vm275_vm0, %v800_v31  ;;  %v5798_v4 = vld [vmem:[%s8475_s1 + $0x224] ss:$8 sps:$4 sm:$0xff]   ;;  %v2795_v51 = vld [vmem:[#allocation2 + $0x94] sm:$0xf]  ;;  %2609 = vrot.lane.b32.xlu1 %v2528_v39, %s5908_s11 }
 0x118   : > { %v2796_v55 = vld [vmem:[#allocation2 + $0x98] sm:$0x1]  ;;  %1395 = vst.msk [vmem:[#allocation3 + $0x21c] sm:$0xf] %vm1367_vm14, %v1326_v58  ;;  %v7368_v46 = vrot.slane %v3045_v22, 4  ;;  %v7370_v7 = vrot.slane %v3048_v26, 5  ;;  %4981 = vmatprep.subr.bf16.mxu0 %v5798_v4 }
 0x119   : > { %v3062_v28 = vshll.u32 %v2795_v51, 16  ;;  %v3066_v38 = vshrl.u32 %v2795_v51, 16  ;;  %v2794_v56 = vld [vmem:[#allocation2 + $0x90] sm:$0xf]  ;;  %v3668_v59 = vld [vmem:[#allocation3 + $0x1e0] sm:$0xff]  ;;  %v3072_v57 = vshll.u32 %v2796_v55, 16  ;;  %4982 = vmatpush1.bf16.msra.mxu0 %v5796_v30  ;;  %v1792_v58 = vpop.permute.xlu0 %1791  ;;  %2607 = vrot.lane.b32.xlu0 %v2525_v6, %s5908_s11 }
 0x11a   : > { %v5772_v18 = vld [vmem:[#allocation3 + $0x1e4] ss:$20 sps:$4 sm:$0xff]   ;;  %v7375_v20 = vld [vmem:[#allocation2 + $0x84] sm:$0xe]  ;;  %1843 = vst.msk [vmem:[#allocation3 + $0xa4] sm:$0xf] %vm1367_vm14, %v1756_v16  ;;  %v5558_v40 = vcombine.low %v3668_v59, %v3671_v8  ;;  %v3051_v5 = vsel %vm6099_vm8, %v7368_v46, %v7370_v7  ;;  %v1294_v8 = vpop.permute.xlu1 %1293 }
 0x11b   : > { %v7378_v21 = vrot.slane %v3062_v28, 5  ;;  %v3068_v29 = vrot.slane %v3066_v38, 4  ;;  %v3053_v48 = vshrl.u32 %v2794_v56, 16  ;;  %v5799_v41 = vld [vmem:[%s8475_s1 + $0x120] ss:$8 sps:$4 sm:$0xff]   ;;  %4737 = vmatprep.mubr.bf16.mxu1 %v5772_v18  ;;  %v7384_v35 = vrot.slane %v3035_v60, 4  ;;  %3234 = vrot.lane.b32.xlu1 %v3051_v5, %s5908_s11 }
 0x11c   : > { %v2533_v36 = vrot.slane %v2531_v17, 4  ;;  %v2534_v33 = vrot.slane %v7350_v47, 5  ;;  %v3056_v53 = vshll.u32 %v2794_v56, 16  ;;  %v5801_v24 = vld [vmem:[%s8475_s1 + $0x124] ss:$8 sps:$4 sm:$0xff]   ;;  %4738 = vmatmul.mubr.bf16.gmra.mxu1 %v5558_v40  ;;  %v5476_v50 = vrot.slane %v7375_v20, 9 }
 0x11d   : > { %1862 = vst.msk [vmem:[#allocation3 + $0x220] sm:$0xf] %vm1367_vm14, %v1794_v3  ;;  %v1443_v11 = vld [vmem:[#allocation2 + $0xac] sm:$0xf]  ;;  %v1444_v25 = vld [vmem:[#allocation2 + $0xb0] sm:$0x1]  ;;  %v3069_v13 = vor.u32 %v3068_v29, %v7378_v21  ;;  %4788 = vmatprep.subr.bf16.mxu1 %v5801_v24  ;;  %v3041_v18 = vsel %vm6099_vm8, %v7384_v35, %v7309_v27 }
 0x11e   : > { %v1442_v42 = vld [vmem:[#allocation2 + $0xa8] sm:$0xe]  ;;  %v1599_v15 = vrot.slane %v1443_v11, 5  ;;  %v1602_v19 = vrot.slane %v1444_v25, 5  ;;  %v7399_v26 = vld [vmem:[#allocation2 + $0x94] sm:$0xf]  ;;  %4789 = vmatpush1.bf16.msra.mxu1 %v5799_v41  ;;  %v2535_v51 = vsel %vm6681_vm13, %v2533_v36, %v2534_v33  ;;  %v1762_v28 = vpop.permute.xlu1 %1761  ;;  %v1292_v41 = vpop.permute.xlu0 %1291  ;;  %3232 = vrot.lane.b32.xlu0 %v3041_v18, %s5908_s11 }
 0x11f   : > { %v5464_v22 = vrot.slane %v1442_v42, 9  ;;  %1394 = vst.msk [vmem:[#allocation3 + $0x208] sm:$0xf] %vm1367_vm14, %v1324_v49  ;;  %v7407_v62 = vrot.slane %v3072_v57, 5  ;;  %v7409_v54 = vrot.slane %v3053_v48, 4  ;;  %v3623_v43 = vld [vmem:[#allocation3 + $0xb4] sm:$0xff]  ;;  %2613 = vrot.lane.b32.xlu1 %v2535_v51, %s5908_s11 }
 0x120   : > { %v7412_v10 = vrot.slane %v3056_v53, 5  ;;  %v1601_v2 = vrot.slane %v1599_v15, 4  ;;  %v7416_v63 = vld [vmem:[#allocation2 + $0x98] sm:$0x1]  ;;  %v2538_v47 = vrot.slane %v7399_v26, 5  ;;  %v3070_v52 = vrot.slane %v3069_v13, 4 }
 0x121   : > { %v1600_v1 = vsel %vm6681_vm13, %v5464_v22, %v1599_v15  ;;  %1379 = vst.msk [vmem:[#allocation3 + $0xdc] sm:$0xf] %vm1367_vm14, %v1294_v8  ;;  %v5804_v31 = vld [vmem:[%s8475_s1 + $0x110] ss:$8 sps:$4 sm:$0xff]   ;;  %v5806_v30 = vld [vmem:[%s8475_s1 + $0x114] ss:$8 sps:$4 sm:$0xff]   ;;  %v2532_v13 = vsel %vm6681_vm13, %v5476_v50, %v2531_v17 }
 0x122   : > { %1671 = vst.msk [vmem:[#allocation3 + $0x234] sm:$0xf] %vm275_vm0, %v1600_v1  ;;  %v785_v44 = vld [vmem:[#allocation2 + $0x4c] sm:$0xf]  ;;  %v3620_v12 = vld [vmem:[#allocation3 + $0xa0] sm:$0xff]  ;;  %v1603_v14 = vsel %vm6681_vm13, %v1601_v2, %v1602_v19  ;;  %4790 = vmatprep.subr.bf16.mxu1 %v5806_v30  ;;  %v2541_v38 = vrot.slane %v7416_v63, 5  ;;  %v3059_v39 = vor.u32 %v7412_v10, %v7409_v54  ;;  %v3075_v23 = vsel %vm6099_vm8, %v3070_v52, %v7407_v62  ;;  %v1330_v15 = vpop.permute.xlu1 %1329  ;;  %v1760_v20 = vpop.permute.xlu0 %1759 }
 0x123   : > { %v5783_v60 = vld [vmem:[#allocation3 + $0xa4] ss:$20 sps:$4 sm:$0xff]   ;;  %817 = vst.msk [vmem:[#allocation3 + $0x104] sm:$0xf] %vm275_vm0, %v785_v44  ;;  %v784_v61 = vld [vmem:[#allocation2 + $0x48] sm:$0xf]  ;;  %v5518_v4 = vcombine.low %v3620_v12, %v3623_v43  ;;  %4791 = vmatpush1.bf16.msra.mxu1 %v5804_v31  ;;  %3238 = vrot.lane.b32.xlu1 %v3075_v23, %s5908_s11 }
 0x124   : > { %1861 = vst.msk [vmem:[#allocation3 + $0x20c] sm:$0xf] %vm1367_vm14, %v1792_v58  ;;  %v2798_v55 = vld [vmem:[#allocation2 + $0xa0] sm:$0xf]  ;;  %v2799_v46 = vld [vmem:[#allocation2 + $0xa4] sm:$0x1]  ;;  %4657 = vmatprep.mubr.bf16.mxu0 %v5783_v60  ;;  %2611 = vrot.lane.b32.xlu0 %v2532_v13, %s5908_s11 }
 0x125   : > { %1672 = vst.msk [vmem:[#allocation3 + $0x248] sm:$0xf] %vm275_vm0, %v1603_v14  ;;  %816 = vst.msk [vmem:[#allocation3 + $0xf0] sm:$0xf] %vm275_vm0, %v784_v61  ;;  %v2797_v7 = vld [vmem:[#allocation2 + $0x9c] sm:$0xf]  ;;  %4658 = vmatmul.mubr.bf16.gmra.mxu0 %v5518_v4 }
 0x126   : > { %v3086_v56 = vshll.u32 %v2798_v55, 16  ;;  %v3090_v16 = vshrl.u32 %v2798_v55, 16  ;;  %v3077_v59 = vshrl.u32 %v2797_v7, 16  ;;  %1846 = vst.msk [vmem:[#allocation3 + $0xe0] sm:$0xf] %vm1367_vm14, %v1762_v28  ;;  %v2540_v57 = vrot.slane %v2538_v47, 4  ;;  %v1798_v52 = vpop.permute.xlu1 %1797 }
 0x127   : > { %v7453_v40 = vld [vmem:[#allocation2 + $0x90] sm:$0xe]  ;;  %v3080_v29 = vshll.u32 %v2797_v7, 16  ;;  %v5807_v48 = vld [vmem:[%s8475_s1 + $0x100] ss:$8 sps:$4 sm:$0xff]   ;;  %v3677_v3 = vld [vmem:[#allocation3 + $0x21c] sm:$0xff] }
 0x128   : > { %v5809_v27 = vld [vmem:[%s8475_s1 + $0x104] ss:$8 sps:$4 sm:$0xff]   ;;  %v7462_v35 = vrot.slane %v3086_v56, 5  ;;  %v3092_v36 = vrot.slane %v3090_v16, 4  ;;  %v3096_v33 = vshll.u32 %v2799_v46, 16  ;;  %v3079_v53 = vrot.slane %v3077_v59, 4 }
 0x129   : > { %v1419_v24 = vld [vmem:[#allocation2 + $0x4c] sm:$0xf]  ;;  %1378 = vst.msk [vmem:[#allocation3 + $0xc8] sm:$0xf] %vm1367_vm14, %v1292_v41  ;;  %v3082_v11 = vrot.slane %v3080_v29, 5  ;;  %4792 = vmatprep.subr.bf16.mxu1 %v5809_v27  ;;  %v3060_v43 = vrot.slane %v3059_v39, 4  ;;  %v2542_v50 = vsel %vm6681_vm13, %v2540_v57, %v2541_v38  ;;  %v1328_v38 = vpop.permute.xlu0 %1327 }
 0x12a   : > { %v1420_v25 = vld [vmem:[#allocation2 + $0x50] sm:$0x1]  ;;  %v1543_v42 = vrot.slane %v1419_v24, 5  ;;  %v1418_v49 = vld [vmem:[#allocation2 + $0x48] sm:$0xe]  ;;  %v3093_v19 = vor.u32 %v3092_v36, %v7462_v35  ;;  %4793 = vmatpush1.bf16.msra.mxu1 %v5807_v48  ;;  %v5477_v1 = vrot.slane %v7453_v40, 9  ;;  %2617 = vrot.lane.b32.xlu1 %v2542_v50, %s5908_s11 }
 0x12b   : > { %v1546_v22 = vrot.slane %v1420_v25, 5  ;;  %v5456_v5 = vrot.slane %v1418_v49, 9  ;;  %v7476_v62 = vld [vmem:[#allocation2 + $0xa0] sm:$0xf]  ;;  %v7478_v54 = vld [vmem:[#allocation2 + $0xa4] sm:$0x1]  ;;  %v3083_v8 = vor.u32 %v3082_v11, %v3079_v53  ;;  %v3065_v55 = vsel %vm6099_vm8, %v3060_v43, %v7378_v21 }
 0x12c   : > { %1397 = vst.msk [vmem:[#allocation3 + $0x244] sm:$0xf] %vm1367_vm14, %v1330_v15  ;;  %v1545_v10 = vrot.slane %v1543_v42, 4  ;;  %v2545_v45 = vrot.slane %v7476_v62, 5  ;;  %v3674_v2 = vld [vmem:[#allocation3 + $0x208] sm:$0xff]  ;;  %v3098_v63 = vrot.slane %v3096_v33, 5  ;;  %3236 = vrot.lane.b32.xlu0 %v3065_v55, %s5908_s11  ;;  %v2539_v41 = vsel %vm6681_vm13, %v5477_v1, %v2538_v47 }
 0x12d   : > { %v5791_v17 = vld [vmem:[#allocation3 + $0x20c] ss:$20 sps:$4 sm:$0xff]   ;;  %v1544_v6 = vsel %vm6681_vm13, %v5456_v5, %v1543_v42  ;;  %1845 = vst.msk [vmem:[#allocation3 + $0xcc] sm:$0xf] %vm1367_vm14, %v1760_v20  ;;  %v5563_v31 = vcombine.low %v3674_v2, %v3677_v3  ;;  %v3094_v30 = vrot.slane %v3093_v19, 4  ;;  %v2548_v58 = vrot.slane %v7478_v54, 5  ;;  %v1298_v3 = vpop.permute.xlu1 %1297  ;;  %v1796_v49 = vpop.permute.xlu0 %1795 }
 0x12e   : > { %v1547_v44 = vsel %vm6681_vm13, %v1545_v10, %v1546_v22  ;;  %1655 = vst.msk [vmem:[#allocation3 + $0xf4] sm:$0xf] %vm275_vm0, %v1544_v6  ;;  %v5812_v12 = vld [vmem:[%s8475_s1 + $0x1f0] ss:$8 sps:$4 sm:$0xff]   ;;  %v5814_v60 = vld [vmem:[%s8475_s1 + $0x1f4] ss:$8 sps:$4 sm:$0xff]   ;;  %4747 = vmatprep.mubr.bf16.mxu1 %v5791_v17 }
 0x12f   : > { %v7500_v14 = vrot.slane %v3083_v8, 4  ;;  %1656 = vst.msk [vmem:[#allocation3 + $0x108] sm:$0xf] %vm275_vm0, %v1547_v44  ;;  %v2547_v61 = vrot.slane %v2545_v45, 4  ;;  %v803_v4 = vld [vmem:[#allocation2 + $0xb8] sm:$0xf]  ;;  %4748 = vmatmul.mubr.bf16.gmra.mxu1 %v5563_v31  ;;  %4794 = vmatprep.subr.bf16.mxu1 %v5814_v60  ;;  %v3099_v39 = vsel %vm6099_vm8, %v3094_v30, %v3098_v63 }
 0x130   : > { %v802_v51 = vld [vmem:[#allocation2 + $0xb4] sm:$0xf]  ;;  %1864 = vst.msk [vmem:[#allocation3 + $0x248] sm:$0xf] %vm1367_vm14, %v1798_v52  ;;  %v5815_v46 = vld [vmem:[%s8475_s1 + $0x210] ss:$8 sps:$4 sm:$0xff]   ;;  %4795 = vmatpush2.bf16.msra.mxu1 %v5812_v12  ;;  %3242 = vrot.lane.b32.xlu1 %v3099_v39, %s5908_s11 }
 0x131   : > { %835 = vst.msk [vmem:[#allocation3 + $0x26c] sm:$0xf] %vm275_vm0, %v803_v4  ;;  %834 = vst.msk [vmem:[#allocation3 + $0x258] sm:$0xf] %vm275_vm0, %v802_v51  ;;  %v5817_v7 = vld [vmem:[%s8475_s1 + $0x214] ss:$8 sps:$4 sm:$0xff]   ;;  %v2549_v54 = vsel %vm6681_vm13, %v2547_v61, %v2548_v58  ;;  %2615 = vrot.lane.b32.xlu0 %v2539_v41, %s5908_s11  ;;  %v1766_v2 = vpop.permute.xlu1 %1765  ;;  %v3089_v6 = vsel %vm6099_vm8, %v7500_v14, %v7462_v35  ;;  %v1296_v60 = vpop.permute.xlu0 %1295 }
 0x132   : > { %v2801_v28 = vld [vmem:[#allocation2 + $0xac] sm:$0xf]  ;;  %v2802_v21 = vld [vmem:[#allocation2 + $0xb0] sm:$0x1]  ;;  %v2800_v59 = vld [vmem:[#allocation2 + $0xa8] sm:$0xf]  ;;  %4983 = vmatprep.subr.bf16.mxu0 %v5817_v7 }
 0x133   : > { %v3110_v56 = vshll.u32 %v2801_v28, 16  ;;  %v3114_v16 = vshrl.u32 %v2801_v28, 16  ;;  %1396 = vst.msk [vmem:[#allocation3 + $0x230] sm:$0xf] %vm1367_vm14, %v1328_v38  ;;  %v3629_v18 = vld [vmem:[#allocation3 + $0xdc] sm:$0xff]  ;;  %v3120_v40 = vshll.u32 %v2802_v21, 16  ;;  %4984 = vmatpush1.bf16.msra.mxu0 %v5815_v46 }
 0x134   : > { %v7521_v57 = vld [vmem:[#allocation2 + $0x9c] sm:$0xe]  ;;  %v3101_v29 = vshrl.u32 %v2800_v59, 16  ;;  %v3104_v48 = vshll.u32 %v2800_v59, 16  ;;  %v5818_v27 = vld [vmem:[%s8475_s1 + $0x1e0] ss:$8 sps:$4 sm:$0xff]   ;;  %2621 = vrot.lane.b32.xlu1 %v2549_v54, %s5908_s11 }
 0x135   : > { %v7531_v36 = vrot.slane %v3110_v56, 5  ;;  %v3116_v33 = vrot.slane %v3114_v16, 4  ;;  %v5820_v53 = vld [vmem:[%s8475_s1 + $0x1e4] ss:$8 sps:$4 sm:$0xff]   ;;  %v1446_v24 = vld [vmem:[#allocation2 + $0xb8] sm:$0xf]  ;;  %3240 = vrot.lane.b32.xlu0 %v3089_v6, %s5908_s11  ;;  %v1334_v28 = vpop.permute.xlu1 %1333 }
 0x136   : > { %1381 = vst.msk [vmem:[#allocation3 + $0x104] sm:$0xf] %vm1367_vm14, %v1298_v3  ;;  %v7537_v23 = vrot.slane %v3120_v40, 5  ;;  %v3103_v11 = vrot.slane %v3101_v29, 4  ;;  %v3106_v25 = vrot.slane %v3104_v48, 5  ;;  %v1606_v42 = vrot.slane %v1446_v24, 5  ;;  %4796 = vmatprep.subr.bf16.mxu1 %v5820_v53  ;;  %v1764_v48 = vpop.permute.xlu0 %1763 }
 0x137   : > { %v1447_v26 = vld [vmem:[#allocation2 + $0xbc] sm:$0x1]  ;;  %v3626_v47 = vld [vmem:[#allocation3 + $0xc8] sm:$0xff]  ;;  %v3117_v15 = vor.u32 %v3116_v33, %v7531_v36  ;;  %v1445_v22 = vld [vmem:[#allocation2 + $0xb4] sm:$0xe]  ;;  %4797 = vmatpush2.bf16.msra.mxu1 %v5818_v27  ;;  %v5478_v17 = vrot.slane %v7521_v57, 9 }
 0x138   : > { %v5802_v13 = vld [vmem:[#allocation3 + $0xcc] ss:$20 sps:$4 sm:$0xff]   ;;  %v1609_v19 = vrot.slane %v1447_v26, 5  ;;  %1863 = vst.msk [vmem:[#allocation3 + $0x234] sm:$0xf] %vm1367_vm14, %v1796_v49  ;;  %v5523_v5 = vcombine.low %v3626_v47, %v3629_v18  ;;  %v1608_v43 = vrot.slane %v1606_v42, 4  ;;  %v3107_v1 = vor.u32 %v3106_v25, %v3103_v11 }
 0x139   : > { %v5465_v8 = vrot.slane %v1445_v22, 9  ;;  %v7544_v10 = vld [vmem:[#allocation2 + $0xac] sm:$0xf]  ;;  %v2404_v20 = vld [vmem:[#allocation2 + $0xb0] sm:$0x1]  ;;  %4667 = vmatprep.mubr.bf16.mxu0 %v5802_v13  ;;  %v3118_v50 = vrot.slane %v3117_v15, 4  ;;  %v2546_v18 = vsel %vm6681_vm13, %v5478_v17, %v2545_v45 }
 0x13a   : > { %v2552_v63 = vrot.slane %v7544_v10, 5  ;;  %4668 = vmatmul.mubr.bf16.gmra.mxu0 %v5523_v5  ;;  %1848 = vst.msk [vmem:[#allocation3 + $0x108] sm:$0xf] %vm1367_vm14, %v1766_v2  ;;  %v1610_v31 = vsel %vm6681_vm13, %v1608_v43, %v1609_v19  ;;  %v7558_v44 = vld [vmem:[#allocation2 + $0xa8] sm:$0xe]  ;;  %v3683_v35 = vld [vmem:[#allocation3 + $0x244] sm:$0xff]  ;;  %2619 = vrot.lane.b32.xlu0 %v2546_v18, %s5908_s11 }
 0x13b   : > { %v1607_v30 = vsel %vm6681_vm13, %v5465_v8, %v1606_v42  ;;  %v5823_v58 = vld [vmem:[%s8475_s1 + $0x1d0] ss:$8 sps:$4 sm:$0xff]   ;;  %v5825_v12 = vld [vmem:[%s8475_s1 + $0x1d4] ss:$8 sps:$4 sm:$0xff]   ;;  %1674 = vst.msk [vmem:[#allocation3 + $0x270] sm:$0xf] %vm275_vm0, %v1610_v31  ;;  %v3123_v51 = vsel %vm6099_vm8, %v3118_v50, %v7537_v23  ;;  %v1802_v42 = vpop.permute.xlu1 %1801 }
 0x13c   : > { %1673 = vst.msk [vmem:[#allocation3 + $0x25c] sm:$0xf] %vm275_vm0, %v1607_v30  ;;  %v2554_v52 = vrot.slane %v2552_v63, 4  ;;  %v2555_v14 = vrot.slane %v2404_v20, 5  ;;  %v787_v61 = vld [vmem:[#allocation2 + $0x58] sm:$0xf]  ;;  %4798 = vmatprep.subr.bf16.mxu1 %v5825_v12  ;;  %3246 = vrot.lane.b32.xlu1 %v3123_v51, %s5908_s11  ;;  %v1332_v20 = vpop.permute.xlu0 %1331 }
 0x13d   : > { %v786_v4 = vld [vmem:[#allocation2 + $0x54] sm:$0xf]  ;;  %1380 = vst.msk [vmem:[#allocation3 + $0xf0] sm:$0xf] %vm1367_vm14, %v1296_v60  ;;  %v2804_v55 = vld [vmem:[#allocation2 + $0xb8] sm:$0xf]  ;;  %4799 = vmatpush2.bf16.msra.mxu1 %v5823_v58 }
 0x13e   : > { %819 = vst.msk [vmem:[#allocation3 + $0x12c] sm:$0xf] %vm275_vm0, %v787_v61  ;;  %818 = vst.msk [vmem:[#allocation3 + $0x118] sm:$0xf] %vm275_vm0, %v786_v4  ;;  %v2805_v46 = vld [vmem:[#allocation2 + $0xbc] sm:$0x1]  ;;  %v2556_v62 = vsel %vm6681_vm13, %v2554_v52, %v2555_v14 }
 0x13f   : > { %v2803_v7 = vld [vmem:[#allocation2 + $0xb4] sm:$0xf]  ;;  %v3108_v38 = vrot.slane %v3107_v1, 4  ;;  %v3134_v21 = vshll.u32 %v2804_v55, 16  ;;  %v3138_v56 = vshrl.u32 %v2804_v55, 16  ;;  %v3144_v16 = vshll.u32 %v2805_v46, 16 }
 0x140   : > { %v5826_v59 = vld [vmem:[%s8475_s1 + $0x1c0] ss:$8 sps:$4 sm:$0xff]   ;;  %1399 = vst.msk [vmem:[#allocation3 + $0x26c] sm:$0xf] %vm1367_vm14, %v1334_v28  ;;  %v3125_v39 = vshrl.u32 %v2803_v7, 16  ;;  %v3128_v57 = vshll.u32 %v2803_v7, 16  ;;  %2625 = vrot.lane.b32.xlu1 %v2556_v62, %s5908_s11  ;;  %v1800_v28 = vpop.permute.xlu0 %1799 }
 0x141   : > { %v5828_v40 = vld [vmem:[%s8475_s1 + $0x1c4] ss:$8 sps:$4 sm:$0xff]   ;;  %v1422_v29 = vld [vmem:[#allocation2 + $0x58] sm:$0xf]  ;;  %v5479_v3 = vrot.slane %v7558_v44, 9  ;;  %v7593_v45 = vrot.slane %v3134_v21, 5  ;;  %v3113_v26 = vsel %vm6099_vm8, %v3108_v38, %v7531_v36 }
 0x142   : > { %v3680_v27 = vld [vmem:[#allocation3 + $0x230] sm:$0xff]  ;;  %v3140_v33 = vrot.slane %v3138_v56, 4  ;;  %1847 = vst.msk [vmem:[#allocation3 + $0xf4] sm:$0xf] %vm1367_vm14, %v1764_v48  ;;  %v3127_v24 = vrot.slane %v3125_v39, 4  ;;  %v3130_v23 = vrot.slane %v3128_v57, 5  ;;  %4800 = vmatprep.subr.bf16.mxu1 %v5828_v40  ;;  %3244 = vrot.lane.b32.xlu0 %v3113_v26, %s5908_s11 }
 0x143   : > { %v5810_v41 = vld [vmem:[#allocation3 + $0x234] ss:$20 sps:$4 sm:$0xff]   ;;  %v5568_v53 = vcombine.low %v3680_v27, %v3683_v35  ;;  %v1423_v11 = vld [vmem:[#allocation2 + $0x5c] sm:$0x1]  ;;  %v1550_v25 = vrot.slane %v1422_v29, 5  ;;  %v3146_v47 = vrot.slane %v3144_v16, 5  ;;  %4801 = vmatpush2.bf16.msra.mxu1 %v5826_v59  ;;  %v1302_v35 = vpop.permute.xlu1 %1301  ;;  %v2553_v51 = vsel %vm6681_vm13, %v5479_v3, %v2552_v63 }
 0x144   : > { %4757 = vmatprep.mubr.bf16.mxu1 %v5810_v41  ;;  %v3141_v49 = vor.u32 %v3140_v33, %v7593_v45  ;;  %v1553_v13 = vrot.slane %v1423_v11, 5  ;;  %v1421_v15 = vld [vmem:[#allocation2 + $0x54] sm:$0xe]  ;;  %v7601_v19 = vld [vmem:[#allocation2 + $0xb8] sm:$0xf]  ;;  %v3131_v22 = vor.u32 %v3130_v23, %v3127_v24  ;;  %v605_v12 = vrot.slane %v6641_v9, 4 }
 0x145   : > { %4758 = vmatmul.mubr.bf16.gmra.mxu1 %v5568_v53  ;;  %1866 = vst.msk [vmem:[#allocation3 + $0x270] sm:$0xf] %vm1367_vm14, %v1802_v42  ;;  %v1552_v5 = vrot.slane %v1550_v25, 4  ;;  %v5457_v54 = vrot.slane %v1421_v15, 9  ;;  %v2407_v43 = vld [vmem:[#allocation2 + $0xbc] sm:$0x1] }
 0x146   : > { %v2559_v8 = vrot.slane %v7601_v19, 5  ;;  %v3142_v36 = vrot.slane %v3141_v49, 4  ;;  %v2562_v2 = vrot.slane %v2407_v43, 5  ;;  %v7606_v17 = vld [vmem:[#allocation2 + $0xb4] sm:$0xe]  ;;  %v7612_v1 = vrot.slane %v3131_v22, 4  ;;  %2623 = vrot.lane.b32.xlu0 %v2553_v51, %s5908_s11 }
 0x147   : > { %v5831_v50 = vld [vmem:[%s8475_s1 + $0x1b0] ss:$8 sps:$4 sm:$0xff]   ;;  %1398 = vst.msk [vmem:[#allocation3 + $0x258] sm:$0xf] %vm1367_vm14, %v1332_v20  ;;  %v1554_v6 = vsel %vm6681_vm13, %v1552_v5, %v1553_v13  ;;  %v1551_v31 = vsel %vm6681_vm13, %v5457_v54, %v1550_v25  ;;  %v5833_v44 = vld [vmem:[%s8475_s1 + $0x1b4] ss:$8 sps:$4 sm:$0xff]   ;;  %v1770_v29 = vpop.permute.xlu1 %1769  ;;  %v1300_v25 = vpop.permute.xlu0 %1299 }
 0x148   : > { %v2561_v30 = vrot.slane %v2559_v8, 4  ;;  %v1868_v58 = vld [vmem:[#allocation2 + $0x10] sm:$0xf]  ;;  %v3635_v60 = vld [vmem:[#allocation3 + $0x104] sm:$0xff]  ;;  %v3147_v52 = vsel %vm6099_vm8, %v3142_v36, %v3146_v47  ;;  %1658 = vst.msk [vmem:[#allocation3 + $0x130] sm:$0xf] %vm275_vm0, %v1554_v6  ;;  %4802 = vmatprep.subr.bf16.mxu1 %v5833_v44  ;;  %v3137_v59 = vsel %vm6099_vm8, %v7612_v1, %v7593_v45 }
 0x149   : > { %1657 = vst.msk [vmem:[#allocation3 + $0x11c] sm:$0xf] %vm275_vm0, %v1551_v31  ;;  %v1869_v14 = vld [vmem:[#allocation2 + $0x14] sm:$0x1]  ;;  %v1925_v61 = vshll.u32 %v1868_v58, 16  ;;  %v1929_v4 = vshrl.u32 %v1868_v58, 16  ;;  %3250 = vrot.lane.b32.xlu1 %v3147_v52, %s5908_s11  ;;  %4803 = vmatpush2.bf16.msra.mxu1 %v5831_v50 }
 0x14a   : > { %1383 = vst.msk [vmem:[#allocation3 + $0x12c] sm:$0xf] %vm1367_vm14, %v1302_v35  ;;  %v5480_v9 = vrot.slane %v7606_v17, 9  ;;  %v1935_v55 = vshll.u32 %v1869_v14, 16  ;;  %v1867_v46 = vld [vmem:[#allocation2 + $0xc] sm:$0xf]  ;;  %v2563_v18 = vsel %vm6681_vm13, %v2561_v30, %v2562_v2  ;;  %3248 = vrot.lane.b32.xlu0 %v3137_v59, %s5908_s11 }
 0x14b   : > { %v5834_v7 = vld [vmem:[%s8475_s1 + $0x200] ss:$8 sps:$4 sm:$0xff]   ;;  %v7639_v10 = vrot.slane %v1925_v61, 5  ;;  %v1931_v56 = vrot.slane %v1929_v4, 4  ;;  %v1916_v63 = vshrl.u32 %v1867_v46, 16  ;;  %v1919_v39 = vshll.u32 %v1867_v46, 16  ;;  %v2574_v36 = vpop.permute.xlu1 %2573  ;;  %v1768_v30 = vpop.permute.xlu0 %1767 }
 0x14c   : > { %v3632_v38 = vld [vmem:[#allocation3 + $0xf0] sm:$0xff]  ;;  %1865 = vst.msk [vmem:[#allocation3 + $0x25c] sm:$0xf] %vm1367_vm14, %v1800_v28  ;;  %v1937_v27 = vrot.slane %v1935_v55, 5  ;;  %v2807_v3 = vld [vmem:[#allocation2 + $0xc4] sm:$0xf]  ;;  %v2560_v54 = vsel %vm6681_vm13, %v5480_v9, %v2559_v8 }
 0x14d   : > { %v5821_v21 = vld [vmem:[#allocation3 + $0xf4] ss:$20 sps:$4 sm:$0xff]   ;;  %v5528_v16 = vcombine.low %v3632_v38, %v3635_v60  ;;  %v769_v40 = vld [vmem:[#allocation2 + $0xc8] sm:$0x1]  ;;  %v1932_v48 = vor.u32 %v1931_v56, %v7639_v10  ;;  %v1918_v41 = vrot.slane %v1916_v63, 4  ;;  %v1921_v33 = vrot.slane %v1919_v39, 5  ;;  %2629 = vrot.lane.b32.xlu1 %v2563_v18, %s5908_s11 }
 0x14e   : > { %v5836_v57 = vld [vmem:[%s8475_s1 + $0x204] ss:$8 sps:$4 sm:$0xff]   ;;  %4677 = vmatprep.mubr.bf16.mxu0 %v5821_v21  ;;  %v770_v62 = vsel %vm6152_vm10, %v605_v12, %v769_v40  ;;  %v2806_v45 = vld [vmem:[#allocation2 + $0xc0] sm:$0xf]  ;;  %1850 = vst.msk [vmem:[#allocation3 + $0x130] sm:$0xf] %vm1367_vm14, %v1770_v29  ;;  %2627 = vrot.lane.b32.xlu0 %v2560_v54, %s5908_s11 }
 0x14f   : > { %4678 = vmatmul.mubr.bf16.gmra.mxu0 %v5528_v16  ;;  %4985 = vmatprep.subr.bf16.mxu0 %v5836_v57  ;;  %771 = vst [vmem:[#allocation2 + $0xc8] sm:$0x1] %v770_v62  ;;  %v3158_v53 = vshll.u32 %v2807_v3, 16  ;;  %v3162_v24 = vshrl.u32 %v2807_v3, 16  ;;  %v3149_v23 = vshrl.u32 %v2806_v45, 16  ;;  %v1933_v34 = vrot.slane %v1932_v48, 4  ;;  %v3199_v46 = vpop.permute.xlu1 %3198  ;;  %v2572_v16 = vpop.permute.xlu0 %2571 }
 0x150   : > { %v5837_v11 = vld [vmem:[%s8475_s1 + $0x1a0] ss:$8 sps:$4 sm:$0xff]   ;;  %4986 = vmatpush1.bf16.msra.mxu0 %v5834_v7  ;;  %v3152_v26 = vshll.u32 %v2806_v45, 16  ;;  %v5839_v42 = vld [vmem:[%s8475_s1 + $0x1a4] ss:$8 sps:$4 sm:$0xff]   ;;  %v1922_v47 = vor.u32 %v1921_v33, %v1918_v41  ;;  %vm4536_vm15 = vcmask 523264  }
 0x151   : > { %v2701_v49 = vld [vmem:[#allocation2 + $0x1c] sm:$0xf]  ;;  %1382 = vst.msk [vmem:[#allocation3 + $0x118] sm:$0xf] %vm1367_vm14, %v1300_v25  ;;  %v7664_v13 = vrot.slane %v3158_v53, 5  ;;  %v3164_v15 = vrot.slane %v3162_v24, 4  ;;  %v1938_v20 = vsel %vm6099_vm8, %v1933_v34, %v1937_v27  ;;  %4804 = vmatprep.subr.bf16.mxu1 %v5839_v42 }
 0x152   : > { %v3151_v22 = vrot.slane %v3149_v23, 4  ;;  %2733 = vst.msk [vmem:[#allocation3 + $0x20] sm:$0xf] %vm275_vm0, %v2701_v49  ;;  %v2700_v5 = vld [vmem:[#allocation2 + $0x18] sm:$0xf]  ;;  %v3689_v43 = vld [vmem:[#allocation3 + $0x26c] sm:$0xff]  ;;  %4805 = vmatpush2.bf16.msra.mxu1 %v5837_v11 }
 0x153   : > { %v3154_v2 = vrot.slane %v3152_v26, 5  ;;  %2732 = vst.msk [vmem:[#allocation3 + $0xc] sm:$0xf] %vm275_vm0, %v2700_v5  ;;  %v2409_v17 = vld [vmem:[#allocation2 + $0xc4] sm:$0xf]  ;;  %v1923_v1 = vrot.slane %v1922_v47, 4  ;;  %v3165_v6 = vor.u32 %v3164_v15, %v7664_v13  ;;  %v2578_v33 = vpop.permute.xlu1 %2577 }
 0x154   : > { %v2408_v50 = vld [vmem:[#allocation2 + $0xc0] sm:$0xe]  ;;  %2332 = vst.msk [vmem:[#allocation3 + $0x1c] sm:$0xf] %vm275_vm0, %v1938_v20  ;;  %v2566_v19 = vrot.slane %v2409_v17, 5  ;;  %v3686_v44 = vld [vmem:[#allocation3 + $0x258] sm:$0xff] }
 0x155   : > { %v5481_v31 = vrot.slane %v2408_v50, 9  ;;  %v5842_v8 = vld [vmem:[%s8475_s1 + $0x190] ss:$8 sps:$4 sm:$0xff]   ;;  %v5829_v58 = vld [vmem:[#allocation3 + $0x25c] ss:$20 sps:$4 sm:$0xff]   ;;  %v3155_v12 = vor.u32 %v3154_v2, %v3151_v22  ;;  %v5573_v35 = vcombine.low %v3686_v44, %v3689_v43  ;;  %v1928_v52 = vsel %vm6099_vm8, %v1923_v1, %v7639_v10 }
 0x156   : > { %2668 = vst.msk [vmem:[#allocation3 + $0x1c] sm:$0xf] %vm1367_vm14, %v2574_v36  ;;  %v5844_v60 = vld [vmem:[%s8475_s1 + $0x194] ss:$8 sps:$4 sm:$0xff]   ;;  %1849 = vst.msk [vmem:[#allocation3 + $0x11c] sm:$0xf] %vm1367_vm14, %v1768_v30  ;;  %4767 = vmatprep.mubr.bf16.mxu1 %v5829_v58 }
 0x157   : > { %v2568_v14 = vrot.slane %v2566_v19, 4  ;;  %v1871_v61 = vld [vmem:[#allocation2 + $0x1c] sm:$0xf]  ;;  %v1872_v4 = vld [vmem:[#allocation2 + $0x20] sm:$0x1]  ;;  %v3166_v9 = vrot.slane %v3165_v6, 4  ;;  %v2567_v28 = vsel %vm6681_vm13, %v5481_v31, %v2566_v19  ;;  %4768 = vmatmul.mubr.bf16.gmra.mxu1 %v5573_v35  ;;  %4806 = vmatprep.subr.bf16.mxu1 %v5844_v60 }
 0x158   : > { %2331 = vst.msk [vmem:[#allocation3 + $0x8] sm:$0xf] %vm275_vm0, %v1928_v52  ;;  %v2808_v51 = vld [vmem:[#allocation2 + $0xc8] sm:$0x1]  ;;  %v3156_v55 = vrot.slane %v3155_v12, 4  ;;  %v1949_v10 = vshll.u32 %v1871_v61, 16  ;;  %4807 = vmatpush2.bf16.msra.mxu1 %v5842_v8  ;;  %v3203_v8 = vpop.permute.xlu1 %3202 }
 0x159   : > { %v2410_v7 = vld [vmem:[#allocation2 + $0xc8] sm:$0x1]  ;;  %v3168_v38 = vshll.u32 %v2808_v51, 16  ;;  %3293 = vst.msk [vmem:[#allocation3 + $0x20] sm:$0xf] %vm1367_vm14, %v3199_v46  ;;  %v1953_v56 = vshrl.u32 %v1871_v61, 16 }
 0x15a   : > { %v2569_v21 = vrot.slane %v2410_v7, 5  ;;  %v1870_v63 = vld [vmem:[#allocation2 + $0x18] sm:$0xf]  ;;  %v3161_v59 = vsel %vm6099_vm8, %v3156_v55, %v7664_v13  ;;  %v1959_v18 = vshll.u32 %v1872_v4, 16  ;;  %v2810_v40 = vld [vmem:[#allocation2 + $0xd0] sm:$0xf]  ;;  %v3197_v13 = vpop.permute.xlu0 %3196 }
 0x15b   : > { %v1940_v39 = vshrl.u32 %v1870_v63, 16  ;;  %v1943_v57 = vshll.u32 %v1870_v63, 16  ;;  %2667 = vst.msk [vmem:[#allocation3 + $0x8] sm:$0xf] %vm1367_vm14, %v2572_v16  ;;  %v3170_v29 = vrot.slane %v3168_v38, 5  ;;  %v3641_v27 = vld [vmem:[#allocation3 + $0x12c] sm:$0xff]  ;;  %3252 = vrot.lane.b32.xlu0 %v3161_v59, %s5908_s11 }
 0x15c   : > { %v2570_v48 = vsel %vm6681_vm13, %v2568_v14, %v2569_v21  ;;  %v1951_v41 = vrot.slane %v1949_v10, 5  ;;  %v1955_v62 = vrot.slane %v1953_v56, 4  ;;  %v2811_v3 = vld [vmem:[#allocation2 + $0xd4] sm:$0x1]  ;;  %v1961_v45 = vrot.slane %v1959_v18, 5  ;;  %v2582_v16 = vpop.permute.xlu1 %2581 }
 0x15d   : > { %v1942_v53 = vrot.slane %v1940_v39, 4  ;;  %v1945_v24 = vrot.slane %v1943_v57, 5  ;;  %v3182_v23 = vshll.u32 %v2810_v40, 16  ;;  %v2809_v11 = vld [vmem:[#allocation2 + $0xcc] sm:$0xf]  ;;  %v3171_v25 = vsel %vm6099_vm8, %v3166_v9, %v3170_v29  ;;  %v3638_v15 = vld [vmem:[#allocation3 + $0x118] sm:$0xff] }
 0x15e   : > { %v1956_v34 = vor.u32 %v1955_v62, %v1951_v41  ;;  %v3186_v26 = vshrl.u32 %v2810_v40, 16  ;;  %v3192_v42 = vshll.u32 %v2811_v3, 16  ;;  %v5845_v49 = vld [vmem:[%s8475_s1 + $0x180] ss:$8 sps:$4 sm:$0xff]   ;;  %v5847_v47 = vld [vmem:[%s8475_s1 + $0x184] ss:$8 sps:$4 sm:$0xff]   ;;  %3254 = vrot.lane.b32.xlu1 %v3171_v25, %s5908_s11  ;;  %v5533_v2 = vcombine.low %v3638_v15, %v3641_v27  ;;  %v2576_v14 = vpop.permute.xlu0 %2575 }
 0x15f   : > { %v5840_v22 = vld [vmem:[#allocation3 + $0x11c] ss:$20 sps:$4 sm:$0xff]   ;;  %v1946_v5 = vor.u32 %v1945_v24, %v1942_v53  ;;  %v7709_v54 = vrot.slane %v3182_v23, 5  ;;  %v3173_v43 = vshrl.u32 %v2809_v11, 16  ;;  %v3176_v20 = vshll.u32 %v2809_v11, 16  ;;  %4808 = vmatprep.subr.bf16.mxu1 %v5847_v47  ;;  %2631 = vrot.lane.b32.xlu0 %v2567_v28, %s5908_s11 }
 0x160   : > { %3292 = vst.msk [vmem:[#allocation3 + $0xc] sm:$0xf] %vm1367_vm14, %v3197_v13  ;;  %v1957_v36 = vrot.slane %v1956_v34, 4  ;;  %v3188_v17 = vrot.slane %v3186_v26, 4  ;;  %v3194_v50 = vrot.slane %v3192_v42, 5  ;;  %4687 = vmatprep.mubr.bf16.mxu0 %v5840_v22  ;;  %4809 = vmatpush2.bf16.msra.mxu1 %v5845_v49  ;;  %v3207_v42 = vpop.permute.xlu1 %3206 }
 0x161   : > { %v2703_v1 = vld [vmem:[#allocation2 + $0x28] sm:$0xf]  ;;  %v1947_v6 = vrot.slane %v1946_v5, 4  ;;  %v3175_v19 = vrot.slane %v3173_v43, 4  ;;  %v3178_v31 = vrot.slane %v3176_v20, 5  ;;  %4688 = vmatmul.mubr.bf16.gmra.mxu0 %v5533_v2 }
 0x162   : > { %2735 = vst.msk [vmem:[#allocation3 + $0x48] sm:$0xf] %vm275_vm0, %v2703_v1  ;;  %v2702_v30 = vld [vmem:[#allocation2 + $0x24] sm:$0xf]  ;;  %v1962_v44 = vsel %vm6099_vm8, %v1957_v36, %v1961_v45  ;;  %v3189_v58 = vor.u32 %v3188_v17, %v7709_v54  ;;  %v1874_v12 = vld [vmem:[#allocation2 + $0x28] sm:$0xf]  ;;  %2633 = vrot.lane.b32.xlu1 %v2570_v48, %s5908_s11  ;;  %5003 = vmatprep.mubr.bf16.mxu0 %v5907_v0 }
 0x163   : > { %3295 = vst.msk [vmem:[#allocation3 + $0x48] sm:$0xf] %vm1367_vm14, %v3203_v8  ;;  %v1875_v60 = vld [vmem:[#allocation2 + $0x2c] sm:$0x1]  ;;  %v1873_v35 = vld [vmem:[#allocation2 + $0x24] sm:$0xf]  ;;  %v1952_v52 = vsel %vm6099_vm8, %v1947_v6, %v1951_v41  ;;  %v3179_v61 = vor.u32 %v3178_v31, %v3175_v19  ;;  %v3201_v41 = vpop.permute.xlu0 %3200 }
 0x164   : > { %2734 = vst.msk [vmem:[#allocation3 + $0x34] sm:$0xf] %vm275_vm0, %v2702_v30  ;;  %2334 = vst.msk [vmem:[#allocation3 + $0x44] sm:$0xf] %vm275_vm0, %v1962_v44  ;;  %v1973_v4 = vshll.u32 %v1874_v12, 16  ;;  %v1977_v51 = vshrl.u32 %v1874_v12, 16  ;;  %v2586_v44 = vpop.permute.xlu1 %2585 }
 0x165   : > { %v3324_v9 = vld [vmem:[#allocation2 + $0x18] sm:$0xe]  ;;  %v3325_v55 = vld [vmem:[#allocation2 + $0x1c] sm:$0xf]  ;;  %2670 = vst.msk [vmem:[#allocation3 + $0x44] sm:$0xf] %vm1367_vm14, %v2578_v33 }
 0x166   : > { %2333 = vst.msk [vmem:[#allocation3 + $0x30] sm:$0xf] %vm275_vm0, %v1952_v52  ;;  %v3190_v46 = vrot.slane %v3189_v58, 4  ;;  %v1983_v7 = vshll.u32 %v1875_v60, 16  ;;  %v1964_v28 = vshrl.u32 %v1873_v35, 16  ;;  %v1967_v38 = vshll.u32 %v1873_v35, 16 }
 0x167   : > { %v3326_v21 = vld [vmem:[#allocation2 + $0x20] sm:$0x1]  ;;  %2669 = vst.msk [vmem:[#allocation3 + $0x30] sm:$0xf] %vm1367_vm14, %v2576_v14  ;;  %v3180_v10 = vrot.slane %v3179_v61, 4  ;;  %v1975_v56 = vrot.slane %v1973_v4, 5  ;;  %v2580_v20 = vpop.permute.xlu0 %2579 }
 0x168   : > { %v1979_v63 = vrot.slane %v1977_v51, 4  ;;  %v5482_v59 = vrot.slane %v3324_v9, 9  ;;  %v2705_v18 = vld [vmem:[#allocation2 + $0x34] sm:$0xf]  ;;  %v3195_v39 = vsel %vm6099_vm8, %v3190_v46, %v3194_v50  ;;  %v1985_v57 = vrot.slane %v1983_v7, 5 }
 0x169   : > { %v1966_v40 = vrot.slane %v1964_v28, 4  ;;  %v1969_v29 = vrot.slane %v1967_v38, 5  ;;  %2737 = vst.msk [vmem:[#allocation3 + $0x70] sm:$0xf] %vm275_vm0, %v2705_v18  ;;  %v2704_v48 = vld [vmem:[#allocation2 + $0x30] sm:$0xf]  ;;  %3258 = vrot.lane.b32.xlu1 %v3195_v39, %s5908_s11  ;;  %v3185_v27 = vsel %vm6099_vm8, %v3180_v10, %v7709_v54 }
 0x16a   : > { %v5848_v62 = vld [vmem:[#allocation3 + $0x8] ss:$20 sps:$4 sm:$0xff]   ;;  %v5850_v3 = vld [vmem:[#allocation3 + $0xc] ss:$20 sps:$4 sm:$0xff]   ;;  %v1980_v45 = vor.u32 %v1979_v63, %v1975_v56  ;;  %v3422_v33 = vrot.slane %v3325_v55, 5  ;;  %3256 = vrot.lane.b32.xlu0 %v3185_v27, %s5908_s11  ;;  %v3425_v24 = vrot.slane %v3326_v21, 5 }
 0x16b   : > { %2736 = vst.msk [vmem:[#allocation3 + $0x5c] sm:$0xf] %vm275_vm0, %v2704_v48  ;;  %v1970_v53 = vor.u32 %v1969_v29, %v1966_v40  ;;  %v1877_v23 = vld [vmem:[#allocation2 + $0x34] sm:$0xf]  ;;  %v1878_v11 = vld [vmem:[#allocation2 + $0x38] sm:$0x1]  ;;  %4810 = vmatprep.mubr.bf16.mxu1 %v5850_v3  ;;  %v3205_v9 = vpop.permute.xlu0 %3204 }
 0x16c   : > { %3294 = vst.msk [vmem:[#allocation3 + $0x34] sm:$0xf] %vm1367_vm14, %v3201_v41  ;;  %v1981_v25 = vrot.slane %v1980_v45, 4  ;;  %v3423_v34 = vsel %vm6681_vm13, %v5482_v59, %v3422_v33  ;;  %v3424_v26 = vrot.slane %v3422_v33, 4  ;;  %v1997_v49 = vshll.u32 %v1877_v23, 16  ;;  %4811 = vmatmul.mubr.bf16.vlgmr.msra.gmra.mxu1 %v5848_v62  ;;  %v3606_v6 = vld [vmem:[#allocation3 + $0x44] sm:$0xff] }
 0x16d   : > { %v1876_v47 = vld [vmem:[#allocation2 + $0x30] sm:$0xf]  ;;  %v1971_v13 = vrot.slane %v1970_v53, 4  ;;  %3564 = vst.msk [vmem:[#allocation3 + $0x10] sm:$0xf] %vm275_vm0, %v3423_v34  ;;  %v2001_v15 = vshrl.u32 %v1877_v23, 16 }
 0x16e   : > { %3297 = vst.msk [vmem:[#allocation3 + $0x70] sm:$0xf] %vm1367_vm14, %v3207_v42  ;;  %v2007_v22 = vshll.u32 %v1878_v11, 16  ;;  %v1988_v5 = vshrl.u32 %v1876_v47, 16  ;;  %v3327_v54 = vld [vmem:[#allocation2 + $0x24] sm:$0xe]  ;;  %v1986_v43 = vsel %vm6099_vm8, %v1981_v25, %v1985_v57  ;;  %v3426_v36 = vsel %vm6681_vm13, %v3424_v26, %v3425_v24  ;;  %v3211_v57 = vpop.permute.xlu1 %3210 }
 0x16f   : > { %v1999_v2 = vrot.slane %v1997_v49, 5  ;;  %v1991_v17 = vshll.u32 %v1876_v47, 16  ;;  %v3328_v50 = vld [vmem:[#allocation2 + $0x28] sm:$0xf]  ;;  %2336 = vst.msk [vmem:[#allocation3 + $0x6c] sm:$0xf] %vm275_vm0, %v1986_v43  ;;  %v1976_v1 = vsel %vm6099_vm8, %v1971_v13, %v1975_v56  ;;  %v2584_v53 = vpop.permute.xlu0 %2583 }
 0x170   : > { %3565 = vst.msk [vmem:[#allocation3 + $0x24] sm:$0xf] %vm275_vm0, %v3426_v36  ;;  %v2003_v19 = vrot.slane %v2001_v15, 4  ;;  %v2009_v31 = vrot.slane %v2007_v22, 5  ;;  %v1990_v8 = vrot.slane %v1988_v5, 4  ;;  %v5483_v12 = vrot.slane %v3327_v54, 9 }
 0x171   : > { %v3329_v30 = vld [vmem:[#allocation2 + $0x2c] sm:$0x1]  ;;  %2672 = vst.msk [vmem:[#allocation3 + $0x6c] sm:$0xf] %vm1367_vm14, %v2582_v16  ;;  %v1993_v58 = vrot.slane %v1991_v17, 5  ;;  %v3429_v60 = vrot.slane %v3328_v50, 5 }
 0x172   : > { %2335 = vst.msk [vmem:[#allocation3 + $0x58] sm:$0xf] %vm275_vm0, %v1976_v1  ;;  %v3432_v35 = vrot.slane %v3329_v30, 5  ;;  %v2707_v52 = vld [vmem:[#allocation2 + $0x40] sm:$0xf]  ;;  %v2004_v14 = vor.u32 %v2003_v19, %v1999_v2  ;;  %v2590_v49 = vpop.permute.xlu1 %2589 }
 0x173   : > { %2671 = vst.msk [vmem:[#allocation3 + $0x58] sm:$0xf] %vm1367_vm14, %v2580_v20  ;;  %v2706_v61 = vld [vmem:[#allocation2 + $0x3c] sm:$0xf]  ;;  %v1880_v4 = vld [vmem:[#allocation2 + $0x40] sm:$0xf]  ;;  %v1994_v7 = vor.u32 %v1993_v58, %v1990_v8  ;;  %v3430_v28 = vsel %vm6681_vm13, %v5483_v12, %v3429_v60  ;;  %v3209_v36 = vpop.permute.xlu0 %3208 }
 0x174   : > { %2739 = vst.msk [vmem:[#allocation3 + $0x98] sm:$0xf] %vm275_vm0, %v2707_v52  ;;  %v1881_v51 = vld [vmem:[#allocation2 + $0x44] sm:$0x1]  ;;  %v3603_v55 = vld [vmem:[#allocation3 + $0x30] sm:$0xff]  ;;  %v3431_v38 = vrot.slane %v3429_v60, 4 }
 0x175   : > { %v5852_v46 = vld [vmem:[#allocation3 + $0x34] ss:$20 sps:$4 sm:$0xff]   ;;  %2738 = vst.msk [vmem:[#allocation3 + $0x84] sm:$0xf] %vm275_vm0, %v2706_v61  ;;  %v2021_v21 = vshll.u32 %v1880_v4, 16  ;;  %v2005_v10 = vrot.slane %v2004_v14, 4  ;;  %v5505_v56 = vcombine.low %v3603_v55, %v3606_v6 }
 0x176   : > { %3296 = vst.msk [vmem:[#allocation3 + $0x5c] sm:$0xf] %vm1367_vm14, %v3205_v9  ;;  %v2025_v63 = vshrl.u32 %v1880_v4, 16  ;;  %v2031_v16 = vshll.u32 %v1881_v51, 16  ;;  %v1879_v59 = vld [vmem:[#allocation2 + $0x3c] sm:$0xf]  ;;  %4820 = vmatprep.mubr.bf16.mxu1 %v5852_v46  ;;  %v3433_v39 = vsel %vm6681_vm13, %v3431_v38, %v3432_v35  ;;  %v3215_v60 = vpop.permute.xlu1 %3214 }
 0x177   : > { %3566 = vst.msk [vmem:[#allocation3 + $0x38] sm:$0xf] %vm275_vm0, %v3430_v28  ;;  %v1995_v18 = vrot.slane %v1994_v7, 4  ;;  %v7760_v40 = vrot.slane %v2021_v21, 5  ;;  %v2012_v29 = vshrl.u32 %v1879_v59, 16  ;;  %v2010_v48 = vsel %vm6099_vm8, %v2005_v10, %v2009_v31  ;;  %4821 = vmatmul.mubr.bf16.gmra.mxu1 %v5505_v56  ;;  %v2588_v55 = vpop.permute.xlu0 %2587 }
 0x178   : > { %3567 = vst.msk [vmem:[#allocation3 + $0x4c] sm:$0xf] %vm275_vm0, %v3433_v39  ;;  %v2027_v27 = vrot.slane %v2025_v63, 4  ;;  %v2033_v41 = vrot.slane %v2031_v16, 5  ;;  %v2015_v62 = vshll.u32 %v1879_v59, 16  ;;  %v3612_v11 = vld [vmem:[#allocation3 + $0x6c] sm:$0xff] }
 0x179   : > { %3299 = vst.msk [vmem:[#allocation3 + $0x98] sm:$0xf] %vm1367_vm14, %v3211_v57  ;;  %v3330_v3 = vld [vmem:[#allocation2 + $0x30] sm:$0xe]  ;;  %v5851_v45 = vld [vmem:[#allocation3 + $0x10] ss:$20 sps:$4 sm:$0xff]   ;;  %v2000_v33 = vsel %vm6099_vm8, %v1995_v18, %v1999_v2 }
 0x17a   : > { %2338 = vst.msk [vmem:[#allocation3 + $0x94] sm:$0xf] %vm275_vm0, %v2010_v48  ;;  %v2014_v24 = vrot.slane %v2012_v29, 4  ;;  %v5484_v23 = vrot.slane %v3330_v3, 9  ;;  %2337 = vst.msk [vmem:[#allocation3 + $0x80] sm:$0xf] %vm275_vm0, %v2000_v33  ;;  %v2028_v25 = vor.u32 %v2027_v27, %v7760_v40  ;;  %5650 = vmatmul.mubr.msk.bf16.vlgmr.msra.gmra.mxu0 %vm4536_vm15, %v5851_v45  ;;  %v2594_v39 = vpop.permute.xlu1 %2593 }
 0x17b   : > { %2674 = vst.msk [vmem:[#allocation3 + $0x94] sm:$0xf] %vm1367_vm14, %v2586_v44  ;;  %v2017_v34 = vrot.slane %v2015_v62, 5  ;;  %v3331_v26 = vld [vmem:[#allocation2 + $0x34] sm:$0xf]  ;;  %5013 = vmatprep.mubr.bf16.mxu0 %v5907_v0  ;;  %v3213_v33 = vpop.permute.xlu0 %3212 }
 0x17c   : > { %v3332_v42 = vld [vmem:[#allocation2 + $0x38] sm:$0x1]  ;;  %2673 = vst.msk [vmem:[#allocation3 + $0x80] sm:$0xf] %vm1367_vm14, %v2584_v53  ;;  %v3436_v47 = vrot.slane %v3331_v26, 5  ;;  %v2029_v5 = vrot.slane %v2028_v25, 4 }
 0x17d   : > { %v3439_v13 = vrot.slane %v3332_v42, 5  ;;  %v2709_v15 = vld [vmem:[#allocation2 + $0x4c] sm:$0xf]  ;;  %v2708_v22 = vld [vmem:[#allocation2 + $0x48] sm:$0xf]  ;;  %v2018_v54 = vor.u32 %v2017_v34, %v2014_v24  ;;  %v3609_v2 = vld [vmem:[#allocation3 + $0x58] sm:$0xff] }
 0x17e   : > { %2741 = vst.msk [vmem:[#allocation3 + $0xc0] sm:$0xf] %vm275_vm0, %v2709_v15  ;;  %2740 = vst.msk [vmem:[#allocation3 + $0xac] sm:$0xf] %vm275_vm0, %v2708_v22  ;;  %v1883_v43 = vld [vmem:[#allocation2 + $0x4c] sm:$0xf]  ;;  %v3437_v50 = vsel %vm6681_vm13, %v5484_v23, %v3436_v47  ;;  %v2034_v6 = vsel %vm6099_vm8, %v2029_v5, %v2033_v41  ;;  %v5510_v19 = vcombine.low %v3609_v2, %v3612_v11 }
 0x17f   : > { %v1884_v20 = vld [vmem:[#allocation2 + $0x50] sm:$0x1]  ;;  %v5855_v17 = vld [vmem:[#allocation3 + $0x5c] ss:$20 sps:$4 sm:$0xff]   ;;  %v3438_v1 = vrot.slane %v3436_v47, 4  ;;  %v2019_v31 = vrot.slane %v2018_v54, 4  ;;  %v2592_v2 = vpop.permute.xlu0 %2591 }
 0x180   : > { %3298 = vst.msk [vmem:[#allocation3 + $0x84] sm:$0xf] %vm1367_vm14, %v3209_v36  ;;  %v2045_v8 = vshll.u32 %v1883_v43, 16  ;;  %v1882_v30 = vld [vmem:[#allocation2 + $0x48] sm:$0xf]  ;;  %4830 = vmatprep.mubr.bf16.mxu1 %v5855_v17  ;;  %v2049_v35 = vshrl.u32 %v1883_v43, 16 }
 0x181   : > { %3568 = vst.msk [vmem:[#allocation3 + $0x60] sm:$0xf] %vm275_vm0, %v3437_v50  ;;  %v3333_v44 = vld [vmem:[#allocation2 + $0x3c] sm:$0xe]  ;;  %v5854_v58 = vld [vmem:[#allocation3 + $0x38] ss:$20 sps:$4 sm:$0xff]   ;;  %v3440_v12 = vsel %vm6681_vm13, %v3438_v1, %v3439_v13  ;;  %4831 = vmatmul.mubr.bf16.gmra.mxu1 %v5510_v19  ;;  %v2024_v14 = vsel %vm6099_vm8, %v2019_v31, %v7760_v40  ;;  %v3219_v13 = vpop.permute.xlu1 %3218 }
 0x182   : > { %2340 = vst.msk [vmem:[#allocation3 + $0xbc] sm:$0xf] %vm275_vm0, %v2034_v6  ;;  %v2055_v52 = vshll.u32 %v1884_v20, 16  ;;  %3569 = vst.msk [vmem:[#allocation3 + $0x74] sm:$0xf] %vm275_vm0, %v3440_v12  ;;  %v2047_v61 = vrot.slane %v2045_v8, 5  ;;  %5651 = vmatmul.mubr.msk.bf16.gmra.mxu0 %vm4536_vm15, %v5854_v58 }
 0x183   : > { %2676 = vst.msk [vmem:[#allocation3 + $0xbc] sm:$0xf] %vm1367_vm14, %v2590_v49  ;;  %3301 = vst.msk [vmem:[#allocation3 + $0xc0] sm:$0xf] %vm1367_vm14, %v3215_v60  ;;  %v2036_v4 = vshrl.u32 %v1882_v30, 16  ;;  %v2039_v51 = vshll.u32 %v1882_v30, 16  ;;  %5023 = vmatprep.mubr.bf16.mxu0 %v5907_v0 }
 0x184   : > { %v3334_v9 = vld [vmem:[#allocation2 + $0x40] sm:$0xf]  ;;  %2339 = vst.msk [vmem:[#allocation3 + $0xa8] sm:$0xf] %vm275_vm0, %v2024_v14  ;;  %v3618_v46 = vld [vmem:[#allocation3 + $0x94] sm:$0xff]  ;;  %v2051_v7 = vrot.slane %v2049_v35, 4 }
 0x185   : > { %v2057_v28 = vrot.slane %v2055_v52, 5  ;;  %v3335_v38 = vld [vmem:[#allocation2 + $0x44] sm:$0x1]  ;;  %v5485_v21 = vrot.slane %v3333_v44, 9  ;;  %2675 = vst.msk [vmem:[#allocation3 + $0xa8] sm:$0xf] %vm1367_vm14, %v2588_v55  ;;  %v2598_v60 = vpop.permute.xlu1 %2597 }
 0x186   : > { %v2038_v10 = vrot.slane %v2036_v4, 4  ;;  %v2041_v56 = vrot.slane %v2039_v51, 5  ;;  %v3443_v63 = vrot.slane %v3334_v9, 5  ;;  %v3446_v16 = vrot.slane %v3335_v38, 5  ;;  %v2711_v59 = vld [vmem:[#allocation2 + $0x58] sm:$0xf] }
 0x187   : > { %v2052_v18 = vor.u32 %v2051_v7, %v2047_v61  ;;  %2743 = vst.msk [vmem:[#allocation3 + $0xe8] sm:$0xf] %vm275_vm0, %v2711_v59  ;;  %v2710_v57 = vld [vmem:[#allocation2 + $0x54] sm:$0xf]  ;;  %v1886_v40 = vld [vmem:[#allocation2 + $0x58] sm:$0xf]  ;;  %v3217_v7 = vpop.permute.xlu0 %3216 }
 0x188   : > { %v1887_v29 = vld [vmem:[#allocation2 + $0x5c] sm:$0x1]  ;;  %v2042_v48 = vor.u32 %v2041_v56, %v2038_v10  ;;  %v3444_v27 = vsel %vm6681_vm13, %v5485_v21, %v3443_v63  ;;  %v3445_v41 = vrot.slane %v3443_v63, 4  ;;  %2742 = vst.msk [vmem:[#allocation3 + $0xd4] sm:$0xf] %vm275_vm0, %v2710_v57  ;;  %v2069_v62 = vshll.u32 %v1886_v40, 16 }
 0x189   : > { %v1885_v3 = vld [vmem:[#allocation2 + $0x54] sm:$0xf]  ;;  %v3336_v45 = vld [vmem:[#allocation2 + $0x48] sm:$0xe]  ;;  %v3615_v53 = vld [vmem:[#allocation3 + $0x80] sm:$0xff]  ;;  %v2053_v23 = vrot.slane %v2052_v18, 4 }
 0x18a   : > { %v5858_v24 = vld [vmem:[#allocation3 + $0x84] ss:$20 sps:$4 sm:$0xff]   ;;  %3570 = vst.msk [vmem:[#allocation3 + $0x88] sm:$0xf] %vm275_vm0, %v3444_v27  ;;  %v5515_v11 = vcombine.low %v3615_v53, %v3618_v46  ;;  %v2043_v25 = vrot.slane %v2042_v48, 4  ;;  %v3447_v34 = vsel %vm6681_vm13, %v3445_v41, %v3446_v16  ;;  %v7807_v15 = vrot.slane %v2069_v62, 5 }
 0x18b   : > { %3300 = vst.msk [vmem:[#allocation3 + $0xac] sm:$0xf] %vm1367_vm14, %v3213_v33  ;;  %v3337_v26 = vld [vmem:[#allocation2 + $0x4c] sm:$0xf]  ;;  %v3338_v42 = vld [vmem:[#allocation2 + $0x50] sm:$0x1]  ;;  %4840 = vmatprep.mubr.bf16.mxu1 %v5858_v24  ;;  %v2058_v47 = vsel %vm6099_vm8, %v2053_v23, %v2057_v28  ;;  %v2596_v24 = vpop.permute.xlu0 %2595 }
 0x18c   : > { %v5857_v49 = vld [vmem:[#allocation3 + $0x60] ss:$20 sps:$4 sm:$0xff]   ;;  %3571 = vst.msk [vmem:[#allocation3 + $0x9c] sm:$0xf] %vm275_vm0, %v3447_v34  ;;  %v2073_v22 = vshrl.u32 %v1886_v40, 16  ;;  %4841 = vmatmul.mubr.bf16.gmra.mxu1 %v5515_v11  ;;  %v2048_v5 = vsel %vm6099_vm8, %v2043_v25, %v2047_v61  ;;  %v2079_v54 = vshll.u32 %v1887_v29, 16  ;;  %v3223_v40 = vpop.permute.xlu1 %3222 }
 0x18d   : > { %2342 = vst.msk [vmem:[#allocation3 + $0xe4] sm:$0xf] %vm275_vm0, %v2058_v47  ;;  %v2060_v43 = vshrl.u32 %v1885_v3, 16  ;;  %v2063_v20 = vshll.u32 %v1885_v3, 16  ;;  %v2713_v36 = vld [vmem:[#allocation2 + $0x64] sm:$0xf]  ;;  %5652 = vmatmul.mubr.msk.bf16.gmra.mxu0 %vm4536_vm15, %v5857_v49 }
 0x18e   : > { %3303 = vst.msk [vmem:[#allocation3 + $0xe8] sm:$0xf] %vm1367_vm14, %v3219_v13  ;;  %2678 = vst.msk [vmem:[#allocation3 + $0xe4] sm:$0xf] %vm1367_vm14, %v2594_v39  ;;  %v2075_v17 = vrot.slane %v2073_v22, 4  ;;  %v5486_v50 = vrot.slane %v3336_v45, 9  ;;  %5033 = vmatprep.mubr.bf16.mxu0 %v5907_v0 }
 0x18f   : > { %2341 = vst.msk [vmem:[#allocation3 + $0xd0] sm:$0xf] %vm275_vm0, %v2048_v5  ;;  %v3450_v1 = vrot.slane %v3337_v26, 5  ;;  %v3453_v6 = vrot.slane %v3338_v42, 5  ;;  %2745 = vst.msk [vmem:[#allocation3 + $0x110] sm:$0xf] %vm275_vm0, %v2713_v36 }
 0x190   : > { %v2712_v19 = vld [vmem:[#allocation2 + $0x60] sm:$0xf]  ;;  %2677 = vst.msk [vmem:[#allocation3 + $0xd0] sm:$0xf] %vm1367_vm14, %v2592_v2  ;;  %v3624_v31 = vld [vmem:[#allocation3 + $0xbc] sm:$0xff]  ;;  %v2081_v8 = vrot.slane %v2079_v54, 5  ;;  %v2076_v12 = vor.u32 %v2075_v17, %v7807_v15 }
 0x191   : > { %v2062_v30 = vrot.slane %v2060_v43, 4  ;;  %v2065_v44 = vrot.slane %v2063_v20, 5  ;;  %2744 = vst.msk [vmem:[#allocation3 + $0xfc] sm:$0xf] %vm275_vm0, %v2712_v19  ;;  %v1889_v58 = vld [vmem:[#allocation2 + $0x64] sm:$0xf]  ;;  %v3451_v35 = vsel %vm6681_vm13, %v5486_v50, %v3450_v1 }
 0x192   : > { %v3452_v52 = vrot.slane %v3450_v1, 4  ;;  %v1890_v14 = vld [vmem:[#allocation2 + $0x68] sm:$0x1]  ;;  %v2093_v61 = vshll.u32 %v1889_v58, 16  ;;  %v1888_v4 = vld [vmem:[#allocation2 + $0x60] sm:$0xf] }
 0x193   : > { %v2066_v51 = vor.u32 %v2065_v44, %v2062_v30  ;;  %3572 = vst.msk [vmem:[#allocation3 + $0xb0] sm:$0xf] %vm275_vm0, %v3451_v35  ;;  %v2097_v9 = vshrl.u32 %v1889_v58, 16  ;;  %v2103_v55 = vshll.u32 %v1890_v14, 16  ;;  %v2084_v46 = vshrl.u32 %v1888_v4, 16  ;;  %v3621_v28 = vld [vmem:[#allocation3 + $0xa8] sm:$0xff] }
 0x194   : > { %v5861_v38 = vld [vmem:[#allocation3 + $0xac] ss:$20 sps:$4 sm:$0xff]   ;;  %v2077_v21 = vrot.slane %v2076_v12, 4  ;;  %v3454_v10 = vsel %vm6681_vm13, %v3452_v52, %v3453_v6  ;;  %v7826_v56 = vrot.slane %v2093_v61, 5  ;;  %v2087_v63 = vshll.u32 %v1888_v4, 16  ;;  %v3221_v6 = vpop.permute.xlu0 %3220 }
 0x195   : > { %3302 = vst.msk [vmem:[#allocation3 + $0xd4] sm:$0xf] %vm1367_vm14, %v3217_v7  ;;  %v5520_v16 = vcombine.low %v3621_v28, %v3624_v31  ;;  %v2067_v59 = vrot.slane %v2066_v51, 4  ;;  %v2099_v18 = vrot.slane %v2097_v9, 4  ;;  %v5860_v39 = vld [vmem:[#allocation3 + $0x88] ss:$20 sps:$4 sm:$0xff]   ;;  %4850 = vmatprep.mubr.bf16.mxu1 %v5861_v38 }
 0x196   : > { %3573 = vst.msk [vmem:[#allocation3 + $0xc4] sm:$0xf] %vm275_vm0, %v3454_v10  ;;  %v2082_v57 = vsel %vm6099_vm8, %v2077_v21, %v2081_v8  ;;  %v2086_v29 = vrot.slane %v2084_v46, 4  ;;  %v2089_v48 = vrot.slane %v2087_v63, 5  ;;  %v3339_v27 = vld [vmem:[#allocation2 + $0x54] sm:$0xe]  ;;  %5653 = vmatmul.mubr.msk.bf16.gmra.mxu0 %vm4536_vm15, %v5860_v39 }
 0x197   : > { %2344 = vst.msk [vmem:[#allocation3 + $0x10c] sm:$0xf] %vm275_vm0, %v2082_v57  ;;  %4851 = vmatmul.mubr.bf16.gmra.mxu1 %v5520_v16  ;;  %v2072_v41 = vsel %vm6099_vm8, %v2067_v59, %v7807_v15  ;;  %v2100_v62 = vor.u32 %v2099_v18, %v7826_v56  ;;  %v2105_v3 = vrot.slane %v2103_v55, 5  ;;  %v3340_v45 = vld [vmem:[#allocation2 + $0x58] sm:$0xf]  ;;  %v5487_v53 = vrot.slane %v3339_v27, 9  ;;  %v2602_v15 = vpop.permute.xlu1 %2601  ;;  %5043 = vmatprep.mubr.bf16.mxu0 %v5907_v0 }
 0x198   : > { %3305 = vst.msk [vmem:[#allocation3 + $0x110] sm:$0xf] %vm1367_vm14, %v3223_v40  ;;  %v3341_v33 = vld [vmem:[#allocation2 + $0x5c] sm:$0x1]  ;;  %2680 = vst.msk [vmem:[#allocation3 + $0x10c] sm:$0xf] %vm1367_vm14, %v2598_v60  ;;  %v2090_v23 = vor.u32 %v2089_v48, %v2086_v29  ;;  %v2600_v38 = vpop.permute.xlu0 %2599 }
 0x199   : > { %2343 = vst.msk [vmem:[#allocation3 + $0xf8] sm:$0xf] %vm275_vm0, %v2072_v41  ;;  %v3457_v11 = vrot.slane %v3340_v45, 5  ;;  %v3460_v25 = vrot.slane %v3341_v33, 5  ;;  %v2715_v34 = vld [vmem:[#allocation2 + $0x70] sm:$0xf] }
 0x19a   : > { %v2714_v26 = vld [vmem:[#allocation2 + $0x6c] sm:$0xf]  ;;  %2679 = vst.msk [vmem:[#allocation3 + $0xf8] sm:$0xf] %vm1367_vm14, %v2596_v24  ;;  %v2101_v42 = vrot.slane %v2100_v62, 4  ;;  %v3630_v13 = vld [vmem:[#allocation3 + $0xe4] sm:$0xff] }
 0x19b   : > { %2747 = vst.msk [vmem:[#allocation3 + $0x138] sm:$0xf] %vm275_vm0, %v2715_v34  ;;  %2746 = vst.msk [vmem:[#allocation3 + $0x124] sm:$0xf] %vm275_vm0, %v2714_v26  ;;  %v1892_v49 = vld [vmem:[#allocation2 + $0x70] sm:$0xf]  ;;  %v3458_v5 = vsel %vm6681_vm13, %v5487_v53, %v3457_v11  ;;  %v3227_v52 = vpop.permute.xlu1 %3226 }
 0x19c   : > { %v1893_v47 = vld [vmem:[#allocation2 + $0x74] sm:$0x1]  ;;  %v2091_v22 = vrot.slane %v2090_v23, 4  ;;  %v3459_v54 = vrot.slane %v3457_v11, 4  ;;  %v2117_v43 = vshll.u32 %v1892_v49, 16  ;;  %v2106_v20 = vsel %vm6099_vm8, %v2101_v42, %v2105_v3  ;;  %v3627_v19 = vld [vmem:[#allocation3 + $0xd0] sm:$0xff]  ;;  %v3225_v23 = vpop.permute.xlu0 %3224 }
 0x19d   : > { %3574 = vst.msk [vmem:[#allocation3 + $0xd8] sm:$0xf] %vm275_vm0, %v3458_v5  ;;  %v2121_v36 = vshrl.u32 %v1892_v49, 16  ;;  %v2127_v2 = vshll.u32 %v1893_v47, 16  ;;  %v1891_v17 = vld [vmem:[#allocation2 + $0x6c] sm:$0xf]  ;;  %v5525_v58 = vcombine.low %v3627_v19, %v3630_v13 }
 0x19e   : > { %v3342_v50 = vld [vmem:[#allocation2 + $0x60] sm:$0xe]  ;;  %v5863_v1 = vld [vmem:[#allocation3 + $0xb0] ss:$20 sps:$4 sm:$0xff]   ;;  %2346 = vst.msk [vmem:[#allocation3 + $0x134] sm:$0xf] %vm275_vm0, %v2106_v20  ;;  %v2096_v31 = vsel %vm6099_vm8, %v2091_v22, %v7826_v56  ;;  %v3461_v8 = vsel %vm6681_vm13, %v3459_v54, %v3460_v25 }
 0x19f   : > { %v7856_v30 = vrot.slane %v2117_v43, 5  ;;  %3304 = vst.msk [vmem:[#allocation3 + $0xfc] sm:$0xf] %vm1367_vm14, %v3221_v6  ;;  %v5864_v44 = vld [vmem:[#allocation3 + $0xd4] ss:$20 sps:$4 sm:$0xff]   ;;  %v2123_v12 = vrot.slane %v2121_v36, 4  ;;  %5654 = vmatmul.mubr.msk.bf16.gmra.mxu0 %vm4536_vm15, %v5863_v1  ;;  %v2606_v40 = vpop.permute.xlu1 %2605 }
 0x1a0   : > { %2682 = vst.msk [vmem:[#allocation3 + $0x134] sm:$0xf] %vm1367_vm14, %v2602_v15  ;;  %v2129_v60 = vrot.slane %v2127_v2, 5  ;;  %v2108_v35 = vshrl.u32 %v1891_v17, 16  ;;  %v2111_v14 = vshll.u32 %v1891_v17, 16  ;;  %v5488_v51 = vrot.slane %v3342_v50, 9  ;;  %4860 = vmatprep.mubr.bf16.mxu1 %v5864_v44  ;;  %5053 = vmatprep.mubr.bf16.mxu0 %v5907_v0  ;;  %v2604_v1 = vpop.permute.xlu0 %2603 }
 0x1a1   : > { %2345 = vst.msk [vmem:[#allocation3 + $0x120] sm:$0xf] %vm275_vm0, %v2096_v31  ;;  %3575 = vst.msk [vmem:[#allocation3 + $0xec] sm:$0xf] %vm275_vm0, %v3461_v8  ;;  %v3343_v61 = vld [vmem:[#allocation2 + $0x64] sm:$0xf]  ;;  %v2124_v9 = vor.u32 %v2123_v12, %v7856_v30  ;;  %4861 = vmatmul.mubr.bf16.gmra.mxu1 %v5525_v58 }
 0x1a2   : > { %v3344_v4 = vld [vmem:[#allocation2 + $0x68] sm:$0x1]  ;;  %3307 = vst.msk [vmem:[#allocation3 + $0x138] sm:$0xf] %vm1367_vm14, %v3227_v52  ;;  %v2110_v55 = vrot.slane %v2108_v35, 4  ;;  %v3464_v46 = vrot.slane %v3343_v61, 5 }
 0x1a3   : > { %v3467_v7 = vrot.slane %v3344_v4, 5  ;;  %v2717_v28 = vld [vmem:[#allocation2 + $0x7c] sm:$0xf]  ;;  %v2113_v21 = vrot.slane %v2111_v14, 5  ;;  %v2716_v10 = vld [vmem:[#allocation2 + $0x78] sm:$0xf]  ;;  %v3231_v15 = vpop.permute.xlu1 %3230 }
 0x1a4   : > { %2749 = vst.msk [vmem:[#allocation3 + $0x160] sm:$0xf] %vm275_vm0, %v2717_v28  ;;  %v1895_v56 = vld [vmem:[#allocation2 + $0x7c] sm:$0xf]  ;;  %v3636_v63 = vld [vmem:[#allocation3 + $0x10c] sm:$0xff]  ;;  %v2125_v16 = vrot.slane %v2124_v9, 4  ;;  %v3465_v59 = vsel %vm6681_vm13, %v5488_v51, %v3464_v46 }
 0x1a5   : > { %2681 = vst.msk [vmem:[#allocation3 + $0x120] sm:$0xf] %vm1367_vm14, %v2600_v38  ;;  %v3466_v18 = vrot.slane %v3464_v46, 4  ;;  %v1896_v39 = vld [vmem:[#allocation2 + $0x80] sm:$0x1]  ;;  %v2141_v57 = vshll.u32 %v1895_v56, 16  ;;  %v2114_v29 = vor.u32 %v2113_v21, %v2110_v55  ;;  %v3229_v38 = vpop.permute.xlu0 %3228 }
 0x1a6   : > { %2748 = vst.msk [vmem:[#allocation3 + $0x14c] sm:$0xf] %vm275_vm0, %v2716_v10  ;;  %3576 = vst.msk [vmem:[#allocation3 + $0x100] sm:$0xf] %vm275_vm0, %v3465_v59  ;;  %v2145_v48 = vshrl.u32 %v1895_v56, 16  ;;  %v2151_v27 = vshll.u32 %v1896_v39, 16  ;;  %v2130_v62 = vsel %vm6099_vm8, %v2125_v16, %v2129_v60 }
 0x1a7   : > { %v1894_v41 = vld [vmem:[#allocation2 + $0x78] sm:$0xf]  ;;  %v3468_v3 = vsel %vm6681_vm13, %v3466_v18, %v3467_v7  ;;  %v7876_v45 = vrot.slane %v2141_v57, 5  ;;  %v3345_v53 = vld [vmem:[#allocation2 + $0x6c] sm:$0xe]  ;;  %v3633_v11 = vld [vmem:[#allocation3 + $0xf8] sm:$0xff]  ;;  %v2610_v52 = vpop.permute.xlu1 %2609 }
 0x1a8   : > { %v2132_v33 = vshrl.u32 %v1894_v41, 16  ;;  %v3346_v24 = vld [vmem:[#allocation2 + $0x70] sm:$0xf]  ;;  %2348 = vst.msk [vmem:[#allocation3 + $0x15c] sm:$0xf] %vm275_vm0, %v2130_v62  ;;  %v2115_v25 = vrot.slane %v2114_v29, 4  ;;  %v5530_v42 = vcombine.low %v3633_v11, %v3636_v63 }
 0x1a9   : > { %3577 = vst.msk [vmem:[#allocation3 + $0x114] sm:$0xf] %vm275_vm0, %v3468_v3  ;;  %v5866_v34 = vld [vmem:[#allocation3 + $0xd8] ss:$20 sps:$4 sm:$0xff]   ;;  %v5867_v26 = vld [vmem:[#allocation3 + $0xfc] ss:$20 sps:$4 sm:$0xff]  }
 0x1aa   : > { %3306 = vst.msk [vmem:[#allocation3 + $0x124] sm:$0xf] %vm1367_vm14, %v3225_v23  ;;  %2684 = vst.msk [vmem:[#allocation3 + $0x15c] sm:$0xf] %vm1367_vm14, %v2606_v40  ;;  %v2147_v49 = vrot.slane %v2145_v48, 4  ;;  %v2134_v47 = vrot.slane %v2132_v33, 4  ;;  %v2120_v13 = vsel %vm6099_vm8, %v2115_v25, %v7856_v30  ;;  %4870 = vmatprep.mubr.bf16.mxu1 %v5867_v26  ;;  %5655 = vmatmul.mubr.msk.bf16.gmra.mxu0 %vm4536_vm15, %v5866_v34  ;;  %v2608_v25 = vpop.permute.xlu0 %2607 }
 0x1ab   : > { %v2135_v22 = vshll.u32 %v1894_v41, 16  ;;  %v3347_v5 = vld [vmem:[#allocation2 + $0x74] sm:$0x1]  ;;  %v5489_v54 = vrot.slane %v3345_v53, 9  ;;  %v3471_v43 = vrot.slane %v3346_v24, 5  ;;  %v2153_v36 = vrot.slane %v2151_v27, 5  ;;  %4871 = vmatmul.mubr.bf16.gmra.mxu1 %v5530_v42  ;;  %5063 = vmatprep.mubr.bf16.mxu0 %v5907_v0  ;;  %v3235_v27 = vpop.permute.xlu1 %3234 }
 0x1ac   : > { %2347 = vst.msk [vmem:[#allocation3 + $0x148] sm:$0xf] %vm275_vm0, %v2120_v13  ;;  %v2148_v20 = vor.u32 %v2147_v49, %v7876_v45  ;;  %v3474_v2 = vrot.slane %v3347_v5, 5  ;;  %v2719_v17 = vld [vmem:[#allocation2 + $0x88] sm:$0xf]  ;;  %v3642_v35 = vld [vmem:[#allocation3 + $0x134] sm:$0xff] }
 0x1ad   : > { %3309 = vst.msk [vmem:[#allocation3 + $0x160] sm:$0xf] %vm1367_vm14, %v3231_v15  ;;  %v2718_v50 = vld [vmem:[#allocation2 + $0x84] sm:$0xf]  ;;  %v2137_v6 = vrot.slane %v2135_v22, 5  ;;  %v3472_v19 = vsel %vm6681_vm13, %v5489_v54, %v3471_v43  ;;  %v3473_v31 = vrot.slane %v3471_v43, 4 }
 0x1ae   : > { %2751 = vst.msk [vmem:[#allocation3 + $0x188] sm:$0xf] %vm275_vm0, %v2719_v17  ;;  %2750 = vst.msk [vmem:[#allocation3 + $0x174] sm:$0xf] %vm275_vm0, %v2718_v50  ;;  %v1898_v8 = vld [vmem:[#allocation2 + $0x88] sm:$0xf] }
 0x1af   : > { %v1899_v30 = vld [vmem:[#allocation2 + $0x8c] sm:$0x1]  ;;  %2683 = vst.msk [vmem:[#allocation3 + $0x148] sm:$0xf] %vm1367_vm14, %v2604_v1  ;;  %v2149_v44 = vrot.slane %v2148_v20, 4  ;;  %v2165_v58 = vshll.u32 %v1898_v8, 16  ;;  %v2138_v14 = vor.u32 %v2137_v6, %v2134_v47  ;;  %v3475_v61 = vsel %vm6681_vm13, %v3473_v31, %v3474_v2  ;;  %v2614_v5 = vpop.permute.xlu1 %2613 }
 0x1b0   : > { %3578 = vst.msk [vmem:[#allocation3 + $0x128] sm:$0xf] %vm275_vm0, %v3472_v19  ;;  %v2169_v12 = vshrl.u32 %v1898_v8, 16  ;;  %v2175_v60 = vshll.u32 %v1899_v30, 16  ;;  %v1897_v4 = vld [vmem:[#allocation2 + $0x84] sm:$0xf]  ;;  %v3233_v19 = vpop.permute.xlu0 %3232 }
 0x1b1   : > { %v3348_v51 = vld [vmem:[#allocation2 + $0x78] sm:$0xe]  ;;  %v2154_v9 = vsel %vm6099_vm8, %v2149_v44, %v2153_v36  ;;  %3579 = vst.msk [vmem:[#allocation3 + $0x13c] sm:$0xf] %vm275_vm0, %v3475_v61  ;;  %v7901_v55 = vrot.slane %v2165_v58, 5  ;;  %v2139_v56 = vrot.slane %v2138_v14, 4 }
 0x1b2   : > { %v2171_v46 = vrot.slane %v2169_v12, 4  ;;  %v3349_v7 = vld [vmem:[#allocation2 + $0x7c] sm:$0xf]  ;;  %v5869_v28 = vld [vmem:[#allocation3 + $0x100] ss:$20 sps:$4 sm:$0xff]   ;;  %v2177_v63 = vrot.slane %v2175_v60, 5 }
 0x1b3   : > { %v3639_v21 = vld [vmem:[#allocation3 + $0x120] sm:$0xff]  ;;  %2350 = vst.msk [vmem:[#allocation3 + $0x184] sm:$0xf] %vm275_vm0, %v2154_v9  ;;  %v2156_v16 = vshrl.u32 %v1897_v4, 16  ;;  %v2159_v39 = vshll.u32 %v1897_v4, 16  ;;  %v5490_v40 = vrot.slane %v3348_v51, 9  ;;  %v2144_v48 = vsel %vm6099_vm8, %v2139_v56, %v7876_v45  ;;  %5656 = vmatmul.mubr.msk.bf16.gmra.mxu0 %vm4536_vm15, %v5869_v28  ;;  %v3239_v4 = vpop.permute.xlu1 %3238 }
 0x1b4   : > { %v5870_v10 = vld [vmem:[#allocation3 + $0x124] ss:$20 sps:$4 sm:$0xff]   ;;  %3308 = vst.msk [vmem:[#allocation3 + $0x14c] sm:$0xf] %vm1367_vm14, %v3229_v38  ;;  %2686 = vst.msk [vmem:[#allocation3 + $0x184] sm:$0xf] %vm1367_vm14, %v2610_v52  ;;  %v5535_v59 = vcombine.low %v3639_v21, %v3642_v35  ;;  %v2172_v18 = vor.u32 %v2171_v46, %v7901_v55  ;;  %5073 = vmatprep.mubr.bf16.mxu0 %v5907_v0 }
 0x1b5   : > { %v3350_v57 = vld [vmem:[#allocation2 + $0x80] sm:$0x1]  ;;  %v2721_v29 = vld [vmem:[#allocation2 + $0x94] sm:$0xf]  ;;  %4880 = vmatprep.mubr.bf16.mxu1 %v5870_v10  ;;  %v2158_v41 = vrot.slane %v2156_v16, 4  ;;  %v3478_v62 = vrot.slane %v3349_v7, 5  ;;  %v2612_v10 = vpop.permute.xlu0 %2611 }
 0x1b6   : > { %v3481_v3 = vrot.slane %v3350_v57, 5  ;;  %2753 = vst.msk [vmem:[#allocation3 + $0x1b0] sm:$0xf] %vm275_vm0, %v2721_v29  ;;  %v2720_v33 = vld [vmem:[#allocation2 + $0x90] sm:$0xf]  ;;  %v2173_v53 = vrot.slane %v2172_v18, 4  ;;  %4881 = vmatmul.mubr.bf16.gmra.mxu1 %v5535_v59 }
 0x1b7   : > { %2349 = vst.msk [vmem:[#allocation3 + $0x170] sm:$0xf] %vm275_vm0, %v2144_v48  ;;  %v2161_v24 = vrot.slane %v2159_v39, 5  ;;  %2752 = vst.msk [vmem:[#allocation3 + $0x19c] sm:$0xf] %vm275_vm0, %v2720_v33  ;;  %v3479_v45 = vsel %vm6681_vm13, %v5490_v40, %v3478_v62  ;;  %v3480_v34 = vrot.slane %v3478_v62, 4  ;;  %v2618_v48 = vpop.permute.xlu1 %2617 }
 0x1b8   : > { %3311 = vst.msk [vmem:[#allocation3 + $0x188] sm:$0xf] %vm1367_vm14, %v3235_v27  ;;  %v1901_v23 = vld [vmem:[#allocation2 + $0x94] sm:$0xf]  ;;  %v1902_v11 = vld [vmem:[#allocation2 + $0x98] sm:$0x1]  ;;  %v2178_v49 = vsel %vm6099_vm8, %v2173_v53, %v2177_v63 }
 0x1b9   : > { %v2189_v26 = vshll.u32 %v1901_v23, 16  ;;  %v2193_v42 = vshrl.u32 %v1901_v23, 16  ;;  %2685 = vst.msk [vmem:[#allocation3 + $0x170] sm:$0xf] %vm1367_vm14, %v2608_v25  ;;  %v2162_v47 = vor.u32 %v2161_v24, %v2158_v41  ;;  %v2199_v13 = vshll.u32 %v1902_v11, 16  ;;  %v3648_v22 = vld [vmem:[#allocation3 + $0x15c] sm:$0xff]  ;;  %v3237_v25 = vpop.permute.xlu0 %3236 }
 0x1ba   : > { %3580 = vst.msk [vmem:[#allocation3 + $0x150] sm:$0xf] %vm275_vm0, %v3479_v45  ;;  %v1900_v15 = vld [vmem:[#allocation2 + $0x90] sm:$0xf]  ;;  %2352 = vst.msk [vmem:[#allocation3 + $0x1ac] sm:$0xf] %vm275_vm0, %v2178_v49  ;;  %v3482_v54 = vsel %vm6681_vm13, %v3480_v34, %v3481_v3 }
 0x1bb   : > { %v7924_v43 = vrot.slane %v2189_v26, 5  ;;  %v2195_v20 = vrot.slane %v2193_v42, 4  ;;  %2688 = vst.msk [vmem:[#allocation3 + $0x1ac] sm:$0xf] %vm1367_vm14, %v2614_v5  ;;  %v2163_v36 = vrot.slane %v2162_v47, 4  ;;  %v2201_v2 = vrot.slane %v2199_v13, 5 }
 0x1bc   : > { %3581 = vst.msk [vmem:[#allocation3 + $0x164] sm:$0xf] %vm275_vm0, %v3482_v54  ;;  %v2180_v17 = vshrl.u32 %v1900_v15, 16  ;;  %v2183_v50 = vshll.u32 %v1900_v15, 16  ;;  %v3351_v1 = vld [vmem:[#allocation2 + $0x84] sm:$0xe] }
 0x1bd   : > { %v5872_v6 = vld [vmem:[#allocation3 + $0x128] ss:$20 sps:$4 sm:$0xff]   ;;  %v5873_v8 = vld [vmem:[#allocation3 + $0x14c] ss:$20 sps:$4 sm:$0xff]   ;;  %v2196_v30 = vor.u32 %v2195_v20, %v7924_v43  ;;  %v3352_v44 = vld [vmem:[#allocation2 + $0x88] sm:$0xf]  ;;  %v2168_v60 = vsel %vm6099_vm8, %v2163_v36, %v7901_v55  ;;  %v3243_v20 = vpop.permute.xlu1 %3242 }
 0x1be   : > { %v3645_v31 = vld [vmem:[#allocation3 + $0x148] sm:$0xff]  ;;  %v5491_v58 = vrot.slane %v3351_v1, 9  ;;  %3310 = vst.msk [vmem:[#allocation3 + $0x174] sm:$0xf] %vm1367_vm14, %v3233_v19  ;;  %v2182_v35 = vrot.slane %v2180_v17, 4  ;;  %v2185_v52 = vrot.slane %v2183_v50, 5  ;;  %4890 = vmatprep.mubr.bf16.mxu1 %v5873_v8  ;;  %5657 = vmatmul.mubr.msk.bf16.gmra.mxu0 %vm4536_vm15, %v5872_v6  ;;  %v2616_v8 = vpop.permute.xlu0 %2615 }
 0x1bf   : > { %v5540_v12 = vcombine.low %v3645_v31, %v3648_v22  ;;  %v3353_v14 = vld [vmem:[#allocation2 + $0x8c] sm:$0x1]  ;;  %v2723_v61 = vld [vmem:[#allocation2 + $0xa0] sm:$0xf]  ;;  %2351 = vst.msk [vmem:[#allocation3 + $0x198] sm:$0xf] %vm275_vm0, %v2168_v60  ;;  %5083 = vmatprep.mubr.bf16.mxu0 %v5907_v0 }
 0x1c0   : > { %v2197_v51 = vrot.slane %v2196_v30, 4  ;;  %v3485_v9 = vrot.slane %v3352_v44, 5  ;;  %v3488_v46 = vrot.slane %v3353_v14, 5  ;;  %2755 = vst.msk [vmem:[#allocation3 + $0x1d8] sm:$0xf] %vm275_vm0, %v2723_v61  ;;  %v2186_v28 = vor.u32 %v2185_v52, %v2182_v35  ;;  %v3654_v56 = vld [vmem:[#allocation3 + $0x184] sm:$0xff] }
 0x1c1   : > { %v2722_v7 = vld [vmem:[#allocation2 + $0x9c] sm:$0xf]  ;;  %3313 = vst.msk [vmem:[#allocation3 + $0x1b0] sm:$0xf] %vm1367_vm14, %v3239_v4  ;;  %v1904_v55 = vld [vmem:[#allocation2 + $0xa0] sm:$0xf]  ;;  %4891 = vmatmul.mubr.bf16.gmra.mxu1 %v5540_v12 }
 0x1c2   : > { %2754 = vst.msk [vmem:[#allocation3 + $0x1c4] sm:$0xf] %vm275_vm0, %v2722_v7  ;;  %v1905_v38 = vld [vmem:[#allocation2 + $0xa4] sm:$0x1]  ;;  %v1903_v21 = vld [vmem:[#allocation2 + $0x9c] sm:$0xf]  ;;  %v2202_v63 = vsel %vm6099_vm8, %v2197_v51, %v2201_v2  ;;  %v3486_v16 = vsel %vm6681_vm13, %v5491_v58, %v3485_v9 }
 0x1c3   : > { %v3487_v59 = vrot.slane %v3485_v9, 4  ;;  %2687 = vst.msk [vmem:[#allocation3 + $0x198] sm:$0xf] %vm1367_vm14, %v2612_v10  ;;  %v2187_v18 = vrot.slane %v2186_v28, 4  ;;  %v2213_v39 = vshll.u32 %v1904_v55, 16  ;;  %v2217_v57 = vshrl.u32 %v1904_v55, 16  ;;  %v2622_v9 = vpop.permute.xlu1 %2621 }
 0x1c4   : > { %2354 = vst.msk [vmem:[#allocation3 + $0x1d4] sm:$0xf] %vm275_vm0, %v2202_v63  ;;  %3582 = vst.msk [vmem:[#allocation3 + $0x178] sm:$0xf] %vm275_vm0, %v3486_v16  ;;  %v2223_v40 = vshll.u32 %v1905_v38, 16  ;;  %v2204_v41 = vshrl.u32 %v1903_v21, 16  ;;  %v3241_v16 = vpop.permute.xlu0 %3240 }
 0x1c5   : > { %v3354_v29 = vld [vmem:[#allocation2 + $0x90] sm:$0xe]  ;;  %v3489_v27 = vsel %vm6681_vm13, %v3487_v59, %v3488_v46  ;;  %v2207_v62 = vshll.u32 %v1903_v21, 16  ;;  %v3355_v3 = vld [vmem:[#allocation2 + $0x94] sm:$0xf]  ;;  %v2192_v33 = vsel %vm6099_vm8, %v2187_v18, %v7924_v43  ;;  %v2215_v53 = vrot.slane %v2213_v39, 5 }
 0x1c6   : > { %2690 = vst.msk [vmem:[#allocation3 + $0x1d4] sm:$0xf] %vm1367_vm14, %v2618_v48  ;;  %v2219_v24 = vrot.slane %v2217_v57, 4  ;;  %v2225_v23 = vrot.slane %v2223_v40, 5  ;;  %v3356_v11 = vld [vmem:[#allocation2 + $0x98] sm:$0x1] }
 0x1c7   : > { %3583 = vst.msk [vmem:[#allocation3 + $0x18c] sm:$0xf] %vm275_vm0, %v3489_v27  ;;  %v3651_v45 = vld [vmem:[#allocation3 + $0x170] sm:$0xff]  ;;  %2353 = vst.msk [vmem:[#allocation3 + $0x1c0] sm:$0xf] %vm275_vm0, %v2192_v33  ;;  %v2206_v26 = vrot.slane %v2204_v41, 4  ;;  %v3247_v33 = vpop.permute.xlu1 %3246 }
 0x1c8   : > { %v5876_v34 = vld [vmem:[#allocation3 + $0x174] ss:$20 sps:$4 sm:$0xff]   ;;  %v2209_v42 = vrot.slane %v2207_v62, 5  ;;  %v5492_v49 = vrot.slane %v3354_v29, 9  ;;  %3312 = vst.msk [vmem:[#allocation3 + $0x19c] sm:$0xf] %vm1367_vm14, %v3237_v25  ;;  %v5545_v47 = vcombine.low %v3651_v45, %v3654_v56  ;;  %v2220_v13 = vor.u32 %v2219_v24, %v2215_v53  ;;  %v7984_v25 = vpop.f32.mrf.mxu1 }
 0x1c9   : > { %v3492_v15 = vrot.slane %v3355_v3, 5  ;;  %v3495_v22 = vrot.slane %v3356_v11, 5  ;;  %v2725_v5 = vld [vmem:[#allocation2 + $0xac] sm:$0xf]  ;;  %v2724_v54 = vld [vmem:[#allocation2 + $0xa8] sm:$0xf]  ;;  %4900 = vmatprep.mubr.bf16.mxu1 %v5876_v34 }
 0x1ca   : > { %v5875_v43 = vld [vmem:[#allocation3 + $0x150] ss:$20 sps:$4 sm:$0xff]   ;;  %v2210_v36 = vor.u32 %v2209_v42, %v2206_v26  ;;  %2757 = vst.msk [vmem:[#allocation3 + $0x200] sm:$0xf] %vm275_vm0, %v2725_v5  ;;  %2756 = vst.msk [vmem:[#allocation3 + $0x1ec] sm:$0xf] %vm275_vm0, %v2724_v54  ;;  %4901 = vmatmul.mubr.bf16.gmra.mxu1 %v5545_v47  ;;  %v7995_v54 = vpop.f32.mrf.mxu1 }
 0x1cb   : > { %v1907_v2 = vld [vmem:[#allocation2 + $0xac] sm:$0xf]  ;;  %v1908_v17 = vld [vmem:[#allocation2 + $0xb0] sm:$0x1]  ;;  %3315 = vst.msk [vmem:[#allocation3 + $0x1d8] sm:$0xf] %vm1367_vm14, %v3243_v20  ;;  %v3493_v1 = vsel %vm6681_vm13, %v5492_v49, %v3492_v15  ;;  %5658 = vmatmul.mubr.msk.bf16.gmra.mxu0 %vm4536_vm15, %v5875_v43  ;;  %v2620_v49 = vpop.permute.xlu0 %2619 }
 0x1cc   : > { %v2221_v50 = vrot.slane %v2220_v13, 4  ;;  %v3494_v6 = vrot.slane %v3492_v15, 4  ;;  %v2237_v19 = vshll.u32 %v1907_v2, 16  ;;  %v1906_v31 = vld [vmem:[#allocation2 + $0xa8] sm:$0xf]  ;;  %v2211_v30 = vrot.slane %v2210_v36, 4  ;;  %5093 = vmatprep.mubr.bf16.mxu0 %v5907_v0 }
 0x1cd   : > { %3584 = vst.msk [vmem:[#allocation3 + $0x1a0] sm:$0xf] %vm275_vm0, %v3493_v1  ;;  %v2241_v44 = vshrl.u32 %v1907_v2, 16  ;;  %v2247_v58 = vshll.u32 %v1908_v17, 16  ;;  %v2228_v12 = vshrl.u32 %v1906_v31, 16  ;;  %v2231_v14 = vshll.u32 %v1906_v31, 16  ;;  %v2626_v17 = vpop.permute.xlu1 %2625 }
 0x1ce   : > { %2689 = vst.msk [vmem:[#allocation3 + $0x1c0] sm:$0xf] %vm1367_vm14, %v2616_v8  ;;  %v2226_v60 = vsel %vm6099_vm8, %v2221_v50, %v2225_v23  ;;  %v3496_v35 = vsel %vm6681_vm13, %v3494_v6, %v3495_v22  ;;  %v7967_v52 = vrot.slane %v2237_v19, 5  ;;  %v3357_v61 = vld [vmem:[#allocation2 + $0x9c] sm:$0xe]  ;;  %v3660_v51 = vld [vmem:[#allocation3 + $0x1ac] sm:$0xff]  ;;  %v2216_v46 = vsel %vm6099_vm8, %v2211_v30, %v2215_v53  ;;  %v8005_v8 = vpop.f32.mrf.mxu1 }
 0x1cf   : > { %v3358_v4 = vld [vmem:[#allocation2 + $0xa0] sm:$0xf]  ;;  %2356 = vst.msk [vmem:[#allocation3 + $0x1fc] sm:$0xf] %vm275_vm0, %v2226_v60  ;;  %3585 = vst.msk [vmem:[#allocation3 + $0x1b4] sm:$0xf] %vm275_vm0, %v3496_v35  ;;  %v3245_v35 = vpop.permute.xlu0 %3244 }
 0x1d0   : > { %v2243_v7 = vrot.slane %v2241_v44, 4  ;;  %v2249_v28 = vrot.slane %v2247_v58, 5  ;;  %2692 = vst.msk [vmem:[#allocation3 + $0x1fc] sm:$0xf] %vm1367_vm14, %v2622_v9  ;;  %v2230_v55 = vrot.slane %v2228_v12, 4  ;;  %v2233_v38 = vrot.slane %v2231_v14, 5 }
 0x1d1   : > { %2355 = vst.msk [vmem:[#allocation3 + $0x1e8] sm:$0xf] %vm275_vm0, %v2216_v46  ;;  %v3359_v21 = vld [vmem:[#allocation2 + $0xa4] sm:$0x1]  ;;  %v5493_v10 = vrot.slane %v3357_v61, 9  ;;  %v3499_v56 = vrot.slane %v3358_v4, 5 }
 0x1d2   : > { %v5878_v63 = vld [vmem:[#allocation3 + $0x178] ss:$20 sps:$4 sm:$0xff]   ;;  %v5879_v18 = vld [vmem:[#allocation3 + $0x19c] ss:$20 sps:$4 sm:$0xff]   ;;  %v2244_v39 = vor.u32 %v2243_v7, %v7967_v52  ;;  %v3502_v57 = vrot.slane %v3359_v21, 5  ;;  %v2234_v48 = vor.u32 %v2233_v38, %v2230_v55 }
 0x1d3   : > { %v3657_v59 = vld [vmem:[#allocation3 + $0x198] sm:$0xff]  ;;  %v2727_v40 = vld [vmem:[#allocation2 + $0xb8] sm:$0xf]  ;;  %3314 = vst.msk [vmem:[#allocation3 + $0x1c4] sm:$0xf] %vm1367_vm14, %v3241_v16  ;;  %v3500_v27 = vsel %vm6681_vm13, %v5493_v10, %v3499_v56  ;;  %v3501_v41 = vrot.slane %v3499_v56, 4  ;;  %4910 = vmatprep.mubr.bf16.mxu1 %v5879_v18  ;;  %5659 = vmatmul.mubr.msk.bf16.gmra.mxu0 %vm4536_vm15, %v5878_v63  ;;  %v8016_v63 = vpop.f32.mrf.mxu1 }
 0x1d4   : > { %v5550_v29 = vcombine.low %v3657_v59, %v3660_v51  ;;  %2759 = vst.msk [vmem:[#allocation3 + $0x228] sm:$0xf] %vm275_vm0, %v2727_v40  ;;  %v2726_v62 = vld [vmem:[#allocation2 + $0xb4] sm:$0xf]  ;;  %v1910_v3 = vld [vmem:[#allocation2 + $0xb8] sm:$0xf]  ;;  %5103 = vmatprep.mubr.bf16.mxu0 %v5907_v0 }
 0x1d5   : > { %v2245_v53 = vrot.slane %v2244_v39, 4  ;;  %3586 = vst.msk [vmem:[#allocation3 + $0x1c8] sm:$0xf] %vm275_vm0, %v3500_v27  ;;  %2758 = vst.msk [vmem:[#allocation3 + $0x214] sm:$0xf] %vm275_vm0, %v2726_v62  ;;  %v2261_v23 = vshll.u32 %v1910_v3, 16  ;;  %v3503_v34 = vsel %vm6681_vm13, %v3501_v41, %v3502_v57  ;;  %v8022_v39 = vpop.f32.mrf.mxu0  ;;  %v2624_v57 = vpop.permute.xlu0 %2623 }
 0x1d6   : > { %v1911_v24 = vld [vmem:[#allocation2 + $0xbc] sm:$0x1]  ;;  %v2265_v11 = vshrl.u32 %v1910_v3, 16  ;;  %3317 = vst.msk [vmem:[#allocation3 + $0x200] sm:$0xf] %vm1367_vm14, %v3247_v33  ;;  %v2235_v45 = vrot.slane %v2234_v48, 4  ;;  %4911 = vmatmul.mubr.bf16.gmra.mxu1 %v5550_v29 }
 0x1d7   : > { %v2271_v26 = vshll.u32 %v1911_v24, 16  ;;  %v1909_v42 = vld [vmem:[#allocation2 + $0xb4] sm:$0xf]  ;;  %v2250_v47 = vsel %vm6099_vm8, %v2245_v53, %v2249_v28  ;;  %3587 = vst.msk [vmem:[#allocation3 + $0x1dc] sm:$0xf] %vm275_vm0, %v3503_v34  ;;  %v7992_v13 = vrot.slane %v2261_v23, 5  ;;  %v3251_v28 = vpop.permute.xlu1 %3250 }
 0x1d8   : > { %v2267_v15 = vrot.slane %v2265_v11, 4  ;;  %v3360_v22 = vld [vmem:[#allocation2 + $0xa8] sm:$0xe]  ;;  %v3361_v5 = vld [vmem:[#allocation2 + $0xac] sm:$0xf]  ;;  %v2240_v20 = vsel %vm6099_vm8, %v2235_v45, %v7967_v52  ;;  %v2252_v2 = vshrl.u32 %v1909_v42, 16 }
 0x1d9   : > { %2691 = vst.msk [vmem:[#allocation3 + $0x1e8] sm:$0xf] %vm1367_vm14, %v2620_v49  ;;  %v3666_v43 = vld [vmem:[#allocation3 + $0x1d4] sm:$0xff]  ;;  %v2273_v36 = vrot.slane %v2271_v26, 5  ;;  %v2255_v1 = vshll.u32 %v1909_v42, 16  ;;  %v5494_v19 = vrot.slane %v3360_v22, 9  ;;  %v8033_v42 = vpop.f32.mrf.mxu1 }
 0x1da   : > { %2358 = vst.msk [vmem:[#allocation3 + $0x224] sm:$0xf] %vm275_vm0, %v2250_v47  ;;  %2357 = vst.msk [vmem:[#allocation3 + $0x210] sm:$0xf] %vm275_vm0, %v2240_v20  ;;  %v2268_v50 = vor.u32 %v2267_v15, %v7992_v13  ;;  %v3362_v6 = vld [vmem:[#allocation2 + $0xb0] sm:$0x1] }
 0x1db   : > { %v2729_v31 = vld [vmem:[#allocation2 + $0xc4] sm:$0xf]  ;;  %2694 = vst.msk [vmem:[#allocation3 + $0x224] sm:$0xf] %vm1367_vm14, %v2626_v17  ;;  %v2254_v30 = vrot.slane %v2252_v2, 4  ;;  %v3506_v44 = vrot.slane %v3361_v5, 5  ;;  %v2630_v24 = vpop.permute.xlu1 %2629  ;;  %v8040_v5 = vpop.f32.mrf.mxu0 }
 0x1dc   : > { %v3509_v58 = vrot.slane %v3362_v6, 5  ;;  %2761 = vst.msk [vmem:[#allocation3 + $0x250] sm:$0xf] %vm275_vm0, %v2729_v31  ;;  %v2728_v12 = vld [vmem:[#allocation2 + $0xc0] sm:$0xf]  ;;  %v3663_v52 = vld [vmem:[#allocation3 + $0x1c0] sm:$0xff] }
 0x1dd   : > { %v5881_v60 = vld [vmem:[#allocation3 + $0x1a0] ss:$20 sps:$4 sm:$0xff]   ;;  %v5882_v14 = vld [vmem:[#allocation3 + $0x1c4] ss:$20 sps:$4 sm:$0xff]   ;;  %v2269_v61 = vrot.slane %v2268_v50, 4  ;;  %v2257_v4 = vrot.slane %v2255_v1, 5  ;;  %v5555_v51 = vcombine.low %v3663_v52, %v3666_v43  ;;  %v3507_v9 = vsel %vm6681_vm13, %v5494_v19, %v3506_v44  ;;  %v3249_v43 = vpop.permute.xlu0 %3248 }
 0x1de   : > { %2760 = vst.msk [vmem:[#allocation3 + $0x23c] sm:$0xf] %vm275_vm0, %v2728_v12  ;;  %v3508_v46 = vrot.slane %v3506_v44, 4  ;;  %v1913_v7 = vld [vmem:[#allocation2 + $0xc4] sm:$0xf]  ;;  %4920 = vmatprep.mubr.bf16.mxu1 %v5882_v14  ;;  %v3672_v41 = vld [vmem:[#allocation3 + $0x1fc] sm:$0xff]  ;;  %5660 = vmatmul.mubr.msk.bf16.gmra.mxu0 %vm4536_vm15, %v5881_v60  ;;  %v8046_v60 = vpop.f32.mrf.mxu1 }
 0x1df   : > { %3316 = vst.msk [vmem:[#allocation3 + $0x1ec] sm:$0xf] %vm1367_vm14, %v3245_v35  ;;  %v2274_v55 = vsel %vm6099_vm8, %v2269_v61, %v2273_v36  ;;  %v2258_v38 = vor.u32 %v2257_v4, %v2254_v30  ;;  %v1914_v21 = vld [vmem:[#allocation2 + $0xc8] sm:$0x1]  ;;  %v2285_v10 = vshll.u32 %v1913_v7, 16  ;;  %v2289_v59 = vshrl.u32 %v1913_v7, 16  ;;  %4921 = vmatmul.mubr.bf16.gmra.mxu1 %v5555_v51  ;;  %5113 = vmatprep.mubr.bf16.mxu0 %v5907_v0  ;;  %v8050_v61 = vpop.f32.mrf.mxu0 }
 0x1e0   : > { %3588 = vst.msk [vmem:[#allocation3 + $0x1f0] sm:$0xf] %vm275_vm0, %v3507_v9  ;;  %v1912_v56 = vld [vmem:[#allocation2 + $0xc0] sm:$0xf]  ;;  %2360 = vst.msk [vmem:[#allocation3 + $0x24c] sm:$0xf] %vm275_vm0, %v2274_v55  ;;  %v3510_v16 = vsel %vm6681_vm13, %v3508_v46, %v3509_v58 }
 0x1e1   : > { %3319 = vst.msk [vmem:[#allocation3 + $0x228] sm:$0xf] %vm1367_vm14, %v3251_v28  ;;  %v2295_v18 = vshll.u32 %v1914_v21, 16  ;;  %v2259_v40 = vrot.slane %v2258_v38, 4  ;;  %v8025_v29 = vrot.slane %v2285_v10, 5  ;;  %v2291_v62 = vrot.slane %v2289_v59, 4  ;;  %v2628_v4 = vpop.permute.xlu0 %2627  ;;  %v8065_v59 = vpop.f32.mrf.mxu1 }
 0x1e2   : > { %3589 = vst.msk [vmem:[#allocation3 + $0x204] sm:$0xf] %vm275_vm0, %v3510_v16  ;;  %v3363_v48 = vld [vmem:[#allocation2 + $0xb4] sm:$0xe]  ;;  %v3364_v27 = vld [vmem:[#allocation2 + $0xb8] sm:$0xf] }
 0x1e3   : > { %2693 = vst.msk [vmem:[#allocation3 + $0x210] sm:$0xf] %vm1367_vm14, %v2624_v57  ;;  %v2276_v3 = vshrl.u32 %v1912_v56, 16  ;;  %v2279_v33 = vshll.u32 %v1912_v56, 16  ;;  %v3365_v53 = vld [vmem:[#allocation2 + $0xbc] sm:$0x1]  ;;  %v2264_v23 = vsel %vm6099_vm8, %v2259_v40, %v7992_v13  ;;  %v2292_v49 = vor.u32 %v2291_v62, %v8025_v29  ;;  %v8072_v40 = vpop.f32.mrf.mxu0 }
 0x1e4   : > { %v2297_v11 = vrot.slane %v2295_v18, 5  ;;  %v5495_v45 = vrot.slane %v3363_v48, 9  ;;  %v2731_v34 = vld [vmem:[#allocation2 + $0xd0] sm:$0xf]  ;;  %v2730_v26 = vld [vmem:[#allocation2 + $0xcc] sm:$0xf] }
 0x1e5   : > { %2696 = vst.msk [vmem:[#allocation3 + $0x24c] sm:$0xf] %vm1367_vm14, %v2630_v24  ;;  %v2278_v47 = vrot.slane %v2276_v3, 4  ;;  %v2281_v15 = vrot.slane %v2279_v33, 5  ;;  %v3513_v22 = vrot.slane %v3364_v27, 5  ;;  %v3516_v2 = vrot.slane %v3365_v53, 5  ;;  %v8079_v3 = vpop.f32.mrf.mxu0  ;;  %v3255_v53 = vpop.permute.xlu1 %3254 }
 0x1e6   : > { %2359 = vst.msk [vmem:[#allocation3 + $0x238] sm:$0xf] %vm275_vm0, %v2264_v23  ;;  %2763 = vst.msk [vmem:[#allocation3 + $0x278] sm:$0xf] %vm275_vm0, %v2731_v34  ;;  %v3366_v13 = vld [vmem:[#allocation2 + $0xc0] sm:$0xe]  ;;  %v8082_v24 = vpop.f32.mrf.mxu1 }
 0x1e7   : > { %2762 = vst.msk [vmem:[#allocation3 + $0x264] sm:$0xf] %vm275_vm0, %v2730_v26  ;;  %v3669_v20 = vld [vmem:[#allocation3 + $0x1e8] sm:$0xff]  ;;  %v2293_v1 = vrot.slane %v2292_v49, 4  ;;  %v2282_v6 = vor.u32 %v2281_v15, %v2278_v47  ;;  %v3514_v19 = vsel %vm6681_vm13, %v5495_v45, %v3513_v22  ;;  %v3368_v31 = vld [vmem:[#allocation2 + $0xc8] sm:$0x1] }
 0x1e8   : > { %v5885_v36 = vld [vmem:[#allocation3 + $0x1ec] ss:$20 sps:$4 sm:$0xff]   ;;  %3318 = vst.msk [vmem:[#allocation3 + $0x214] sm:$0xf] %vm1367_vm14, %v3249_v43  ;;  %v5560_v50 = vcombine.low %v3669_v20, %v3672_v41  ;;  %v5884_v30 = vld [vmem:[#allocation3 + $0x1c8] ss:$20 sps:$4 sm:$0xff]   ;;  %v8089_v45 = vpop.f32.mrf.mxu1 }
 0x1e9   : > { %v3367_v17 = vld [vmem:[#allocation2 + $0xc4] sm:$0xf]  ;;  %4930 = vmatprep.mubr.bf16.mxu1 %v5885_v36  ;;  %v3515_v44 = vrot.slane %v3513_v22, 4  ;;  %3590 = vst.msk [vmem:[#allocation3 + $0x218] sm:$0xf] %vm275_vm0, %v3514_v19  ;;  %v5496_v58 = vrot.slane %v3366_v13, 9  ;;  %v2298_v35 = vsel %vm6099_vm8, %v2293_v1, %v2297_v11  ;;  %5661 = vmatmul.mubr.msk.bf16.gmra.mxu0 %vm4536_vm15, %v5884_v30  ;;  %v8086_v11 = vpop.f32.mrf.mxu0  ;;  %v2634_v32 = vpop.permute.xlu1 %2633 }
 0x1ea   : > { %v3369_v12 = vld [vmem:[#allocation2 + $0xcc] sm:$0xe]  ;;  %v2283_v52 = vrot.slane %v2282_v6, 4  ;;  %v3520_v14 = vrot.slane %v3367_v17, 5  ;;  %4931 = vmatmul.mubr.bf16.gmra.mxu1 %v5560_v50  ;;  %2362 = vst.msk [vmem:[#allocation3 + $0x274] sm:$0xf] %vm275_vm0, %v2298_v35  ;;  %5123 = vmatprep.mubr.bf16.mxu0 %v5907_v0  ;;  %v8095_v22 = vpop.f32.mrf.mxu1 }
 0x1eb   : > { %v3517_v51 = vsel %vm6681_vm13, %v3515_v44, %v3516_v2  ;;  %v3523_v9 = vrot.slane %v3368_v31, 5  ;;  %v3370_v46 = vld [vmem:[#allocation2 + $0xd0] sm:$0xf]  ;;  %v3371_v7 = vld [vmem:[#allocation2 + $0xd4] sm:$0x1]  ;;  %v5497_v28 = vrot.slane %v3369_v12, 9  ;;  %v8093_v26 = vpop.f32.mrf.mxu0 }
 0x1ec   : > { %2695 = vst.msk [vmem:[#allocation3 + $0x238] sm:$0xf] %vm1367_vm14, %v2628_v4  ;;  %v2288_v55 = vsel %vm6099_vm8, %v2283_v52, %v8025_v29  ;;  %v3521_v38 = vsel %vm6681_vm13, %v5496_v58, %v3520_v14  ;;  %v3522_v21 = vrot.slane %v3520_v14, 4  ;;  %v3527_v10 = vrot.slane %v3370_v46, 5  ;;  %v3678_v56 = vld [vmem:[#allocation3 + $0x224] sm:$0xff]  ;;  %v3253_v29 = vpop.permute.xlu0 %3252  ;;  %v8102_v20 = vpop.f32.mrf.mxu1 }
 0x1ed   : > { %3591 = vst.msk [vmem:[#allocation3 + $0x22c] sm:$0xf] %vm275_vm0, %v3517_v51  ;;  %2361 = vst.msk [vmem:[#allocation3 + $0x260] sm:$0xf] %vm275_vm0, %v2288_v55  ;;  %v3530_v16 = vrot.slane %v3371_v7, 5  ;;  %v3259_v49 = vpop.permute.xlu1 %3258  ;;  %v8099_v43 = vpop.f32.mrf.mxu0 }
 0x1ee   : > { %3592 = vst.msk [vmem:[#allocation3 + $0x240] sm:$0xf] %vm275_vm0, %v3521_v38  ;;  %v3524_v37 = vsel %vm6681_vm13, %v3522_v21, %v3523_v9  ;;  %v3528_v18 = vsel %vm6681_vm13, %v5497_v28, %v3527_v10  ;;  %v3529_v57 = vrot.slane %v3527_v10, 4  ;;  %v5887_v33 = vld [vmem:[#allocation3 + $0x1f0] ss:$20 sps:$4 sm:$0xff]   ;;  %v8107_v17 = vpop.f32.mrf.mxu1 }
 0x1ef   : > { %v3675_v48 = vld [vmem:[#allocation3 + $0x210] sm:$0xff]  ;;  %3593 = vst.msk [vmem:[#allocation3 + $0x254] sm:$0xf] %vm275_vm0, %v3524_v37  ;;  %3594 = vst.msk [vmem:[#allocation3 + $0x268] sm:$0xf] %vm275_vm0, %v3528_v18  ;;  %v8105_v36 = vpop.f32.mrf.mxu0 }
 0x1f0   : > { %v5888_v27 = vld [vmem:[#allocation3 + $0x214] ss:$20 sps:$4 sm:$0xff]   ;;  %3320 = vst.msk [vmem:[#allocation3 + $0x23c] sm:$0xf] %vm1367_vm14, %v3253_v29  ;;  %v5565_v41 = vcombine.low %v3675_v48, %v3678_v56  ;;  %v3531_v62 = vsel %vm6681_vm13, %v3529_v57, %v3530_v16  ;;  %3321 = vst.msk [vmem:[#allocation3 + $0x250] sm:$0xf] %vm1367_vm14, %v3255_v53  ;;  %v2632_v23 = vpop.permute.xlu0 %2631  ;;  %v8111_v19 = vpop.f32.mrf.mxu1 }
 0x1f1   : > { %4940 = vmatprep.mubr.bf16.mxu1 %v5888_v27  ;;  %3595 = vst.msk [vmem:[#allocation3 + $0x27c] sm:$0xf] %vm275_vm0, %v3531_v62  ;;  %5662 = vmatmul.mubr.msk.bf16.gmra.mxu0 %vm4536_vm15, %v5887_v33  ;;  %v8109_v6 = vpop.f32.mrf.mxu0 }
 0x1f2   : > { %4941 = vmatmul.mubr.bf16.gmra.mxu1 %v5565_v41  ;;  %2697 = vst.msk [vmem:[#allocation3 + $0x260] sm:$0xf] %vm1367_vm14, %v2632_v23  ;;  %5133 = vmatprep.mubr.bf16.mxu0 %v5907_v0  ;;  %2698 = vst.msk [vmem:[#allocation3 + $0x274] sm:$0xf] %vm1367_vm14, %v2634_v32  ;;  %v8117_v30 = vpop.f32.mrf.mxu1 }
 0x1f3   : > { %v5893_v15 = vld [vmem:[#allocation3 + $0x238] ss:$20 sps:$4 sm:$0xff]   ;;  %3323 = vst.msk [vmem:[#allocation3 + $0x278] sm:$0xf] %vm1367_vm14, %v3259_v49  ;;  %v8115_v31 = vpop.f32.mrf.mxu0  ;;  %v3766_v49 = vlaneseq }
 0x1f4   : > { %v5890_v34 = vld [vmem:[#allocation3 + $0x218] ss:$20 sps:$4 sm:$0xff]   ;;  %v3257_v13 = vpop.permute.xlu0 %3256  ;;  %v8121_v12 = vpop.f32.mrf.mxu1 }
 0x1f5   : > { %3322 = vst.msk [vmem:[#allocation3 + $0x264] sm:$0xf] %vm1367_vm14, %v3257_v13  ;;  %v8119_v58 = vpop.f32.mrf.mxu0  ;;  %8490 = vst [vmem:[#allocation4_spill] sm:$0xff] %v8121_v12  ;;  %v3767_v13 = vshrl.u32 %v3766_v49, 7 }
 0x1f6   : > { %v5894_v2 = vld [vmem:[#allocation3 + $0x240] ss:$20 sps:$4 sm:$0xff]   ;;  %v8126_v52 = vpop.f32.mrf.mxu1 }
 0x1f7   : > { %v5891_v47 = vld [vmem:[#allocation3 + $0x23c] ss:$20 sps:$4 sm:$0xff]   ;;  %v8123_v35 = vpop.f32.mrf.mxu0  ;;  %8491 = vst [vmem:[#allocation5_spill] sm:$0xff] %v8126_v52 }
 0x1f8   : > { %4950 = vmatprep.mubr.bf16.mxu1 %v5891_v47  ;;  %v5898_v44 = vld [vmem:[#allocation3 + $0x268] ss:$20 sps:$4 sm:$0xff]   ;;  %v8130_v4 = vpop.f32.mrf.mxu1 }
 0x1f9   : > { %5663 = vmatmul.mubr.msk.bf16.gmra.mxu0 %vm4536_vm15, %v5890_v34  ;;  %v5897_v1 = vld [vmem:[#allocation3 + $0x260] ss:$20 sps:$4 sm:$0xff]   ;;  %v8128_v14 = vpop.f32.mrf.mxu0  ;;  %8492 = vst [vmem:[#allocation6_spill] sm:$0xff] %v8130_v4 }
 0x1fa   : > { %4951 = vmatmul.mubr.bf16.gmra.mxu1 %v5893_v15  ;;  %5143 = vmatprep.mubr.bf16.mxu0 %v5907_v0  ;;  %v8134_v51 = vpop.f32.mrf.mxu1 }
 0x1fb   : > { %8493 = vst [vmem:[#allocation7_spill] sm:$0xff] %v8134_v51 }
 0x1fc   : > { %v5895_v50 = vld [vmem:[#allocation3 + $0x264] ss:$20 sps:$4 sm:$0xff]   ;;  %v8138_v46 = vpop.f32.mrf.mxu1 }
 0x1fd   : > { %4960 = vmatprep.mubr.bf16.mxu1 %v5895_v50  ;;  %8494 = vst [vmem:[#allocation8_spill] sm:$0xff] %v8138_v46 }
 0x1fe   : > { %v8142_v28 = vpop.f32.mrf.mxu1 }
 0x1ff   : > { %8495 = vst [vmem:[#allocation9_spill] sm:$0xff] %v8142_v28 }
 0x200   : > { %v8146_v38 = vpop.f32.mrf.mxu1 }
 0x201   : > { %5664 = vmatmul.mubr.msk.bf16.gmra.mxu0 %vm4536_vm15, %v5894_v2  ;;  %8496 = vst [vmem:[#allocation10_spill] sm:$0xff] %v8146_v38 }
 0x202   : > { %4961 = vmatmul.mubr.bf16.gmra.mxu1 %v5897_v1  ;;  %5153 = vmatprep.mubr.bf16.mxu0 %v5907_v0  ;;  %v8132_v0 = vpop.f32.mrf.mxu0  ;;  %v8150_v10 = vpop.f32.mrf.mxu1  ;;  %v3768_v1 = vsub.s32 0, %v3767_v13 }
 0x203   : > { %8497 = vst [vmem:[#allocation11_spill] sm:$0xff] %v8150_v10 }
 0x204   : > { %v8136_v9 = vpop.f32.mrf.mxu0  ;;  %v8154_v16 = vpop.f32.mrf.mxu1 }
 0x205   : > { %8498 = vst [vmem:[#allocation12_spill] sm:$0xff] %v8154_v16 }
 0x206   : > { %v8140_v7 = vpop.f32.mrf.mxu0  ;;  %v8158_v18 = vpop.f32.mrf.mxu1 }
 0x207   : > { %8499 = vst [vmem:[#allocation13_spill] sm:$0xff] %v8158_v18 }
 0x208   : > { %v8144_v55 = vpop.f32.mrf.mxu0  ;;  %v8162_v29 = vpop.f32.mrf.mxu1 }
 0x209   : > { %5665 = vmatmul.mubr.msk.bf16.gmra.mxu0 %vm4536_vm15, %v5898_v44  ;;  %8500 = vst [vmem:[#allocation14_spill] sm:$0xff] %v8162_v29 }
 0x20a   : > { %v8148_v21 = vpop.f32.mrf.mxu0  ;;  %v8166_v27 = vpop.f32.mrf.mxu1 }
 0x20b   : > { %8501 = vst [vmem:[#allocation15_spill] sm:$0xff] %v8166_v27 }
 0x20c   : > { %v8152_v56 = vpop.f32.mrf.mxu0  ;;  %v8170_v62 = vpop.f32.mrf.mxu1 }
 0x20d   : > { %8502 = vst [vmem:[#allocation16_spill] sm:$0xff] %v8170_v62  ;;  %v3772_v62 = vsub.s32 1, %v3767_v13 }
 0x20e   : > { %v8156_v37 = vpop.f32.mrf.mxu0  ;;  %v8174_v53 = vpop.f32.mrf.mxu1 }
 0x20f   : > { %8503 = vst [vmem:[#allocation17_spill] sm:$0xff] %v8174_v53 }
 0x210   : > { %v8160_v57 = vpop.f32.mrf.mxu0 }
 0x212   : > { %v8164_v48 = vpop.f32.mrf.mxu0 }
 0x214   : > { %v8168_v41 = vpop.f32.mrf.mxu0 }
 0x216   : > { %v8172_v33 = vpop.f32.mrf.mxu0 }
 0x217   : > { %v8178_v32 = vpop.f32.mrf.mxu1 }
 0x218   : > { %v8176_v23 = vpop.f32.mrf.mxu0  ;;  %8504 = vst [vmem:[#allocation18_spill] sm:$0xff] %v8178_v32  ;;  %v3764_v32 = vld [vmem:[%s8476_s2] sm:$0x3] }
 0x219   : > { %v8182_v47 = vpop.f32.mrf.mxu1 }
 0x21a   : > { %v8180_v34 = vpop.f32.mrf.mxu0  ;;  %8505 = vst [vmem:[#allocation19_spill] sm:$0xff] %v8182_v47  ;;  %v8197_v47 = vrot.slane %v3764_v32, %v3768_v1 }
 0x21b   : > { %v8186_v2 = vpop.f32.mrf.mxu1 }
 0x21c   : > { %v8184_v15 = vpop.f32.mrf.mxu0  ;;  %8506 = vst [vmem:[#allocation20_spill] sm:$0xff] %v8186_v2  ;;  %v8201_v2 = vrot.slane %v3764_v32, %v3772_v62  ;;  %v4620_v16 = vadd.f32 %v8022_v39, %v8197_v47  ;;  %v4624_v1 = vadd.f32 %v8050_v61, %v8197_v47  ;;  %v4630_v61 = vadd.f32 %v8079_v3, %v8197_v47 }
 0x21d   : > { %v8190_v44 = vpop.f32.mrf.mxu1  ;;  %v4634_v3 = vadd.f32 %v8093_v26, %v8197_v47  ;;  %v4640_v26 = vadd.f32 %v8105_v36, %v8197_v47  ;;  %v4644_v36 = vadd.f32 %v8115_v31, %v8197_v47  ;;  %v4650_v31 = vadd.f32 %v8123_v35, %v8197_v47 }
 0x21e   : > { %8507 = vst [vmem:[#allocation21_spill] sm:$0xff] %v8190_v44  ;;  %v4622_v38 = vadd.f32 %v8040_v5, %v8201_v2  ;;  %v4626_v62 = vadd.f32 %v8072_v40, %v8201_v2  ;;  %v4632_v12 = vadd.f32 %v8086_v11, %v8201_v2  ;;  %v4636_v11 = vadd.f32 %v8099_v43, %v8201_v2 }
 0x21f   : > { %v4642_v43 = vadd.f32 %v8109_v6, %v8201_v2  ;;  %v4646_v6 = vadd.f32 %v8119_v58, %v8201_v2  ;;  %v4652_v58 = vadd.f32 %v8128_v14, %v8201_v2  ;;  %v4654_v35 = vadd.f32 %v8132_v0, %v8197_v47 }
 0x220   : > { %v4656_v14 = vadd.f32 %v8136_v9, %v8201_v2  ;;  %v4660_v0 = vadd.f32 %v8140_v7, %v8197_v47  ;;  %v4662_v9 = vadd.f32 %v8144_v55, %v8201_v2  ;;  %v4664_v7 = vadd.f32 %v8148_v21, %v8197_v47 }
 0x221   : > { %v8188_v50 = vpop.f32.mrf.mxu0  ;;  %v4670_v21 = vadd.f32 %v8156_v37, %v8197_v47 }
 0x223   : > { %v8195_v53 = vpop.f32.mrf.mxu0 }
 0x225   : > { %v8199_v49 = vpop.f32.mrf.mxu0 }
 0x227   : > { %v8205_v10 = vpop.f32.mrf.mxu0 }
 0x22c   : > { %v4812_v27 = vpop.f32.mrf.mxu1 }
 0x22d   : > { %v4813_v28 = vadd.f32 %v4812_v27, %v4620_v16 }
 0x22e   : > { %v4814_v29 = vpop.f32.mrf.mxu1 }
 0x22f   : > { %v4815_v46 = vadd.f32 %v4814_v29, %v4622_v38 }
 0x230   : > { %v4816_v18 = vpop.f32.mrf.mxu1 }
 0x231   : > { %v4817_v16 = vadd.f32 %v4816_v18, %v4624_v1 }
 0x232   : > { %v4818_v44 = vpop.f32.mrf.mxu1 }
 0x233   : > { %v4819_v29 = vadd.f32 %v4818_v44, %v4626_v62 }
 0x237   : > { %v4822_v13 = vpop.f32.mrf.mxu1 }
 0x239   : > { %v4824_v51 = vpop.f32.mrf.mxu1 }
 0x23a   : > { %v5005_v39 = vpop.f32.mrf.mxu0  ;;  %v4825_v44 = vadd.f32 %v4824_v51, %v4632_v12 }
 0x23b   : > { %v8219_v5 = vadd.f32 %v5005_v39, %v4813_v28  ;;  %v4826_v27 = vpop.f32.mrf.mxu1  ;;  %v4823_v28 = vadd.f32 %v4822_v13, %v4630_v61 }
 0x23c   : > { %v5007_v32 = vpop.f32.mrf.mxu0  ;;  %v4827_v13 = vadd.f32 %v4826_v27, %v4634_v3 }
 0x23d   : > { %5272 = vst [vmem:[%s8215_s7] sm:$0xff] %v8219_v5  ;;  %v5008_v38 = vadd.f32 %v5007_v32, %v4815_v46  ;;  %v4828_v4 = vpop.f32.mrf.mxu1 }
 0x23e   : > { %v5009_v52 = vpop.f32.mrf.mxu0  ;;  %v4829_v12 = vadd.f32 %v4828_v4, %v4636_v11 }
 0x23f   : > { %5273 = vst [vmem:[%s8215_s7 + $0x8] sm:$0xff] %v5008_v38  ;;  %v8228_v40 = vadd.f32 %v5009_v52, %v4817_v16 }
 0x240   : > { %v5011_v1 = vpop.f32.mrf.mxu0 }
 0x241   : > { %v4832_v18 = vpop.f32.mrf.mxu1  ;;  %5274 = vst [vmem:[%s8215_s7 + $0x10] sm:$0xff] %v8228_v40  ;;  %v5012_v46 = vadd.f32 %v5011_v1, %v4819_v29 }
 0x242   : > { %v5015_v62 = vpop.f32.mrf.mxu0  ;;  %v4833_v27 = vadd.f32 %v4832_v18, %v4640_v26 }
 0x243   : > { %v4834_v39 = vpop.f32.mrf.mxu1  ;;  %5275 = vst [vmem:[%s8215_s7 + $0x18] sm:$0xff] %v5012_v46  ;;  %v8237_v52 = vadd.f32 %v5015_v62, %v4823_v28 }
 0x244   : > { %v5017_v32 = vpop.f32.mrf.mxu0  ;;  %v4835_v4 = vadd.f32 %v4834_v39, %v4642_v43 }
 0x245   : > { %v4836_v16 = vpop.f32.mrf.mxu1  ;;  %5276 = vst [vmem:[%s8215_s7 + $0x20] sm:$0xff] %v8237_v52  ;;  %v5018_v61 = vadd.f32 %v5017_v32, %v4825_v44 }
 0x246   : > { %v5019_v38 = vpop.f32.mrf.mxu0  ;;  %v4837_v18 = vadd.f32 %v4836_v16, %v4644_v36 }
 0x247   : > { %v4838_v51 = vpop.f32.mrf.mxu1  ;;  %5277 = vst [vmem:[%s8215_s7 + $0x28] sm:$0xff] %v5018_v61  ;;  %v8246_v29 = vadd.f32 %v5019_v38, %v4827_v13 }
 0x248   : > { %v5021_v1 = vpop.f32.mrf.mxu0  ;;  %v4839_v39 = vadd.f32 %v4838_v51, %v4646_v6 }
 0x249   : > { %5278 = vst [vmem:[%s8215_s7 + $0x30] sm:$0xff] %v8246_v29  ;;  %v5022_v3 = vadd.f32 %v5021_v1, %v4829_v12 }
 0x24b   : > { %5279 = vst [vmem:[%s8215_s7 + $0x38] sm:$0xff] %v5022_v3 }
 0x24c   : > { %v4842_v28 = vpop.f32.mrf.mxu1 }
 0x24d   : > { %v5025_v44 = vpop.f32.mrf.mxu0  ;;  %v4843_v16 = vadd.f32 %v4842_v28, %v4650_v31 }
 0x24e   : > { %v4844_v46 = vpop.f32.mrf.mxu1  ;;  %v8255_v62 = vadd.f32 %v5025_v44, %v4833_v27 }
 0x24f   : > { %v5027_v13 = vpop.f32.mrf.mxu0  ;;  %v4845_v51 = vadd.f32 %v4844_v46, %v4652_v58 }
 0x250   : > { %v4846_v11 = vpop.f32.mrf.mxu1  ;;  %5280 = vst [vmem:[%s8215_s7 + $0x40] sm:$0xff] %v8255_v62  ;;  %v5028_v32 = vadd.f32 %v5027_v13, %v4835_v4 }
 0x251   : > { %v5029_v61 = vpop.f32.mrf.mxu0  ;;  %v4847_v28 = vadd.f32 %v4846_v11, %v4654_v35  ;;  %v5203_v35 = vmul.f32 %v8228_v40, %v8228_v40 }
 0x252   : > { %v4848_v26 = vpop.f32.mrf.mxu1  ;;  %5281 = vst [vmem:[%s8215_s7 + $0x48] sm:$0xff] %v5028_v32  ;;  %v8264_v12 = vadd.f32 %v5029_v61, %v4837_v18 }
 0x253   : > { %v5031_v43 = vpop.f32.mrf.mxu0  ;;  %v4849_v46 = vadd.f32 %v4848_v26, %v4656_v14  ;;  %v5204_v14 = vmul.f32 %v8237_v52, %v8237_v52 }
 0x254   : > { %5282 = vst [vmem:[%s8215_s7 + $0x50] sm:$0xff] %v8264_v12  ;;  %v5032_v27 = vadd.f32 %v5031_v43, %v4839_v39  ;;  %v4666_v43 = vadd.f32 %v8152_v56, %v8201_v2  ;;  %v5202_v56 = vmul.f32 %v8219_v5, %v8219_v5 }
 0x256   : > { %v5035_v36 = vpop.f32.mrf.mxu0  ;;  %5283 = vst [vmem:[%s8215_s7 + $0x58] sm:$0xff] %v5032_v27 }
 0x257   : > { %v4852_v38 = vpop.f32.mrf.mxu1  ;;  %v8273_v3 = vadd.f32 %v5035_v36, %v4843_v16 }
 0x258   : > { %v5037_v44 = vpop.f32.mrf.mxu0  ;;  %v4853_v11 = vadd.f32 %v4852_v38, %v4660_v0  ;;  %v5164_v0 = vadd.f32 %v8228_v40, %v8219_v5 }
 0x259   : > { %v4854_v1 = vpop.f32.mrf.mxu1  ;;  %5284 = vst [vmem:[%s8215_s7 + $0x60] sm:$0xff] %v8273_v3  ;;  %v5038_v6 = vadd.f32 %v5037_v44, %v4845_v51  ;;  %v4672_v44 = vadd.f32 %v8160_v57, %v8201_v2 }
 0x25a   : > { %v5039_v13 = vpop.f32.mrf.mxu0  ;;  %v4855_v26 = vadd.f32 %v4854_v1, %v4662_v9 }
 0x25b   : > { %v4856_v4 = vpop.f32.mrf.mxu1  ;;  %5285 = vst [vmem:[%s8215_s7 + $0x68] sm:$0xff] %v5038_v6  ;;  %v8282_v31 = vadd.f32 %v5039_v13, %v4847_v28 }
 0x25c   : > { %v5041_v32 = vpop.f32.mrf.mxu0  ;;  %v4857_v38 = vadd.f32 %v4856_v4, %v4664_v7 }
 0x25d   : > { %v4858_v18 = vpop.f32.mrf.mxu1  ;;  %5286 = vst [vmem:[%s8215_s7 + $0x70] sm:$0xff] %v8282_v31  ;;  %v5042_v61 = vadd.f32 %v5041_v32, %v4849_v46  ;;  %v5234_v46 = vadd.f32 %v5203_v35, %v5202_v56  ;;  %v5165_v32 = vadd.f32 %v5164_v0, %v8237_v52 }
 0x25e   : > { %v4859_v36 = vadd.f32 %v4858_v18, %v4666_v43  ;;  %v5205_v18 = vmul.f32 %v8246_v29, %v8246_v29 }
 0x25f   : > { %v5045_v58 = vpop.f32.mrf.mxu0  ;;  %5287 = vst [vmem:[%s8215_s7 + $0x78] sm:$0xff] %v5042_v61  ;;  %v5235_v40 = vadd.f32 %v5234_v46, %v5204_v14  ;;  %v4682_v14 = vadd.f32 %v8176_v23, %v8201_v2  ;;  %v4684_v46 = vadd.f32 %v8180_v34, %v8197_v47 }
 0x260   : > { %v8291_v55 = vadd.f32 %v5045_v58, %v4853_v11  ;;  %v4674_v11 = vadd.f32 %v8164_v48, %v8197_v47  ;;  %v5166_v58 = vadd.f32 %v5165_v32, %v8246_v29 }
 0x261   : > { %v4862_v39 = vpop.f32.mrf.mxu1  ;;  %v5047_v27 = vpop.f32.mrf.mxu0  ;;  %v5236_v52 = vadd.f32 %v5235_v40, %v5205_v18 }
 0x262   : > { %5288 = vst [vmem:[%s8215_s7 + $0x80] sm:$0xff] %v8291_v55  ;;  %v5048_v1 = vadd.f32 %v5047_v27, %v4855_v26  ;;  %v4863_v6 = vadd.f32 %v4862_v39, %v4670_v21  ;;  %v5206_v39 = vmul.f32 %v8255_v62, %v8255_v62  ;;  %v4676_v26 = vadd.f32 %v8168_v41, %v8201_v2 }
 0x263   : > { %v4864_v16 = vpop.f32.mrf.mxu1  ;;  %v5049_v28 = vpop.f32.mrf.mxu0  ;;  %v4680_v27 = vadd.f32 %v8172_v33, %v8197_v47  ;;  %v5167_v21 = vadd.f32 %v5166_v58, %v8255_v62 }
 0x264   : > { %5289 = vst [vmem:[%s8215_s7 + $0x88] sm:$0xff] %v5048_v1  ;;  %v8308_v37 = vadd.f32 %v5049_v28, %v4857_v38  ;;  %v4865_v5 = vadd.f32 %v4864_v16, %v4672_v44  ;;  %v5207_v16 = vmul.f32 %v8264_v12, %v8264_v12  ;;  %v5237_v29 = vadd.f32 %v5236_v52, %v5206_v39 }
 0x265   : > { %v4866_v51 = vpop.f32.mrf.mxu1  ;;  %v5051_v13 = vpop.f32.mrf.mxu0  ;;  %v5168_v28 = vadd.f32 %v5167_v21, %v8264_v12 }
 0x266   : > { %5290 = vst [vmem:[%s8215_s7 + $0x90] sm:$0xff] %v8308_v37  ;;  %v5052_v57 = vadd.f32 %v5051_v13, %v4859_v36  ;;  %v4867_v43 = vadd.f32 %v4866_v51, %v4674_v11  ;;  %v5208_v51 = vmul.f32 %v8273_v3, %v8273_v3  ;;  %v5238_v62 = vadd.f32 %v5237_v29, %v5207_v16 }
 0x267   : > { %v4868_v4 = vpop.f32.mrf.mxu1  ;;  %v5169_v18 = vadd.f32 %v5168_v28, %v8273_v3  ;;  %v5211_v39 = vmul.f32 %v8308_v37, %v8308_v37 }
 0x268   : > { %5291 = vst [vmem:[%s8215_s7 + $0x98] sm:$0xff] %v5052_v57  ;;  %v4869_v41 = vadd.f32 %v4868_v4, %v4676_v26  ;;  %v5209_v4 = vmul.f32 %v8282_v31, %v8282_v31  ;;  %v5239_v12 = vadd.f32 %v5238_v62, %v5208_v51  ;;  %v4686_v57 = vadd.f32 %v8184_v15, %v8201_v2 }
 0x269   : > { %v4690_v26 = vadd.f32 %v8188_v50, %v8197_v47  ;;  %v4694_v51 = vadd.f32 %v8199_v49, %v8197_v47  ;;  %v4696_v62 = vadd.f32 %v8205_v10, %v8201_v2  ;;  %v4702_v10 = vadd.f32 %v7995_v54, %v8201_v2 }
 0x26a   : > { %v5055_v7 = vpop.f32.mrf.mxu0  ;;  %v5240_v3 = vadd.f32 %v5239_v12, %v5209_v4 }
 0x26b   : > { %v4872_v9 = vpop.f32.mrf.mxu1  ;;  %v5056_v48 = vadd.f32 %v5055_v7, %v4863_v6 }
 0x26c   : > { %v5057_v38 = vpop.f32.mrf.mxu0  ;;  %v4873_v33 = vadd.f32 %v4872_v9, %v4680_v27  ;;  %v5210_v9 = vmul.f32 %v8291_v55, %v8291_v55 }
 0x26d   : > { %v4874_v61 = vpop.f32.mrf.mxu1  ;;  %5292 = vst [vmem:[%s8215_s7 + $0xa0] sm:$0xff] %v5056_v48  ;;  %v5058_v1 = vadd.f32 %v5057_v38, %v4865_v5  ;;  %v5170_v5 = vadd.f32 %v5169_v18, %v8282_v31  ;;  %v5212_v52 = vmul.f32 %v5056_v48, %v5056_v48 }
 0x26e   : > { %v5059_v36 = vpop.f32.mrf.mxu0  ;;  %v4875_v23 = vadd.f32 %v4874_v61, %v4682_v14  ;;  %v5241_v31 = vadd.f32 %v5240_v3, %v5210_v9 }
 0x26f   : > { %v4876_v35 = vpop.f32.mrf.mxu1  ;;  %5293 = vst [vmem:[%s8215_s7 + $0xa8] sm:$0xff] %v5058_v1  ;;  %v5060_v44 = vadd.f32 %v5059_v36, %v4867_v43  ;;  %v5171_v58 = vadd.f32 %v5170_v5, %v8291_v55 }
 0x270   : > { %v5061_v0 = vpop.f32.mrf.mxu0  ;;  %v4877_v34 = vadd.f32 %v4876_v35, %v4684_v46  ;;  %v4692_v35 = vadd.f32 %v8195_v53, %v8201_v2  ;;  %v5242_v50 = vadd.f32 %v5241_v31, %v5211_v39 }
 0x271   : > { %v4878_v56 = vpop.f32.mrf.mxu1  ;;  %5294 = vst [vmem:[%s8215_s7 + $0xb0] sm:$0xff] %v5060_v44  ;;  %v5062_v13 = vadd.f32 %v5061_v0, %v4869_v41  ;;  %v5172_v27 = vadd.f32 %v5171_v58, %v8308_v37  ;;  %v5213_v41 = vmul.f32 %v5060_v44, %v5060_v44 }
 0x272   : > { %v4879_v15 = vadd.f32 %v4878_v56, %v4686_v57  ;;  %v5243_v28 = vadd.f32 %v5242_v50, %v5212_v52 }
 0x273   : > { %v5065_v11 = vpop.f32.mrf.mxu0  ;;  %5295 = vst [vmem:[%s8215_s7 + $0xb8] sm:$0xff] %v5062_v13  ;;  %v5173_v36 = vadd.f32 %v5172_v27, %v5056_v48  ;;  %v4700_v13 = vadd.f32 %v7984_v25, %v8197_v47  ;;  %v4704_v25 = vadd.f32 %v8005_v8, %v8197_v47 }
 0x274   : > { %v5066_v40 = vadd.f32 %v5065_v11, %v4873_v33  ;;  %v5244_v46 = vadd.f32 %v5243_v28, %v5213_v41 }
 0x275   : > { %v5067_v7 = vpop.f32.mrf.mxu0  ;;  %v5174_v4 = vadd.f32 %v5173_v36, %v5060_v44  ;;  %v4712_v36 = vadd.f32 %v8046_v60, %v8201_v2  ;;  %v4716_v60 = vadd.f32 %v8082_v24, %v8201_v2  ;;  %v4722_v24 = vadd.f32 %v8095_v22, %v8201_v2 }
 0x276   : > { %v4882_v6 = vpop.f32.mrf.mxu1  ;;  %5296 = vst [vmem:[%s8215_s7 + $0xc0] sm:$0xff] %v5066_v40  ;;  %v5068_v43 = vadd.f32 %v5067_v7, %v4875_v23  ;;  %v5214_v53 = vmul.f32 %v5066_v40, %v5066_v40  ;;  %v4726_v22 = vadd.f32 %v8107_v17, %v8201_v2  ;;  %v4732_v17 = vadd.f32 %v8117_v30, %v8201_v2  ;;  %v8509_v30 = vld [vmem:[#allocation5_spill] sm:$0xff] }
 0x277   : > { %v5069_v16 = vpop.f32.mrf.mxu0  ;;  %v4883_v1 = vadd.f32 %v4882_v6, %v4690_v26  ;;  %v5175_v23 = vadd.f32 %v5174_v4, %v5066_v40 }
 0x278   : > { %v4884_v32 = vpop.f32.mrf.mxu1  ;;  %5297 = vst [vmem:[%s8215_s7 + $0xc8] sm:$0xff] %v5068_v43  ;;  %v5070_v21 = vadd.f32 %v5069_v16, %v4877_v34  ;;  %v5245_v44 = vadd.f32 %v5244_v46, %v5214_v53  ;;  %v4706_v43 = vadd.f32 %v8016_v63, %v8201_v2 }
 0x279   : > { %v5071_v55 = vpop.f32.mrf.mxu0  ;;  %v4885_v14 = vadd.f32 %v4884_v32, %v4692_v35  ;;  %v4710_v35 = vadd.f32 %v8033_v42, %v8197_v47  ;;  %v4714_v42 = vadd.f32 %v8065_v59, %v8197_v47  ;;  %v4720_v59 = vadd.f32 %v8089_v45, %v8197_v47 }
 0x27a   : > { %v4886_v61 = vpop.f32.mrf.mxu1  ;;  %5298 = vst [vmem:[%s8215_s7 + $0xd0] sm:$0xff] %v5070_v21  ;;  %v5072_v56 = vadd.f32 %v5071_v55, %v4879_v15  ;;  %v5215_v18 = vmul.f32 %v5070_v21, %v5070_v21  ;;  %v5176_v57 = vadd.f32 %v5175_v23, %v5070_v21  ;;  %v4724_v45 = vadd.f32 %v8102_v20, %v8197_v47 }
 0x27b   : > { %v4887_v6 = vadd.f32 %v4886_v61, %v4694_v51  ;;  %v4730_v20 = vadd.f32 %v8111_v19, %v8197_v47  ;;  %v8508_v19 = vld [vmem:[#allocation4_spill] sm:$0xff] }
 0x27c   : > { %v4888_v38 = vpop.f32.mrf.mxu1  ;;  %5299 = vst [vmem:[%s8215_s7 + $0xd8] sm:$0xff] %v5072_v56  ;;  %v5246_v40 = vadd.f32 %v5245_v44, %v5215_v18 }
 0x27d   : > { %v4889_v9 = vadd.f32 %v4888_v38, %v4696_v62 }
 0x27e   : > { %v5075_v33 = vpop.f32.mrf.mxu0 }
 0x27f   : > { %v5076_v0 = vadd.f32 %v5075_v33, %v4883_v1 }
 0x280   : > { %v5077_v49 = vpop.f32.mrf.mxu0 }
 0x281   : > { %v4892_v29 = vpop.f32.mrf.mxu1  ;;  %5300 = vst [vmem:[%s8215_s7 + $0xe0] sm:$0xff] %v5076_v0  ;;  %v5078_v12 = vadd.f32 %v5077_v49, %v4885_v14  ;;  %v5216_v5 = vmul.f32 %v5076_v0, %v5076_v0  ;;  %v5177_v61 = vadd.f32 %v5176_v57, %v5076_v0 }
 0x282   : > { %v5079_v11 = vpop.f32.mrf.mxu0  ;;  %v4893_v3 = vadd.f32 %v4892_v29, %v4700_v13 }
 0x283   : > { %v4894_v37 = vpop.f32.mrf.mxu1  ;;  %5301 = vst [vmem:[%s8215_s7 + $0xe8] sm:$0xff] %v5078_v12  ;;  %v5080_v34 = vadd.f32 %v5079_v11, %v4887_v6  ;;  %v5247_v52 = vadd.f32 %v5246_v40, %v5216_v5 }
 0x284   : > { %v5081_v39 = vpop.f32.mrf.mxu0  ;;  %v4895_v54 = vadd.f32 %v4894_v37, %v4702_v10 }
 0x285   : > { %v4896_v48 = vpop.f32.mrf.mxu1  ;;  %v5217_v26 = vmul.f32 %v5080_v34, %v5080_v34  ;;  %5302 = vst [vmem:[%s8215_s7 + $0xf0] sm:$0xff] %v5080_v34  ;;  %v5082_v58 = vadd.f32 %v5081_v39, %v4889_v9  ;;  %v5178_v16 = vadd.f32 %v5177_v61, %v5080_v34 }
 0x286   : > { %v4897_v8 = vadd.f32 %v4896_v48, %v4704_v25 }
 0x287   : > { %v4898_v32 = vpop.f32.mrf.mxu1  ;;  %5303 = vst [vmem:[%s8215_s7 + $0xf8] sm:$0xff] %v5082_v58  ;;  %v5248_v50 = vadd.f32 %v5247_v52, %v5217_v26 }
 0x288   : > { %v4899_v21 = vadd.f32 %v4898_v32, %v4706_v43 }
 0x28a   : > { %v4902_v7 = vpop.f32.mrf.mxu1 }
 0x28b   : > { %v5085_v15 = vpop.f32.mrf.mxu0  ;;  %v4903_v28 = vadd.f32 %v4902_v7, %v4710_v35 }
 0x28c   : > { %v4904_v31 = vpop.f32.mrf.mxu1  ;;  %v5086_v38 = vadd.f32 %v5085_v15, %v4893_v3 }
 0x28d   : > { %v5087_v27 = vpop.f32.mrf.mxu0  ;;  %v4905_v0 = vadd.f32 %v4904_v31, %v4712_v36 }
 0x28e   : > { %v4906_v1 = vpop.f32.mrf.mxu1  ;;  %v5179_v41 = vadd.f32 %v5178_v16, %v5086_v38  ;;  %v5218_v55 = vmul.f32 %v5086_v38, %v5086_v38  ;;  %5304 = vst [vmem:[%s8215_s7 + $0x100] sm:$0xff] %v5086_v38  ;;  %v5088_v63 = vadd.f32 %v5087_v27, %v4895_v54 }
 0x28f   : > { %v5089_v29 = vpop.f32.mrf.mxu0  ;;  %v4907_v48 = vadd.f32 %v4906_v1, %v4714_v42 }
 0x290   : > { %v4908_v51 = vpop.f32.mrf.mxu1  ;;  %v5249_v56 = vadd.f32 %v5248_v50, %v5218_v55  ;;  %5305 = vst [vmem:[%s8215_s7 + $0x108] sm:$0xff] %v5088_v63  ;;  %v5090_v14 = vadd.f32 %v5089_v29, %v4897_v8  ;;  %v4734_v55 = vadd.f32 %v8508_v19, %v8197_v47 }
 0x291   : > { %v5091_v53 = vpop.f32.mrf.mxu0  ;;  %v4909_v44 = vadd.f32 %v4908_v51, %v4716_v60 }
 0x292   : > { %v5180_v37 = vadd.f32 %v5179_v41, %v5090_v14  ;;  %v5219_v62 = vmul.f32 %v5090_v14, %v5090_v14  ;;  %5306 = vst [vmem:[%s8215_s7 + $0x110] sm:$0xff] %v5090_v14  ;;  %v5092_v4 = vadd.f32 %v5091_v53, %v4899_v21  ;;  %v4736_v53 = vadd.f32 %v8509_v30, %v8201_v2 }
 0x293   : > { %v5095_v6 = vpop.f32.mrf.mxu0 }
 0x294   : > { %v5250_v18 = vadd.f32 %v5249_v56, %v5219_v62  ;;  %5307 = vst [vmem:[%s8215_s7 + $0x118] sm:$0xff] %v5092_v4  ;;  %v5096_v49 = vadd.f32 %v5095_v6, %v4903_v28  ;;  %v8510_v4 = vld [vmem:[#allocation6_spill] sm:$0xff] }
 0x295   : > { %v5097_v13 = vpop.f32.mrf.mxu0 }
 0x296   : > { %v4912_v33 = vpop.f32.mrf.mxu1  ;;  %v5181_v12 = vadd.f32 %v5180_v37, %v5096_v49  ;;  %v5220_v9 = vmul.f32 %v5096_v49, %v5096_v49  ;;  %5308 = vst [vmem:[%s8215_s7 + $0x120] sm:$0xff] %v5096_v49  ;;  %v5098_v10 = vadd.f32 %v5097_v13, %v4905_v0  ;;  %v4740_v0 = vadd.f32 %v8510_v4, %v8197_v47 }
 0x297   : > { %v5099_v11 = vpop.f32.mrf.mxu0  ;;  %v4913_v34 = vadd.f32 %v4912_v33, %v4720_v59 }
 0x298   : > { %v4914_v46 = vpop.f32.mrf.mxu1  ;;  %v5251_v57 = vadd.f32 %v5250_v18, %v5220_v9  ;;  %5309 = vst [vmem:[%s8215_s7 + $0x128] sm:$0xff] %v5098_v10  ;;  %v5100_v5 = vadd.f32 %v5099_v11, %v4907_v48  ;;  %v8512_v11 = vld [vmem:[#allocation8_spill] sm:$0xff] }
 0x299   : > { %v5101_v3 = vpop.f32.mrf.mxu0  ;;  %v4915_v61 = vadd.f32 %v4914_v46, %v4722_v24 }
 0x29a   : > { %v4916_v23 = vpop.f32.mrf.mxu1  ;;  %v5182_v40 = vadd.f32 %v5181_v12, %v5100_v5  ;;  %v5221_v39 = vmul.f32 %v5100_v5, %v5100_v5  ;;  %5310 = vst [vmem:[%s8215_s7 + $0x130] sm:$0xff] %v5100_v5  ;;  %v5102_v7 = vadd.f32 %v5101_v3, %v4909_v44 }
 0x29b   : > { %v4917_v15 = vadd.f32 %v4916_v23, %v4724_v45  ;;  %v8511_v23 = vld [vmem:[#allocation7_spill] sm:$0xff] }
 0x29c   : > { %v4918_v32 = vpop.f32.mrf.mxu1  ;;  %v5252_v54 = vadd.f32 %v5251_v57, %v5221_v39  ;;  %5311 = vst [vmem:[%s8215_s7 + $0x138] sm:$0xff] %v5102_v7  ;;  %v4742_v12 = vadd.f32 %v8511_v23, %v8201_v2  ;;  %v8513_v39 = vld [vmem:[#allocation9_spill] sm:$0xff] }
 0x29d   : > { %v4919_v35 = vadd.f32 %v4918_v32, %v4726_v22  ;;  %v4744_v32 = vadd.f32 %v8512_v11, %v8197_v47  ;;  %v4746_v7 = vadd.f32 %v8513_v39, %v8201_v2  ;;  %v8514_v22 = vld [vmem:[#allocation10_spill] sm:$0xff] }
 0x29e   : > { %v5105_v26 = vpop.f32.mrf.mxu0 }
 0x29f   : > { %v4922_v25 = vpop.f32.mrf.mxu1  ;;  %v5106_v43 = vadd.f32 %v5105_v26, %v4913_v34 }
 0x2a0   : > { %v5107_v31 = vpop.f32.mrf.mxu0  ;;  %v4923_v41 = vadd.f32 %v4922_v25, %v4730_v20 }
 0x2a1   : > { %v4924_v58 = vpop.f32.mrf.mxu1  ;;  %v5183_v16 = vadd.f32 %v5182_v40, %v5106_v43  ;;  %v5222_v38 = vmul.f32 %v5106_v43, %v5106_v43  ;;  %5312 = vst [vmem:[%s8215_s7 + $0x140] sm:$0xff] %v5106_v43  ;;  %v5108_v8 = vadd.f32 %v5107_v31, %v4915_v61 }
 0x2a2   : > { %v5109_v27 = vpop.f32.mrf.mxu0  ;;  %v4925_v14 = vadd.f32 %v4924_v58, %v4732_v17 }
 0x2a3   : > { %v4926_v52 = vpop.f32.mrf.mxu1  ;;  %v5253_v1 = vadd.f32 %v5252_v54, %v5222_v38  ;;  %5313 = vst [vmem:[%s8215_s7 + $0x148] sm:$0xff] %v5108_v8  ;;  %v5110_v50 = vadd.f32 %v5109_v27, %v4917_v15  ;;  %v4750_v54 = vadd.f32 %v8514_v22, %v8197_v47 }
 0x2a4   : > { %v5111_v63 = vpop.f32.mrf.mxu0  ;;  %v4927_v62 = vadd.f32 %v4926_v52, %v4734_v55 }
 0x2a5   : > { %v4928_v21 = vpop.f32.mrf.mxu1  ;;  %v5184_v51 = vadd.f32 %v5183_v16, %v5110_v50  ;;  %v5223_v36 = vmul.f32 %v5110_v50, %v5110_v50  ;;  %5314 = vst [vmem:[%s8215_s7 + $0x150] sm:$0xff] %v5110_v50  ;;  %v5112_v56 = vadd.f32 %v5111_v63, %v4919_v35  ;;  %v8515_v35 = vld [vmem:[#allocation11_spill] sm:$0xff]  ;;  %v8516_v50 = vld [vmem:[#allocation12_spill] sm:$0xff] }
 0x2a6   : > { %v4929_v48 = vadd.f32 %v4928_v21, %v4736_v53  ;;  %v4752_v27 = vadd.f32 %v8515_v35, %v8201_v2 }
 0x2a7   : > { %v5254_v33 = vadd.f32 %v5253_v1, %v5223_v36  ;;  %5315 = vst [vmem:[%s8215_s7 + $0x158] sm:$0xff] %v5112_v56 }
 0x2a9   : > { %v5115_v28 = vpop.f32.mrf.mxu0 }
 0x2aa   : > { %v4932_v29 = vpop.f32.mrf.mxu1  ;;  %v5116_v37 = vadd.f32 %v5115_v28, %v4923_v41  ;;  %v4754_v41 = vadd.f32 %v8516_v50, %v8197_v47 }
 0x2ab   : > { %v5117_v6 = vpop.f32.mrf.mxu0  ;;  %v4933_v44 = vadd.f32 %v4932_v29, %v4740_v0 }
 0x2ac   : > { %v4934_v42 = vpop.f32.mrf.mxu1  ;;  %v5185_v60 = vadd.f32 %v5184_v51, %v5116_v37  ;;  %v5224_v18 = vmul.f32 %v5116_v37, %v5116_v37  ;;  %5316 = vst [vmem:[%s8215_s7 + $0x160] sm:$0xff] %v5116_v37  ;;  %v5118_v49 = vadd.f32 %v5117_v6, %v4925_v14  ;;  %v8517_v14 = vld [vmem:[#allocation13_spill] sm:$0xff]  ;;  %v8518_v37 = vld [vmem:[#allocation14_spill] sm:$0xff] }
 0x2ad   : > { %v5119_v59 = vpop.f32.mrf.mxu0  ;;  %v4935_v3 = vadd.f32 %v4934_v42, %v4742_v12  ;;  %v4756_v28 = vadd.f32 %v8517_v14, %v8201_v2 }
 0x2ae   : > { %v4936_v46 = vpop.f32.mrf.mxu1  ;;  %v5255_v9 = vadd.f32 %v5254_v33, %v5224_v18  ;;  %5317 = vst [vmem:[%s8215_s7 + $0x168] sm:$0xff] %v5118_v49  ;;  %v5120_v10 = vadd.f32 %v5119_v59, %v4927_v62  ;;  %v4760_v62 = vadd.f32 %v8518_v37, %v8197_v47 }
 0x2af   : > { %v5121_v24 = vpop.f32.mrf.mxu0  ;;  %v4937_v58 = vadd.f32 %v4936_v46, %v4744_v32 }
 0x2b0   : > { %v4938_v13 = vpop.f32.mrf.mxu1  ;;  %v5186_v5 = vadd.f32 %v5185_v60, %v5120_v10  ;;  %v5225_v34 = vmul.f32 %v5120_v10, %v5120_v10  ;;  %5318 = vst [vmem:[%s8215_s7 + $0x170] sm:$0xff] %v5120_v10  ;;  %v5122_v45 = vadd.f32 %v5121_v24, %v4929_v48  ;;  %v8519_v48 = vld [vmem:[#allocation15_spill] sm:$0xff]  ;;  %v8520_v10 = vld [vmem:[#allocation16_spill] sm:$0xff] }
 0x2b1   : > { %v5125_v25 = vpop.f32.mrf.mxu0  ;;  %v4939_v16 = vadd.f32 %v4938_v13, %v4746_v7  ;;  %v4762_v59 = vadd.f32 %v8519_v48, %v8201_v2 }
 0x2b2   : > { %v4942_v57 = vpop.f32.mrf.mxu1  ;;  %v5256_v61 = vadd.f32 %v5255_v9, %v5225_v34  ;;  %5319 = vst [vmem:[%s8215_s7 + $0x178] sm:$0xff] %v5122_v45  ;;  %v5126_v26 = vadd.f32 %v5125_v25, %v4933_v44  ;;  %v4764_v44 = vadd.f32 %v8520_v10, %v8197_v47 }
 0x2b3   : > { %v5127_v43 = vpop.f32.mrf.mxu0  ;;  %v4943_v1 = vadd.f32 %v4942_v57, %v4750_v54 }
 0x2b4   : > { %v4944_v40 = vpop.f32.mrf.mxu1  ;;  %v5187_v20 = vadd.f32 %v5186_v5, %v5126_v26  ;;  %v5226_v31 = vmul.f32 %v5126_v26, %v5126_v26  ;;  %5320 = vst [vmem:[%s8215_s7 + $0x180] sm:$0xff] %v5126_v26  ;;  %v5128_v52 = vadd.f32 %v5127_v43, %v4935_v3  ;;  %v8521_v3 = vld [vmem:[#allocation17_spill] sm:$0xff] }
 0x2b5   : > { %v5129_v38 = vpop.f32.mrf.mxu0  ;;  %v4945_v51 = vadd.f32 %v4944_v40, %v4752_v27  ;;  %v4766_v25 = vadd.f32 %v8521_v3, %v8201_v2 }
 0x2b6   : > { %v4946_v15 = vpop.f32.mrf.mxu1  ;;  %v5257_v21 = vadd.f32 %v5256_v61, %v5226_v31  ;;  %5321 = vst [vmem:[%s8215_s7 + $0x188] sm:$0xff] %v5128_v52  ;;  %v5130_v17 = vadd.f32 %v5129_v38, %v4937_v58  ;;  %v8522_v61 = vld [vmem:[#allocation18_spill] sm:$0xff] }
 0x2b7   : > { %v5131_v19 = vpop.f32.mrf.mxu0  ;;  %v4947_v53 = vadd.f32 %v4946_v15, %v4754_v41  ;;  %v4770_v26 = vadd.f32 %v8522_v61, %v8197_v47 }
 0x2b8   : > { %v4948_v8 = vpop.f32.mrf.mxu1  ;;  %v5188_v55 = vadd.f32 %v5187_v20, %v5130_v17  ;;  %v5227_v63 = vmul.f32 %v5130_v17, %v5130_v17  ;;  %5322 = vst [vmem:[%s8215_s7 + $0x190] sm:$0xff] %v5130_v17  ;;  %v5132_v29 = vadd.f32 %v5131_v19, %v4939_v16  ;;  %v8523_v16 = vld [vmem:[#allocation19_spill] sm:$0xff] }
 0x2b9   : > { %v5135_v56 = vpop.f32.mrf.mxu0  ;;  %v4949_v60 = vadd.f32 %v4948_v8, %v4756_v28  ;;  %v4772_v38 = vadd.f32 %v8523_v16, %v8201_v2 }
 0x2ba   : > { %v4952_v36 = vpop.f32.mrf.mxu1  ;;  %v5258_v42 = vadd.f32 %v5257_v21, %v5227_v63  ;;  %5323 = vst [vmem:[%s8215_s7 + $0x198] sm:$0xff] %v5132_v29  ;;  %v5136_v30 = vadd.f32 %v5135_v56, %v4943_v1  ;;  %v8524_v21 = vld [vmem:[#allocation20_spill] sm:$0xff] }
 0x2bb   : > { %v5137_v4 = vpop.f32.mrf.mxu0  ;;  %v4953_v12 = vadd.f32 %v4952_v36, %v4760_v62  ;;  %v4774_v17 = vadd.f32 %v8524_v21, %v8197_v47 }
 0x2bc   : > { %v4954_v33 = vpop.f32.mrf.mxu1  ;;  %v5189_v0 = vadd.f32 %v5188_v55, %v5136_v30  ;;  %v5228_v6 = vmul.f32 %v5136_v30, %v5136_v30  ;;  %5324 = vst [vmem:[%s8215_s7 + $0x1a0] sm:$0xff] %v5136_v30  ;;  %v5138_v46 = vadd.f32 %v5137_v4, %v4945_v51  ;;  %v8525_v51 = vld [vmem:[#allocation21_spill] sm:$0xff] }
 0x2bd   : > { %v5139_v49 = vpop.f32.mrf.mxu0  ;;  %v4955_v5 = vadd.f32 %v4954_v33, %v4762_v59  ;;  %v4776_v36 = vadd.f32 %v8525_v51, %v8201_v2 }
 0x2be   : > { %v4956_v18 = vpop.f32.mrf.mxu1  ;;  %v5259_v13 = vadd.f32 %v5258_v42, %v5228_v6  ;;  %5325 = vst [vmem:[%s8215_s7 + $0x1a8] sm:$0xff] %v5138_v46  ;;  %v5140_v23 = vadd.f32 %v5139_v49, %v4947_v53 }
 0x2bf   : > { %v5141_v11 = vpop.f32.mrf.mxu0  ;;  %v4957_v7 = vadd.f32 %v4956_v18, %v4764_v44 }
 0x2c0   : > { %v4958_v9 = vpop.f32.mrf.mxu1  ;;  %v5190_v32 = vadd.f32 %v5189_v0, %v5140_v23  ;;  %v5229_v24 = vmul.f32 %v5140_v23, %v5140_v23  ;;  %5326 = vst [vmem:[%s8215_s7 + $0x1b0] sm:$0xff] %v5140_v23  ;;  %v5142_v57 = vadd.f32 %v5141_v11, %v4949_v60 }
 0x2c1   : > { %v5145_v34 = vpop.f32.mrf.mxu0  ;;  %v4959_v20 = vadd.f32 %v4958_v9, %v4766_v25 }
 0x2c2   : > { %v4962_v45 = vpop.f32.mrf.mxu1  ;;  %v5260_v40 = vadd.f32 %v5259_v13, %v5229_v24  ;;  %5327 = vst [vmem:[%s8215_s7 + $0x1b8] sm:$0xff] %v5142_v57  ;;  %v5146_v39 = vadd.f32 %v5145_v34, %v4953_v12 }
 0x2c3   : > { %v5147_v58 = vpop.f32.mrf.mxu0  ;;  %v4963_v27 = vadd.f32 %v4962_v45, %v4770_v26 }
 0x2c4   : > { %v4964_v22 = vpop.f32.mrf.mxu1  ;;  %v5191_v54 = vadd.f32 %v5190_v32, %v5146_v39  ;;  %v5230_v43 = vmul.f32 %v5146_v39, %v5146_v39  ;;  %5328 = vst [vmem:[%s8215_s7 + $0x1c0] sm:$0xff] %v5146_v39  ;;  %v5148_v15 = vadd.f32 %v5147_v58, %v4955_v5 }
 0x2c5   : > { %v5149_v31 = vpop.f32.mrf.mxu0  ;;  %v4965_v55 = vadd.f32 %v4964_v22, %v4772_v38 }
 0x2c6   : > { %v4966_v52 = vpop.f32.mrf.mxu1  ;;  %v5261_v8 = vadd.f32 %v5260_v40, %v5230_v43  ;;  %5329 = vst [vmem:[%s8215_s7 + $0x1c8] sm:$0xff] %v5148_v15  ;;  %v5150_v35 = vadd.f32 %v5149_v31, %v4957_v7 }
 0x2c7   : > { %v5151_v1 = vpop.f32.mrf.mxu0  ;;  %v4967_v28 = vadd.f32 %v4966_v52, %v4774_v17 }
 0x2c8   : > { %v5192_v50 = vadd.f32 %v5191_v54, %v5150_v35  ;;  %v5231_v41 = vmul.f32 %v5150_v35, %v5150_v35  ;;  %5330 = vst [vmem:[%s8215_s7 + $0x1d0] sm:$0xff] %v5150_v35  ;;  %v5152_v19 = vadd.f32 %v5151_v1, %v4959_v20  ;;  %v4968_v29 = vpop.f32.mrf.mxu1 }
 0x2c9   : > { %v5155_v63 = vpop.f32.mrf.mxu0  ;;  %v4969_v33 = vadd.f32 %v4968_v29, %v4776_v36 }
 0x2ca   : > { %v5262_v56 = vadd.f32 %v5261_v8, %v5231_v41  ;;  %5331 = vst [vmem:[%s8215_s7 + $0x1d8] sm:$0xff] %v5152_v19  ;;  %v5156_v14 = vadd.f32 %v5155_v63, %v4963_v27 }
 0x2cb   : > { %v5157_v42 = vpop.f32.mrf.mxu0 }
 0x2cc   : > { %v5193_v47 = vadd.f32 %v5192_v50, %v5156_v14  ;;  %v5232_v30 = vmul.f32 %v5156_v14, %v5156_v14  ;;  %5332 = vst [vmem:[%s8215_s7 + $0x1e0] sm:$0xff] %v5156_v14  ;;  %v5158_v53 = vadd.f32 %v5157_v42, %v4965_v55 }
 0x2cd   : > { %v5159_v37 = vpop.f32.mrf.mxu0 }
 0x2ce   : > { %v5263_v62 = vadd.f32 %v5262_v56, %v5232_v30  ;;  %5333 = vst [vmem:[%s8215_s7 + $0x1e8] sm:$0xff] %v5158_v53  ;;  %v5160_v4 = vadd.f32 %v5159_v37, %v4967_v28 }
 0x2cf   : > { %v5161_v0 = vpop.f32.mrf.mxu0 }
 0x2d0   : > { %v5194_v6 = vadd.f32 %v5193_v47, %v5160_v4  ;;  %v5233_v2 = vmul.f32 %v5160_v4, %v5160_v4  ;;  %5334 = vst [vmem:[%s8215_s7 + $0x1f0] sm:$0xff] %v5160_v4  ;;  %v5162_v46 = vadd.f32 %v5161_v0, %v4969_v33 }
 0x2d2   : > { %v5195_v60 = vrot.slane %v5194_v6, 4  ;;  %v5264_v18 = vadd.f32 %v5263_v62, %v5233_v2  ;;  %5335 = vst [vmem:[%s8215_s7 + $0x1f8] sm:$0xff] %v5162_v46 }
 0x2d4   : > { %v5196_v49 = vadd.f32 %v5195_v60, %v5194_v6  ;;  %v5265_v48 = vrot.slane %v5264_v18, 4 }
 0x2d6   : > { %v5197_v59 = vrot.slane %v5196_v49, 2  ;;  %v5266_v13 = vadd.f32 %v5265_v48, %v5264_v18 }
 0x2d8   : > { %v5198_v23 = vadd.f32 %v5197_v59, %v5196_v49  ;;  %v5267_v12 = vrot.slane %v5266_v13, 2 }
 0x2da   : > { %v5199_v9 = vrot.slane %v5198_v23, 1  ;;  %v5268_v10 = vadd.f32 %v5267_v12, %v5266_v13 }
 0x2dc   : > { %v5200_v44 = vadd.f32 %v5199_v9, %v5198_v23  ;;  %v5269_v11 = vrot.slane %v5268_v10, 1 }
 0x2de   : > { %5201 = vst [vmem:[%s238_s10] sm:$0x1] %v5200_v44  ;;  %v5270_v32 = vadd.f32 %v5269_v11, %v5268_v10 }
 0x2e0   : > { %5271 = vst [vmem:[%s241_s14] sm:$0x1] %v5270_v32 }
 0x2e1 PF: > { %s16_s18 = sadd.s32 1, %s5905_s18  }
 0x2e2   : > { %p13_p4 = scmp.ge.s32.totalorder %s16_s18, 4  }
 0x2e4   :  { %15 = sbr.rel (!%p13_p4) target bundleno = 1 (0x1), region = 88 }

// kernel: resblock_forward.4
= control target key start
LH: loop header
LB: loop body
LE: loop exit
PB: predicated region body
PF: predicated region fallthrough
CT: control target
= control target key end

     0   :  { %s7444_s21 = smov 0   ;;  %s7446_s22 = smov 0   ;;  %s9039_s0 = inlined_call_operand.vmem [shape: f32[2,16,16,256], index: 0, kind: input, shape index: {}]   ;;  %s9040_s1 = inlined_call_operand.vmem [shape: bf16[1152,128], index: 1, kind: input, shape index: {}]   ;;  %s9041_s2 = inlined_call_operand.vmem [shape: f32[1,128], index: 2, kind: input, shape index: {}]   ;;  %s9042_s3 = inlined_call_operand.vmem [shape: f32[1,128], index: 3, kind: input, shape index: {}]   ;;  %s9043_s4 = inlined_call_operand.vmem [shape: f32[2,16,16,128], index: 4, kind: output, shape index: {0}]   ;;  %s9044_s5 = inlined_call_operand.vmem [shape: f32[2,1,128], index: 5, kind: output, shape index: {1}]   ;;  %s9045_s6 = inlined_call_operand.vmem [shape: f32[2,1,128], index: 6, kind: output, shape index: {2}]  }
   0x1   :  { %s7448_s23 = smov 0  }
   0x2 LB: > { %s6194_s24 = sadd.s32 4294967295, %s7406_s23   ;;  %s7461_s25 = sadd.s32 1, %s7406_s23   ;;  %s7406_s23 = sphi %s7448_s23, %s9079_s23   ;;  %s7402_s22 = sphi %s7446_s22, %s9078_s22   ;;  %s7398_s21 = sphi %s7444_s21, %s9077_s21  }
   0x3   : > { %s21_s26 = ssub.s32 %s7406_s23, %s7461_s25  ;;  %s24_s27 = sadd.s32 1, %s7402_s22 }
   0x4   : > { %p22_p0 = scmp.eq.s32.totalorder %s21_s26, 0  ;;  %p31_p1 = scmp.ne.s32.totalorder %s7402_s22, %s7398_s21 }
   0x5   : > { %p32_p2 = scmp.eq.s32.totalorder %s7406_s23, 0  ;;  %p6197_p4 = scmp.ge.s32.totalorder %s7406_s23, 2 }
   0x6   : > { %s7470_s28 = scalar_select %p22_p0, %s7402_s22, %s24_s27  }
   0x7   : > { %p33_p3 = por %p32_p2, %p31_p1  ;;  %207 = sbr.rel (%p6197_p4) target bundleno = 32 (0x20), region = 28 }
   0xc   : > { %210 = sbr.rel (!%p33_p3) target bundleno = 32 (0x20), region = 32  ;;  %s212_s29 = sand.u32 (%p33_p3), 1, %s7402_s22  }
   0xd   : > { %s6505_s30 = sshll.u32 (%p33_p3), %s7406_s23, 9  ;;  %s6198_s7 = sshll.u32 (%p33_p3), %s212_s29, 8 }
   0xe   : > { %s7478_s10 = scalar_lea.vmem (%p33_p3), %s9039_s0, %s6505_s30  ;;  %s7483_s11 = scalar_lea.vmem (%p33_p3), [#allocation4], %s6198_s7 }
   0xf   : > { %v308_v0 = vld [vmem:[%s7478_s10] sm:$0xff] (%p33_p3)  ;;  %v310_v1 = vld [vmem:[%s7478_s10 + $0x10] sm:$0xff] (%p33_p3) }
  0x10   : > { %v312_v2 = vld [vmem:[%s7478_s10 + $0x20] sm:$0xff] (%p33_p3)  ;;  %309 = vst [vmem:[%s7483_s11] sm:$0xff] (%p33_p3), %v308_v0  ;;  %311 = vst [vmem:[%s7483_s11 + $0x8] sm:$0xff] (%p33_p3), %v310_v1  ;;  %v314_v3 = vld [vmem:[%s7478_s10 + $0x30] sm:$0xff] (%p33_p3) }
  0x11   : > { %313 = vst [vmem:[%s7483_s11 + $0x10] sm:$0xff] %v312_v2  ;;  %v316_v4 = vld [vmem:[%s7478_s10 + $0x40] sm:$0xff]  ;;  %v318_v5 = vld [vmem:[%s7478_s10 + $0x50] sm:$0xff]  ;;  %315 = vst [vmem:[%s7483_s11 + $0x18] sm:$0xff] %v314_v3 }
  0x12   : > { %317 = vst [vmem:[%s7483_s11 + $0x20] sm:$0xff] %v316_v4  ;;  %319 = vst [vmem:[%s7483_s11 + $0x28] sm:$0xff] %v318_v5  ;;  %v320_v6 = vld [vmem:[%s7478_s10 + $0x60] sm:$0xff]  ;;  %v322_v7 = vld [vmem:[%s7478_s10 + $0x70] sm:$0xff] }
  0x13   : > { %v324_v8 = vld [vmem:[%s7478_s10 + $0x80] sm:$0xff]  ;;  %321 = vst [vmem:[%s7483_s11 + $0x30] sm:$0xff] %v320_v6  ;;  %323 = vst [vmem:[%s7483_s11 + $0x38] sm:$0xff] %v322_v7  ;;  %v326_v9 = vld [vmem:[%s7478_s10 + $0x90] sm:$0xff] }
  0x14   : > { %325 = vst [vmem:[%s7483_s11 + $0x40] sm:$0xff] %v324_v8  ;;  %v328_v10 = vld [vmem:[%s7478_s10 + $0xa0] sm:$0xff]  ;;  %v330_v11 = vld [vmem:[%s7478_s10 + $0xb0] sm:$0xff]  ;;  %327 = vst [vmem:[%s7483_s11 + $0x48] sm:$0xff] %v326_v9 }
  0x15   : > { %329 = vst [vmem:[%s7483_s11 + $0x50] sm:$0xff] %v328_v10  ;;  %331 = vst [vmem:[%s7483_s11 + $0x58] sm:$0xff] %v330_v11  ;;  %v332_v12 = vld [vmem:[%s7478_s10 + $0xc0] sm:$0xff]  ;;  %v334_v13 = vld [vmem:[%s7478_s10 + $0xd0] sm:$0xff] }
  0x16   : > { %v336_v14 = vld [vmem:[%s7478_s10 + $0xe0] sm:$0xff]  ;;  %333 = vst [vmem:[%s7483_s11 + $0x60] sm:$0xff] %v332_v12  ;;  %335 = vst [vmem:[%s7483_s11 + $0x68] sm:$0xff] %v334_v13  ;;  %v338_v15 = vld [vmem:[%s7478_s10 + $0xf0] sm:$0xff] }
  0x17   : > { %337 = vst [vmem:[%s7483_s11 + $0x70] sm:$0xff] %v336_v14  ;;  %v340_v16 = vld [vmem:[%s7478_s10 + $0x100] sm:$0xff]  ;;  %v342_v17 = vld [vmem:[%s7478_s10 + $0x110] sm:$0xff]  ;;  %339 = vst [vmem:[%s7483_s11 + $0x78] sm:$0xff] %v338_v15 }
  0x18   : > { %341 = vst [vmem:[%s7483_s11 + $0x80] sm:$0xff] %v340_v16  ;;  %343 = vst [vmem:[%s7483_s11 + $0x88] sm:$0xff] %v342_v17  ;;  %v344_v18 = vld [vmem:[%s7478_s10 + $0x120] sm:$0xff]  ;;  %v346_v19 = vld [vmem:[%s7478_s10 + $0x130] sm:$0xff] }
  0x19   : > { %v348_v20 = vld [vmem:[%s7478_s10 + $0x140] sm:$0xff]  ;;  %345 = vst [vmem:[%s7483_s11 + $0x90] sm:$0xff] %v344_v18  ;;  %347 = vst [vmem:[%s7483_s11 + $0x98] sm:$0xff] %v346_v19  ;;  %v350_v21 = vld [vmem:[%s7478_s10 + $0x150] sm:$0xff] }
  0x1a   : > { %349 = vst [vmem:[%s7483_s11 + $0xa0] sm:$0xff] %v348_v20  ;;  %v352_v22 = vld [vmem:[%s7478_s10 + $0x160] sm:$0xff]  ;;  %v354_v23 = vld [vmem:[%s7478_s10 + $0x170] sm:$0xff]  ;;  %351 = vst [vmem:[%s7483_s11 + $0xa8] sm:$0xff] %v350_v21 }
  0x1b   : > { %353 = vst [vmem:[%s7483_s11 + $0xb0] sm:$0xff] %v352_v22  ;;  %355 = vst [vmem:[%s7483_s11 + $0xb8] sm:$0xff] %v354_v23  ;;  %v356_v24 = vld [vmem:[%s7478_s10 + $0x180] sm:$0xff]  ;;  %v358_v25 = vld [vmem:[%s7478_s10 + $0x190] sm:$0xff] }
  0x1c   : > { %v360_v26 = vld [vmem:[%s7478_s10 + $0x1a0] sm:$0xff]  ;;  %357 = vst [vmem:[%s7483_s11 + $0xc0] sm:$0xff] %v356_v24  ;;  %359 = vst [vmem:[%s7483_s11 + $0xc8] sm:$0xff] %v358_v25  ;;  %v362_v27 = vld [vmem:[%s7478_s10 + $0x1b0] sm:$0xff] }
  0x1d   : > { %361 = vst [vmem:[%s7483_s11 + $0xd0] sm:$0xff] %v360_v26  ;;  %v364_v28 = vld [vmem:[%s7478_s10 + $0x1c0] sm:$0xff]  ;;  %v366_v29 = vld [vmem:[%s7478_s10 + $0x1d0] sm:$0xff]  ;;  %363 = vst [vmem:[%s7483_s11 + $0xd8] sm:$0xff] %v362_v27 }
  0x1e   : > { %365 = vst [vmem:[%s7483_s11 + $0xe0] sm:$0xff] %v364_v28  ;;  %367 = vst [vmem:[%s7483_s11 + $0xe8] sm:$0xff] %v366_v29  ;;  %v368_v30 = vld [vmem:[%s7478_s10 + $0x1e0] sm:$0xff]  ;;  %v370_v31 = vld [vmem:[%s7478_s10 + $0x1f0] sm:$0xff] }
  0x1f   : > { %369 = vst [vmem:[%s7483_s11 + $0xf0] sm:$0xff] %v368_v30  ;;  %371 = vst [vmem:[%s7483_s11 + $0xf8] sm:$0xff] %v370_v31 }
  0x20 PF: > { %p6201_p5 = scmp.ge.s32.totalorder %s7406_s23, 1  ;;  %p376_p6 = scmp.lt.s32.totalorder %s7406_s23, 3 }
  0x22   : > { %p377_p7 = pnand %p6201_p5, %p376_p6 }
  0x24   : > { %380 = sbr.rel (%p377_p7) target bundleno = 782 (0x30e), region = 70 }
  0x29   : > { %v7100_v32 = vld [vmem:[%s9040_s1 + $0x78] sm:$0xff]   ;;  %v7408_v34 = vmov 0   ;;  %v7102_v35 = vld [vmem:[%s9040_s1 + $0x70] sm:$0xff]   ;;  %v7104_v37 = vld [vmem:[%s9040_s1 + $0x68] sm:$0xff]   ;;  %s383_s8 = sand.u32 1, %s7398_s21   ;;  %vm1046_vm2 = vcmask 1043456  }
  0x2a   : > { %v7101_v33 = vld [vmem:[%s9040_s1 + $0x38] sm:$0xff]   ;;  %588 = vst [vmem:[#allocation2] sm:$0xf] %v7408_v34  ;;  %589 = vst [vmem:[#allocation2 + $0x4] sm:$0xf] %v7408_v34  ;;  %6539 = vmatprep.subr.bf16.mxu0 %v7100_v32  ;;  %7059 = vmatprep.subr.bf16.mxu1 %v7100_v32  ;;  %v7103_v36 = vld [vmem:[%s9040_s1 + $0x30] sm:$0xff]  }
  0x2b   : > { %590 = vst [vmem:[#allocation2 + $0x8] sm:$0x1] %v7408_v34  ;;  %591 = vst [vmem:[#allocation2 + $0xc] sm:$0xf] %v7408_v34  ;;  %6540 = vmatpush3.bf16.msra.mxu0 %v7101_v33  ;;  %7067 = vmatpush3.bf16.msra.mxu1 %v7101_v33  ;;  %v7105_v38 = vld [vmem:[%s9040_s1 + $0x28] sm:$0xff]   ;;  %v7106_v39 = vld [vmem:[%s9040_s1 + $0x60] sm:$0xff]  }
  0x2c   : > { %592 = vst [vmem:[#allocation2 + $0x10] sm:$0xf] %v7408_v34  ;;  %593 = vst [vmem:[#allocation2 + $0x14] sm:$0x1] %v7408_v34  ;;  %6541 = vmatprep.subr.bf16.mxu0 %v7102_v35  ;;  %7060 = vmatprep.subr.bf16.mxu1 %v7102_v35  ;;  %v7107_v40 = vld [vmem:[%s9040_s1 + $0x20] sm:$0xff]   ;;  %v7108_v41 = vld [vmem:[%s9040_s1 + $0x58] sm:$0xff]  }
  0x2d   : > { %594 = vst [vmem:[#allocation2 + $0x18] sm:$0xf] %v7408_v34  ;;  %595 = vst [vmem:[#allocation2 + $0x1c] sm:$0xf] %v7408_v34  ;;  %s6202_s13 = sshll.u32 %s383_s8, 8  ;;  %v7109_v42 = vld [vmem:[%s9040_s1 + $0x18] sm:$0xff]  }
  0x2e   : > { %596 = vst [vmem:[#allocation2 + $0x20] sm:$0x1] %v7408_v34  ;;  %597 = vst [vmem:[#allocation2 + $0x24] sm:$0xf] %v7408_v34  ;;  %v7110_v43 = vld [vmem:[%s9040_s1 + $0x50] sm:$0xff]   ;;  %s7585_s19 = scalar_lea.vmem [#allocation4], %s6202_s13 }
  0x2f   : > { %598 = vst [vmem:[#allocation2 + $0x28] sm:$0xf] %v7408_v34  ;;  %599 = vst [vmem:[#allocation2 + $0x2c] sm:$0x1] %v7408_v34  ;;  %6542 = vmatpush3.bf16.msra.mxu0 %v7103_v36  ;;  %7068 = vmatpush3.bf16.msra.mxu1 %v7103_v36  ;;  %v7111_v47 = vld [vmem:[%s9040_s1 + $0x10] sm:$0xff]   ;;  %v430_v53 = vld [vmem:[%s7585_s19] sm:$0xff] }
  0x30   : > { %600 = vst [vmem:[#allocation2 + $0x30] sm:$0xf] %v7408_v34  ;;  %601 = vst [vmem:[#allocation2 + $0x34] sm:$0xf] %v7408_v34  ;;  %6543 = vmatprep.subr.bf16.mxu0 %v7104_v37  ;;  %7061 = vmatprep.subr.bf16.mxu1 %v7104_v37  ;;  %vm1275_vm0 = vsmask.f32 3328 }
  0x31   : > { %602 = vst [vmem:[#allocation2 + $0x38] sm:$0x1] %v7408_v34  ;;  %603 = vst [vmem:[#allocation2 + $0x3c] sm:$0xf] %v7408_v34  ;;  %v1163_v44 = vld [vmem:[#allocation2] sm:$0xf] }
  0x32   : > { %604 = vst [vmem:[#allocation2 + $0x40] sm:$0xf] %v7408_v34  ;;  %605 = vst [vmem:[#allocation2 + $0x44] sm:$0x1] %v7408_v34  ;;  %v1164_v45 = vld [vmem:[#allocation2 + $0x4] sm:$0xf] }
  0x33   : > { %606 = vst [vmem:[#allocation2 + $0x48] sm:$0xf] %v7408_v34  ;;  %607 = vst [vmem:[#allocation2 + $0x4c] sm:$0xf] %v7408_v34  ;;  %6544 = vmatpush3.bf16.msra.mxu0 %v7105_v38  ;;  %7069 = vmatpush3.bf16.msra.mxu1 %v7105_v38  ;;  %v1227_v46 = vld [vmem:[#allocation2] sm:$0xf] }
  0x34   : > { %608 = vst [vmem:[#allocation2 + $0x50] sm:$0x1] %v7408_v34  ;;  %609 = vst [vmem:[#allocation2 + $0x54] sm:$0xf] %v7408_v34  ;;  %6545 = vmatprep.subr.bf16.mxu0 %v7106_v39  ;;  %7062 = vmatprep.subr.bf16.mxu1 %v7106_v39  ;;  %v1228_v48 = vld [vmem:[#allocation2 + $0x4] sm:$0xf] }
  0x35   : > { %610 = vst [vmem:[#allocation2 + $0x58] sm:$0xf] %v7408_v34  ;;  %611 = vst [vmem:[#allocation2 + $0x5c] sm:$0x1] %v7408_v34  ;;  %v1229_v49 = vld [vmem:[#allocation2 + $0x8] sm:$0x1] }
  0x36   : > { %612 = vst [vmem:[#allocation2 + $0x60] sm:$0xf] %v7408_v34  ;;  %613 = vst [vmem:[#allocation2 + $0x64] sm:$0xf] %v7408_v34  ;;  %vm1276_vm1 = vsmask.f32 7440 }
  0x37   : > { %614 = vst [vmem:[#allocation2 + $0x68] sm:$0x1] %v7408_v34  ;;  %615 = vst [vmem:[#allocation2 + $0x6c] sm:$0xf] %v7408_v34  ;;  %6546 = vmatpush3.bf16.msra.mxu0 %v7107_v40  ;;  %7070 = vmatpush3.bf16.msra.mxu1 %v7107_v40  ;;  %v1279_v50 = vshrl.u32 %v1227_v46, 16  ;;  %v1282_v51 = vshll.u32 %v1227_v46, 16 }
  0x38   : > { %616 = vst [vmem:[#allocation2 + $0x70] sm:$0xf] %v7408_v34  ;;  %617 = vst [vmem:[#allocation2 + $0x74] sm:$0x1] %v7408_v34  ;;  %6547 = vmatprep.subr.bf16.mxu0 %v7108_v41  ;;  %7063 = vmatprep.subr.bf16.mxu1 %v7108_v41  ;;  %v1288_v52 = vshll.u32 %v1228_v48, 16  ;;  %v7112_v54 = vld [vmem:[%s9040_s1 + $0x48] sm:$0xff]  }
  0x39   : > { %618 = vst [vmem:[#allocation2 + $0x78] sm:$0xf] %v7408_v34  ;;  %619 = vst [vmem:[#allocation2 + $0x7c] sm:$0xf] %v7408_v34  ;;  %v1292_v55 = vshrl.u32 %v1228_v48, 16  ;;  %v1298_v56 = vshll.u32 %v1229_v49, 16 }
  0x3a   : > { %620 = vst [vmem:[#allocation2 + $0x80] sm:$0x1] %v7408_v34  ;;  %621 = vst [vmem:[#allocation2 + $0x84] sm:$0xf] %v7408_v34  ;;  %v431_v57 = vld [vmem:[%s7585_s19 + $0x8] sm:$0xff]  ;;  %v1281_v59 = vrot.slane %v1279_v50, 4 }
  0x3b   : > { %622 = vst [vmem:[#allocation2 + $0x88] sm:$0xf] %v7408_v34  ;;  %623 = vst [vmem:[#allocation2 + $0x8c] sm:$0x1] %v7408_v34  ;;  %6548 = vmatpush3.bf16.msra.mxu0 %v7109_v42  ;;  %7071 = vmatpush3.bf16.msra.mxu1 %v7109_v42  ;;  %v7595_v58 = vld [vmem:[%s9041_s2] ss:$0 sm:$0xff] }
  0x3c   : > { %624 = vst [vmem:[#allocation2 + $0x90] sm:$0xf] %v7408_v34  ;;  %625 = vst [vmem:[#allocation2 + $0x94] sm:$0xf] %v7408_v34  ;;  %6549 = vmatprep.subr.bf16.mxu0 %v7110_v43  ;;  %7064 = vmatprep.subr.bf16.mxu1 %v7110_v43  ;;  %v1284_v60 = vrot.slane %v1282_v51, 5  ;;  %v1290_v61 = vrot.slane %v1288_v52, 5  ;;  %v469_v62 = vmul.f32 %v7595_v58, %v430_v53 }
  0x3d   : > { %626 = vst [vmem:[#allocation2 + $0x98] sm:$0x1] %v7408_v34  ;;  %627 = vst [vmem:[#allocation2 + $0x9c] sm:$0xf] %v7408_v34  ;;  %v7601_v63 = vld [vmem:[%s9042_s3] ss:$0 sm:$0xff]  ;;  %v470_v2 = vmul.f32 %v7595_v58, %v431_v57 }
  0x3e   : > { %628 = vst [vmem:[#allocation2 + $0xa0] sm:$0xf] %v7408_v34  ;;  %629 = vst [vmem:[#allocation2 + $0xa4] sm:$0x1] %v7408_v34  ;;  %v452_v0 = vld [vmem:[%s7585_s19 + $0xb0] sm:$0xff]  ;;  %v1294_v1 = vrot.slane %v1292_v55, 4  ;;  %v1285_v4 = vor.u32 %v1284_v60, %v1281_v59  ;;  %v508_v6 = vadd.f32 %v7601_v63, %v469_v62 }
  0x3f   : > { %630 = vst [vmem:[#allocation2 + $0xa8] sm:$0xf] %v7408_v34  ;;  %631 = vst [vmem:[#allocation2 + $0xac] sm:$0xf] %v7408_v34  ;;  %v7113_v3 = vld [vmem:[%s9040_s1 + $0x8] sm:$0xff]   ;;  %v1300_v5 = vrot.slane %v1298_v56, 5  ;;  %6550 = vmatpush3.bf16.msra.mxu0 %v7111_v47  ;;  %7072 = vmatpush3.bf16.msra.mxu1 %v7111_v47  ;;  %v509_v10 = vadd.f32 %v7601_v63, %v470_v2  ;;  %v491_v12 = vmul.f32 %v7595_v58, %v452_v0 }
  0x40   : > { %632 = vst [vmem:[#allocation2 + $0xb0] sm:$0x1] %v7408_v34  ;;  %633 = vst [vmem:[#allocation2 + $0xb4] sm:$0xf] %v7408_v34  ;;  %vm1053_vm3 = vcmask 1040384   ;;  %v7114_v7 = vld [vmem:[%s9040_s1 + $0x40] sm:$0xff]   ;;  %v1295_v9 = vor.u32 %v1294_v1, %v1290_v61  ;;  %6551 = vmatprep.subr.bf16.mxu0 %v7112_v54  ;;  %7065 = vmatprep.subr.bf16.mxu1 %v7112_v54 }
  0x41   : > { %634 = vst [vmem:[#allocation2 + $0xb8] sm:$0xf] %v7408_v34  ;;  %635 = vst [vmem:[#allocation2 + $0xbc] sm:$0x1] %v7408_v34  ;;  %vm722_vm5 = vsmask.f32 256  ;;  %v530_v19 = vadd.f32 %v7601_v63, %v491_v12 }
  0x42   : > { %636 = vst [vmem:[#allocation2 + $0xc0] sm:$0xf] %v7408_v34  ;;  %637 = vst [vmem:[#allocation2 + $0xc4] sm:$0xf] %v7408_v34  ;;  %v453_v11 = vld [vmem:[%s7585_s19 + $0xb8] sm:$0xff]  ;;  %v1286_v13 = vrot.slane %v1285_v4, 4 }
  0x43   : > { %638 = vst [vmem:[#allocation2 + $0xc8] sm:$0x1] %v7408_v34  ;;  %639 = vst [vmem:[#allocation2 + $0xcc] sm:$0xf] %v7408_v34  ;;  %v540_v14 = vmax.f32 %v508_v6, 0.0  ;;  %v492_v15 = vmul.f32 %v7595_v58, %v453_v11  ;;  %v7115_v16 = vld [vmem:[%s9040_s1] sm:$0xff]   ;;  %6552 = vmatpush3.bf16.msra.mxu0 %v7113_v3  ;;  %7073 = vmatpush3.bf16.msra.mxu1 %v7113_v3 }
  0x44   : > { %640 = vst [vmem:[#allocation2 + $0xd0] sm:$0xf] %v7408_v34  ;;  %641 = vst [vmem:[#allocation2 + $0xd4] sm:$0x1] %v7408_v34  ;;  %vm723_vm6 = vsmask.f32 4368  ;;  %6553 = vmatprep.subr.bf16.mxu0 %v7114_v7  ;;  %7066 = vmatprep.subr.bf16.mxu1 %v7114_v7 }
  0x45   : > { %1195 = vst [vmem:[#allocation3] sm:$0xf] %v1163_v44  ;;  %1196 = vst [vmem:[#allocation3 + $0x24] sm:$0xf] %v1164_v45  ;;  %v1296_v17 = vrot.slane %v1295_v9, 4  ;;  %v541_v18 = vmax.f32 %v509_v10, 0.0  ;;  %v6507_v21 = vpack.c.bf16 %v540_v14, %v540_v14  ;;  %v531_v22 = vadd.f32 %v7601_v63, %v492_v15 }
  0x46   : > { %vm7614_vm4 = vmor %vm1275_vm0, %vm1276_vm1  ;;  %vm1047_vm7 = vsmask.f32 7938  ;;  %v562_v25 = vmax.f32 %v530_v19, 0.0  ;;  %v7124_v26 = vld [vmem:[%s9040_s1 + $0xf8] sm:$0xff]   ;;  %v1049_v33 = vld [vmem:[#allocation2 + $0xc] sm:$0xf] }
  0x47   : > { %v1291_v20 = vsel %vm7614_vm4, %v1286_v13, %v1290_v61  ;;  %v1301_v23 = vsel %vm7614_vm4, %v1296_v17, %v1300_v5  ;;  %v6508_v24 = vpack.c.bf16 %v541_v18, %v541_v18  ;;  %v726_v27 = vshrl.u32 %v6507_v21, 16  ;;  %v7125_v30 = vld [vmem:[%s9040_s1 + $0x178] sm:$0xff]   ;;  %vm7639_vm8 = vmand %vm1053_vm3, %vm722_vm5  ;;  %6554 = vmatpush3.bf16.msra.mxu0 %v7115_v16  ;;  %7074 = vmatpush3.bf16.msra.mxu1 %v7115_v16  ;;  %v432_v42 = vld [vmem:[%s7585_s19 + $0x10] sm:$0xff]  ;;  %p418_p8 = scmp.lt.s32.totalorder %s6194_s24, 1 }
  0x48   : > { %1694 = vst [vmem:[#allocation3 + $0x4] sm:$0xf] %v1291_v20  ;;  %1695 = vst [vmem:[#allocation3 + $0x28] sm:$0xf] %v1301_v23  ;;  %v729_v28 = vshll.u32 %v6507_v21, 16  ;;  %v563_v29 = vmax.f32 %v531_v22, 0.0  ;;  %v6529_v34 = vpack.c.bf16 %v562_v25, %v562_v25  ;;  %6651 = vmatprep.subr.bf16.mxu1 %v7124_v26  ;;  %6763 = vmatprep.subr.bf16.mxu0 %v7125_v30 }
  0x49   : > { %v734_v31 = vshrl.u32 %v6508_v24, 16  ;;  %v737_v32 = vshll.u32 %v6508_v24, 16  ;;  %v728_v35 = vrot.slane %v726_v27, 7  ;;  %vm7645_vm9 = vmand %vm1046_vm2, %vm1047_vm7  ;;  %v433_v43 = vld [vmem:[%s7585_s19 + $0x18] sm:$0xff]  ;;  %v454_v50 = vld [vmem:[%s7585_s19 + $0xc0] sm:$0xff]  ;;  %v471_v56 = vmul.f32 %v7595_v58, %v432_v42  ;;  %s9081_s24 = smov (!%p418_p8, %s6194_s24), 1 }
  0x4a   : > { %v6530_v37 = vpack.c.bf16 %v563_v29, %v563_v29  ;;  %v913_v40 = vshrl.u32 %v6529_v34, 16  ;;  %v916_v41 = vshll.u32 %v6529_v34, 16  ;;  %vm7653_vm10 = vmor %vm722_vm5, %vm723_vm6  ;;  %v1055_v47 = vld [vmem:[#allocation2 + $0x14] sm:$0x1]  ;;  %v1128_v54 = vld [vmem:[#allocation2 + $0x90] sm:$0xf]  ;;  %v472_v61 = vmul.f32 %v7595_v58, %v433_v43  ;;  %s428_s14 = scalar_lea.vmem %s9045_s6, %s9081_s24 }
  0x4b   : > { %v736_v38 = vrot.slane %v734_v31, 7  ;;  %v731_v45 = vor.u32 %v729_v28, %v728_v35  ;;  %v732_v46 = vrot.slane %v728_v35, 4  ;;  %v1132_v55 = vld [vmem:[#allocation2 + $0x98] sm:$0x1]  ;;  %v455_v62 = vld [vmem:[%s7585_s19 + $0xc8] sm:$0xff]  ;;  %v493_v0 = vmul.f32 %v7595_v58, %v454_v50  ;;  %v7140_v18 = vld [vmem:[%s9040_s1 + $0x170] sm:$0xff]  }
  0x4c   : > { %v921_v48 = vshrl.u32 %v6530_v37, 16  ;;  %v924_v49 = vshll.u32 %v6530_v37, 16  ;;  %v915_v53 = vrot.slane %v913_v40, 7  ;;  %v7128_v60 = vld [vmem:[%s9040_s1 + $0x138] sm:$0xff]   ;;  %v510_v10 = vadd.f32 %v7601_v63, %v471_v56  ;;  %v7142_v24 = vld [vmem:[%s9040_s1 + $0x130] sm:$0xff]   ;;  %v435_v43 = vld [vmem:[%s7585_s19 + $0x28] sm:$0xff] }
  0x4d   : > { %v739_v51 = vor.u32 %v737_v32, %v736_v38  ;;  %v741_v52 = vrot.slane %v736_v38, 4  ;;  %v1050_v57 = vsel %vm7645_vm9, %v731_v45, %v1049_v33  ;;  %v7116_v1 = vld [vmem:[#allocation3] ss:$36 sps:$4 sm:$0xff]   ;;  %v511_v11 = vadd.f32 %v7601_v63, %v472_v61  ;;  %s6506_s7 = sshll.u32 %s9081_s24, 8 }
  0x4e   : > { %v923_v59 = vrot.slane %v921_v48, 7  ;;  %1051 = vst [vmem:[#allocation2 + $0xc] sm:$0xf] %v1050_v57  ;;  %v918_v5 = vor.u32 %v916_v41, %v915_v53  ;;  %v919_v6 = vrot.slane %v915_v53, 4  ;;  %v494_v13 = vmul.f32 %v7595_v58, %v455_v62  ;;  %v434_v25 = vld [vmem:[%s7585_s19 + $0x20] sm:$0xff]  ;;  %s8906_s9 = scalar_lea.vmem %s9043_s4, %s6506_s7 }
  0x4f   : > { %v7118_v2 = vld [vmem:[#allocation3 + $0x4] ss:$36 sps:$4 sm:$0xff]   ;;  %v740_v3 = vsel %vm7653_vm10, %v732_v46, %v739_v51  ;;  %v1056_v4 = vsel %vm7639_vm8, %v741_v52, %v1055_v47  ;;  %v532_v14 = vadd.f32 %v7601_v63, %v493_v0  ;;  %v542_v17 = vmax.f32 %v510_v10, 0.0 }
  0x50   : > { %1052 = vst [vmem:[#allocation2 + $0x10] sm:$0xf] %v740_v3  ;;  %1057 = vst [vmem:[#allocation2 + $0x14] sm:$0x1] %v1056_v4  ;;  %v926_v7 = vor.u32 %v924_v49, %v923_v59  ;;  %v928_v9 = vrot.slane %v923_v59, 4  ;;  %5170 = vmatprep.mubr.bf16.mxu0 %v7118_v2  ;;  %v1129_v12 = vsel %vm7645_vm9, %v918_v5, %v1128_v54  ;;  %v543_v19 = vmax.f32 %v511_v11, 0.0 }
  0x51   : > { %5171 = vmatmul.mubr.bf16.vlgmr.msra.gmra.mxu0 %v7116_v1  ;;  %1130 = vst [vmem:[#allocation2 + $0x90] sm:$0xf] %v1129_v12  ;;  %v533_v20 = vadd.f32 %v7601_v63, %v494_v13  ;;  %v564_v21 = vmax.f32 %v532_v14, 0.0  ;;  %v6509_v22 = vpack.c.bf16 %v542_v17, %v542_v17  ;;  %v473_v30 = vmul.f32 %v7595_v58, %v434_v25 }
  0x52   : > { %v927_v15 = vsel %vm7653_vm10, %v919_v6, %v926_v7  ;;  %v1133_v16 = vsel %vm7639_vm8, %v928_v9, %v1132_v55  ;;  %6764 = vmatpush3.bf16.msra.mxu0 %v7128_v60  ;;  %v7690_v34 = vpack.c.bf16 %v543_v19, %v543_v19  ;;  %v474_v49 = vmul.f32 %v7595_v58, %v435_v43  ;;  %v1058_v9 = vld [vmem:[#allocation2 + $0x18] sm:$0xf] }
  0x53   : > { %1131 = vst [vmem:[#allocation2 + $0x94] sm:$0xf] %v927_v15  ;;  %1134 = vst [vmem:[#allocation2 + $0x98] sm:$0x1] %v1133_v16  ;;  %6765 = vmatprep.subr.bf16.mxu0 %v7140_v18  ;;  %v565_v23 = vmax.f32 %v533_v20, 0.0  ;;  %v743_v28 = vshrl.u32 %v6509_v22, 16  ;;  %v7692_v35 = vpack.c.bf16 %v564_v21, %v564_v21  ;;  %v512_v50 = vadd.f32 %v7601_v63, %v473_v30 }
  0x54   : > { %v746_v29 = vshll.u32 %v6509_v22, 16  ;;  %v513_v62 = vadd.f32 %v7601_v63, %v474_v49  ;;  %v751_v16 = vshrl.u32 %v7690_v34, 16  ;;  %v754_v17 = vshll.u32 %v7690_v34, 16  ;;  %v1062_v22 = vld [vmem:[#allocation2 + $0x20] sm:$0x1] }
  0x55   : > { %v1165_v26 = vld [vmem:[#allocation2 + $0xc] sm:$0xf]  ;;  %v7694_v37 = vpack.c.bf16 %v565_v23, %v565_v23  ;;  %v7697_v48 = vrot.slane %v743_v28, 7  ;;  %v930_v25 = vshrl.u32 %v7692_v35, 16  ;;  %v1135_v30 = vld [vmem:[#allocation2 + $0x9c] sm:$0xf] }
  0x56   : > { %v1230_v27 = vld [vmem:[#allocation2 + $0xc] sm:$0xf]  ;;  %1197 = vst [vmem:[#allocation3 + $0x48] sm:$0xf] %v1165_v26  ;;  %6766 = vmatpush3.bf16.msra.mxu0 %v7142_v24  ;;  %v753_v24 = vrot.slane %v751_v16, 7  ;;  %v933_v26 = vshll.u32 %v7692_v35, 16 }
  0x57   : > { %v1166_v31 = vld [vmem:[#allocation2 + $0x10] sm:$0xf]  ;;  %v1232_v33 = vld [vmem:[#allocation2 + $0x14] sm:$0x1]  ;;  %v1303_v38 = vshrl.u32 %v1230_v27, 16  ;;  %v1306_v40 = vshll.u32 %v1230_v27, 16  ;;  %v748_v61 = vor.u32 %v746_v29, %v7697_v48 }
  0x58   : > { %v1231_v32 = vld [vmem:[#allocation2 + $0x10] sm:$0xf]  ;;  %1198 = vst [vmem:[#allocation3 + $0x6c] sm:$0xf] %v1166_v31  ;;  %v1322_v45 = vshll.u32 %v1232_v33, 16  ;;  %v749_v7 = vrot.slane %v7697_v48, 4  ;;  %v756_v33 = vor.u32 %v754_v17, %v753_v24 }
  0x59   : > { %v1312_v41 = vshll.u32 %v1231_v32, 16  ;;  %v1316_v42 = vshrl.u32 %v1231_v32, 16  ;;  %v1187_v46 = vld [vmem:[#allocation2 + $0x90] sm:$0xf]  ;;  %v1305_v51 = vrot.slane %v1303_v38, 4  ;;  %v1308_v52 = vrot.slane %v1306_v40, 5 }
  0x5a   : > { %v1263_v47 = vld [vmem:[#allocation2 + $0x90] sm:$0xf]  ;;  %v1188_v55 = vld [vmem:[#allocation2 + $0x94] sm:$0xf]  ;;  %1219 = vst [vmem:[#allocation3 + $0x360] sm:$0xf] %v1187_v46  ;;  %v1059_v21 = vsel %vm7645_vm9, %v748_v61, %v1058_v9 }
  0x5b   : > { %v1314_v53 = vrot.slane %v1312_v41, 5  ;;  %v1318_v54 = vrot.slane %v1316_v42, 4  ;;  %v1324_v56 = vrot.slane %v1322_v45, 5  ;;  %1220 = vst [vmem:[#allocation3 + $0x384] sm:$0xf] %v1188_v55  ;;  %v1567_v60 = vshrl.u32 %v1263_v47, 16 }
  0x5c   : > { %v1264_v57 = vld [vmem:[#allocation2 + $0x94] sm:$0xf]  ;;  %v1265_v59 = vld [vmem:[#allocation2 + $0x98] sm:$0x1]  ;;  %v1309_v0 = vor.u32 %v1308_v52, %v1305_v51  ;;  %v1570_v2 = vshll.u32 %v1263_v47, 16  ;;  %v938_v28 = vshrl.u32 %v7694_v37, 16 }
  0x5d   : > { %v1319_v1 = vor.u32 %v1318_v54, %v1314_v53  ;;  %v1576_v3 = vshll.u32 %v1264_v57, 16  ;;  %v1569_v4 = vrot.slane %v1567_v60, 4  ;;  %v1580_v5 = vshrl.u32 %v1264_v57, 16  ;;  %1060 = vst [vmem:[#allocation2 + $0x18] sm:$0xf] %v1059_v21  ;;  %v456_v40 = vld [vmem:[%s7585_s19 + $0xd0] sm:$0xff] }
  0x5e   : > { %v1586_v6 = vshll.u32 %v1265_v59, 16  ;;  %v1310_v10 = vrot.slane %v1309_v0, 4  ;;  %v1572_v12 = vrot.slane %v1570_v2, 5  ;;  %v941_v29 = vshll.u32 %v7694_v37, 16  ;;  %v1139_v48 = vld [vmem:[#allocation2 + $0xa4] sm:$0x1] }
  0x5f   : > { %v1320_v11 = vrot.slane %v1319_v1, 4  ;;  %v1578_v13 = vrot.slane %v1576_v3, 5  ;;  %v1582_v14 = vrot.slane %v1580_v5, 4  ;;  %v544_v31 = vmax.f32 %v512_v50, 0.0  ;;  %v436_v54 = vld [vmem:[%s7585_s19 + $0x30] sm:$0xff]  ;;  %v437_v55 = vld [vmem:[%s7585_s19 + $0x38] sm:$0xff] }
  0x60   : > { %v1588_v15 = vrot.slane %v1586_v6, 5  ;;  %v1315_v18 = vsel %vm7614_vm4, %v1310_v10, %v1314_v53  ;;  %v1573_v20 = vor.u32 %v1572_v12, %v1569_v4  ;;  %v758_v34 = vrot.slane %v753_v24, 4  ;;  %v457_v53 = vld [vmem:[%s7585_s19 + $0xd8] sm:$0xff]  ;;  %v7126_v3 = vld [vmem:[#allocation3 + $0x48] ss:$36 sps:$4 sm:$0xff]   ;;  %v458_v16 = vld [vmem:[%s7585_s19 + $0xe0] sm:$0xff] }
  0x61   : > { %v1325_v19 = vsel %vm7614_vm4, %v1320_v11, %v1324_v56  ;;  %1696 = vst [vmem:[#allocation3 + $0x4c] sm:$0xf] %v1315_v18  ;;  %v1583_v23 = vor.u32 %v1582_v14, %v1578_v13  ;;  %v932_v38 = vrot.slane %v930_v25, 7  ;;  %v940_v42 = vrot.slane %v938_v28, 7  ;;  %v1065_v6 = vld [vmem:[#allocation2 + $0x24] sm:$0xf] }
  0x62   : > { %1697 = vst [vmem:[#allocation3 + $0x70] sm:$0xf] %v1325_v19  ;;  %v1574_v27 = vrot.slane %v1573_v20, 4  ;;  %v545_v43 = vmax.f32 %v513_v62, 0.0  ;;  %v6511_v35 = vpack.c.bf16 %v544_v31, %v544_v31  ;;  %v757_v37 = vsel %vm7653_vm10, %v749_v7, %v756_v33  ;;  %v7127_v17 = vld [vmem:[%s9040_s1 + $0xb8] sm:$0xff]  }
  0x63   : > { %v1584_v32 = vrot.slane %v1583_v23, 4  ;;  %v1063_v46 = vsel %vm7639_vm8, %v758_v34, %v1062_v22  ;;  %v935_v47 = vor.u32 %v933_v26, %v932_v38  ;;  %1061 = vst [vmem:[#allocation2 + $0x1c] sm:$0xf] %v757_v37  ;;  %v936_v49 = vrot.slane %v932_v38, 4  ;;  %v1069_v18 = vld [vmem:[#allocation2 + $0x2c] sm:$0x1] }
  0x64   : > { %v1579_v41 = vsel %vm7614_vm4, %v1574_v27, %v1578_v13  ;;  %1064 = vst [vmem:[#allocation2 + $0x20] sm:$0x1] %v1063_v46  ;;  %v943_v50 = vor.u32 %v941_v29, %v940_v42  ;;  %v945_v51 = vrot.slane %v940_v42, 4  ;;  %v6512_v52 = vpack.c.bf16 %v545_v43, %v545_v43  ;;  %v1167_v4 = vld [vmem:[#allocation2 + $0x18] sm:$0xf]  ;;  %v459_v22 = vld [vmem:[%s7585_s19 + $0xe8] sm:$0xff] }
  0x65   : > { %v1589_v45 = vsel %vm7614_vm4, %v1584_v32, %v1588_v15  ;;  %1718 = vst [vmem:[#allocation3 + $0x364] sm:$0xf] %v1579_v41  ;;  %v1136_v56 = vsel %vm7645_vm9, %v935_v47, %v1135_v30  ;;  %v760_v57 = vshrl.u32 %v6511_v35, 16  ;;  %v763_v59 = vshll.u32 %v6511_v35, 16  ;;  %v1233_v5 = vld [vmem:[#allocation2 + $0x18] sm:$0xf] }
  0x66   : > { %1719 = vst [vmem:[#allocation3 + $0x388] sm:$0xf] %v1589_v45  ;;  %v495_v60 = vmul.f32 %v7595_v58, %v456_v40  ;;  %v944_v62 = vsel %vm7653_vm10, %v936_v49, %v943_v50  ;;  %1137 = vst [vmem:[#allocation2 + $0x9c] sm:$0xf] %v1136_v56  ;;  %v1140_v0 = vsel %vm7639_vm8, %v945_v51, %v1139_v48  ;;  %v768_v1 = vshrl.u32 %v6512_v52, 16  ;;  %v7129_v23 = vld [vmem:[%s9040_s1 + $0xf0] sm:$0xff]  }
  0x67   : > { %v771_v2 = vshll.u32 %v6512_v52, 16  ;;  %1138 = vst [vmem:[#allocation2 + $0xa0] sm:$0xf] %v944_v62  ;;  %1141 = vst [vmem:[#allocation2 + $0xa4] sm:$0x1] %v1140_v0  ;;  %v496_v7 = vmul.f32 %v7595_v58, %v457_v53  ;;  %v475_v10 = vmul.f32 %v7595_v58, %v436_v54  ;;  %v476_v11 = vmul.f32 %v7595_v58, %v437_v55  ;;  %v7130_v45 = vld [vmem:[%s9040_s1 + $0xb0] sm:$0xff]  }
  0x68   : > { %v534_v9 = vadd.f32 %v7601_v63, %v495_v60  ;;  %1199 = vst [vmem:[#allocation3 + $0x90] sm:$0xf] %v1167_v4  ;;  %v1327_v12 = vshrl.u32 %v1233_v5, 16  ;;  %v1330_v13 = vshll.u32 %v1233_v5, 16  ;;  %v762_v14 = vrot.slane %v760_v57, 7  ;;  %v7158_v50 = vld [vmem:[%s9040_s1 + $0x168] sm:$0xff]  }
  0x69   : > { %v7119_v61 = vld [vmem:[#allocation3 + $0x4c] ss:$36 sps:$4 sm:$0xff]   ;;  %v770_v15 = vrot.slane %v768_v1, 7  ;;  %v535_v19 = vadd.f32 %v7601_v63, %v496_v7  ;;  %v7745_v21 = vadd.f32 %v7601_v63, %v475_v10  ;;  %v7121_v28 = vld [vmem:[#allocation3 + $0x360] ss:$36 sps:$4 sm:$0xff]   ;;  %v7752_v32 = vadd.f32 %v7601_v63, %v476_v11  ;;  %6767 = vmatprep.subr.bf16.mxu0 %v7158_v50 }
  0x6a   : > { %5178 = vmatprep.mubr.bf16.mxu0 %v7119_v61  ;;  %v566_v20 = vmax.f32 %v534_v9, 0.0  ;;  %v1329_v24 = vrot.slane %v1327_v12, 4  ;;  %v1332_v25 = vrot.slane %v1330_v13, 5  ;;  %v765_v26 = vor.u32 %v763_v59, %v762_v14  ;;  %v1168_v34 = vld [vmem:[#allocation2 + $0x1c] sm:$0xf]  ;;  %v7135_v4 = vld [vmem:[%s9040_s1 + $0xe8] sm:$0xff]  }
  0x6b   : > { %5179 = vmatmul.mubr.bf16.gmra.mxu0 %v7126_v3  ;;  %v766_v27 = vrot.slane %v762_v14, 4  ;;  %v773_v30 = vor.u32 %v771_v2, %v770_v15  ;;  %v775_v31 = vrot.slane %v770_v15, 4  ;;  %v497_v33 = vmul.f32 %v7595_v58, %v458_v16  ;;  %v1234_v38 = vld [vmem:[#allocation2 + $0x1c] sm:$0xf]  ;;  %v1235_v40 = vld [vmem:[#allocation2 + $0x20] sm:$0x1] }
  0x6c   : > { %v1333_v41 = vor.u32 %v1332_v25, %v1329_v24  ;;  %v1066_v42 = vsel %vm7645_vm9, %v765_v26, %v1065_v6  ;;  %v7757_v43 = vpack.c.bf16 %v566_v20, %v566_v20  ;;  %v7760_v35 = vmul.f32 %v7595_v58, %v459_v22  ;;  %1200 = vst [vmem:[#allocation3 + $0xb4] sm:$0xf] %v1168_v34  ;;  %v7138_v11 = vld [vmem:[%s9040_s1 + $0xa8] sm:$0xff]   ;;  %v7139_v15 = vld [vmem:[%s9040_s1 + $0xe0] sm:$0xff]  }
  0x6d   : > { %v7123_v29 = vld [vmem:[#allocation3 + $0x364] ss:$36 sps:$4 sm:$0xff]   ;;  %v1336_v37 = vshll.u32 %v1234_v38, 16  ;;  %v1340_v46 = vshrl.u32 %v1234_v38, 16  ;;  %v1346_v47 = vshll.u32 %v1235_v40, 16  ;;  %v774_v49 = vsel %vm7653_vm10, %v766_v27, %v773_v30 }
  0x6e   : > { %5266 = vmatprep.mubr.bf16.mxu1 %v7123_v29  ;;  %v1189_v48 = vld [vmem:[#allocation2 + $0x9c] sm:$0xf]  ;;  %1067 = vst [vmem:[#allocation2 + $0x24] sm:$0xf] %v1066_v42  ;;  %v1334_v51 = vrot.slane %v1333_v41, 4  ;;  %v1070_v54 = vsel %vm7639_vm8, %v775_v31, %v1069_v18  ;;  %v567_v55 = vmax.f32 %v535_v19, 0.0  ;;  %v7773_v56 = vadd.f32 %v7601_v63, %v497_v33 }
  0x6f   : > { %5267 = vmatmul.mubr.bf16.vlgmr.msra.gmra.mxu1 %v7121_v28  ;;  %v1190_v52 = vld [vmem:[#allocation2 + $0xa0] sm:$0xf]  ;;  %1221 = vst [vmem:[#allocation3 + $0x3a8] sm:$0xf] %v1189_v48  ;;  %v1266_v53 = vld [vmem:[#allocation2 + $0x9c] sm:$0xf]  ;;  %v7799_v40 = vadd.f32 %v7601_v63, %v7760_v35 }
  0x70   : > { %1068 = vst [vmem:[#allocation2 + $0x28] sm:$0xf] %v774_v49  ;;  %6652 = vmatpush3.bf16.msra.mxu1 %v7127_v17  ;;  %v1338_v57 = vrot.slane %v1336_v37, 5  ;;  %v1342_v59 = vrot.slane %v1340_v46, 4  ;;  %v1348_v60 = vrot.slane %v1346_v47, 5  ;;  %v1591_v62 = vshrl.u32 %v1266_v53, 16 }
  0x71   : > { %1222 = vst [vmem:[#allocation3 + $0x3cc] sm:$0xf] %v1190_v52  ;;  %v1267_v61 = vld [vmem:[#allocation2 + $0xa0] sm:$0xf]  ;;  %1071 = vst [vmem:[#allocation2 + $0x2c] sm:$0x1] %v1070_v54  ;;  %6653 = vmatprep.subr.bf16.mxu1 %v7129_v23  ;;  %v7778_v5 = vpack.c.bf16 %v567_v55, %v567_v55 }
  0x72   : > { %v1268_v0 = vld [vmem:[#allocation2 + $0xa4] sm:$0x1]  ;;  %v1594_v1 = vshll.u32 %v1266_v53, 16  ;;  %v1600_v2 = vshll.u32 %v1267_v61, 16  ;;  %v1604_v3 = vshrl.u32 %v1267_v61, 16  ;;  %v1339_v6 = vsel %vm7614_vm4, %v1334_v51, %v1338_v57  ;;  %v7147_v46 = vld [vmem:[%s9040_s1 + $0xd8] sm:$0xff]  }
  0x73   : > { %v1343_v7 = vor.u32 %v1342_v59, %v1338_v57  ;;  %v1593_v9 = vrot.slane %v1591_v62, 4  ;;  %v1610_v10 = vshll.u32 %v1268_v0, 16  ;;  %1698 = vst [vmem:[#allocation3 + $0x94] sm:$0xf] %v1339_v6  ;;  %v947_v16 = vshrl.u32 %v7757_v43, 16  ;;  %v7141_v29 = vld [vmem:[%s9040_s1 + $0xa0] sm:$0xff]  }
  0x74   : > { %v1596_v12 = vrot.slane %v1594_v1, 5  ;;  %v1602_v13 = vrot.slane %v1600_v2, 5  ;;  %v1606_v14 = vrot.slane %v1604_v3, 4  ;;  %6654 = vmatpush3.bf16.msra.mxu1 %v7130_v45  ;;  %v950_v19 = vshll.u32 %v7757_v43, 16  ;;  %v1142_v38 = vld [vmem:[#allocation2 + $0xa8] sm:$0xf] }
  0x75   : > { %v1344_v17 = vrot.slane %v1343_v7, 4  ;;  %v1612_v18 = vrot.slane %v1610_v10, 5  ;;  %v955_v20 = vshrl.u32 %v7778_v5, 16  ;;  %6655 = vmatprep.subr.bf16.mxu1 %v7135_v4  ;;  %v1169_v24 = vld [vmem:[#allocation2 + $0x24] sm:$0xf]  ;;  %v949_v26 = vrot.slane %v947_v16, 7 }
  0x76   : > { %v1597_v22 = vor.u32 %v1596_v12, %v1593_v9  ;;  %v1607_v23 = vor.u32 %v1606_v14, %v1602_v13  ;;  %v1236_v25 = vld [vmem:[#allocation2 + $0x24] sm:$0xf]  ;;  %v958_v27 = vshll.u32 %v7778_v5, 16  ;;  %1201 = vst [vmem:[#allocation3 + $0xd8] sm:$0xf] %v1169_v24  ;;  %v7162_v35 = vld [vmem:[%s9040_s1 + $0x128] sm:$0xff]  }
  0x77   : > { %v1349_v28 = vsel %vm7614_vm4, %v1344_v17, %v1348_v60  ;;  %v1170_v30 = vld [vmem:[#allocation2 + $0x28] sm:$0xf]  ;;  %v1351_v33 = vshrl.u32 %v1236_v25, 16  ;;  %v1354_v34 = vshll.u32 %v1236_v25, 16  ;;  %v952_v50 = vor.u32 %v950_v19, %v949_v26  ;;  %v1146_v61 = vld [vmem:[#allocation2 + $0xb0] sm:$0x1]  ;;  %6768 = vmatpush3.bf16.msra.mxu0 %v7162_v35 }
  0x78   : > { %v1237_v31 = vld [vmem:[#allocation2 + $0x28] sm:$0xf]  ;;  %1699 = vst [vmem:[#allocation3 + $0xb8] sm:$0xf] %v1349_v28  ;;  %v1598_v41 = vrot.slane %v1597_v22, 4  ;;  %v1608_v42 = vrot.slane %v1607_v23, 4  ;;  %6656 = vmatpush3.bf16.msra.mxu1 %v7138_v11 }
  0x79   : > { %1202 = vst [vmem:[#allocation3 + $0xfc] sm:$0xf] %v1170_v30  ;;  %v1238_v43 = vld [vmem:[#allocation2 + $0x2c] sm:$0x1]  ;;  %v1360_v45 = vshll.u32 %v1237_v31, 16  ;;  %v1364_v37 = vshrl.u32 %v1237_v31, 16  ;;  %6657 = vmatprep.subr.bf16.mxu1 %v7139_v15  ;;  %v1143_v0 = vsel %vm7645_vm9, %v952_v50, %v1142_v38 }
  0x7a   : > { %v1353_v47 = vrot.slane %v1351_v33, 4  ;;  %v1356_v48 = vrot.slane %v1354_v34, 5  ;;  %v1370_v49 = vshll.u32 %v1238_v43, 16  ;;  %v1603_v51 = vsel %vm7614_vm4, %v1598_v41, %v1602_v13  ;;  %1144 = vst [vmem:[#allocation2 + $0xa8] sm:$0xf] %v1143_v0  ;;  %v7150_v6 = vld [vmem:[%s9040_s1 + $0x98] sm:$0xff]  }
  0x7b   : > { %v1613_v52 = vsel %vm7614_vm4, %v1608_v42, %v1612_v18  ;;  %v1362_v53 = vrot.slane %v1360_v45, 5  ;;  %v1366_v54 = vrot.slane %v1364_v37, 4  ;;  %1720 = vst [vmem:[#allocation3 + $0x3ac] sm:$0xf] %v1603_v51  ;;  %v953_v59 = vrot.slane %v949_v26, 4  ;;  %v438_v12 = vld [vmem:[%s7585_s19 + $0x40] sm:$0xff] }
  0x7c   : > { %1721 = vst [vmem:[#allocation3 + $0x3d0] sm:$0xf] %v1613_v52  ;;  %v1357_v55 = vor.u32 %v1356_v48, %v1353_v47  ;;  %v1372_v57 = vrot.slane %v1370_v49, 5  ;;  %v957_v60 = vrot.slane %v955_v20, 7  ;;  %v546_v1 = vmax.f32 %v7745_v21, 0.0  ;;  %6658 = vmatpush3.bf16.msra.mxu1 %v7141_v29  ;;  %v7151_v21 = vld [vmem:[%s9040_s1 + $0xd0] sm:$0xff]  }
  0x7d   : > { %v1367_v62 = vor.u32 %v1366_v54, %v1362_v53  ;;  %v547_v2 = vmax.f32 %v7752_v32, 0.0  ;;  %v568_v7 = vmax.f32 %v7773_v56, 0.0  ;;  %6659 = vmatprep.subr.bf16.mxu1 %v7147_v46  ;;  %v569_v32 = vmax.f32 %v7799_v40, 0.0  ;;  %v439_v13 = vld [vmem:[%s7585_s19 + $0x48] sm:$0xff]  ;;  %v7136_v15 = vld [vmem:[#allocation3 + $0x90] ss:$36 sps:$4 sm:$0xff]  }
  0x7e   : > { %v1358_v3 = vrot.slane %v1357_v55, 4  ;;  %v960_v4 = vor.u32 %v958_v27, %v957_v60  ;;  %v962_v5 = vrot.slane %v957_v60, 4  ;;  %v6513_v10 = vpack.c.bf16 %v546_v1, %v546_v1  ;;  %v7833_v24 = vld [vmem:[#allocation2] sm:$0xe]  ;;  %v7152_v25 = vld [vmem:[%s9040_s1 + $0x90] sm:$0xff]   ;;  %v7157_v33 = vld [vmem:[%s9040_s1 + $0xc8] sm:$0xff]  }
  0x7f   : > { %v1368_v9 = vrot.slane %v1367_v62, 4  ;;  %v6514_v11 = vpack.c.bf16 %v547_v2, %v547_v2  ;;  %v7131_v14 = vld [vmem:[#allocation3 + $0x94] ss:$36 sps:$4 sm:$0xff]   ;;  %v6535_v18 = vpack.c.bf16 %v568_v7, %v568_v7  ;;  %vm1822_vm11 = vcmask 1042432   ;;  %v1076_v28 = vld [vmem:[#allocation2 + $0x38] sm:$0x1] }
  0x80   : > { %v1363_v16 = vsel %vm7614_vm4, %v1358_v3, %v1362_v53  ;;  %v961_v56 = vsel %vm7653_vm10, %v953_v59, %v960_v4  ;;  %v1147_v17 = vsel %vm7639_vm8, %v962_v5, %v1146_v61  ;;  %v777_v20 = vshrl.u32 %v6513_v10, 16  ;;  %5186 = vmatprep.mubr.bf16.mxu0 %v7131_v14  ;;  %6660 = vmatpush3.bf16.msra.mxu1 %v7150_v6  ;;  %v1072_v27 = vld [vmem:[#allocation2 + $0x30] sm:$0xf]  ;;  %v7173_v34 = vld [vmem:[%s9040_s1 + $0x160] sm:$0xff]   ;;  %v1149_v42 = vld [vmem:[#allocation2 + $0xb4] sm:$0xf] }
  0x81   : > { %v1373_v19 = vsel %vm7614_vm4, %v1368_v9, %v1372_v57  ;;  %1700 = vst [vmem:[#allocation3 + $0xdc] sm:$0xf] %v1363_v16  ;;  %1145 = vst [vmem:[#allocation2 + $0xac] sm:$0xf] %v961_v56  ;;  %v780_v22 = vshll.u32 %v6513_v10, 16  ;;  %v785_v23 = vshrl.u32 %v6514_v11, 16  ;;  %v7838_v29 = vpack.c.bf16 %v569_v32, %v569_v32  ;;  %5187 = vmatmul.mubr.bf16.gmra.mxu0 %v7136_v15 }
  0x82   : > { %1148 = vst [vmem:[#allocation2 + $0xb0] sm:$0x1] %v1147_v17  ;;  %vm1823_vm12 = vcmask 1046532   ;;  %1701 = vst [vmem:[#allocation3 + $0x100] sm:$0xf] %v1373_v19  ;;  %v788_v26 = vshll.u32 %v6514_v11, 16  ;;  %6661 = vmatprep.subr.bf16.mxu1 %v7151_v21  ;;  %v477_v43 = vmul.f32 %v7595_v58, %v438_v12  ;;  %v478_v45 = vmul.f32 %v7595_v58, %v439_v13  ;;  %6769 = vmatprep.subr.bf16.mxu0 %v7173_v34 }
  0x83   : > { %v964_v30 = vshrl.u32 %v6535_v18, 16  ;;  %v967_v31 = vshll.u32 %v6535_v18, 16  ;;  %v7133_v38 = vld [vmem:[#allocation3 + $0x3ac] ss:$36 sps:$4 sm:$0xff]   ;;  %v779_v40 = vrot.slane %v777_v20, 7  ;;  %v787_v41 = vrot.slane %v785_v23, 7  ;;  %vm7897_vm13 = vmor %vm1822_vm11, %vm1823_vm12 }
  0x84   : > { %v7137_v37 = vld [vmem:[#allocation3 + $0x3a8] ss:$36 sps:$4 sm:$0xff]   ;;  %v972_v47 = vshrl.u32 %v7838_v29, 16  ;;  %v975_v48 = vshll.u32 %v7838_v29, 16  ;;  %v6239_v49 = vrot.slane %v7833_v24, 9  ;;  %5274 = vmatprep.mubr.bf16.mxu1 %v7133_v38  ;;  %v7161_v60 = vld [vmem:[%s9040_s1 + $0x88] sm:$0xff]   ;;  %6662 = vmatpush3.bf16.msra.mxu1 %v7152_v25  ;;  %v516_v32 = vadd.f32 %v7601_v63, %v477_v43 }
  0x85   : > { %v7848_v46 = vrot.slane %v964_v30, 7  ;;  %v1191_v50 = vld [vmem:[#allocation2 + $0xa8] sm:$0xf]  ;;  %v782_v51 = vor.u32 %v780_v22, %v779_v40  ;;  %v783_v52 = vrot.slane %v779_v40, 4  ;;  %v790_v53 = vor.u32 %v788_v26, %v787_v41  ;;  %5275 = vmatmul.mubr.bf16.gmra.mxu1 %v7137_v37  ;;  %v7163_v61 = vld [vmem:[%s9040_s1 + $0xc0] sm:$0xff]   ;;  %6663 = vmatprep.subr.bf16.mxu1 %v7157_v33 }
  0x86   : > { %v1269_v35 = vld [vmem:[#allocation2 + $0xa8] sm:$0xf]  ;;  %v792_v54 = vrot.slane %v787_v41, 4  ;;  %1223 = vst [vmem:[#allocation3 + $0x3f0] sm:$0xf] %v1191_v50  ;;  %v7174_v62 = vld [vmem:[%s9040_s1 + $0x120] sm:$0xff]   ;;  %v517_v12 = vadd.f32 %v7601_v63, %v478_v45 }
  0x87   : > { %v1615_v58 = vshrl.u32 %v1269_v35, 16  ;;  %v1618_v55 = vshll.u32 %v1269_v35, 16  ;;  %v969_v57 = vor.u32 %v967_v31, %v7848_v46  ;;  %v970_v59 = vrot.slane %v7848_v46, 4  ;;  %v1153_v4 = vld [vmem:[#allocation2 + $0xbc] sm:$0x1]  ;;  %v440_v7 = vld [vmem:[%s7585_s19 + $0x50] sm:$0xff]  ;;  %6770 = vmatpush3.bf16.msra.mxu0 %v7174_v62 }
  0x88   : > { %v791_v0 = vsel %vm7653_vm10, %v783_v52, %v790_v53  ;;  %v1073_v1 = vsel %vm7645_vm9, %v782_v51, %v1072_v27  ;;  %v1077_v2 = vsel %vm7639_vm8, %v792_v54, %v1076_v28  ;;  %v974_v3 = vrot.slane %v972_v47, 7  ;;  %v2001_v5 = vld [vmem:[#allocation2 + $0xc] sm:$0xf]  ;;  %v2002_v6 = vld [vmem:[#allocation2 + $0x10] sm:$0xf]  ;;  %v7164_v17 = vld [vmem:[%s9040_s1 + $0x80] sm:$0xff]   ;;  %6664 = vmatpush3.bf16.msra.mxu1 %v7161_v60 }
  0x89   : > { %v1192_v9 = vld [vmem:[#allocation2 + $0xac] sm:$0xf]  ;;  %v1617_v10 = vrot.slane %v1615_v58, 4  ;;  %1074 = vst [vmem:[#allocation2 + $0x30] sm:$0xf] %v1073_v1  ;;  %v1150_v11 = vsel %vm7645_vm9, %v969_v57, %v1149_v42  ;;  %v1620_v16 = vrot.slane %v1618_v55, 5  ;;  %6665 = vmatprep.subr.bf16.mxu1 %v7163_v61 }
  0x8a   : > { %v1270_v21 = vld [vmem:[#allocation2 + $0xac] sm:$0xf]  ;;  %1075 = vst [vmem:[#allocation2 + $0x34] sm:$0xf] %v791_v0  ;;  %1078 = vst [vmem:[#allocation2 + $0x38] sm:$0x1] %v1077_v2  ;;  %v977_v56 = vor.u32 %v975_v48, %v974_v3 }
  0x8b   : > { %v7875_v13 = vld [vmem:[#allocation2 + $0x4] sm:$0xf]  ;;  %2033 = vst [vmem:[#allocation3 + $0xc] sm:$0xf] %v2001_v5  ;;  %2034 = vst [vmem:[#allocation3 + $0x30] sm:$0xf] %v2002_v6  ;;  %v1621_v28 = vor.u32 %v1620_v16, %v1617_v10 }
  0x8c   : > { %v7143_v14 = vld [vmem:[#allocation3 + $0xdc] ss:$36 sps:$4 sm:$0xff]   ;;  %1224 = vst [vmem:[#allocation3 + $0x414] sm:$0xf] %v1192_v9  ;;  %v1271_v15 = vld [vmem:[#allocation2 + $0xb0] sm:$0x1]  ;;  %v978_v29 = vsel %vm7653_vm10, %v970_v59, %v977_v56  ;;  %6666 = vmatpush3.bf16.msra.mxu1 %v7164_v17 }
  0x8d   : > { %1151 = vst [vmem:[#allocation2 + $0xb4] sm:$0xf] %v1150_v11  ;;  %v7880_v18 = vld [vmem:[#allocation2 + $0x8] sm:$0x1]  ;;  %v7885_v63 = vld [vmem:[%s9041_s2] ss:$0 sm:$0xff]  ;;  %5194 = vmatprep.mubr.bf16.mxu0 %v7143_v14 }
  0x8e   : > { %v479_v19 = vmul.f32 %v7885_v63, %v440_v7  ;;  %v1624_v20 = vshll.u32 %v1270_v21, 16  ;;  %v1628_v22 = vshrl.u32 %v1270_v21, 16  ;;  %v1634_v23 = vshll.u32 %v1271_v15, 16  ;;  %v7148_v25 = vld [vmem:[#allocation3 + $0xd8] ss:$36 sps:$4 sm:$0xff]   ;;  %v7170_v27 = vld [vmem:[%s9040_s1 + $0x1f8] sm:$0xff]  }
  0x8f   : > { %v979_v26 = vrot.slane %v974_v3, 4  ;;  %v548_v30 = vmax.f32 %v516_v32, 0.0  ;;  %v549_v31 = vmax.f32 %v517_v12, 0.0  ;;  %5195 = vmatmul.mubr.bf16.gmra.mxu0 %v7148_v25  ;;  %1152 = vst [vmem:[#allocation2 + $0xb8] sm:$0xf] %v978_v29  ;;  %v441_v42 = vld [vmem:[%s7585_s19 + $0x58] sm:$0xff]  ;;  %6875 = vmatprep.subr.bf16.mxu1 %v7170_v27 }
  0x90   : > { %v1626_v33 = vrot.slane %v1624_v20, 5  ;;  %v1630_v34 = vrot.slane %v1628_v22, 4  ;;  %v1636_v38 = vrot.slane %v1634_v23, 5  ;;  %v1622_v43 = vrot.slane %v1621_v28, 4  ;;  %v442_v48 = vld [vmem:[%s7585_s19 + $0x60] sm:$0xff]  ;;  %v443_v21 = vld [vmem:[%s7585_s19 + $0x68] sm:$0xff] }
  0x91   : > { %v1154_v40 = vsel %vm7639_vm8, %v979_v26, %v1153_v4  ;;  %v1827_v45 = vrot.slane %v7875_v13, 5  ;;  %v7903_v46 = vpack.c.bf16 %v548_v30, %v548_v30  ;;  %v1830_v47 = vrot.slane %v7880_v18, 5  ;;  %v1171_v35 = vld [vmem:[#allocation2 + $0x30] sm:$0xf]  ;;  %v1172_v51 = vld [vmem:[#allocation2 + $0x34] sm:$0xf] }
  0x92   : > { %1155 = vst [vmem:[#allocation2 + $0xbc] sm:$0x1] %v1154_v40  ;;  %v1631_v37 = vor.u32 %v1630_v34, %v1626_v33  ;;  %v1627_v50 = vsel %vm7614_vm4, %v1622_v43, %v1626_v33  ;;  %v1239_v52 = vld [vmem:[#allocation2 + $0x30] sm:$0xf]  ;;  %v7909_v53 = vpack.c.bf16 %v549_v31, %v549_v31  ;;  %v480_v58 = vmul.f32 %v7885_v63, %v441_v42  ;;  %v1240_v57 = vld [vmem:[#allocation2 + $0x34] sm:$0xf] }
  0x93   : > { %v1828_v54 = vsel %vm7897_vm13, %v6239_v49, %v1827_v45  ;;  %1722 = vst [vmem:[#allocation3 + $0x3f4] sm:$0xf] %v1627_v50  ;;  %1203 = vst [vmem:[#allocation3 + $0x120] sm:$0xf] %v1171_v35  ;;  %v1241_v59 = vld [vmem:[#allocation2 + $0x38] sm:$0x1]  ;;  %v481_v49 = vmul.f32 %v7885_v63, %v442_v48  ;;  %v482_v20 = vmul.f32 %v7885_v63, %v443_v21 }
  0x94   : > { %v1632_v55 = vrot.slane %v1631_v37, 4  ;;  %1204 = vst [vmem:[#allocation3 + $0x144] sm:$0xf] %v1172_v51  ;;  %v1375_v60 = vshrl.u32 %v1239_v52, 16  ;;  %1969 = vst [vmem:[#allocation3 + $0x8] sm:$0xf] %v1828_v54 }
  0x95   : > { %v7921_v61 = vld [vmem:[%s9042_s3] ss:$0 sm:$0xff]  ;;  %v1378_v62 = vshll.u32 %v1239_v52, 16  ;;  %v1384_v0 = vshll.u32 %v1240_v57, 16  ;;  %v1388_v1 = vshrl.u32 %v1240_v57, 16  ;;  %v1394_v2 = vshll.u32 %v1241_v59, 16 }
  0x96   : > { %v7924_v24 = vadd.f32 %v7921_v61, %v479_v19  ;;  %v1193_v3 = vld [vmem:[#allocation2 + $0xb4] sm:$0xf]  ;;  %v1637_v4 = vsel %vm7614_vm4, %v1632_v55, %v1636_v38  ;;  %v1377_v5 = vrot.slane %v1375_v60, 4  ;;  %v794_v7 = vshrl.u32 %v7903_v46, 16  ;;  %v1194_v14 = vld [vmem:[#allocation2 + $0xb8] sm:$0xf] }
  0x97   : > { %1225 = vst [vmem:[#allocation3 + $0x438] sm:$0xf] %v1193_v3  ;;  %v1272_v6 = vld [vmem:[#allocation2 + $0xb4] sm:$0xf]  ;;  %v797_v9 = vshll.u32 %v7903_v46, 16  ;;  %v1380_v10 = vrot.slane %v1378_v62, 5  ;;  %v519_v19 = vadd.f32 %v7921_v61, %v480_v58 }
  0x98   : > { %1723 = vst [vmem:[#allocation3 + $0x418] sm:$0xf] %v1637_v4  ;;  %v1386_v11 = vrot.slane %v1384_v0, 5  ;;  %v1390_v32 = vrot.slane %v1388_v1, 4  ;;  %v1396_v12 = vrot.slane %v1394_v2, 5  ;;  %v1639_v56 = vshrl.u32 %v1272_v6, 16 }
  0x99   : > { %1226 = vst [vmem:[#allocation3 + $0x45c] sm:$0xf] %v1194_v14  ;;  %v1273_v15 = vld [vmem:[#allocation2 + $0xb8] sm:$0xf]  ;;  %v1274_v16 = vld [vmem:[#allocation2 + $0xbc] sm:$0x1]  ;;  %v1381_v22 = vor.u32 %v1380_v10, %v1377_v5  ;;  %v520_v1 = vadd.f32 %v7921_v61, %v481_v49  ;;  %v521_v2 = vadd.f32 %v7921_v61, %v482_v20 }
  0x9a   : > { %v1642_v17 = vshll.u32 %v1272_v6, 16  ;;  %v1391_v23 = vor.u32 %v1390_v32, %v1386_v11  ;;  %v1648_v25 = vshll.u32 %v1273_v15, 16  ;;  %v1652_v26 = vshrl.u32 %v1273_v15, 16  ;;  %v1079_v31 = vld [vmem:[#allocation2 + $0x3c] sm:$0xf] }
  0x9b   : > { %v1641_v27 = vrot.slane %v1639_v56, 4  ;;  %v1658_v29 = vshll.u32 %v1274_v16, 16  ;;  %v796_v30 = vrot.slane %v794_v7, 7  ;;  %v1382_v33 = vrot.slane %v1381_v22, 4  ;;  %v7934_v48 = vld [vmem:[#allocation2 + $0xc] sm:$0xe] }
  0x9c   : > { %v1644_v28 = vrot.slane %v1642_v17, 5  ;;  %v1392_v34 = vrot.slane %v1391_v23, 4  ;;  %v1650_v38 = vrot.slane %v1648_v25, 5  ;;  %v1654_v40 = vrot.slane %v1652_v26, 4  ;;  %v1730_v54 = vld [vmem:[#allocation2 + $0x10] sm:$0xf] }
  0x9d   : > { %v1660_v43 = vrot.slane %v1658_v29, 5  ;;  %v799_v37 = vor.u32 %v797_v9, %v796_v30  ;;  %v800_v46 = vrot.slane %v796_v30, 4  ;;  %v1387_v50 = vsel %vm7614_vm4, %v1382_v33, %v1386_v11  ;;  %v7941_v58 = vld [vmem:[#allocation2 + $0x14] sm:$0x1]  ;;  %v2003_v55 = vld [vmem:[#allocation2 + $0x18] sm:$0xf] }
  0x9e   : > { %v1645_v42 = vor.u32 %v1644_v28, %v1641_v27  ;;  %v1397_v35 = vsel %vm7614_vm4, %v1392_v34, %v1396_v12  ;;  %v1655_v51 = vor.u32 %v1654_v40, %v1650_v38  ;;  %v802_v52 = vshrl.u32 %v7909_v53, 16  ;;  %v7185_v57 = vld [vmem:[%s9040_s1 + $0x158] sm:$0xff]   ;;  %v7149_v60 = vld [vmem:[#allocation3 + $0x3f0] ss:$36 sps:$4 sm:$0xff]   ;;  %1702 = vst [vmem:[#allocation3 + $0x124] sm:$0xf] %v1387_v50 }
  0x9f   : > { %v7145_v59 = vld [vmem:[#allocation3 + $0x3f4] ss:$36 sps:$4 sm:$0xff]   ;;  %1703 = vst [vmem:[#allocation3 + $0x148] sm:$0xf] %v1397_v35  ;;  %v1080_v0 = vsel %vm7645_vm9, %v799_v37, %v1079_v31  ;;  %2035 = vst [vmem:[#allocation3 + $0x54] sm:$0xf] %v2003_v55  ;;  %6771 = vmatprep.subr.bf16.mxu0 %v7185_v57 }
  0xa0   : > { %v1646_v62 = vrot.slane %v1645_v42, 4  ;;  %v1656_v3 = vrot.slane %v1655_v51, 4  ;;  %v804_v4 = vrot.slane %v802_v52, 7  ;;  %v805_v5 = vshll.u32 %v7909_v53, 16  ;;  %1081 = vst [vmem:[#allocation2 + $0x3c] sm:$0xf] %v1080_v0  ;;  %5282 = vmatprep.mubr.bf16.mxu1 %v7145_v59 }
  0xa1   : > { %v1829_v6 = vrot.slane %v1827_v45, 4  ;;  %v2004_v7 = vld [vmem:[#allocation2 + $0x1c] sm:$0xf]  ;;  %v1083_v21 = vld [vmem:[#allocation2 + $0x44] sm:$0x1]  ;;  %v550_v10 = vmax.f32 %v7924_v24, 0.0  ;;  %5283 = vmatmul.mubr.bf16.gmra.mxu1 %v7149_v60 }
  0xa2   : > { %v1651_v9 = vsel %vm7614_vm4, %v1646_v62, %v1650_v38  ;;  %v551_v49 = vmax.f32 %v519_v19, 0.0  ;;  %v6240_v11 = vrot.slane %v7934_v48, 9  ;;  %2036 = vst [vmem:[#allocation3 + $0x78] sm:$0xf] %v2004_v7  ;;  %v1661_v53 = vsel %vm7614_vm4, %v1656_v3, %v1660_v43  ;;  %v7189_v24 = vld [vmem:[%s9040_s1 + $0x118] sm:$0xff]  }
  0xa3   : > { %1724 = vst [vmem:[#allocation3 + $0x43c] sm:$0xf] %v1651_v9  ;;  %v807_v13 = vor.u32 %v805_v5, %v804_v4  ;;  %v809_v45 = vrot.slane %v804_v4, 4  ;;  %v1831_v32 = vsel %vm7897_vm13, %v1829_v6, %v1830_v47  ;;  %1725 = vst [vmem:[#allocation3 + $0x460] sm:$0xf] %v1661_v53  ;;  %v6517_v12 = vpack.c.bf16 %v550_v10, %v550_v10 }
  0xa4   : > { %1970 = vst [vmem:[#allocation3 + $0x2c] sm:$0xf] %v1831_v32  ;;  %v6518_v14 = vpack.c.bf16 %v551_v49, %v551_v49  ;;  %v1834_v15 = vrot.slane %v1730_v54, 5  ;;  %v1837_v16 = vrot.slane %v7941_v58, 5  ;;  %v552_v17 = vmax.f32 %v520_v1, 0.0  ;;  %6772 = vmatpush3.bf16.msra.mxu0 %v7189_v24  ;;  %v444_v32 = vld [vmem:[%s7585_s19 + $0x70] sm:$0xff] }
  0xa5   : > { %v808_v56 = vsel %vm7653_vm10, %v800_v46, %v807_v13  ;;  %v1084_v18 = vsel %vm7639_vm8, %v809_v45, %v1083_v21  ;;  %v553_v19 = vmax.f32 %v521_v2, 0.0  ;;  %v2005_v47 = vld [vmem:[#allocation2 + $0x24] sm:$0xf]  ;;  %v2006_v20 = vld [vmem:[#allocation2 + $0x28] sm:$0xf]  ;;  %v811_v22 = vshrl.u32 %v6517_v12, 16 }
  0xa6   : > { %1082 = vst [vmem:[#allocation2 + $0x40] sm:$0xf] %v808_v56  ;;  %1085 = vst [vmem:[#allocation2 + $0x44] sm:$0x1] %v1084_v18  ;;  %v814_v23 = vshll.u32 %v6517_v12, 16  ;;  %v819_v25 = vshrl.u32 %v6518_v14, 16  ;;  %v1835_v28 = vsel %vm7897_vm13, %v6240_v11, %v1834_v15  ;;  %v6519_v30 = vpack.c.bf16 %v552_v17, %v552_v17 }
  0xa7   : > { %v822_v26 = vshll.u32 %v6518_v14, 16  ;;  %2037 = vst [vmem:[#allocation3 + $0x9c] sm:$0xf] %v2005_v47  ;;  %2038 = vst [vmem:[#allocation3 + $0xc0] sm:$0xf] %v2006_v20  ;;  %v1836_v29 = vrot.slane %v1834_v15, 4  ;;  %v7973_v31 = vpack.c.bf16 %v553_v19, %v553_v19 }
  0xa8   : > { %v7153_v27 = vld [vmem:[#allocation3 + $0x124] ss:$36 sps:$4 sm:$0xff]   ;;  %v1086_v40 = vld [vmem:[#allocation2 + $0x48] sm:$0xf]  ;;  %1971 = vst [vmem:[#allocation3 + $0x50] sm:$0xf] %v1835_v28  ;;  %v483_v28 = vmul.f32 %v7885_v63, %v444_v32 }
  0xa9   : > { %v7159_v33 = vld [vmem:[#allocation3 + $0x120] ss:$36 sps:$4 sm:$0xff]   ;;  %5202 = vmatprep.mubr.bf16.mxu0 %v7153_v27  ;;  %v813_v37 = vrot.slane %v811_v22, 7  ;;  %v821_v46 = vrot.slane %v819_v25, 7  ;;  %v1838_v48 = vsel %vm7897_vm13, %v1836_v29, %v1837_v16  ;;  %v828_v50 = vshrl.u32 %v6519_v30, 16  ;;  %v445_v20 = vld [vmem:[%s7585_s19 + $0x78] sm:$0xff] }
  0xaa   : > { %v1173_v34 = vld [vmem:[#allocation2 + $0x3c] sm:$0xf]  ;;  %5203 = vmatmul.mubr.bf16.gmra.mxu0 %v7159_v33  ;;  %v836_v35 = vshrl.u32 %v7973_v31, 16  ;;  %v7155_v51 = vld [vmem:[#allocation3 + $0x43c] ss:$36 sps:$4 sm:$0xff]   ;;  %v831_v60 = vshll.u32 %v6519_v30, 16 }
  0xab   : > { %v1242_v38 = vld [vmem:[#allocation2 + $0x3c] sm:$0xf]  ;;  %1205 = vst [vmem:[#allocation3 + $0x168] sm:$0xf] %v1173_v34  ;;  %v7160_v52 = vld [vmem:[#allocation3 + $0x438] ss:$36 sps:$4 sm:$0xff]   ;;  %v816_v58 = vor.u32 %v814_v23, %v813_v37  ;;  %5290 = vmatprep.mubr.bf16.mxu1 %v7155_v51  ;;  %v824_v2 = vor.u32 %v822_v26, %v821_v46 }
  0xac   : > { %v1399_v42 = vshrl.u32 %v1242_v38, 16  ;;  %v1402_v43 = vshll.u32 %v1242_v38, 16  ;;  %1972 = vst [vmem:[#allocation3 + $0x74] sm:$0xf] %v1838_v48  ;;  %v7169_v57 = vld [vmem:[#allocation3 + $0xc] ss:$36 sps:$4 sm:$0xff]   ;;  %5291 = vmatmul.mubr.bf16.gmra.mxu1 %v7160_v52 }
  0xad   : > { %v1090_v59 = vld [vmem:[#allocation2 + $0x50] sm:$0x1]  ;;  %v1174_v62 = vld [vmem:[#allocation2 + $0x40] sm:$0xf]  ;;  %v1244_v1 = vld [vmem:[#allocation2 + $0x44] sm:$0x1]  ;;  %v1087_v3 = vsel %vm7645_vm9, %v816_v58, %v1086_v40  ;;  %5331 = vmatprep.mubr.bf16.mxu1 %v7169_v57 }
  0xae   : > { %v1401_v54 = vrot.slane %v1399_v42, 4  ;;  %v1404_v55 = vrot.slane %v1402_v43, 5  ;;  %v1243_v0 = vld [vmem:[#allocation2 + $0x40] sm:$0xf]  ;;  %1206 = vst [vmem:[#allocation3 + $0x18c] sm:$0xf] %v1174_v62 }
  0xaf   : > { %v1408_v5 = vshll.u32 %v1243_v0, 16  ;;  %v1412_v6 = vshrl.u32 %v1243_v0, 16  ;;  %v1418_v7 = vshll.u32 %v1244_v1, 16  ;;  %1088 = vst [vmem:[#allocation2 + $0x48] sm:$0xf] %v1087_v3  ;;  %v817_v49 = vrot.slane %v813_v37, 4 }
  0xb0   : > { %v1405_v4 = vor.u32 %v1404_v55, %v1401_v54  ;;  %v1093_v9 = vld [vmem:[#allocation2 + $0x54] sm:$0xf]  ;;  %v1732_v21 = vld [vmem:[#allocation2 + $0x18] sm:$0xe]  ;;  %v1733_v10 = vld [vmem:[#allocation2 + $0x1c] sm:$0xf]  ;;  %v484_v37 = vmul.f32 %v7885_v63, %v445_v20  ;;  %v522_v54 = vadd.f32 %v7921_v61, %v483_v28 }
  0xb1   : > { %v826_v11 = vrot.slane %v821_v46, 4  ;;  %v830_v53 = vrot.slane %v828_v50, 7  ;;  %v838_v13 = vrot.slane %v836_v35, 7  ;;  %v1734_v45 = vld [vmem:[#allocation2 + $0x20] sm:$0x1]  ;;  %v1410_v12 = vrot.slane %v1408_v5, 5 }
  0xb2   : > { %v1406_v24 = vrot.slane %v1405_v4, 4  ;;  %v1414_v14 = vrot.slane %v1412_v6, 4  ;;  %v1420_v15 = vrot.slane %v1418_v7, 5  ;;  %v1097_v16 = vld [vmem:[#allocation2 + $0x5c] sm:$0x1]  ;;  %v825_v18 = vsel %vm7653_vm10, %v817_v49, %v824_v2  ;;  %v7197_v38 = vld [vmem:[%s9040_s1 + $0x150] sm:$0xff]  }
  0xb3   : > { %v7172_v56 = vld [vmem:[%s9040_s1 + $0x1b8] sm:$0xff]   ;;  %v1091_v17 = vsel %vm7639_vm8, %v826_v11, %v1090_v59  ;;  %v833_v19 = vor.u32 %v831_v60, %v830_v53  ;;  %v834_v47 = vrot.slane %v830_v53, 4  ;;  %v7167_v25 = vld [vmem:[#allocation3 + $0x8] ss:$36 sps:$4 sm:$0xff]   ;;  %1089 = vst [vmem:[#allocation2 + $0x4c] sm:$0xf] %v825_v18  ;;  %6773 = vmatprep.subr.bf16.mxu0 %v7197_v38  ;;  %v523_v2 = vadd.f32 %v7921_v61, %v484_v37 }
  0xb4   : > { %v1411_v22 = vsel %vm7614_vm4, %v1406_v24, %v1410_v12  ;;  %v1415_v23 = vor.u32 %v1414_v14, %v1410_v12  ;;  %1092 = vst [vmem:[#allocation2 + $0x50] sm:$0x1] %v1091_v17  ;;  %v7177_v26 = vld [vmem:[#allocation3 + $0x54] ss:$36 sps:$4 sm:$0xff]   ;;  %v839_v27 = vshll.u32 %v7973_v31, 16  ;;  %v843_v29 = vrot.slane %v838_v13, 4  ;;  %5332 = vmatmul.mubr.bf16.vlgmr.msra.gmra.mxu1 %v7167_v25 }
  0xb5   : > { %1704 = vst [vmem:[#allocation3 + $0x16c] sm:$0xf] %v1411_v22  ;;  %v1094_v30 = vsel %vm7645_vm9, %v833_v19, %v1093_v9  ;;  %v6241_v33 = vrot.slane %v1732_v21, 9  ;;  %v1841_v34 = vrot.slane %v1733_v10, 5  ;;  %v1844_v43 = vrot.slane %v1734_v45, 5  ;;  %v7186_v31 = vld [vmem:[%s9040_s1 + $0x1f0] sm:$0xff]   ;;  %6876 = vmatpush3.bf16.msra.mxu1 %v7172_v56  ;;  %5339 = vmatprep.mubr.bf16.mxu1 %v7177_v26 }
  0xb6   : > { %v1416_v40 = vrot.slane %v1415_v23, 4  ;;  %v841_v42 = vor.u32 %v839_v27, %v838_v13  ;;  %1095 = vst [vmem:[#allocation2 + $0x54] sm:$0xf] %v1094_v30  ;;  %v1175_v46 = vld [vmem:[#allocation2 + $0x48] sm:$0xf]  ;;  %v1098_v50 = vsel %vm7639_vm8, %v843_v29, %v1097_v16  ;;  %v7190_v52 = vld [vmem:[%s9040_s1 + $0x1b0] sm:$0xff]   ;;  %6877 = vmatprep.subr.bf16.mxu1 %v7186_v31 }
  0xb7   : > { %v1245_v48 = vld [vmem:[#allocation2 + $0x48] sm:$0xf]  ;;  %v1842_v35 = vsel %vm7897_vm13, %v6241_v33, %v1841_v34  ;;  %v1843_v51 = vrot.slane %v1841_v34, 4  ;;  %v7198_v58 = vld [vmem:[%s9040_s1 + $0x110] sm:$0xff]   ;;  %1207 = vst [vmem:[#allocation3 + $0x1b0] sm:$0xf] %v1175_v46 }
  0xb8   : > { %v1421_v55 = vsel %vm7614_vm4, %v1416_v40, %v1420_v15  ;;  %v1423_v57 = vshrl.u32 %v1245_v48, 16  ;;  %v1426_v59 = vshll.u32 %v1245_v48, 16  ;;  %v842_v60 = vsel %vm7653_vm10, %v834_v47, %v841_v42  ;;  %1099 = vst [vmem:[#allocation2 + $0x5c] sm:$0x1] %v1098_v50  ;;  %1973 = vst [vmem:[#allocation3 + $0x98] sm:$0xf] %v1842_v35  ;;  %6774 = vmatpush3.bf16.msra.mxu0 %v7198_v58 }
  0xb9   : > { %v1735_v62 = vld [vmem:[#allocation2 + $0x24] sm:$0xe]  ;;  %v8017_v0 = vld [vmem:[#allocation2 + $0x28] sm:$0xf]  ;;  %1705 = vst [vmem:[#allocation3 + $0x190] sm:$0xf] %v1421_v55  ;;  %v1845_v1 = vsel %vm7897_vm13, %v1843_v51, %v1844_v43  ;;  %6878 = vmatpush3.bf16.msra.mxu1 %v7190_v52 }
  0xba   : > { %1096 = vst [vmem:[#allocation2 + $0x58] sm:$0xf] %v842_v60  ;;  %v554_v3 = vmax.f32 %v522_v54, 0.0  ;;  %v8022_v4 = vld [vmem:[#allocation2 + $0x2c] sm:$0x1]  ;;  %v6242_v5 = vrot.slane %v1735_v62, 9 }
  0xbb   : > { %v2007_v6 = vld [vmem:[#allocation2 + $0x30] sm:$0xf]  ;;  %v1425_v7 = vrot.slane %v1423_v57, 4  ;;  %v1428_v9 = vrot.slane %v1426_v59, 5  ;;  %v7180_v21 = vld [vmem:[#allocation3 + $0x50] ss:$36 sps:$4 sm:$0xff]  }
  0xbc   : > { %1974 = vst [vmem:[#allocation3 + $0xbc] sm:$0xf] %v1845_v1  ;;  %v1848_v10 = vrot.slane %v8017_v0, 5  ;;  %v1851_v49 = vrot.slane %v8022_v4, 5  ;;  %v2008_v11 = vld [vmem:[#allocation2 + $0x34] sm:$0xf]  ;;  %v6521_v32 = vpack.c.bf16 %v554_v3, %v554_v3  ;;  %5340 = vmatmul.mubr.bf16.gmra.mxu1 %v7180_v21 }
  0xbd   : > { %2039 = vst [vmem:[#allocation3 + $0xe4] sm:$0xf] %v2007_v6  ;;  %v1176_v53 = vld [vmem:[#allocation2 + $0x4c] sm:$0xf]  ;;  %v1247_v45 = vld [vmem:[#allocation2 + $0x50] sm:$0x1]  ;;  %v1429_v24 = vor.u32 %v1428_v9, %v1425_v7 }
  0xbe   : > { %v1246_v13 = vld [vmem:[#allocation2 + $0x4c] sm:$0xf]  ;;  %2040 = vst [vmem:[#allocation3 + $0x108] sm:$0xf] %v2008_v11  ;;  %1208 = vst [vmem:[#allocation3 + $0x1d4] sm:$0xf] %v1176_v53  ;;  %v1849_v19 = vsel %vm7897_vm13, %v6242_v5, %v1848_v10 }
  0xbf   : > { %v1432_v12 = vshll.u32 %v1246_v13, 16  ;;  %v1436_v14 = vshrl.u32 %v1246_v13, 16  ;;  %v1442_v15 = vshll.u32 %v1247_v45, 16  ;;  %v1177_v16 = vld [vmem:[#allocation2 + $0x54] sm:$0xf]  ;;  %v555_v18 = vmax.f32 %v523_v2, 0.0 }
  0xc0   : > { %v1248_v56 = vld [vmem:[#allocation2 + $0x54] sm:$0xf]  ;;  %v845_v17 = vshrl.u32 %v6521_v32, 16  ;;  %v1430_v47 = vrot.slane %v1429_v24, 4  ;;  %1209 = vst [vmem:[#allocation3 + $0x1f8] sm:$0xf] %v1177_v16 }
  0xc1   : > { %v1434_v20 = vrot.slane %v1432_v12, 5  ;;  %v1438_v22 = vrot.slane %v1436_v14, 4  ;;  %v1444_v23 = vrot.slane %v1442_v15, 5  ;;  %1975 = vst [vmem:[#allocation3 + $0xe0] sm:$0xf] %v1849_v19  ;;  %v1447_v26 = vshrl.u32 %v1248_v56, 16 }
  0xc2   : > { %v1250_v25 = vld [vmem:[#allocation2 + $0x5c] sm:$0x1]  ;;  %v1450_v27 = vshll.u32 %v1248_v56, 16  ;;  %v8030_v28 = vrot.slane %v845_v17, 7  ;;  %v7165_v29 = vld [vmem:[#allocation3 + $0x16c] ss:$36 sps:$4 sm:$0xff]   ;;  %v6522_v40 = vpack.c.bf16 %v555_v18, %v555_v18 }
  0xc3   : > { %v7171_v30 = vld [vmem:[#allocation3 + $0x168] ss:$36 sps:$4 sm:$0xff]   ;;  %v1435_v33 = vsel %vm7614_vm4, %v1430_v47, %v1434_v20  ;;  %v1439_v34 = vor.u32 %v1438_v22, %v1434_v20  ;;  %v1466_v38 = vshll.u32 %v1250_v25, 16  ;;  %v1178_v42 = vld [vmem:[#allocation2 + $0x58] sm:$0xf]  ;;  %v1449_v31 = vrot.slane %v1447_v26, 4  ;;  %5210 = vmatprep.mubr.bf16.mxu0 %v7165_v29 }
  0xc4   : > { %1706 = vst [vmem:[#allocation3 + $0x1b4] sm:$0xf] %v1435_v33  ;;  %v1249_v43 = vld [vmem:[#allocation2 + $0x58] sm:$0xf]  ;;  %v1452_v37 = vrot.slane %v1450_v27, 5  ;;  %5211 = vmatmul.mubr.bf16.gmra.mxu0 %v7171_v30  ;;  %v848_v57 = vshll.u32 %v6521_v32, 16 }
  0xc5   : > { %v1440_v46 = vrot.slane %v1439_v34, 4  ;;  %1210 = vst [vmem:[#allocation3 + $0x21c] sm:$0xf] %v1178_v42  ;;  %v1456_v48 = vshll.u32 %v1249_v43, 16  ;;  %v1460_v50 = vshrl.u32 %v1249_v43, 16  ;;  %v1468_v35 = vrot.slane %v1466_v38, 5 }
  0xc6   : > { %v1100_v51 = vld [vmem:[#allocation2 + $0x60] sm:$0xf]  ;;  %v446_v52 = vld [vmem:[%s7585_s19 + $0x80] sm:$0xff]  ;;  %v1453_v54 = vor.u32 %v1452_v37, %v1449_v31  ;;  %v7188_v55 = vld [vmem:[#allocation3 + $0x98] ss:$36 sps:$4 sm:$0xff]   ;;  %v851_v59 = vrot.slane %v8030_v28, 4  ;;  %v850_v7 = vor.u32 %v848_v57, %v8030_v28 }
  0xc7   : > { %v7183_v58 = vld [vmem:[#allocation3 + $0x9c] ss:$36 sps:$4 sm:$0xff]   ;;  %v485_v60 = vmul.f32 %v7885_v63, %v446_v52  ;;  %v1445_v62 = vsel %vm7614_vm4, %v1440_v46, %v1444_v23  ;;  %v1458_v1 = vrot.slane %v1456_v48, 5  ;;  %v1462_v2 = vrot.slane %v1460_v50, 4  ;;  %v447_v5 = vld [vmem:[%s7585_s19 + $0x88] sm:$0xff]  ;;  %v7203_v24 = vld [vmem:[%s9040_s1 + $0x1e8] sm:$0xff]  }
  0xc8   : > { %v853_v3 = vshrl.u32 %v6522_v40, 16  ;;  %1707 = vst [vmem:[#allocation3 + $0x1d8] sm:$0xf] %v1445_v62  ;;  %v1454_v6 = vrot.slane %v1453_v54, 4  ;;  %5347 = vmatprep.mubr.bf16.mxu1 %v7183_v58  ;;  %v856_v9 = vshll.u32 %v6522_v40, 16  ;;  %v1850_v21 = vrot.slane %v1848_v10, 4  ;;  %6879 = vmatprep.subr.bf16.mxu1 %v7203_v24 }
  0xc9   : > { %v1463_v11 = vor.u32 %v1462_v2, %v1458_v1  ;;  %v1104_v13 = vld [vmem:[#allocation2 + $0x68] sm:$0x1]  ;;  %v486_v45 = vmul.f32 %v7885_v63, %v447_v5  ;;  %v524_v32 = vadd.f32 %v7921_v61, %v485_v60  ;;  %v1101_v14 = vsel %vm7645_vm9, %v850_v7, %v1100_v51  ;;  %v1738_v10 = vld [vmem:[#allocation2 + $0x30] sm:$0xe]  ;;  %v1739_v15 = vld [vmem:[#allocation2 + $0x34] sm:$0xf]  ;;  %5348 = vmatmul.mubr.bf16.gmra.mxu1 %v7188_v55 }
  0xca   : > { %v855_v53 = vrot.slane %v853_v3, 7  ;;  %v1459_v12 = vsel %vm7614_vm4, %v1454_v6, %v1458_v1  ;;  %v1852_v0 = vsel %vm7897_vm13, %v1850_v21, %v1851_v49  ;;  %v1740_v16 = vld [vmem:[#allocation2 + $0x38] sm:$0x1]  ;;  %1102 = vst [vmem:[#allocation2 + $0x60] sm:$0xf] %v1101_v14  ;;  %v7206_v4 = vld [vmem:[%s9040_s1 + $0x1a8] sm:$0xff]  }
  0xcb   : > { %v1464_v56 = vrot.slane %v1463_v11, 4  ;;  %1708 = vst [vmem:[#allocation3 + $0x1fc] sm:$0xf] %v1459_v12  ;;  %1976 = vst [vmem:[#allocation3 + $0x104] sm:$0xf] %v1852_v0  ;;  %v525_v19 = vadd.f32 %v7921_v61, %v486_v45  ;;  %v556_v49 = vmax.f32 %v524_v32, 0.0  ;;  %6880 = vmatpush3.bf16.msra.mxu1 %v7206_v4 }
  0xcc   : > { %v858_v18 = vor.u32 %v856_v9, %v855_v53  ;;  %v860_v17 = vrot.slane %v855_v53, 4  ;;  %v2009_v47 = vld [vmem:[#allocation2 + $0x3c] sm:$0xf]  ;;  %v6243_v20 = vrot.slane %v1738_v10, 9  ;;  %v1855_v22 = vrot.slane %v1739_v15, 5  ;;  %v448_v30 = vld [vmem:[%s7585_s19 + $0x90] sm:$0xff] }
  0xcd   : > { %v1858_v23 = vrot.slane %v1740_v16, 5  ;;  %v2010_v25 = vld [vmem:[#allocation2 + $0x40] sm:$0xf]  ;;  %2041 = vst [vmem:[#allocation3 + $0x12c] sm:$0xf] %v2009_v47  ;;  %v1469_v26 = vsel %vm7614_vm4, %v1464_v56, %v1468_v35  ;;  %v557_v29 = vmax.f32 %v525_v19, 0.0  ;;  %v6523_v33 = vpack.c.bf16 %v556_v49, %v556_v49 }
  0xce   : > { %v859_v27 = vsel %vm7653_vm10, %v851_v59, %v858_v18  ;;  %v1105_v28 = vsel %vm7639_vm8, %v860_v17, %v1104_v13  ;;  %2042 = vst [vmem:[#allocation3 + $0x150] sm:$0xf] %v2010_v25  ;;  %1709 = vst [vmem:[#allocation3 + $0x220] sm:$0xf] %v1469_v26  ;;  %v1856_v34 = vsel %vm7897_vm13, %v6243_v20, %v1855_v22  ;;  %v1857_v38 = vrot.slane %v1855_v22, 4  ;;  %v449_v40 = vld [vmem:[%s7585_s19 + $0x98] sm:$0xff] }
  0xcf   : > { %1103 = vst [vmem:[#allocation2 + $0x64] sm:$0xf] %v859_v27  ;;  %1106 = vst [vmem:[#allocation2 + $0x68] sm:$0x1] %v1105_v28  ;;  %v487_v42 = vmul.f32 %v7885_v63, %v448_v30  ;;  %v7175_v43 = vld [vmem:[#allocation3 + $0x1b4] ss:$36 sps:$4 sm:$0xff]   ;;  %v6524_v37 = vpack.c.bf16 %v557_v29, %v557_v29  ;;  %v488_v46 = vmul.f32 %v7885_v63, %v449_v40 }
  0xd0   : > { %v7179_v31 = vld [vmem:[#allocation3 + $0x1b0] ss:$36 sps:$4 sm:$0xff]   ;;  %1977 = vst [vmem:[#allocation3 + $0x128] sm:$0xf] %v1856_v34  ;;  %v862_v48 = vshrl.u32 %v6523_v33, 16  ;;  %v865_v50 = vshll.u32 %v6523_v33, 16  ;;  %v1859_v35 = vsel %vm7897_vm13, %v1857_v38, %v1858_v23  ;;  %5218 = vmatprep.mubr.bf16.mxu0 %v7175_v43 }
  0xd1   : > { %v526_v51 = vadd.f32 %v7921_v61, %v487_v42  ;;  %v870_v52 = vshrl.u32 %v6524_v37, 16  ;;  %v873_v54 = vshll.u32 %v6524_v37, 16  ;;  %v1107_v58 = vld [vmem:[#allocation2 + $0x6c] sm:$0xf]  ;;  %1978 = vst [vmem:[#allocation3 + $0x14c] sm:$0xf] %v1859_v35  ;;  %v527_v55 = vadd.f32 %v7921_v61, %v488_v46  ;;  %5219 = vmatmul.mubr.bf16.gmra.mxu0 %v7179_v31 }
  0xd2   : > { %v1179_v57 = vld [vmem:[#allocation2 + $0x60] sm:$0xf]  ;;  %v864_v60 = vrot.slane %v862_v48, 7  ;;  %v7196_v3 = vld [vmem:[#allocation3 + $0xe0] ss:$36 sps:$4 sm:$0xff]   ;;  %v7211_v21 = vld [vmem:[%s9040_s1 + $0x148] sm:$0xff]  }
  0xd3   : > { %v1251_v59 = vld [vmem:[#allocation2 + $0x60] sm:$0xf]  ;;  %1211 = vst [vmem:[#allocation3 + $0x240] sm:$0xf] %v1179_v57  ;;  %v872_v2 = vrot.slane %v870_v52, 7  ;;  %v558_v7 = vmax.f32 %v526_v51, 0.0  ;;  %6775 = vmatprep.subr.bf16.mxu0 %v7211_v21 }
  0xd4   : > { %v1471_v63 = vshrl.u32 %v1251_v59, 16  ;;  %v1474_v62 = vshll.u32 %v1251_v59, 16  ;;  %v7193_v1 = vld [vmem:[#allocation3 + $0xe4] ss:$36 sps:$4 sm:$0xff]   ;;  %v867_v5 = vor.u32 %v865_v50, %v864_v60  ;;  %v868_v6 = vrot.slane %v864_v60, 4  ;;  %v7214_v4 = vld [vmem:[%s9040_s1 + $0x108] sm:$0xff]  }
  0xd5   : > { %v559_v9 = vmax.f32 %v527_v55, 0.0  ;;  %v7181_v11 = vld [vmem:[#allocation3 + $0x1fc] ss:$36 sps:$4 sm:$0xff]   ;;  %5355 = vmatprep.mubr.bf16.mxu1 %v7193_v1  ;;  %v875_v45 = vor.u32 %v873_v54, %v872_v2  ;;  %v6525_v10 = vpack.c.bf16 %v558_v7, %v558_v7  ;;  %v8081_v16 = vld [vmem:[#allocation2 + $0x3c] sm:$0xe]  ;;  %v877_v20 = vrot.slane %v872_v2, 4  ;;  %6776 = vmatpush3.bf16.msra.mxu0 %v7214_v4 }
  0xd6   : > { %v7187_v53 = vld [vmem:[#allocation3 + $0x1f8] ss:$36 sps:$4 sm:$0xff]   ;;  %v1473_v13 = vrot.slane %v1471_v63, 4  ;;  %v1180_v24 = vld [vmem:[#allocation2 + $0x64] sm:$0xf]  ;;  %5356 = vmatmul.mubr.bf16.gmra.mxu1 %v7196_v3  ;;  %v1108_v0 = vsel %vm7645_vm9, %v867_v5, %v1107_v58  ;;  %5226 = vmatprep.mubr.bf16.mxu0 %v7181_v11  ;;  %v1476_v56 = vrot.slane %v1474_v62, 5 }
  0xd7   : > { %v1111_v32 = vld [vmem:[#allocation2 + $0x74] sm:$0x1]  ;;  %v1252_v12 = vld [vmem:[#allocation2 + $0x64] sm:$0xf]  ;;  %v1253_v14 = vld [vmem:[#allocation2 + $0x68] sm:$0x1]  ;;  %v6526_v15 = vpack.c.bf16 %v559_v9, %v559_v9  ;;  %v876_v49 = vsel %vm7653_vm10, %v868_v6, %v875_v45 }
  0xd8   : > { %1212 = vst [vmem:[#allocation3 + $0x264] sm:$0xf] %v1180_v24  ;;  %v1480_v18 = vshll.u32 %v1252_v12, 16  ;;  %v1484_v17 = vshrl.u32 %v1252_v12, 16  ;;  %v1490_v19 = vshll.u32 %v1253_v14, 16  ;;  %v1477_v25 = vor.u32 %v1476_v56, %v1473_v13  ;;  %v450_v30 = vld [vmem:[%s7585_s19 + $0xa0] sm:$0xff] }
  0xd9   : > { %1109 = vst [vmem:[#allocation2 + $0x6c] sm:$0xf] %v1108_v0  ;;  %v8083_v47 = vld [vmem:[#allocation2 + $0x40] sm:$0xf]  ;;  %v7201_v22 = vld [vmem:[#allocation3 + $0x12c] ss:$36 sps:$4 sm:$0xff]   ;;  %5227 = vmatmul.mubr.bf16.gmra.mxu0 %v7187_v53  ;;  %v1112_v33 = vsel %vm7639_vm8, %v877_v20, %v1111_v32 }
  0xda   : > { %v7205_v23 = vld [vmem:[#allocation3 + $0x128] ss:$36 sps:$4 sm:$0xff]   ;;  %v1482_v26 = vrot.slane %v1480_v18, 5  ;;  %v1486_v27 = vrot.slane %v1484_v17, 4  ;;  %v1492_v28 = vrot.slane %v1490_v19, 5  ;;  %5363 = vmatprep.mubr.bf16.mxu1 %v7201_v22  ;;  %v879_v34 = vshrl.u32 %v6525_v10, 16 }
  0xdb   : > { %1110 = vst [vmem:[#allocation2 + $0x70] sm:$0xf] %v876_v49  ;;  %v8090_v29 = vld [vmem:[#allocation2 + $0x44] sm:$0x1]  ;;  %v882_v38 = vshll.u32 %v6525_v10, 16  ;;  %v887_v40 = vshrl.u32 %v6526_v15, 16 }
  0xdc   : > { %v2011_v42 = vld [vmem:[#allocation2 + $0x48] sm:$0xf]  ;;  %v451_v43 = vld [vmem:[%s7585_s19 + $0xa8] sm:$0xff]  ;;  %v1478_v31 = vrot.slane %v1477_v25, 4  ;;  %v1487_v37 = vor.u32 %v1486_v27, %v1482_v26  ;;  %1113 = vst [vmem:[#allocation2 + $0x74] sm:$0x1] %v1112_v33 }
  0xdd   : > { %v890_v46 = vshll.u32 %v6526_v15, 16  ;;  %v1114_v48 = vld [vmem:[#allocation2 + $0x78] sm:$0xf]  ;;  %v1118_v50 = vld [vmem:[#allocation2 + $0x80] sm:$0x1]  ;;  %v6244_v35 = vrot.slane %v8081_v16, 9 }
  0xde   : > { %v2012_v51 = vld [vmem:[#allocation2 + $0x4c] sm:$0xf]  ;;  %2043 = vst [vmem:[#allocation3 + $0x174] sm:$0xf] %v2011_v42  ;;  %v7219_v52 = vld [vmem:[%s9040_s1 + $0x1e0] sm:$0xff]   ;;  %v881_v54 = vrot.slane %v879_v34, 7  ;;  %v1483_v59 = vsel %vm7614_vm4, %v1478_v31, %v1482_v26  ;;  %5364 = vmatmul.mubr.bf16.gmra.mxu1 %v7205_v23 }
  0xdf   : > { %v889_v58 = vrot.slane %v887_v40, 7  ;;  %v1862_v55 = vrot.slane %v8083_v47, 5  ;;  %v1865_v57 = vrot.slane %v8090_v29, 5  ;;  %2044 = vst [vmem:[#allocation3 + $0x198] sm:$0xf] %v2012_v51  ;;  %v1488_v60 = vrot.slane %v1487_v37, 4  ;;  %6881 = vmatprep.subr.bf16.mxu1 %v7219_v52 }
  0xe0   : > { %v8107_v63 = vld [vmem:[%s9041_s2] ss:$0 sm:$0xff]  ;;  %1710 = vst [vmem:[#allocation3 + $0x244] sm:$0xf] %v1483_v59  ;;  %v1181_v3 = vld [vmem:[#allocation2 + $0x6c] sm:$0xf]  ;;  %v884_v6 = vor.u32 %v882_v38, %v881_v54 }
  0xe1   : > { %v489_v62 = vmul.f32 %v8107_v63, %v450_v30  ;;  %v490_v1 = vmul.f32 %v8107_v63, %v451_v43  ;;  %v7222_v2 = vld [vmem:[%s9040_s1 + $0x1a0] sm:$0xff]   ;;  %v1254_v5 = vld [vmem:[#allocation2 + $0x6c] sm:$0xf]  ;;  %v885_v7 = vrot.slane %v881_v54, 4  ;;  %v892_v9 = vor.u32 %v890_v46, %v889_v58  ;;  %1213 = vst [vmem:[#allocation3 + $0x288] sm:$0xf] %v1181_v3 }
  0xe2   : > { %v894_v21 = vrot.slane %v889_v58, 4  ;;  %v1493_v11 = vsel %vm7614_vm4, %v1488_v60, %v1492_v28  ;;  %v1495_v53 = vshrl.u32 %v1254_v5, 16  ;;  %v1498_v13 = vshll.u32 %v1254_v5, 16  ;;  %6882 = vmatpush3.bf16.msra.mxu1 %v7222_v2  ;;  %v1182_v32 = vld [vmem:[#allocation2 + $0x70] sm:$0xf]  ;;  %v7223_v15 = vld [vmem:[%s9040_s1 + $0x140] sm:$0xff]  }
  0xe3   : > { %v1863_v45 = vsel %vm7897_vm13, %v6244_v35, %v1862_v55  ;;  %1711 = vst [vmem:[#allocation3 + $0x268] sm:$0xf] %v1493_v11  ;;  %v1255_v24 = vld [vmem:[#allocation2 + $0x70] sm:$0xf]  ;;  %v893_v12 = vsel %vm7653_vm10, %v885_v7, %v892_v9  ;;  %v1115_v14 = vsel %vm7645_vm9, %v884_v6, %v1114_v48  ;;  %v1864_v10 = vrot.slane %v1862_v55, 4  ;;  %6777 = vmatprep.subr.bf16.mxu0 %v7223_v15  ;;  %v7224_v29 = vld [vmem:[%s9040_s1 + $0x100] sm:$0xff]  }
  0xe4   : > { %v1119_v0 = vsel %vm7639_vm8, %v894_v21, %v1118_v50  ;;  %1979 = vst [vmem:[#allocation3 + $0x170] sm:$0xf] %v1863_v45  ;;  %1214 = vst [vmem:[#allocation3 + $0x2ac] sm:$0xf] %v1182_v32  ;;  %v1497_v16 = vrot.slane %v1495_v53, 4  ;;  %v1500_v56 = vrot.slane %v1498_v13, 5  ;;  %v528_v4 = vadd.f32 %v7921_v61, %v489_v62  ;;  %6778 = vmatpush3.bf16.msra.mxu0 %v7224_v29 }
  0xe5   : > { %v1504_v18 = vshll.u32 %v1255_v24, 16  ;;  %v1508_v17 = vshrl.u32 %v1255_v24, 16  ;;  %1116 = vst [vmem:[#allocation2 + $0x78] sm:$0xf] %v1115_v14  ;;  %1117 = vst [vmem:[#allocation2 + $0x7c] sm:$0xf] %v893_v12  ;;  %v1866_v47 = vsel %vm7897_vm13, %v1864_v10, %v1865_v57  ;;  %v529_v49 = vadd.f32 %v7921_v61, %v490_v1 }
  0xe6   : > { %1120 = vst [vmem:[#allocation2 + $0x80] sm:$0x1] %v1119_v0  ;;  %v1256_v19 = vld [vmem:[#allocation2 + $0x74] sm:$0x1]  ;;  %v1744_v20 = vld [vmem:[#allocation2 + $0x48] sm:$0xe]  ;;  %v1501_v23 = vor.u32 %v1500_v56, %v1497_v16 }
  0xe7   : > { %v1745_v22 = vld [vmem:[#allocation2 + $0x4c] sm:$0xf]  ;;  %v1506_v25 = vrot.slane %v1504_v18, 5  ;;  %v1510_v26 = vrot.slane %v1508_v17, 4  ;;  %v1514_v27 = vshll.u32 %v1256_v19, 16  ;;  %v560_v30 = vmax.f32 %v528_v4, 0.0 }
  0xe8   : > { %1980 = vst [vmem:[#allocation3 + $0x194] sm:$0xf] %v1866_v47  ;;  %v1746_v28 = vld [vmem:[#allocation2 + $0x50] sm:$0x1]  ;;  %v561_v33 = vmax.f32 %v529_v49, 0.0  ;;  %v6245_v34 = vrot.slane %v1744_v20, 9 }
  0xe9   : > { %v1869_v38 = vrot.slane %v1745_v22, 5  ;;  %v2013_v40 = vld [vmem:[#allocation2 + $0x54] sm:$0xf]  ;;  %v1502_v42 = vrot.slane %v1501_v23, 4  ;;  %v1511_v61 = vor.u32 %v1510_v26, %v1506_v25  ;;  %v1516_v43 = vrot.slane %v1514_v27, 5  ;;  %v7235_v35 = vld [vmem:[%s9040_s1 + $0x1d8] sm:$0xff]  }
  0xea   : > { %v1872_v31 = vrot.slane %v1746_v28, 5  ;;  %v2014_v37 = vld [vmem:[#allocation2 + $0x58] sm:$0xf]  ;;  %2045 = vst [vmem:[#allocation3 + $0x1bc] sm:$0xf] %v2013_v40  ;;  %v6527_v46 = vpack.c.bf16 %v560_v30, %v560_v30  ;;  %6883 = vmatprep.subr.bf16.mxu1 %v7235_v35  ;;  %v6528_v6 = vpack.c.bf16 %v561_v33, %v561_v33 }
  0xeb   : > { %v1870_v48 = vsel %vm7897_vm13, %v6245_v34, %v1869_v38  ;;  %v1871_v50 = vrot.slane %v1869_v38, 4  ;;  %2046 = vst [vmem:[#allocation3 + $0x1e0] sm:$0xf] %v2014_v37  ;;  %v7191_v51 = vld [vmem:[#allocation3 + $0x244] ss:$36 sps:$4 sm:$0xff]   ;;  %v1507_v54 = vsel %vm7614_vm4, %v1502_v42, %v1506_v25  ;;  %v1512_v58 = vrot.slane %v1511_v61, 4 }
  0xec   : > { %v7195_v52 = vld [vmem:[#allocation3 + $0x240] ss:$36 sps:$4 sm:$0xff]   ;;  %1981 = vst [vmem:[#allocation3 + $0x1b8] sm:$0xf] %v1870_v48  ;;  %1712 = vst [vmem:[#allocation3 + $0x28c] sm:$0xf] %v1507_v54  ;;  %5234 = vmatprep.mubr.bf16.mxu0 %v7191_v51 }
  0xed   : > { %v1183_v55 = vld [vmem:[#allocation2 + $0x78] sm:$0xf]  ;;  %v1184_v57 = vld [vmem:[#allocation2 + $0x7c] sm:$0xf]  ;;  %v1873_v60 = vsel %vm7897_vm13, %v1871_v50, %v1872_v31  ;;  %v1517_v62 = vsel %vm7614_vm4, %v1512_v58, %v1516_v43  ;;  %v1259_v2 = vld [vmem:[#allocation2 + $0x80] sm:$0x1]  ;;  %5235 = vmatmul.mubr.bf16.gmra.mxu0 %v7195_v52 }
  0xee   : > { %v1257_v59 = vld [vmem:[#allocation2 + $0x78] sm:$0xf]  ;;  %1215 = vst [vmem:[#allocation3 + $0x2d0] sm:$0xf] %v1183_v55  ;;  %1216 = vst [vmem:[#allocation3 + $0x2f4] sm:$0xf] %v1184_v57 }
  0xef   : > { %v1258_v1 = vld [vmem:[#allocation2 + $0x7c] sm:$0xf]  ;;  %v1519_v3 = vshrl.u32 %v1257_v59, 16  ;;  %v1522_v5 = vshll.u32 %v1257_v59, 16  ;;  %1982 = vst [vmem:[#allocation3 + $0x1dc] sm:$0xf] %v1873_v60 }
  0xf0   : > { %1713 = vst [vmem:[#allocation3 + $0x2b0] sm:$0xf] %v1517_v62  ;;  %v1528_v7 = vshll.u32 %v1258_v1, 16  ;;  %v1532_v9 = vshrl.u32 %v1258_v1, 16  ;;  %v1538_v21 = vshll.u32 %v1259_v2, 16  ;;  %v896_v11 = vshrl.u32 %v6527_v46, 16 }
  0xf1   : > { %v1521_v53 = vrot.slane %v1519_v3, 4  ;;  %v1524_v13 = vrot.slane %v1522_v5, 5  ;;  %v7209_v45 = vld [vmem:[#allocation3 + $0x174] ss:$36 sps:$4 sm:$0xff]   ;;  %v1121_v10 = vld [vmem:[#allocation2 + $0x84] sm:$0xf] }
  0xf2   : > { %v7213_v32 = vld [vmem:[#allocation3 + $0x170] ss:$36 sps:$4 sm:$0xff]   ;;  %v1530_v24 = vrot.slane %v1528_v7, 5  ;;  %v1534_v12 = vrot.slane %v1532_v9, 4  ;;  %v1540_v14 = vrot.slane %v1538_v21, 5  ;;  %v898_v0 = vrot.slane %v896_v11, 7  ;;  %5371 = vmatprep.mubr.bf16.mxu1 %v7209_v45 }
  0xf3   : > { %v1525_v15 = vor.u32 %v1524_v13, %v1521_v53  ;;  %v899_v16 = vshll.u32 %v6527_v46, 16  ;;  %v904_v56 = vshrl.u32 %v6528_v6, 16  ;;  %v907_v18 = vshll.u32 %v6528_v6, 16  ;;  %v8148_v17 = vld [vmem:[%s9040_s1 + $0x238] sm:$0xff]   ;;  %5372 = vmatmul.mubr.bf16.gmra.mxu1 %v7213_v32  ;;  %v1125_v4 = vld [vmem:[#allocation2 + $0x8c] sm:$0x1] }
  0xf4   : > { %v1535_v19 = vor.u32 %v1534_v12, %v1530_v24  ;;  %v902_v47 = vrot.slane %v898_v0, 4  ;;  %7011 = vmatprep.subr.bf16.mxu0 %v8148_v17  ;;  %v7239_v23 = vld [vmem:[%s9040_s1 + $0x198] sm:$0xff]   ;;  %v7204_v29 = vld [vmem:[#allocation3 + $0x288] ss:$36 sps:$4 sm:$0xff]   ;;  %v1747_v42 = vld [vmem:[#allocation2 + $0x54] sm:$0xe] }
  0xf5   : > { %v1526_v49 = vrot.slane %v1525_v15, 4  ;;  %v901_v20 = vor.u32 %v899_v16, %v898_v0  ;;  %v906_v22 = vrot.slane %v904_v56, 7  ;;  %v7217_v26 = vld [vmem:[#allocation3 + $0x1bc] ss:$36 sps:$4 sm:$0xff]   ;;  %6884 = vmatpush3.bf16.msra.mxu1 %v7239_v23  ;;  %v1749_v37 = vld [vmem:[#allocation2 + $0x5c] sm:$0x1] }
  0xf6   : > { %v1536_v25 = vrot.slane %v1535_v19, 4  ;;  %v7221_v27 = vld [vmem:[#allocation3 + $0x1b8] ss:$36 sps:$4 sm:$0xff]   ;;  %5379 = vmatprep.mubr.bf16.mxu1 %v7217_v26  ;;  %v1748_v61 = vld [vmem:[#allocation2 + $0x58] sm:$0xf]  ;;  %v6246_v46 = vrot.slane %v1747_v42, 9 }
  0xf7   : > { %v7199_v28 = vld [vmem:[#allocation3 + $0x28c] ss:$36 sps:$4 sm:$0xff]   ;;  %v1531_v30 = vsel %vm7614_vm4, %v1526_v49, %v1530_v24  ;;  %v909_v33 = vor.u32 %v907_v18, %v906_v22  ;;  %v911_v34 = vrot.slane %v906_v22, 4  ;;  %v1122_v38 = vsel %vm7645_vm9, %v901_v20, %v1121_v10  ;;  %v2015_v50 = vld [vmem:[#allocation2 + $0x60] sm:$0xf]  ;;  %v7250_v54 = vld [vmem:[%s9040_s1 + $0x1d0] sm:$0xff]  }
  0xf8   : > { %v1541_v40 = vsel %vm7614_vm4, %v1536_v25, %v1540_v14  ;;  %1714 = vst [vmem:[#allocation3 + $0x2d4] sm:$0xf] %v1531_v30  ;;  %1123 = vst [vmem:[#allocation2 + $0x84] sm:$0xf] %v1122_v38  ;;  %5242 = vmatprep.mubr.bf16.mxu0 %v7199_v28  ;;  %v1876_v48 = vrot.slane %v1748_v61, 5  ;;  %v1879_v35 = vrot.slane %v1749_v37, 5  ;;  %6885 = vmatprep.subr.bf16.mxu1 %v7250_v54 }
  0xf9   : > { %1715 = vst [vmem:[#allocation3 + $0x2f8] sm:$0xf] %v1541_v40  ;;  %v910_v43 = vsel %vm7653_vm10, %v902_v47, %v909_v33  ;;  %v1126_v31 = vsel %vm7639_vm8, %v911_v34, %v1125_v4  ;;  %5243 = vmatmul.mubr.bf16.gmra.mxu0 %v7204_v29  ;;  %v2016_v51 = vld [vmem:[#allocation2 + $0x64] sm:$0xf]  ;;  %2047 = vst [vmem:[#allocation3 + $0x204] sm:$0xf] %v2015_v50 }
  0xfa   : > { %1124 = vst [vmem:[#allocation2 + $0x88] sm:$0xf] %v910_v43  ;;  %1127 = vst [vmem:[#allocation2 + $0x8c] sm:$0x1] %v1126_v31  ;;  %v2065_v52 = vld [vmem:[#allocation2 + $0xc] sm:$0xf]  ;;  %v1877_v58 = vsel %vm7897_vm13, %v6246_v46, %v1876_v48 }
  0xfb   : > { %v1878_v55 = vrot.slane %v1876_v48, 4  ;;  %2048 = vst [vmem:[#allocation3 + $0x228] sm:$0xf] %v2016_v51  ;;  %v2066_v57 = vld [vmem:[#allocation2 + $0x10] sm:$0xf]  ;;  %v2114_v60 = vshrl.u32 %v2065_v52, 16  ;;  %5380 = vmatmul.mubr.bf16.gmra.mxu1 %v7221_v27 }
  0xfc   : > { %v2067_v59 = vld [vmem:[#allocation2 + $0x14] sm:$0x1]  ;;  %1983 = vst [vmem:[#allocation3 + $0x200] sm:$0xf] %v1877_v58  ;;  %v2117_v62 = vshll.u32 %v2065_v52, 16  ;;  %v2123_v1 = vshll.u32 %v2066_v57, 16 }
  0xfd   : > { %v2127_v2 = vshrl.u32 %v2066_v57, 16  ;;  %v2133_v3 = vshll.u32 %v2067_v59, 16  ;;  %v2561_v5 = vld [vmem:[#allocation2 + $0xc] sm:$0xe]  ;;  %v1880_v6 = vsel %vm7897_vm13, %v1878_v55, %v1879_v35  ;;  %v2116_v7 = vrot.slane %v2114_v60, 4  ;;  %v7254_v58 = vld [vmem:[%s9040_s1 + $0x190] sm:$0xff]  }
  0xfe   : > { %v2562_v9 = vld [vmem:[#allocation2 + $0x10] sm:$0xf]  ;;  %v6255_v21 = vrot.slane %v2561_v5, 9  ;;  %1984 = vst [vmem:[#allocation3 + $0x224] sm:$0xf] %v1880_v6  ;;  %v2119_v11 = vrot.slane %v2117_v62, 5  ;;  %6886 = vmatpush3.bf16.msra.mxu1 %v7254_v58 }
  0xff   : > { %v2125_v53 = vrot.slane %v2123_v1, 5  ;;  %v2129_v13 = vrot.slane %v2127_v2, 4  ;;  %v2135_v45 = vrot.slane %v2133_v3, 5  ;;  %v1185_v32 = vld [vmem:[#allocation2 + $0x84] sm:$0xf]  ;;  %v2659_v14 = vrot.slane %v2562_v9, 5 }
 0x100   : > { %v1260_v24 = vld [vmem:[#allocation2 + $0x84] sm:$0xf]  ;;  %v2563_v12 = vld [vmem:[#allocation2 + $0x14] sm:$0x1]  ;;  %v7207_v0 = vld [vmem:[#allocation3 + $0x2d4] ss:$36 sps:$4 sm:$0xff]   ;;  %v2120_v16 = vor.u32 %v2119_v11, %v2116_v7 }
 0x101   : > { %v7212_v10 = vld [vmem:[#allocation3 + $0x2d0] ss:$36 sps:$4 sm:$0xff]   ;;  %1217 = vst [vmem:[#allocation3 + $0x318] sm:$0xf] %v1185_v32  ;;  %v1543_v15 = vshrl.u32 %v1260_v24, 16  ;;  %v2130_v56 = vor.u32 %v2129_v13, %v2125_v53  ;;  %v2660_v4 = vsel %vm7897_vm13, %v6255_v21, %v2659_v14  ;;  %5250 = vmatprep.mubr.bf16.mxu0 %v7207_v0  ;;  %v1546_v22 = vshll.u32 %v1260_v24, 16 }
 0x102   : > { %v1186_v18 = vld [vmem:[#allocation2 + $0x88] sm:$0xf]  ;;  %v1262_v47 = vld [vmem:[#allocation2 + $0x8c] sm:$0x1]  ;;  %v1750_v49 = vld [vmem:[#allocation2 + $0x60] sm:$0xe]  ;;  %5251 = vmatmul.mubr.bf16.gmra.mxu0 %v7212_v10 }
 0x103   : > { %v1261_v19 = vld [vmem:[#allocation2 + $0x88] sm:$0xf]  ;;  %1218 = vst [vmem:[#allocation3 + $0x33c] sm:$0xf] %v1186_v18  ;;  %v1545_v20 = vrot.slane %v1543_v15, 4  ;;  %v1562_v27 = vshll.u32 %v1262_v47, 16 }
 0x104   : > { %v1552_v23 = vshll.u32 %v1261_v19, 16  ;;  %v1556_v25 = vshrl.u32 %v1261_v19, 16  ;;  %2801 = vst [vmem:[#allocation3 + $0x14] sm:$0xf] %v2660_v4  ;;  %v1751_v26 = vld [vmem:[#allocation2 + $0x64] sm:$0xf] }
 0x105   : > { %v2121_v28 = vrot.slane %v2120_v16, 4  ;;  %v2131_v29 = vrot.slane %v2130_v56, 4  ;;  %v2661_v30 = vrot.slane %v2659_v14, 4  ;;  %v1548_v33 = vrot.slane %v1546_v22, 5  ;;  %v1752_v42 = vld [vmem:[#allocation2 + $0x68] sm:$0x1] }
 0x106   : > { %v1554_v34 = vrot.slane %v1552_v23, 5  ;;  %v1558_v38 = vrot.slane %v1556_v25, 4  ;;  %v2662_v40 = vrot.slane %v2563_v12, 5  ;;  %v1564_v61 = vrot.slane %v1562_v27, 5  ;;  %v7225_v43 = vld [vmem:[#allocation3 + $0x204] ss:$36 sps:$4 sm:$0xff]  }
 0x107   : > { %v2126_v31 = vsel %vm7614_vm4, %v2121_v28, %v2125_v53  ;;  %v2136_v37 = vsel %vm7614_vm4, %v2131_v29, %v2135_v45  ;;  %v7230_v46 = vld [vmem:[#allocation3 + $0x200] ss:$36 sps:$4 sm:$0xff]   ;;  %v1549_v48 = vor.u32 %v1548_v33, %v1545_v20  ;;  %v6247_v51 = vrot.slane %v1750_v49, 9  ;;  %v2017_v52 = vld [vmem:[#allocation2 + $0x6c] sm:$0xf]  ;;  %5387 = vmatprep.mubr.bf16.mxu1 %v7225_v43  ;;  %v7280_v43 = vld [vmem:[%s9040_s1 + $0x1c0] sm:$0xff]  }
 0x108   : > { %v1559_v50 = vor.u32 %v1558_v38, %v1554_v34  ;;  %2529 = vst [vmem:[#allocation3 + $0x10] sm:$0xf] %v2126_v31  ;;  %2530 = vst [vmem:[#allocation3 + $0x34] sm:$0xf] %v2136_v37  ;;  %v2663_v35 = vsel %vm7897_vm13, %v2661_v30, %v2662_v40  ;;  %v2018_v54 = vld [vmem:[#allocation2 + $0x70] sm:$0xf]  ;;  %5388 = vmatmul.mubr.bf16.gmra.mxu1 %v7230_v46 }
 0x109   : > { %2802 = vst [vmem:[#allocation3 + $0x38] sm:$0xf] %v2663_v35  ;;  %v1883_v55 = vrot.slane %v1751_v26, 5  ;;  %v1886_v57 = vrot.slane %v1752_v42, 5  ;;  %2049 = vst [vmem:[#allocation3 + $0x24c] sm:$0xf] %v2017_v52 }
 0x10a   : > { %2050 = vst [vmem:[#allocation3 + $0x270] sm:$0xf] %v2018_v54  ;;  %v2068_v59 = vld [vmem:[#allocation2 + $0x18] sm:$0xf]  ;;  %v2069_v60 = vld [vmem:[#allocation2 + $0x1c] sm:$0xf] }
 0x10b   : > { %v1550_v62 = vrot.slane %v1549_v48, 4  ;;  %v1560_v1 = vrot.slane %v1559_v50, 4  ;;  %v2070_v2 = vld [vmem:[#allocation2 + $0x20] sm:$0x1]  ;;  %v2138_v3 = vshrl.u32 %v2068_v59, 16  ;;  %v2141_v5 = vshll.u32 %v2068_v59, 16 }
 0x10c   : > { %v1884_v6 = vsel %vm7897_vm13, %v6247_v51, %v1883_v55  ;;  %v1885_v7 = vrot.slane %v1883_v55, 4  ;;  %v2147_v9 = vshll.u32 %v2069_v60, 16  ;;  %v2151_v21 = vshrl.u32 %v2069_v60, 16  ;;  %v2564_v11 = vld [vmem:[#allocation2 + $0x18] sm:$0xe]  ;;  %v7265_v53 = vld [vmem:[%s9040_s1 + $0x1c8] sm:$0xff]  }
 0x10d   : > { %v1555_v13 = vsel %vm7614_vm4, %v1550_v62, %v1554_v34  ;;  %v1565_v45 = vsel %vm7614_vm4, %v1560_v1, %v1564_v61  ;;  %1985 = vst [vmem:[#allocation3 + $0x248] sm:$0xf] %v1884_v6  ;;  %v2140_v32 = vrot.slane %v2138_v3, 4  ;;  %v2143_v24 = vrot.slane %v2141_v5, 5  ;;  %v2565_v12 = vld [vmem:[#allocation2 + $0x1c] sm:$0xf]  ;;  %6887 = vmatprep.subr.bf16.mxu1 %v7265_v53 }
 0x10e   : > { %v2566_v14 = vld [vmem:[#allocation2 + $0x20] sm:$0x1]  ;;  %1716 = vst [vmem:[#allocation3 + $0x31c] sm:$0xf] %v1555_v13  ;;  %1717 = vst [vmem:[#allocation3 + $0x340] sm:$0xf] %v1565_v45  ;;  %v1887_v0 = vsel %vm7897_vm13, %v1885_v7, %v1886_v57 }
 0x10f   : > { %v2149_v10 = vrot.slane %v2147_v9, 5  ;;  %v2153_v15 = vrot.slane %v2151_v21, 4  ;;  %v2157_v16 = vshll.u32 %v2070_v2, 16  ;;  %1986 = vst [vmem:[#allocation3 + $0x26c] sm:$0xf] %v1887_v0  ;;  %v2144_v56 = vor.u32 %v2143_v24, %v2140_v32  ;;  %v7269_v4 = vld [vmem:[%s9040_s1 + $0x188] sm:$0xff]  }
 0x110   : > { %v6256_v18 = vrot.slane %v2564_v11, 9  ;;  %v2666_v19 = vrot.slane %v2565_v12, 5  ;;  %v2669_v47 = vrot.slane %v2566_v14, 5  ;;  %6888 = vmatpush3.bf16.msra.mxu1 %v7269_v4  ;;  %v7229_v27 = vld [vmem:[#allocation3 + $0x14] ss:$36 sps:$4 sm:$0xff]   ;;  %v7284_v45 = vld [vmem:[%s9040_s1 + $0x180] sm:$0xff]  }
 0x111   : > { %v2154_v49 = vor.u32 %v2153_v15, %v2149_v10  ;;  %v2159_v20 = vrot.slane %v2157_v16, 5  ;;  %v2145_v22 = vrot.slane %v2144_v56, 4  ;;  %v1753_v29 = vld [vmem:[#allocation2 + $0x6c] sm:$0xe]  ;;  %v1754_v30 = vld [vmem:[#allocation2 + $0x70] sm:$0xf]  ;;  %6889 = vmatprep.subr.bf16.mxu1 %v7280_v43 }
 0x112   : > { %v2667_v23 = vsel %vm7897_vm13, %v6256_v18, %v2666_v19  ;;  %v2668_v26 = vrot.slane %v2666_v19, 4  ;;  %v1755_v33 = vld [vmem:[#allocation2 + $0x74] sm:$0x1]  ;;  %v6248_v40 = vrot.slane %v1753_v29, 9  ;;  %v1890_v42 = vrot.slane %v1754_v30, 5  ;;  %v460_v18 = vld [vmem:[%s7585_s19 + $0xf0] sm:$0xff] }
 0x113   : > { %v2155_v25 = vrot.slane %v2154_v49, 4  ;;  %2803 = vst [vmem:[#allocation3 + $0x5c] sm:$0xf] %v2667_v23  ;;  %v2150_v28 = vsel %vm7614_vm4, %v2145_v22, %v2149_v10  ;;  %v2019_v61 = vld [vmem:[#allocation2 + $0x78] sm:$0xf]  ;;  %v1893_v37 = vrot.slane %v1755_v33, 5 }
 0x114   : > { %2531 = vst [vmem:[#allocation3 + $0x58] sm:$0xf] %v2150_v28  ;;  %v2670_v38 = vsel %vm7897_vm13, %v2668_v26, %v2669_v47  ;;  %2051 = vst [vmem:[#allocation3 + $0x294] sm:$0xf] %v2019_v61  ;;  %v7220_v46 = vld [vmem:[#allocation3 + $0x318] ss:$36 sps:$4 sm:$0xff]   ;;  %v1891_v50 = vsel %vm7897_vm13, %v6248_v40, %v1890_v42  ;;  %6890 = vmatpush3.bf16.msra.mxu1 %v7284_v45  ;;  %v6555_v45 = vpop.f32.mrf.mxu0 }
 0x115   : > { %v2160_v34 = vsel %vm7614_vm4, %v2155_v25, %v2159_v20  ;;  %v7215_v31 = vld [vmem:[#allocation3 + $0x31c] ss:$36 sps:$4 sm:$0xff]   ;;  %2804 = vst [vmem:[#allocation3 + $0x80] sm:$0xf] %v2670_v38  ;;  %v7231_v48 = vld [vmem:[#allocation3 + $0x24c] ss:$36 sps:$4 sm:$0xff]  }
 0x116   : > { %2532 = vst [vmem:[#allocation3 + $0x7c] sm:$0xf] %v2160_v34  ;;  %v1892_v35 = vrot.slane %v1890_v42, 4  ;;  %5258 = vmatprep.mubr.bf16.mxu0 %v7215_v31  ;;  %v7237_v51 = vld [vmem:[#allocation3 + $0x248] ss:$36 sps:$4 sm:$0xff]   ;;  %5395 = vmatprep.mubr.bf16.mxu1 %v7231_v48  ;;  %v8217_v0 = vld [vmem:[%s9040_s1 + $0x230] sm:$0xff]   ;;  %v499_v34 = vmul.f32 %v8107_v63, %v460_v18 }
 0x117   : > { %1987 = vst [vmem:[#allocation3 + $0x290] sm:$0xf] %v1891_v50  ;;  %v2020_v52 = vld [vmem:[#allocation2 + $0x7c] sm:$0xf]  ;;  %v2071_v54 = vld [vmem:[#allocation2 + $0x24] sm:$0xf]  ;;  %5259 = vmatmul.mubr.bf16.gmra.mxu0 %v7220_v46  ;;  %5396 = vmatmul.mubr.bf16.gmra.mxu1 %v7237_v51 }
 0x118   : > { %v1894_v58 = vsel %vm7897_vm13, %v1892_v35, %v1893_v37  ;;  %2052 = vst [vmem:[#allocation3 + $0x2b8] sm:$0xf] %v2020_v52  ;;  %v2072_v55 = vld [vmem:[#allocation2 + $0x28] sm:$0xf]  ;;  %v2073_v57 = vld [vmem:[#allocation2 + $0x2c] sm:$0x1]  ;;  %5492 = vmatprep.mubr.bf16.mxu0 %v7229_v27 }
 0x119   : > { %v2162_v59 = vshrl.u32 %v2071_v54, 16  ;;  %v2165_v60 = vshll.u32 %v2071_v54, 16  ;;  %1988 = vst [vmem:[#allocation3 + $0x2b4] sm:$0xf] %v1894_v58  ;;  %v2171_v62 = vshll.u32 %v2072_v55, 16  ;;  %v2175_v1 = vshrl.u32 %v2072_v55, 16 }
 0x11a   : > { %v2181_v2 = vshll.u32 %v2073_v57, 16  ;;  %v2567_v3 = vld [vmem:[#allocation2 + $0x24] sm:$0xe]  ;;  %v7227_v5 = vld [vmem:[#allocation3 + $0x10] ss:$36 sps:$4 sm:$0xff]   ;;  %v461_v27 = vld [vmem:[%s7585_s19 + $0xf8] sm:$0xff]  ;;  %s425_s19 = scalar_lea.vmem %s9044_s5, %s9081_s24 }
 0x11b   : > { %v2164_v6 = vrot.slane %v2162_v59, 4  ;;  %v2167_v7 = vrot.slane %v2165_v60, 5  ;;  %v2568_v9 = vld [vmem:[#allocation2 + $0x28] sm:$0xf]  ;;  %v2569_v21 = vld [vmem:[#allocation2 + $0x2c] sm:$0x1]  ;;  %v500_v35 = vmul.f32 %v8107_v63, %v461_v27 }
 0x11c   : > { %v2173_v11 = vrot.slane %v2171_v62, 5  ;;  %v2177_v53 = vrot.slane %v2175_v1, 4  ;;  %v6257_v13 = vrot.slane %v2567_v3, 9  ;;  %v7233_v32 = vld [vmem:[#allocation3 + $0x5c] ss:$36 sps:$4 sm:$0xff]   ;;  %v2183_v12 = vrot.slane %v2181_v2, 5 }
 0x11d   : > { %v2168_v24 = vor.u32 %v2167_v7, %v2164_v6  ;;  %v2673_v14 = vrot.slane %v2568_v9, 5  ;;  %v2676_v15 = vrot.slane %v2569_v21, 5  ;;  %v1756_v16 = vld [vmem:[#allocation2 + $0x78] sm:$0xe]  ;;  %v1757_v56 = vld [vmem:[#allocation2 + $0x7c] sm:$0xf] }
 0x11e   : > { %v2178_v10 = vor.u32 %v2177_v53, %v2173_v11  ;;  %v1758_v49 = vld [vmem:[#allocation2 + $0x80] sm:$0x1]  ;;  %v6249_v20 = vrot.slane %v1756_v16, 9  ;;  %v1897_v23 = vrot.slane %v1757_v56, 5  ;;  %v2021_v26 = vld [vmem:[#allocation2 + $0x84] sm:$0xf] }
 0x11f   : > { %v2169_v19 = vrot.slane %v2168_v24, 4  ;;  %v2674_v47 = vsel %vm7897_vm13, %v6257_v13, %v2673_v14  ;;  %v2675_v4 = vrot.slane %v2673_v14, 4  ;;  %v1900_v25 = vrot.slane %v1758_v49, 5  ;;  %5493 = vmatmul.mubr.bf16.vlgmr.msra.gmra.mxu0 %v7227_v5  ;;  %v7240_v28 = vld [vmem:[#allocation3 + $0x294] ss:$36 sps:$4 sm:$0xff]   ;;  %v7281_v1 = vld [vmem:[%s9040_s1 + $0x220] sm:$0xff]  }
 0x120   : > { %v2179_v22 = vrot.slane %v2178_v10, 4  ;;  %2805 = vst [vmem:[#allocation3 + $0xa4] sm:$0xf] %v2674_v47  ;;  %v7244_v33 = vld [vmem:[#allocation3 + $0x290] ss:$36 sps:$4 sm:$0xff]   ;;  %5500 = vmatprep.mubr.bf16.mxu0 %v7233_v32  ;;  %7012 = vmatpush3.bf16.msra.mxu0 %v8148_v17  ;;  %v1898_v40 = vsel %vm7897_vm13, %v6249_v20, %v1897_v23  ;;  %v1899_v42 = vrot.slane %v1897_v23, 4 }
 0x121   : > { %v2174_v29 = vsel %vm7614_vm4, %v2169_v19, %v2173_v11  ;;  %v2677_v30 = vsel %vm7897_vm13, %v2675_v4, %v2676_v15  ;;  %2053 = vst [vmem:[#allocation3 + $0x2dc] sm:$0xf] %v2021_v26  ;;  %v2022_v61 = vld [vmem:[#allocation2 + $0x88] sm:$0xf]  ;;  %v2074_v43 = vld [vmem:[#allocation2 + $0x30] sm:$0xf]  ;;  %5403 = vmatprep.mubr.bf16.mxu1 %v7240_v28  ;;  %7013 = vmatprep.subr.bf16.mxu0 %v8217_v0 }
 0x122   : > { %v2184_v38 = vsel %vm7614_vm4, %v2179_v22, %v2183_v12  ;;  %2533 = vst [vmem:[#allocation3 + $0xa0] sm:$0xf] %v2174_v29  ;;  %2806 = vst [vmem:[#allocation3 + $0xc8] sm:$0xf] %v2677_v30  ;;  %v7266_v31 = vld [vmem:[%s9040_s1 + $0x228] sm:$0xff]   ;;  %v2186_v48 = vshrl.u32 %v2074_v43, 16  ;;  %5404 = vmatmul.mubr.bf16.gmra.mxu1 %v7244_v33  ;;  %v1901_v51 = vsel %vm7897_vm13, %v1899_v42, %v1900_v25  ;;  %v6556_v22 = vpop.f32.mrf.mxu0 }
 0x123   : > { %v7238_v37 = vld [vmem:[#allocation3 + $0x58] ss:$36 sps:$4 sm:$0xff]   ;;  %2534 = vst [vmem:[#allocation3 + $0xc4] sm:$0xf] %v2184_v38  ;;  %1989 = vst [vmem:[#allocation3 + $0x2d8] sm:$0xf] %v1898_v40  ;;  %v8262_v28 = vadd.f32 %v6556_v22, %v6555_v45 }
 0x124   : > { %2054 = vst [vmem:[#allocation3 + $0x300] sm:$0xf] %v2022_v61  ;;  %v2075_v17 = vld [vmem:[#allocation2 + $0x34] sm:$0xf]  ;;  %v2076_v46 = vld [vmem:[#allocation2 + $0x38] sm:$0x1]  ;;  %7014 = vmatpush3.bf16.msra.mxu0 %v8217_v0 }
 0x125   : > { %v2189_v50 = vshll.u32 %v2074_v43, 16  ;;  %v2195_v52 = vshll.u32 %v2075_v17, 16  ;;  %v2199_v54 = vshrl.u32 %v2075_v17, 16  ;;  %v2205_v58 = vshll.u32 %v2076_v46, 16  ;;  %v2570_v55 = vld [vmem:[#allocation2 + $0x30] sm:$0xe]  ;;  %7015 = vmatprep.subr.bf16.mxu0 %v7266_v31 }
 0x126   : > { %1990 = vst [vmem:[#allocation3 + $0x2fc] sm:$0xf] %v1901_v51  ;;  %v2188_v57 = vrot.slane %v2186_v48, 4  ;;  %v2571_v60 = vld [vmem:[#allocation2 + $0x34] sm:$0xf]  ;;  %v6258_v7 = vrot.slane %v2570_v55, 9 }
 0x127   : > { %v2191_v59 = vrot.slane %v2189_v50, 5  ;;  %v2572_v62 = vld [vmem:[#allocation2 + $0x38] sm:$0x1]  ;;  %v7383_v63 = vld [vmem:[%s9042_s3] ss:$0 sm:$0xff]  ;;  %v2197_v3 = vrot.slane %v2195_v52, 5  ;;  %5501 = vmatmul.mubr.bf16.gmra.mxu0 %v7238_v37 }
 0x128   : > { %v538_v2 = vadd.f32 %v7383_v63, %v499_v34  ;;  %v2201_v5 = vrot.slane %v2199_v54, 4  ;;  %v2207_v6 = vrot.slane %v2205_v58, 5  ;;  %v2680_v21 = vrot.slane %v2571_v60, 5  ;;  %v1759_v14 = vld [vmem:[#allocation2 + $0x84] sm:$0xe]  ;;  %7016 = vmatpush3.bf16.msra.mxu0 %v7266_v31  ;;  %v7296_v0 = vld [vmem:[%s9040_s1 + $0x218] sm:$0xff]  }
 0x129   : > { %v2192_v9 = vor.u32 %v2191_v59, %v2188_v57  ;;  %v2683_v11 = vrot.slane %v2572_v62, 5  ;;  %v8247_v13 = vadd.f32 %v7383_v63, %v500_v35  ;;  %v7242_v15 = vld [vmem:[#allocation3 + $0xa4] ss:$36 sps:$4 sm:$0xff]   ;;  %v1760_v47 = vld [vmem:[#allocation2 + $0x88] sm:$0xf]  ;;  %v6250_v49 = vrot.slane %v1759_v14, 9  ;;  %7017 = vmatprep.subr.bf16.mxu0 %v7281_v1 }
 0x12a   : > { %v2202_v53 = vor.u32 %v2201_v5, %v2197_v3  ;;  %v2681_v24 = vsel %vm7897_vm13, %v6258_v7, %v2680_v21  ;;  %v2682_v12 = vrot.slane %v2680_v21, 4  ;;  %v570_v10 = vmax.f32 %v538_v2, 0.0  ;;  %v7245_v56 = vld [vmem:[#allocation3 + $0xa0] ss:$36 sps:$4 sm:$0xff]   ;;  %v1761_v4 = vld [vmem:[#allocation2 + $0x8c] sm:$0x1]  ;;  %5508 = vmatprep.mubr.bf16.mxu0 %v7242_v15 }
 0x12b   : > { %v2193_v32 = vrot.slane %v2192_v9, 4  ;;  %2807 = vst [vmem:[#allocation3 + $0xec] sm:$0xf] %v2681_v24  ;;  %v7246_v23 = vld [vmem:[#allocation3 + $0x2dc] ss:$36 sps:$4 sm:$0xff]   ;;  %v1904_v27 = vrot.slane %v1760_v47, 5 }
 0x12c   : > { %v2203_v16 = vrot.slane %v2202_v53, 4  ;;  %v2684_v19 = vsel %vm7897_vm13, %v2682_v12, %v2683_v11  ;;  %v8258_v20 = vpack.c.bf16 %v570_v10, %v570_v10  ;;  %v1907_v29 = vrot.slane %v1761_v4, 5  ;;  %v2023_v30 = vld [vmem:[#allocation2 + $0x90] sm:$0xf]  ;;  %v2024_v33 = vld [vmem:[#allocation2 + $0x94] sm:$0xf]  ;;  %5411 = vmatprep.mubr.bf16.mxu1 %v7246_v23  ;;  %7018 = vmatpush3.bf16.msra.mxu0 %v7281_v1 }
 0x12d   : > { %v2198_v18 = vsel %vm7614_vm4, %v2193_v32, %v2197_v3  ;;  %2808 = vst [vmem:[#allocation3 + $0x110] sm:$0xf] %v2684_v19  ;;  %v7252_v26 = vld [vmem:[#allocation3 + $0x2d8] ss:$36 sps:$4 sm:$0xff]   ;;  %v571_v34 = vmax.f32 %v8247_v13, 0.0  ;;  %v1905_v40 = vsel %vm7897_vm13, %v6250_v49, %v1904_v27  ;;  %v1906_v42 = vrot.slane %v1904_v27, 4  ;;  %7019 = vmatprep.subr.bf16.mxu0 %v7296_v0 }
 0x12e   : > { %v2208_v25 = vsel %vm7614_vm4, %v2203_v16, %v2207_v6  ;;  %2535 = vst [vmem:[#allocation3 + $0xe8] sm:$0xf] %v2198_v18  ;;  %v7308_v38 = vld [vmem:[%s9040_s1 + $0x210] sm:$0xff]   ;;  %2055 = vst [vmem:[#allocation3 + $0x324] sm:$0xf] %v2023_v30  ;;  %v981_v31 = vshrl.u32 %v8258_v20, 16  ;;  %5412 = vmatmul.mubr.bf16.gmra.mxu1 %v7252_v26 }
 0x12f   : > { %2536 = vst [vmem:[#allocation3 + $0x10c] sm:$0xf] %v2208_v25  ;;  %2056 = vst [vmem:[#allocation3 + $0x348] sm:$0xf] %v2024_v33  ;;  %v2077_v61 = vld [vmem:[#allocation2 + $0x3c] sm:$0xf]  ;;  %v1908_v35 = vsel %vm7897_vm13, %v1906_v42, %v1907_v29  ;;  %5509 = vmatmul.mubr.bf16.gmra.mxu0 %v7245_v56 }
 0x130   : > { %v2078_v43 = vld [vmem:[#allocation2 + $0x40] sm:$0xf]  ;;  %1991 = vst [vmem:[#allocation3 + $0x320] sm:$0xf] %v1905_v40  ;;  %v2079_v37 = vld [vmem:[#allocation2 + $0x44] sm:$0x1]  ;;  %7020 = vmatpush3.bf16.msra.mxu0 %v7296_v0 }
 0x131   : > { %v2210_v17 = vshrl.u32 %v2077_v61, 16  ;;  %v2213_v46 = vshll.u32 %v2077_v61, 16  ;;  %v2219_v48 = vshll.u32 %v2078_v43, 16  ;;  %v2223_v50 = vshrl.u32 %v2078_v43, 16  ;;  %v2573_v52 = vld [vmem:[#allocation2 + $0x3c] sm:$0xe]  ;;  %7021 = vmatprep.subr.bf16.mxu0 %v7308_v38  ;;  %v8291_v43 = vpop.f32.mrf.mxu0 }
 0x132   : > { %v2229_v51 = vshll.u32 %v2079_v37, 16  ;;  %v2574_v54 = vld [vmem:[#allocation2 + $0x40] sm:$0xf]  ;;  %v8273_v58 = vrot.slane %v981_v31, 7  ;;  %1992 = vst [vmem:[#allocation3 + $0x344] sm:$0xf] %v1908_v35 }
 0x133   : > { %v2212_v55 = vrot.slane %v2210_v17, 4  ;;  %v2215_v57 = vrot.slane %v2213_v46, 5  ;;  %v2221_v59 = vrot.slane %v2219_v48, 5  ;;  %v2225_v60 = vrot.slane %v2223_v50, 4  ;;  %v2575_v62 = vld [vmem:[#allocation2 + $0x44] sm:$0x1] }
 0x134   : > { %v2231_v1 = vrot.slane %v2229_v51, 5  ;;  %v6259_v63 = vrot.slane %v2573_v52, 9  ;;  %v2687_v2 = vrot.slane %v2574_v54, 5  ;;  %v2690_v3 = vrot.slane %v2575_v62, 5  ;;  %v1762_v5 = vld [vmem:[#allocation2 + $0x90] sm:$0xe]  ;;  %7022 = vmatpush3.bf16.msra.mxu0 %v7308_v38 }
 0x135   : > { %v2216_v6 = vor.u32 %v2215_v57, %v2212_v55  ;;  %v2226_v7 = vor.u32 %v2225_v60, %v2221_v59  ;;  %v1763_v9 = vld [vmem:[#allocation2 + $0x94] sm:$0xf]  ;;  %v1764_v21 = vld [vmem:[#allocation2 + $0x98] sm:$0x1]  ;;  %v6251_v11 = vrot.slane %v1762_v5, 9  ;;  %v984_v19 = vshll.u32 %v8258_v20, 16 }
 0x136   : > { %v7248_v53 = vld [vmem:[#allocation3 + $0xec] ss:$36 sps:$4 sm:$0xff]   ;;  %v2688_v32 = vsel %vm7897_vm13, %v6259_v63, %v2687_v2  ;;  %v2689_v24 = vrot.slane %v2687_v2, 4  ;;  %v1911_v10 = vrot.slane %v1763_v9, 5  ;;  %v1914_v15 = vrot.slane %v1764_v21, 5 }
 0x137   : > { %v7253_v45 = vld [vmem:[#allocation3 + $0xe8] ss:$36 sps:$4 sm:$0xff]   ;;  %v2217_v12 = vrot.slane %v2216_v6, 4  ;;  %v2227_v14 = vrot.slane %v2226_v7, 4  ;;  %2809 = vst [vmem:[#allocation3 + $0x134] sm:$0xf] %v2688_v32  ;;  %5516 = vmatprep.mubr.bf16.mxu0 %v7248_v53  ;;  %v8296_v48 = vpack.c.bf16 %v571_v34, %v571_v34 }
 0x138   : > { %v2025_v16 = vld [vmem:[#allocation2 + $0x9c] sm:$0xf]  ;;  %v2691_v0 = vsel %vm7897_vm13, %v2689_v24, %v2690_v3  ;;  %v2026_v56 = vld [vmem:[#allocation2 + $0xa0] sm:$0xf]  ;;  %v2080_v18 = vld [vmem:[#allocation2 + $0x48] sm:$0xf]  ;;  %v1912_v49 = vsel %vm7897_vm13, %v6251_v11, %v1911_v10  ;;  %5517 = vmatmul.mubr.bf16.gmra.mxu0 %v7253_v45 }
 0x139   : > { %2057 = vst [vmem:[#allocation3 + $0x36c] sm:$0xf] %v2025_v16  ;;  %v2222_v47 = vsel %vm7614_vm4, %v2217_v12, %v2221_v59  ;;  %v2232_v4 = vsel %vm7614_vm4, %v2227_v14, %v2231_v1  ;;  %2810 = vst [vmem:[#allocation3 + $0x158] sm:$0xf] %v2691_v0  ;;  %v1913_v22 = vrot.slane %v1911_v10, 4  ;;  %v7321_v26 = vld [vmem:[%s9040_s1 + $0x208] sm:$0xff]   ;;  %v8299_v1 = vpop.f32.mrf.mxu0 }
 0x13a   : > { %2058 = vst [vmem:[#allocation3 + $0x390] sm:$0xf] %v2026_v56  ;;  %v2081_v23 = vld [vmem:[#allocation2 + $0x4c] sm:$0xf]  ;;  %v2082_v25 = vld [vmem:[#allocation2 + $0x50] sm:$0x1]  ;;  %7023 = vmatprep.subr.bf16.mxu0 %v7321_v26 }
 0x13b   : > { %v7255_v27 = vld [vmem:[#allocation3 + $0x324] ss:$36 sps:$4 sm:$0xff]   ;;  %2537 = vst [vmem:[#allocation3 + $0x130] sm:$0xf] %v2222_v47  ;;  %2538 = vst [vmem:[#allocation3 + $0x154] sm:$0xf] %v2232_v4  ;;  %v1915_v33 = vsel %vm7897_vm13, %v1913_v22, %v1914_v15  ;;  %7024 = vmatpush3.bf16.msra.mxu0 %v7321_v26  ;;  %v6561_v14 = vpop.f32.mrf.mxu0 }
 0x13c   : > { %v7259_v29 = vld [vmem:[#allocation3 + $0x320] ss:$36 sps:$4 sm:$0xff]   ;;  %1993 = vst [vmem:[#allocation3 + $0x368] sm:$0xf] %v1912_v49  ;;  %v2234_v30 = vshrl.u32 %v2080_v18, 16  ;;  %v2237_v38 = vshll.u32 %v2080_v18, 16  ;;  %5419 = vmatprep.mubr.bf16.mxu1 %v7255_v27 }
 0x13d   : > { %v2243_v40 = vshll.u32 %v2081_v23, 16  ;;  %v2247_v42 = vshrl.u32 %v2081_v23, 16  ;;  %v2576_v61 = vld [vmem:[#allocation2 + $0x48] sm:$0xe]  ;;  %1994 = vst [vmem:[#allocation3 + $0x38c] sm:$0xf] %v1915_v33  ;;  %5420 = vmatmul.mubr.bf16.gmra.mxu1 %v7259_v29  ;;  %v6562_v27 = vpop.f32.mrf.mxu0 }
 0x13e   : > { %v2236_v31 = vrot.slane %v2234_v30, 4  ;;  %v2253_v37 = vshll.u32 %v2082_v25, 16  ;;  %v2577_v17 = vld [vmem:[#allocation2 + $0x4c] sm:$0xf]  ;;  %v2578_v46 = vld [vmem:[#allocation2 + $0x50] sm:$0x1] }
 0x13f   : > { %v2239_v50 = vrot.slane %v2237_v38, 5  ;;  %v2245_v35 = vrot.slane %v2243_v40, 5  ;;  %v2249_v51 = vrot.slane %v2247_v42, 4  ;;  %v6260_v52 = vrot.slane %v2576_v61, 9  ;;  %v1765_v63 = vld [vmem:[#allocation2 + $0x9c] sm:$0xe] }
 0x140   : > { %v2255_v54 = vrot.slane %v2253_v37, 5  ;;  %v2694_v55 = vrot.slane %v2577_v17, 5  ;;  %v2697_v57 = vrot.slane %v2578_v46, 5  ;;  %v987_v59 = vrot.slane %v8273_v58, 4  ;;  %v7257_v3 = vld [vmem:[#allocation3 + $0x134] ss:$36 sps:$4 sm:$0xff]  }
 0x141   : > { %v2240_v60 = vor.u32 %v2239_v50, %v2236_v31  ;;  %v2250_v62 = vor.u32 %v2249_v51, %v2245_v35  ;;  %v989_v2 = vshrl.u32 %v8296_v48, 16  ;;  %v1766_v21 = vld [vmem:[#allocation2 + $0xa0] sm:$0xf]  ;;  %v6252_v11 = vrot.slane %v1765_v63, 9  ;;  %5524 = vmatprep.mubr.bf16.mxu0 %v7257_v3  ;;  %v7261_v53 = vld [vmem:[#allocation3 + $0x36c] ss:$36 sps:$4 sm:$0xff]   ;;  %v6627_v50 = vpop.f32.mrf.mxu1 }
 0x142   : > { %v2695_v13 = vsel %vm7897_vm13, %v6260_v52, %v2694_v55  ;;  %v2696_v34 = vrot.slane %v2694_v55, 4  ;;  %v7260_v7 = vld [vmem:[#allocation3 + $0x130] ss:$36 sps:$4 sm:$0xff]   ;;  %v1918_v12 = vrot.slane %v1766_v21, 5  ;;  %v1767_v10 = vld [vmem:[#allocation2 + $0xa4] sm:$0x1]  ;;  %5427 = vmatprep.mubr.bf16.mxu1 %v7261_v53  ;;  %v8316_v42 = vadd.f32 %v6562_v27, %v6561_v14 }
 0x143   : > { %v2241_v5 = vrot.slane %v2240_v60, 4  ;;  %v2251_v6 = vrot.slane %v2250_v62, 4  ;;  %2811 = vst [vmem:[#allocation3 + $0x17c] sm:$0xf] %v2695_v13  ;;  %5525 = vmatmul.mubr.bf16.gmra.mxu0 %v7260_v7  ;;  %v2027_v15 = vld [vmem:[#allocation2 + $0xa8] sm:$0xf] }
 0x144   : > { %v2698_v9 = vsel %vm7897_vm13, %v2696_v34, %v2697_v57  ;;  %v7267_v24 = vld [vmem:[#allocation3 + $0x368] ss:$36 sps:$4 sm:$0xff]   ;;  %v2028_v16 = vld [vmem:[#allocation2 + $0xac] sm:$0xf]  ;;  %v1919_v0 = vsel %vm7897_vm13, %v6252_v11, %v1918_v12  ;;  %v1920_v56 = vrot.slane %v1918_v12, 4  ;;  %v1921_v18 = vrot.slane %v1767_v10, 5 }
 0x145   : > { %v2246_v45 = vsel %vm7614_vm4, %v2241_v5, %v2245_v35  ;;  %v2256_v32 = vsel %vm7614_vm4, %v2251_v6, %v2255_v54  ;;  %2812 = vst [vmem:[#allocation3 + $0x1a0] sm:$0xf] %v2698_v9  ;;  %2059 = vst [vmem:[#allocation3 + $0x3b4] sm:$0xf] %v2027_v15  ;;  %v2083_v47 = vld [vmem:[#allocation2 + $0x54] sm:$0xf]  ;;  %5428 = vmatmul.mubr.bf16.gmra.mxu1 %v7267_v24 }
 0x146   : > { %2539 = vst [vmem:[#allocation3 + $0x178] sm:$0xf] %v2246_v45  ;;  %2540 = vst [vmem:[#allocation3 + $0x19c] sm:$0xf] %v2256_v32  ;;  %v2084_v4 = vld [vmem:[#allocation2 + $0x58] sm:$0xf]  ;;  %v1922_v29 = vsel %vm7897_vm13, %v1920_v56, %v1921_v18 }
 0x147   : > { %2060 = vst [vmem:[#allocation3 + $0x3d8] sm:$0xf] %v2028_v16  ;;  %1995 = vst [vmem:[#allocation3 + $0x3b0] sm:$0xf] %v1919_v0  ;;  %v2085_v49 = vld [vmem:[#allocation2 + $0x5c] sm:$0x1] }
 0x148   : > { %v2258_v22 = vshrl.u32 %v2083_v47, 16  ;;  %v2261_v23 = vshll.u32 %v2083_v47, 16  ;;  %v2267_v25 = vshll.u32 %v2084_v4, 16  ;;  %v2271_v26 = vshrl.u32 %v2084_v4, 16  ;;  %v2579_v33 = vld [vmem:[#allocation2 + $0x54] sm:$0xe] }
 0x149   : > { %v2277_v30 = vshll.u32 %v2085_v49, 16  ;;  %v2580_v38 = vld [vmem:[#allocation2 + $0x58] sm:$0xf]  ;;  %v8314_v40 = vrot.slane %v989_v2, 7  ;;  %1996 = vst [vmem:[#allocation3 + $0x3d4] sm:$0xf] %v1922_v29  ;;  %v6628_v2 = vpop.f32.mrf.mxu1 }
 0x14a   : > { %v2260_v61 = vrot.slane %v2258_v22, 4  ;;  %v2263_v31 = vrot.slane %v2261_v23, 5  ;;  %v2269_v37 = vrot.slane %v2267_v25, 5  ;;  %v2273_v17 = vrot.slane %v2271_v26, 4  ;;  %v2581_v46 = vld [vmem:[#allocation2 + $0x5c] sm:$0x1] }
 0x14b   : > { %v2279_v35 = vrot.slane %v2277_v30, 5  ;;  %v6261_v51 = vrot.slane %v2579_v33, 9  ;;  %v2701_v52 = vrot.slane %v2580_v38, 5  ;;  %v2704_v54 = vrot.slane %v2581_v46, 5  ;;  %v1768_v55 = vld [vmem:[#allocation2 + $0xa8] sm:$0xe] }
 0x14c   : > { %v2264_v57 = vor.u32 %v2263_v31, %v2260_v61  ;;  %v2274_v60 = vor.u32 %v2273_v17, %v2269_v37  ;;  %v1769_v62 = vld [vmem:[#allocation2 + $0xac] sm:$0xf]  ;;  %v1770_v13 = vld [vmem:[#allocation2 + $0xb0] sm:$0x1]  ;;  %v6253_v34 = vrot.slane %v1768_v55, 9  ;;  %v992_v63 = vshll.u32 %v8296_v48, 16 }
 0x14d   : > { %v7263_v3 = vld [vmem:[#allocation3 + $0x17c] ss:$36 sps:$4 sm:$0xff]   ;;  %v2702_v5 = vsel %vm7897_vm13, %v6261_v51, %v2701_v52  ;;  %v2703_v6 = vrot.slane %v2701_v52, 4  ;;  %v1925_v7 = vrot.slane %v1769_v62, 5  ;;  %v8321_v9 = vadd.f32 %v6628_v2, %v6627_v50  ;;  %v7334_v48 = vld [vmem:[%s9040_s1 + $0x200] sm:$0xff]  }
 0x14e   : > { %v7268_v21 = vld [vmem:[#allocation3 + $0x178] ss:$36 sps:$4 sm:$0xff]   ;;  %v2265_v11 = vrot.slane %v2264_v57, 4  ;;  %v2275_v53 = vrot.slane %v2274_v60, 4  ;;  %2813 = vst [vmem:[#allocation3 + $0x1c4] sm:$0xf] %v2702_v5  ;;  %v994_v32 = vor.u32 %v992_v63, %v8314_v40  ;;  %5532 = vmatprep.mubr.bf16.mxu0 %v7263_v3  ;;  %7025 = vmatprep.subr.bf16.mxu0 %v7334_v48  ;;  %v986_v31 = vor.u32 %v984_v19, %v8273_v58 }
 0x14f   : > { %v1928_v45 = vrot.slane %v1770_v13, 5  ;;  %v2705_v24 = vsel %vm7897_vm13, %v2703_v6, %v2704_v54  ;;  %v1926_v12 = vsel %vm7897_vm13, %v6253_v34, %v1925_v7  ;;  %v1927_v14 = vrot.slane %v1925_v7, 4  ;;  %v2029_v10 = vld [vmem:[#allocation2 + $0xb4] sm:$0xf]  ;;  %v2030_v15 = vld [vmem:[#allocation2 + $0xb8] sm:$0xf]  ;;  %5533 = vmatmul.mubr.bf16.gmra.mxu0 %v7268_v21  ;;  %v8348_v13 = vpop.f32.mrf.mxu1 }
 0x150   : > { %v2270_v16 = vsel %vm7614_vm4, %v2265_v11, %v2269_v37  ;;  %v2280_v0 = vsel %vm7614_vm4, %v2275_v53, %v2279_v35  ;;  %2814 = vst [vmem:[#allocation3 + $0x1e8] sm:$0xf] %v2705_v24  ;;  %1997 = vst [vmem:[#allocation3 + $0x3f8] sm:$0xf] %v1926_v12  ;;  %v2086_v56 = vld [vmem:[#allocation2 + $0x60] sm:$0xf]  ;;  %v995_v4 = vsel %vm7653_vm10, %v987_v59, %v994_v32  ;;  %7026 = vmatpush3.bf16.msra.mxu0 %v7334_v48  ;;  %v8344_v35 = vpop.f32.mrf.mxu0 }
 0x151   : > { %2061 = vst [vmem:[#allocation3 + $0x3fc] sm:$0xf] %v2029_v10  ;;  %2062 = vst [vmem:[#allocation3 + $0x420] sm:$0xf] %v2030_v15  ;;  %v2087_v18 = vld [vmem:[#allocation2 + $0x64] sm:$0xf]  ;;  %v1929_v23 = vsel %vm7897_vm13, %v1927_v14, %v1928_v45  ;;  %v8360_v24 = vpop.f32.mrf.mxu1 }
 0x152   : > { %v2088_v47 = vld [vmem:[#allocation2 + $0x68] sm:$0x1]  ;;  %v7270_v49 = vld [vmem:[#allocation3 + $0x3b4] ss:$36 sps:$4 sm:$0xff]   ;;  %2541 = vst [vmem:[#allocation3 + $0x1c0] sm:$0xf] %v2270_v16  ;;  %v8352_v63 = vpop.f32.mrf.mxu0 }
 0x153   : > { %2542 = vst [vmem:[#allocation3 + $0x1e4] sm:$0xf] %v2280_v0  ;;  %v7274_v22 = vld [vmem:[#allocation3 + $0x3b0] ss:$36 sps:$4 sm:$0xff]   ;;  %v2282_v25 = vshrl.u32 %v2086_v56, 16  ;;  %v2285_v26 = vshll.u32 %v2086_v56, 16  ;;  %5435 = vmatprep.mubr.bf16.mxu1 %v7270_v49 }
 0x154   : > { %1159 = vst [vmem:[#allocation2 + $0xc4] sm:$0xf] %v995_v4  ;;  %1998 = vst [vmem:[#allocation3 + $0x41c] sm:$0xf] %v1929_v23  ;;  %v2291_v27 = vshll.u32 %v2087_v18, 16  ;;  %v2295_v29 = vshrl.u32 %v2087_v18, 16  ;;  %5436 = vmatmul.mubr.bf16.gmra.mxu1 %v7274_v22  ;;  %v6567_v15 = vpop.f32.mrf.mxu0 }
 0x155   : > { %v2301_v30 = vshll.u32 %v2088_v47, 16  ;;  %v2582_v33 = vld [vmem:[#allocation2 + $0x60] sm:$0xe]  ;;  %v2284_v44 = vrot.slane %v2282_v25, 4  ;;  %v2583_v59 = vld [vmem:[#allocation2 + $0x64] sm:$0xf] }
 0x156   : > { %v2584_v38 = vld [vmem:[#allocation2 + $0x68] sm:$0x1]  ;;  %v6262_v61 = vrot.slane %v2582_v33, 9  ;;  %v2287_v37 = vrot.slane %v2285_v26, 5  ;;  %v2293_v17 = vrot.slane %v2291_v27, 5  ;;  %v2297_v46 = vrot.slane %v2295_v29, 4  ;;  %v6568_v25 = vpop.f32.mrf.mxu0 }
 0x157   : > { %v2303_v50 = vrot.slane %v2301_v30, 5  ;;  %v2708_v51 = vrot.slane %v2583_v59, 5  ;;  %v2711_v52 = vrot.slane %v2584_v38, 5  ;;  %v1156_v62 = vld [vmem:[#allocation2 + $0xc0] sm:$0xf]  ;;  %v8366_v59 = vadd.f32 %v6568_v25, %v6567_v15 }
 0x158   : > { %v2288_v54 = vor.u32 %v2287_v37, %v2284_v44  ;;  %v2298_v55 = vor.u32 %v2297_v46, %v2293_v17  ;;  %v7272_v20 = vld [vmem:[#allocation3 + $0x1c4] ss:$36 sps:$4 sm:$0xff]   ;;  %v1157_v34 = vsel %vm7645_vm9, %v986_v31, %v1156_v62  ;;  %v7276_v3 = vld [vmem:[#allocation3 + $0x3fc] ss:$36 sps:$4 sm:$0xff]   ;;  %v2089_v14 = vld [vmem:[#allocation2 + $0x6c] sm:$0xf]  ;;  %v6633_v44 = vpop.f32.mrf.mxu1  ;;  %v8368_v46 = vpop.f32.mrf.mxu0 }
 0x159   : > { %v2709_v57 = vsel %vm7897_vm13, %v6262_v61, %v2708_v51  ;;  %v2710_v60 = vrot.slane %v2708_v51, 4  ;;  %1158 = vst [vmem:[#allocation2 + $0xc0] sm:$0xf] %v1157_v34  ;;  %5540 = vmatprep.mubr.bf16.mxu0 %v7272_v20  ;;  %v1771_v11 = vld [vmem:[#allocation2 + $0xb4] sm:$0xe]  ;;  %5443 = vmatprep.mubr.bf16.mxu1 %v7276_v3  ;;  %v2306_v18 = vshrl.u32 %v2089_v14, 16 }
 0x15a   : > { %v2289_v58 = vrot.slane %v2288_v54, 4  ;;  %v2299_v19 = vrot.slane %v2298_v55, 4  ;;  %2815 = vst [vmem:[#allocation3 + $0x20c] sm:$0xf] %v2709_v57  ;;  %v7275_v2 = vld [vmem:[#allocation3 + $0x1c0] ss:$36 sps:$4 sm:$0xff]   ;;  %v6634_v57 = vpop.f32.mrf.mxu1  ;;  %v8372_v34 = vpop.f32.mrf.mxu0 }
 0x15b   : > { %v2712_v5 = vsel %vm7897_vm13, %v2710_v60, %v2711_v52  ;;  %v7282_v21 = vld [vmem:[#allocation3 + $0x3f8] ss:$36 sps:$4 sm:$0xff]   ;;  %v1772_v39 = vld [vmem:[#allocation2 + $0xb8] sm:$0xf]  ;;  %5541 = vmatmul.mubr.bf16.gmra.mxu0 %v7275_v2  ;;  %v1773_v53 = vld [vmem:[#allocation2 + $0xbc] sm:$0x1] }
 0x15c   : > { %v2294_v6 = vsel %vm7614_vm4, %v2289_v58, %v2293_v17  ;;  %v2304_v7 = vsel %vm7614_vm4, %v2299_v19, %v2303_v50  ;;  %2816 = vst [vmem:[#allocation3 + $0x230] sm:$0xf] %v2712_v5  ;;  %v6254_v45 = vrot.slane %v1771_v11, 9  ;;  %v1932_v32 = vrot.slane %v1772_v39, 5  ;;  %v2032_v48 = vld [vmem:[#allocation2 + $0xc4] sm:$0xf]  ;;  %5444 = vmatmul.mubr.bf16.gmra.mxu1 %v7282_v21 }
 0x15d   : > { %2543 = vst [vmem:[#allocation3 + $0x208] sm:$0xf] %v2294_v6  ;;  %2544 = vst [vmem:[#allocation3 + $0x22c] sm:$0xf] %v2304_v7  ;;  %v1935_v12 = vrot.slane %v1773_v53, 5  ;;  %v2309_v47 = vshll.u32 %v2089_v14, 16  ;;  %v8370_v19 = vadd.f32 %v6634_v57, %v6633_v44 }
 0x15e   : > { %2064 = vst [vmem:[#allocation3 + $0x468] sm:$0xf] %v2032_v48  ;;  %v2090_v10 = vld [vmem:[#allocation2 + $0x70] sm:$0xf]  ;;  %v1933_v16 = vsel %vm7897_vm13, %v6254_v45, %v1932_v32  ;;  %v1934_v0 = vrot.slane %v1932_v32, 4  ;;  %v2308_v27 = vrot.slane %v2306_v18, 4 }
 0x15f   : > { %v2091_v56 = vld [vmem:[#allocation2 + $0x74] sm:$0x1]  ;;  %1999 = vst [vmem:[#allocation3 + $0x440] sm:$0xf] %v1933_v16  ;;  %v2315_v4 = vshll.u32 %v2090_v10, 16  ;;  %v2319_v49 = vshrl.u32 %v2090_v10, 16  ;;  %v6573_v16 = vpop.f32.mrf.mxu0 }
 0x160   : > { %v2325_v22 = vshll.u32 %v2091_v56, 16  ;;  %v2585_v23 = vld [vmem:[#allocation2 + $0x6c] sm:$0xe]  ;;  %v1936_v26 = vsel %vm7897_vm13, %v1934_v0, %v1935_v12  ;;  %v2311_v29 = vrot.slane %v2309_v47, 5  ;;  %v2586_v30 = vld [vmem:[#allocation2 + $0x70] sm:$0xf] }
 0x161   : > { %v2587_v33 = vld [vmem:[#allocation2 + $0x74] sm:$0x1]  ;;  %2000 = vst [vmem:[#allocation3 + $0x464] sm:$0xf] %v1936_v26  ;;  %v2031_v38 = vld [vmem:[#allocation2 + $0xc0] sm:$0xf]  ;;  %v6574_v26 = vpop.f32.mrf.mxu0 }
 0x162   : > { %v2317_v61 = vrot.slane %v2315_v4, 5  ;;  %v2321_v31 = vrot.slane %v2319_v49, 4  ;;  %v2327_v37 = vrot.slane %v2325_v22, 5  ;;  %v6263_v17 = vrot.slane %v2585_v23, 9  ;;  %2063 = vst [vmem:[#allocation3 + $0x444] sm:$0xf] %v2031_v38 }
 0x163   : > { %v2312_v50 = vor.u32 %v2311_v29, %v2308_v27  ;;  %v2715_v51 = vrot.slane %v2586_v30, 5  ;;  %v2718_v52 = vrot.slane %v2587_v33, 5  ;;  %v2092_v54 = vld [vmem:[#allocation2 + $0x78] sm:$0xf]  ;;  %v2093_v55 = vld [vmem:[#allocation2 + $0x7c] sm:$0xf]  ;;  %v8382_v33 = vadd.f32 %v6574_v26, %v6573_v16 }
 0x164   : > { %v7278_v60 = vld [vmem:[#allocation3 + $0x20c] ss:$36 sps:$4 sm:$0xff]   ;;  %v2322_v62 = vor.u32 %v2321_v31, %v2317_v61  ;;  %v2330_v20 = vshrl.u32 %v2092_v54, 16  ;;  %v2333_v58 = vshll.u32 %v2092_v54, 16  ;;  %v2094_v7 = vld [vmem:[#allocation2 + $0x80] sm:$0x1] }
 0x165   : > { %v7283_v2 = vld [vmem:[#allocation3 + $0x208] ss:$36 sps:$4 sm:$0xff]   ;;  %v2313_v3 = vrot.slane %v2312_v50, 4  ;;  %v2716_v5 = vsel %vm7897_vm13, %v6263_v17, %v2715_v51  ;;  %v2717_v6 = vrot.slane %v2715_v51, 4  ;;  %5548 = vmatprep.mubr.bf16.mxu0 %v7278_v60  ;;  %v2339_v53 = vshll.u32 %v2093_v55, 16 }
 0x166   : > { %v2323_v21 = vrot.slane %v2322_v62, 4  ;;  %2817 = vst [vmem:[#allocation3 + $0x254] sm:$0xf] %v2716_v5  ;;  %v2332_v11 = vrot.slane %v2330_v20, 4  ;;  %v2335_v39 = vrot.slane %v2333_v58, 5  ;;  %5549 = vmatmul.mubr.bf16.gmra.mxu0 %v7283_v2  ;;  %v2343_v12 = vshrl.u32 %v2093_v55, 16 }
 0x167   : > { %v2588_v45 = vld [vmem:[#allocation2 + $0x78] sm:$0xe]  ;;  %v2318_v32 = vsel %vm7614_vm4, %v2313_v3, %v2317_v61  ;;  %v2719_v48 = vsel %vm7897_vm13, %v2717_v6, %v2718_v52  ;;  %v2349_v14 = vshll.u32 %v2094_v7, 16  ;;  %v2589_v10 = vld [vmem:[#allocation2 + $0x7c] sm:$0xf]  ;;  %v2341_v18 = vrot.slane %v2339_v53, 5 }
 0x168   : > { %v2590_v15 = vld [vmem:[#allocation2 + $0x80] sm:$0x1]  ;;  %v2328_v0 = vsel %vm7614_vm4, %v2323_v21, %v2327_v37  ;;  %2545 = vst [vmem:[#allocation3 + $0x250] sm:$0xf] %v2318_v32  ;;  %2818 = vst [vmem:[#allocation3 + $0x278] sm:$0xf] %v2719_v48  ;;  %v2336_v56 = vor.u32 %v2335_v39, %v2332_v11 }
 0x169   : > { %v6264_v47 = vrot.slane %v2588_v45, 9  ;;  %v2834_v4 = vld [vmem:[#allocation2 + $0x18] sm:$0xf]  ;;  %v2835_v49 = vld [vmem:[#allocation2 + $0x1c] sm:$0xf]  ;;  %v2345_v22 = vrot.slane %v2343_v12, 4  ;;  %v8392_v45 = vpop.f32.mrf.mxu1 }
 0x16a   : > { %2546 = vst [vmem:[#allocation3 + $0x274] sm:$0xf] %v2328_v0  ;;  %v2722_v23 = vrot.slane %v2589_v10, 5  ;;  %v2725_v25 = vrot.slane %v2590_v15, 5  ;;  %2866 = vst [vmem:[#allocation3 + $0x18] sm:$0xf] %v2834_v4 }
 0x16b   : > { %2867 = vst [vmem:[#allocation3 + $0x3c] sm:$0xf] %v2835_v49  ;;  %v7285_v27 = vld [vmem:[#allocation3 + $0x444] ss:$36 sps:$4 sm:$0xff]   ;;  %v2337_v30 = vrot.slane %v2336_v56, 4  ;;  %v2346_v44 = vor.u32 %v2345_v22, %v2341_v18  ;;  %v2351_v38 = vrot.slane %v2349_v14, 5 }
 0x16c   : > { %v7289_v29 = vld [vmem:[#allocation3 + $0x440] ss:$36 sps:$4 sm:$0xff]   ;;  %v2723_v61 = vsel %vm7897_vm13, %v6264_v47, %v2722_v23  ;;  %v2724_v31 = vrot.slane %v2722_v23, 4  ;;  %5451 = vmatprep.mubr.bf16.mxu1 %v7285_v27  ;;  %v2900_v51 = vld [vmem:[#allocation2 + $0x20] sm:$0x1] }
 0x16d   : > { %v2898_v37 = vld [vmem:[#allocation2 + $0x18] sm:$0xf]  ;;  %v2899_v17 = vld [vmem:[#allocation2 + $0x1c] sm:$0xf]  ;;  %v2342_v50 = vsel %vm7614_vm4, %v2337_v30, %v2341_v18  ;;  %2819 = vst [vmem:[#allocation3 + $0x29c] sm:$0xf] %v2723_v61  ;;  %5452 = vmatmul.mubr.bf16.gmra.mxu1 %v7289_v29 }
 0x16e   : > { %v2947_v52 = vshrl.u32 %v2898_v37, 16  ;;  %v2950_v54 = vshll.u32 %v2898_v37, 16  ;;  %v2956_v55 = vshll.u32 %v2899_v17, 16  ;;  %v2347_v57 = vrot.slane %v2346_v44, 4  ;;  %2547 = vst [vmem:[#allocation3 + $0x298] sm:$0xf] %v2342_v50  ;;  %v8396_v44 = vpop.f32.mrf.mxu1 }
 0x16f   : > { %v2726_v60 = vsel %vm7897_vm13, %v2724_v31, %v2725_v25  ;;  %v2960_v62 = vshrl.u32 %v2899_v17, 16  ;;  %v2966_v20 = vshll.u32 %v2900_v51, 16  ;;  %v2095_v7 = vld [vmem:[#allocation2 + $0x84] sm:$0xf]  ;;  %v7287_v21 = vld [vmem:[#allocation3 + $0x254] ss:$36 sps:$4 sm:$0xff]  }
 0x170   : > { %2820 = vst [vmem:[#allocation3 + $0x2c0] sm:$0xf] %v2726_v60  ;;  %v2949_v58 = vrot.slane %v2947_v52, 4  ;;  %v2952_v2 = vrot.slane %v2950_v54, 5  ;;  %v2958_v3 = vrot.slane %v2956_v55, 5  ;;  %v2352_v5 = vsel %vm7614_vm4, %v2347_v57, %v2351_v38  ;;  %5556 = vmatprep.mubr.bf16.mxu0 %v7287_v21 }
 0x171   : > { %v2962_v6 = vrot.slane %v2960_v62, 4  ;;  %v7290_v11 = vld [vmem:[#allocation3 + $0x250] ss:$36 sps:$4 sm:$0xff]   ;;  %2548 = vst [vmem:[#allocation3 + $0x2bc] sm:$0xf] %v2352_v5  ;;  %v2354_v53 = vshrl.u32 %v2095_v7, 16 }
 0x172   : > { %v2953_v39 = vor.u32 %v2952_v2, %v2949_v58  ;;  %v2968_v48 = vrot.slane %v2966_v20, 5  ;;  %v2096_v12 = vld [vmem:[#allocation2 + $0x88] sm:$0xf]  ;;  %v2097_v14 = vld [vmem:[#allocation2 + $0x8c] sm:$0x1]  ;;  %v2357_v10 = vshll.u32 %v2095_v7, 16  ;;  %5557 = vmatmul.mubr.bf16.gmra.mxu0 %v7290_v11  ;;  %v8403_v2 = vpop.f32.mrf.mxu0  ;;  %v6639_v11 = vpop.f32.mrf.mxu1 }
 0x173   : > { %v2963_v32 = vor.u32 %v2962_v6, %v2958_v3  ;;  %v2356_v16 = vrot.slane %v2354_v53, 4  ;;  %v2363_v0 = vshll.u32 %v2096_v12, 16  ;;  %v2367_v56 = vshrl.u32 %v2096_v12, 16  ;;  %v2591_v18 = vld [vmem:[#allocation2 + $0x84] sm:$0xe] }
 0x174   : > { %v2954_v15 = vrot.slane %v2953_v39, 4  ;;  %v2359_v4 = vrot.slane %v2357_v10, 5  ;;  %v2373_v49 = vshll.u32 %v2097_v14, 16  ;;  %v2592_v22 = vld [vmem:[#allocation2 + $0x88] sm:$0xf]  ;;  %v6265_v23 = vrot.slane %v2591_v18, 9 }
 0x175   : > { %v2964_v47 = vrot.slane %v2963_v32, 4  ;;  %v2365_v26 = vrot.slane %v2363_v0, 5  ;;  %v2369_v27 = vrot.slane %v2367_v56, 4  ;;  %v2593_v29 = vld [vmem:[#allocation2 + $0x8c] sm:$0x1]  ;;  %v2729_v30 = vrot.slane %v2592_v22, 5  ;;  %v6640_v56 = vpop.f32.mrf.mxu1 }
 0x176   : > { %v2959_v25 = vsel %vm7614_vm4, %v2954_v15, %v2958_v3  ;;  %v2360_v31 = vor.u32 %v2359_v4, %v2356_v16  ;;  %v2732_v37 = vrot.slane %v2593_v29, 5  ;;  %v2836_v17 = vld [vmem:[#allocation2 + $0x24] sm:$0xf]  ;;  %v2837_v50 = vld [vmem:[#allocation2 + $0x28] sm:$0xf]  ;;  %v2375_v52 = vrot.slane %v2373_v49, 5 }
 0x177   : > { %v2969_v61 = vsel %vm7614_vm4, %v2964_v47, %v2968_v48  ;;  %3362 = vst [vmem:[#allocation3 + $0x1c] sm:$0xf] %v2959_v25  ;;  %v2370_v51 = vor.u32 %v2369_v27, %v2365_v26  ;;  %v2730_v54 = vsel %vm7897_vm13, %v6265_v23, %v2729_v30  ;;  %v2731_v55 = vrot.slane %v2729_v30, 4  ;;  %2868 = vst [vmem:[#allocation3 + $0x60] sm:$0xf] %v2836_v17  ;;  %v8411_v23 = vpop.f32.mrf.mxu0 }
 0x178   : > { %3363 = vst [vmem:[#allocation3 + $0x40] sm:$0xf] %v2969_v61  ;;  %2869 = vst [vmem:[#allocation3 + $0x84] sm:$0xf] %v2837_v50  ;;  %v2901_v57 = vld [vmem:[#allocation2 + $0x24] sm:$0xf]  ;;  %v8413_v61 = vpop.f32.mrf.mxu1 }
 0x179   : > { %v2902_v60 = vld [vmem:[#allocation2 + $0x28] sm:$0xf]  ;;  %v7291_v62 = vld [vmem:[#allocation3 + $0x29c] ss:$36 sps:$4 sm:$0xff]   ;;  %v2361_v58 = vrot.slane %v2360_v31, 4  ;;  %v2371_v3 = vrot.slane %v2370_v51, 4  ;;  %v2733_v5 = vsel %vm7897_vm13, %v2731_v55, %v2732_v37  ;;  %v8415_v51 = vadd.f32 %v6640_v56, %v6639_v11 }
 0x17a   : > { %v7297_v20 = vld [vmem:[#allocation3 + $0x298] ss:$36 sps:$4 sm:$0xff]   ;;  %2821 = vst [vmem:[#allocation3 + $0x2e4] sm:$0xf] %v2730_v54  ;;  %v2903_v6 = vld [vmem:[#allocation2 + $0x2c] sm:$0x1]  ;;  %5564 = vmatprep.mubr.bf16.mxu0 %v7291_v62 }
 0x17b   : > { %v2971_v7 = vshrl.u32 %v2901_v57, 16  ;;  %v2974_v21 = vshll.u32 %v2901_v57, 16  ;;  %v2366_v39 = vsel %vm7614_vm4, %v2361_v58, %v2365_v26  ;;  %2822 = vst [vmem:[#allocation3 + $0x308] sm:$0xf] %v2733_v5  ;;  %v2980_v53 = vshll.u32 %v2902_v60, 16  ;;  %5565 = vmatmul.mubr.bf16.gmra.mxu0 %v7297_v20 }
 0x17c   : > { %v2984_v32 = vshrl.u32 %v2902_v60, 16  ;;  %v2990_v48 = vshll.u32 %v2903_v6, 16  ;;  %v2098_v12 = vld [vmem:[#allocation2 + $0x90] sm:$0xf]  ;;  %v2376_v14 = vsel %vm7614_vm4, %v2371_v3, %v2375_v52  ;;  %2549 = vst [vmem:[#allocation3 + $0x2e0] sm:$0xf] %v2366_v39  ;;  %v8417_v6 = vpop.f32.mrf.mxu1 }
 0x17d   : > { %v2973_v10 = vrot.slane %v2971_v7, 4  ;;  %v2976_v15 = vrot.slane %v2974_v21, 5  ;;  %v2099_v16 = vld [vmem:[#allocation2 + $0x94] sm:$0xf]  ;;  %v2100_v0 = vld [vmem:[#allocation2 + $0x98] sm:$0x1]  ;;  %v6579_v7 = vpop.f32.mrf.mxu0 }
 0x17e   : > { %2550 = vst [vmem:[#allocation3 + $0x304] sm:$0xf] %v2376_v14  ;;  %v2982_v18 = vrot.slane %v2980_v53, 5  ;;  %v2986_v47 = vrot.slane %v2984_v32, 4  ;;  %v2992_v4 = vrot.slane %v2990_v48, 5  ;;  %v2378_v49 = vshrl.u32 %v2098_v12, 16 }
 0x17f   : > { %v2594_v22 = vld [vmem:[#allocation2 + $0x90] sm:$0xe]  ;;  %v2977_v25 = vor.u32 %v2976_v15, %v2973_v10  ;;  %v2381_v26 = vshll.u32 %v2098_v12, 16  ;;  %v2387_v27 = vshll.u32 %v2099_v16, 16  ;;  %v2391_v29 = vshrl.u32 %v2099_v16, 16 }
 0x180   : > { %v2595_v30 = vld [vmem:[#allocation2 + $0x94] sm:$0xf]  ;;  %v2987_v17 = vor.u32 %v2986_v47, %v2982_v18  ;;  %v2380_v50 = vrot.slane %v2378_v49, 4  ;;  %v2596_v60 = vld [vmem:[#allocation2 + $0x98] sm:$0x1]  ;;  %v2397_v20 = vshll.u32 %v2100_v0, 16  ;;  %v6580_v0 = vpop.f32.mrf.mxu0 }
 0x181   : > { %v7293_v31 = vld [vmem:[#allocation3 + $0x18] ss:$36 sps:$4 sm:$0xff]   ;;  %v2978_v52 = vrot.slane %v2977_v25, 4  ;;  %v2383_v54 = vrot.slane %v2381_v26, 5  ;;  %v2389_v55 = vrot.slane %v2387_v27, 5  ;;  %v2393_v57 = vrot.slane %v2391_v29, 4  ;;  %v6645_v29 = vpop.f32.mrf.mxu1 }
 0x182   : > { %v7295_v37 = vld [vmem:[#allocation3 + $0x1c] ss:$36 sps:$4 sm:$0xff]   ;;  %v2988_v62 = vrot.slane %v2987_v17, 4  ;;  %v6266_v58 = vrot.slane %v2594_v22, 9  ;;  %v2736_v3 = vrot.slane %v2595_v30, 5  ;;  %v2739_v53 = vrot.slane %v2596_v60, 5 }
 0x183   : > { %5653 = vmatprep.mubr.bf16.mxu1 %v7295_v37  ;;  %v2838_v5 = vld [vmem:[#allocation2 + $0x30] sm:$0xf]  ;;  %v2983_v21 = vsel %vm7614_vm4, %v2978_v52, %v2982_v18  ;;  %v2384_v11 = vor.u32 %v2383_v54, %v2380_v50  ;;  %v2394_v39 = vor.u32 %v2393_v57, %v2389_v55  ;;  %v2839_v32 = vld [vmem:[#allocation2 + $0x34] sm:$0xf]  ;;  %v2399_v14 = vrot.slane %v2397_v20, 5  ;;  %v6646_v60 = vpop.f32.mrf.mxu1 }
 0x184   : > { %5654 = vmatmul.mubr.bf16.vlgmr.msra.gmra.mxu1 %v7293_v31  ;;  %2870 = vst [vmem:[#allocation3 + $0xa8] sm:$0xf] %v2838_v5  ;;  %v2904_v48 = vld [vmem:[#allocation2 + $0x30] sm:$0xf]  ;;  %v2993_v12 = vsel %vm7614_vm4, %v2988_v62, %v2992_v4  ;;  %3364 = vst [vmem:[#allocation3 + $0x64] sm:$0xf] %v2983_v21  ;;  %v2737_v10 = vsel %vm7897_vm13, %v6266_v58, %v2736_v3  ;;  %v8425_v49 = vadd.f32 %v6580_v0, %v6579_v7 }
 0x185   : > { %v2738_v15 = vrot.slane %v2736_v3, 4  ;;  %2871 = vst [vmem:[#allocation3 + $0xcc] sm:$0xf] %v2839_v32  ;;  %v2905_v16 = vld [vmem:[#allocation2 + $0x34] sm:$0xf]  ;;  %v2385_v47 = vrot.slane %v2384_v11, 4 }
 0x186   : > { %v7298_v56 = vld [vmem:[#allocation3 + $0x2e4] ss:$36 sps:$4 sm:$0xff]   ;;  %3365 = vst [vmem:[#allocation3 + $0x88] sm:$0xf] %v2993_v12  ;;  %2823 = vst [vmem:[#allocation3 + $0x32c] sm:$0xf] %v2737_v10  ;;  %v8435_v10 = vadd.f32 %v6646_v60, %v6645_v29 }
 0x187   : > { %v7302_v18 = vld [vmem:[#allocation3 + $0x2e0] ss:$36 sps:$4 sm:$0xff]   ;;  %v2395_v22 = vrot.slane %v2394_v39, 4  ;;  %v2740_v4 = vsel %vm7897_vm13, %v2738_v15, %v2739_v53  ;;  %v2995_v26 = vshrl.u32 %v2904_v48, 16  ;;  %v2998_v27 = vshll.u32 %v2904_v48, 16  ;;  %5572 = vmatprep.mubr.bf16.mxu0 %v7298_v56  ;;  %v8433_v53 = vpop.f32.mrf.mxu1 }
 0x188   : > { %v2906_v25 = vld [vmem:[#allocation2 + $0x38] sm:$0x1]  ;;  %v2390_v30 = vsel %vm7614_vm4, %v2385_v47, %v2389_v55  ;;  %2824 = vst [vmem:[#allocation3 + $0x350] sm:$0xf] %v2740_v4  ;;  %v3004_v31 = vshll.u32 %v2905_v16, 16  ;;  %v3008_v37 = vshrl.u32 %v2905_v16, 16  ;;  %5573 = vmatmul.mubr.bf16.gmra.mxu0 %v7302_v18 }
 0x189   : > { %v3014_v17 = vshll.u32 %v2906_v25, 16  ;;  %v2400_v50 = vsel %vm7614_vm4, %v2395_v22, %v2399_v14  ;;  %2551 = vst [vmem:[#allocation3 + $0x328] sm:$0xf] %v2390_v30  ;;  %v2997_v52 = vrot.slane %v2995_v26, 4  ;;  %v3000_v54 = vrot.slane %v2998_v27, 5  ;;  %9056 = vst [vmem:[#allocation5_spill] sm:$0xff] %v8433_v53  ;;  %v8437_v56 = vpop.f32.mrf.mxu1 }
 0x18a   : > { %v2101_v57 = vld [vmem:[#allocation2 + $0x9c] sm:$0xf]  ;;  %2552 = vst [vmem:[#allocation3 + $0x34c] sm:$0xf] %v2400_v50  ;;  %v3006_v62 = vrot.slane %v3004_v31, 5  ;;  %v3010_v20 = vrot.slane %v3008_v37, 4 }
 0x18b   : > { %v3016_v58 = vrot.slane %v3014_v17, 5  ;;  %v2102_v3 = vld [vmem:[#allocation2 + $0xa0] sm:$0xf]  ;;  %v2402_v5 = vshrl.u32 %v2101_v57, 16  ;;  %v3001_v55 = vor.u32 %v3000_v54, %v2997_v52  ;;  %v2103_v7 = vld [vmem:[#allocation2 + $0xa4] sm:$0x1]  ;;  %v6667_v29 = vpop.f32.mrf.mxu1 }
 0x18c   : > { %v2405_v21 = vshll.u32 %v2101_v57, 16  ;;  %v2411_v11 = vshll.u32 %v2102_v3, 16  ;;  %v2415_v39 = vshrl.u32 %v2102_v3, 16  ;;  %v3011_v32 = vor.u32 %v3010_v20, %v3006_v62  ;;  %v2597_v14 = vld [vmem:[#allocation2 + $0x9c] sm:$0xe]  ;;  %9057 = vst [vmem:[#allocation6_spill] sm:$0xff] %v8435_v10 }
 0x18d   : > { %v2404_v48 = vrot.slane %v2402_v5, 4  ;;  %v2421_v12 = vshll.u32 %v2103_v7, 16  ;;  %v7300_v15 = vld [vmem:[#allocation3 + $0x64] ss:$36 sps:$4 sm:$0xff]   ;;  %v3002_v0 = vrot.slane %v3001_v55, 4  ;;  %9058 = vst [vmem:[#allocation7_spill] sm:$0xff] %v8437_v56  ;;  %v8447_v55 = vadd.f32 %v8299_v1, %v8291_v43 }
 0x18e   : > { %v7303_v16 = vld [vmem:[#allocation3 + $0x60] ss:$36 sps:$4 sm:$0xff]   ;;  %v3012_v18 = vrot.slane %v3011_v32, 4  ;;  %v2407_v47 = vrot.slane %v2405_v21, 5  ;;  %v2413_v22 = vrot.slane %v2411_v11, 5  ;;  %v2417_v4 = vrot.slane %v2415_v39, 4  ;;  %5661 = vmatprep.mubr.bf16.mxu1 %v7300_v15 }
 0x18f   : > { %v2598_v25 = vld [vmem:[#allocation2 + $0xa0] sm:$0xf]  ;;  %v3007_v26 = vsel %vm7614_vm4, %v3002_v0, %v3006_v62  ;;  %v2423_v27 = vrot.slane %v2421_v12, 5  ;;  %v2599_v30 = vld [vmem:[#allocation2 + $0xa4] sm:$0x1]  ;;  %v6267_v31 = vrot.slane %v2597_v14, 9  ;;  %5662 = vmatmul.mubr.bf16.gmra.mxu1 %v7303_v16  ;;  %v8451_v32 = vadd.f32 %v8352_v63, %v8344_v35 }
 0x190   : > { %v2743_v37 = vrot.slane %v2598_v25, 5  ;;  %v3017_v17 = vsel %vm7614_vm4, %v3012_v18, %v3016_v58  ;;  %3366 = vst [vmem:[#allocation3 + $0xac] sm:$0xf] %v3007_v26  ;;  %v2408_v50 = vor.u32 %v2407_v47, %v2404_v48  ;;  %v2418_v52 = vor.u32 %v2417_v4, %v2413_v22  ;;  %v2840_v57 = vld [vmem:[#allocation2 + $0x3c] sm:$0xf]  ;;  %v6668_v58 = vpop.f32.mrf.mxu1  ;;  %v8453_v48 = vpop.f32.mrf.mxu0 }
 0x191   : > { %v2746_v54 = vrot.slane %v2599_v30, 5  ;;  %v2841_v60 = vld [vmem:[#allocation2 + $0x40] sm:$0xf]  ;;  %v7304_v20 = vld [vmem:[#allocation3 + $0x32c] ss:$36 sps:$4 sm:$0xff]   ;;  %v6669_v12 = vadd.f32 %v6668_v58, %v6667_v29 }
 0x192   : > { %3367 = vst [vmem:[#allocation3 + $0xd0] sm:$0xf] %v3017_v17  ;;  %v7309_v3 = vld [vmem:[#allocation3 + $0x328] ss:$36 sps:$4 sm:$0xff]   ;;  %v2744_v62 = vsel %vm7897_vm13, %v6267_v31, %v2743_v37  ;;  %v2745_v5 = vrot.slane %v2743_v37, 4  ;;  %v2409_v7 = vrot.slane %v2408_v50, 4  ;;  %5580 = vmatprep.mubr.bf16.mxu0 %v7304_v20  ;;  %v6670_v0 = vpop.f32.mrf.mxu1 }
 0x193   : > { %2872 = vst [vmem:[#allocation3 + $0xf0] sm:$0xf] %v2840_v57  ;;  %2873 = vst [vmem:[#allocation3 + $0x114] sm:$0xf] %v2841_v60  ;;  %v2419_v21 = vrot.slane %v2418_v52, 4  ;;  %5581 = vmatmul.mubr.bf16.gmra.mxu0 %v7309_v3  ;;  %v8461_v60 = vpop.f32.mrf.mxu0 }
 0x194   : > { %2825 = vst [vmem:[#allocation3 + $0x374] sm:$0xf] %v2744_v62  ;;  %v2907_v11 = vld [vmem:[#allocation2 + $0x3c] sm:$0xf]  ;;  %v2908_v39 = vld [vmem:[#allocation2 + $0x40] sm:$0xf]  ;;  %v2747_v14 = vsel %vm7897_vm13, %v2745_v5, %v2746_v54  ;;  %v2414_v18 = vsel %vm7614_vm4, %v2409_v7, %v2413_v22  ;;  %v6671_v17 = vpop.f32.mrf.mxu1 }
 0x195   : > { %v2909_v15 = vld [vmem:[#allocation2 + $0x44] sm:$0x1]  ;;  %v3019_v43 = vshrl.u32 %v2907_v11, 16  ;;  %v3022_v1 = vshll.u32 %v2907_v11, 16  ;;  %v3028_v16 = vshll.u32 %v2908_v39, 16  ;;  %v2424_v35 = vsel %vm7614_vm4, %v2419_v21, %v2423_v27 }
 0x196   : > { %2826 = vst [vmem:[#allocation3 + $0x398] sm:$0xf] %v2747_v14  ;;  %v3032_v63 = vshrl.u32 %v2908_v39, 16  ;;  %v3038_v47 = vshll.u32 %v2909_v15, 16  ;;  %v2104_v4 = vld [vmem:[#allocation2 + $0xa8] sm:$0xf]  ;;  %v6673_v58 = vpop.f32.mrf.mxu1  ;;  %v8464_v14 = vadd.f32 %v6669_v12, %v8262_v28  ;;  %v6672_v15 = vadd.f32 %v6671_v17, %v6670_v0 }
 0x197   : > { %v2105_v25 = vld [vmem:[#allocation2 + $0xac] sm:$0xf]  ;;  %2553 = vst [vmem:[#allocation3 + $0x370] sm:$0xf] %v2414_v18  ;;  %2554 = vst [vmem:[#allocation3 + $0x394] sm:$0xf] %v2424_v35 }
 0x198   : > { %v3021_v26 = vrot.slane %v3019_v43, 4  ;;  %v3024_v30 = vrot.slane %v3022_v1, 5  ;;  %v3030_v31 = vrot.slane %v3028_v16, 5  ;;  %v2106_v37 = vld [vmem:[#allocation2 + $0xb0] sm:$0x1]  ;;  %v2426_v29 = vshrl.u32 %v2104_v4, 16 }
 0x199   : > { %v3034_v50 = vrot.slane %v3032_v63, 4  ;;  %v3040_v52 = vrot.slane %v3038_v47, 5  ;;  %v2429_v54 = vshll.u32 %v2104_v4, 16  ;;  %v2435_v22 = vshll.u32 %v2105_v25, 16  ;;  %v2600_v57 = vld [vmem:[#allocation2 + $0xa8] sm:$0xe]  ;;  %v6674_v63 = vpop.f32.mrf.mxu1 }
 0x19a   : > { %v3025_v27 = vor.u32 %v3024_v30, %v3021_v26  ;;  %v2428_v20 = vrot.slane %v2426_v29, 4  ;;  %v2439_v3 = vshrl.u32 %v2105_v25, 16  ;;  %v2445_v62 = vshll.u32 %v2106_v37, 16  ;;  %v2601_v5 = vld [vmem:[#allocation2 + $0xac] sm:$0xf]  ;;  %v6585_v37 = vpop.f32.mrf.mxu0 }
 0x19b   : > { %v7306_v7 = vld [vmem:[#allocation3 + $0xac] ss:$36 sps:$4 sm:$0xff]   ;;  %v3035_v11 = vor.u32 %v3034_v50, %v3030_v31  ;;  %v2431_v39 = vrot.slane %v2429_v54, 5  ;;  %v2437_v1 = vrot.slane %v2435_v22, 5  ;;  %v2602_v35 = vld [vmem:[#allocation2 + $0xb0] sm:$0x1]  ;;  %v8469_v50 = vadd.f32 %v6672_v15, %v8447_v55  ;;  %v6676_v54 = vpop.f32.mrf.mxu1 }
 0x19c   : > { %v7310_v21 = vld [vmem:[#allocation3 + $0xa8] ss:$36 sps:$4 sm:$0xff]   ;;  %v3026_v43 = vrot.slane %v3025_v27, 4  ;;  %v2441_v16 = vrot.slane %v2439_v3, 4  ;;  %v2447_v18 = vrot.slane %v2445_v62, 5  ;;  %5669 = vmatprep.mubr.bf16.mxu1 %v7306_v7  ;;  %v6268_v25 = vrot.slane %v2600_v57, 9 }
 0x19d   : > { %v3036_v47 = vrot.slane %v3035_v11, 4  ;;  %v2432_v4 = vor.u32 %v2431_v39, %v2428_v20  ;;  %v2750_v26 = vrot.slane %v2601_v5, 5  ;;  %v2842_v30 = vld [vmem:[#allocation2 + $0x48] sm:$0xf]  ;;  %5670 = vmatmul.mubr.bf16.gmra.mxu1 %v7310_v21  ;;  %v2753_v12 = vrot.slane %v2602_v35, 5  ;;  %v6677_v39 = vpop.f32.mrf.mxu1 }
 0x19e   : > { %v3031_v29 = vsel %vm7614_vm4, %v3026_v43, %v3030_v31  ;;  %v2442_v28 = vor.u32 %v2441_v16, %v2437_v1  ;;  %v2843_v0 = vld [vmem:[#allocation2 + $0x4c] sm:$0xf]  ;;  %2874 = vst [vmem:[#allocation3 + $0x138] sm:$0xf] %v2842_v30  ;;  %v2910_v17 = vld [vmem:[#allocation2 + $0x48] sm:$0xf]  ;;  %v6586_v31 = vpop.f32.mrf.mxu0  ;;  %v6675_v11 = vadd.f32 %v6674_v63, %v6673_v58 }
 0x19f   : > { %v7311_v22 = vld [vmem:[#allocation3 + $0x374] ss:$36 sps:$4 sm:$0xff]   ;;  %v3041_v57 = vsel %vm7614_vm4, %v3036_v47, %v3040_v52  ;;  %3368 = vst [vmem:[#allocation3 + $0xf4] sm:$0xf] %v3031_v29  ;;  %v2433_v27 = vrot.slane %v2432_v4, 4  ;;  %v2751_v20 = vsel %vm7897_vm13, %v6268_v25, %v2750_v26  ;;  %v2752_v3 = vrot.slane %v2750_v26, 4  ;;  %v6679_v26 = vpop.f32.mrf.mxu1 }
 0x1a0   : > { %2875 = vst [vmem:[#allocation3 + $0x15c] sm:$0xf] %v2843_v0  ;;  %3369 = vst [vmem:[#allocation3 + $0x118] sm:$0xf] %v3041_v57  ;;  %v7315_v62 = vld [vmem:[#allocation3 + $0x370] ss:$36 sps:$4 sm:$0xff]   ;;  %v8475_v21 = vadd.f32 %v6586_v31, %v6585_v37  ;;  %5588 = vmatprep.mubr.bf16.mxu0 %v7311_v22  ;;  %v8481_v47 = vpop.f32.mrf.mxu0 }
 0x1a1   : > { %v2443_v5 = vrot.slane %v2442_v28, 4  ;;  %2827 = vst [vmem:[#allocation3 + $0x3bc] sm:$0xf] %v2751_v20  ;;  %v2911_v7 = vld [vmem:[#allocation2 + $0x4c] sm:$0xf]  ;;  %v3043_v55 = vshrl.u32 %v2910_v17, 16  ;;  %v2438_v52 = vsel %vm7614_vm4, %v2433_v27, %v2437_v1  ;;  %v2754_v15 = vsel %vm7897_vm13, %v2752_v3, %v2753_v12  ;;  %5589 = vmatmul.mubr.bf16.gmra.mxu0 %v7315_v62  ;;  %v6680_v27 = vpop.f32.mrf.mxu1 }
 0x1a2   : > { %v2912_v43 = vld [vmem:[#allocation2 + $0x50] sm:$0x1]  ;;  %v3046_v16 = vshll.u32 %v2910_v17, 16  ;;  %v3052_v35 = vshll.u32 %v2911_v7, 16  ;;  %2555 = vst [vmem:[#allocation3 + $0x3b8] sm:$0xf] %v2438_v52  ;;  %v8486_v28 = vadd.f32 %v6675_v11, %v8316_v42  ;;  %v6678_v12 = vadd.f32 %v6677_v39, %v6676_v54 }
 0x1a3   : > { %v2448_v4 = vsel %vm7614_vm4, %v2443_v5, %v2447_v18  ;;  %2828 = vst [vmem:[#allocation3 + $0x3e0] sm:$0xf] %v2754_v15  ;;  %v3045_v58 = vrot.slane %v3043_v55, 4  ;;  %v3056_v63 = vshrl.u32 %v2911_v7, 16  ;;  %v3062_v25 = vshll.u32 %v2912_v43, 16  ;;  %v8488_v7 = vpop.f32.mrf.mxu0  ;;  %v6682_v11 = vpop.f32.mrf.mxu1 }
 0x1a4   : > { %2556 = vst [vmem:[#allocation3 + $0x3dc] sm:$0xf] %v2448_v4  ;;  %v3048_v1 = vrot.slane %v3046_v16, 5  ;;  %v3054_v30 = vrot.slane %v3052_v35, 5  ;;  %v2107_v37 = vld [vmem:[#allocation2 + $0xb4] sm:$0xf]  ;;  %v8491_v35 = vadd.f32 %v6678_v12, %v8451_v32  ;;  %v6681_v4 = vadd.f32 %v6680_v27, %v6679_v26 }
 0x1a5   : > { %v2108_v29 = vld [vmem:[#allocation2 + $0xb8] sm:$0xf]  ;;  %v3058_v0 = vrot.slane %v3056_v63, 4  ;;  %v3064_v17 = vrot.slane %v3062_v25, 5  ;;  %v2109_v22 = vld [vmem:[#allocation2 + $0xbc] sm:$0x1]  ;;  %v6591_v38 = vpop.f32.mrf.mxu0 }
 0x1a6   : > { %v2450_v57 = vshrl.u32 %v2107_v37, 16  ;;  %v2453_v18 = vshll.u32 %v2107_v37, 16  ;;  %v3049_v20 = vor.u32 %v3048_v1, %v3045_v58  ;;  %v2459_v3 = vshll.u32 %v2108_v29, 16  ;;  %v2603_v5 = vld [vmem:[#allocation2 + $0xb4] sm:$0xe] }
 0x1a7   : > { %v2463_v31 = vshrl.u32 %v2108_v29, 16  ;;  %v2469_v62 = vshll.u32 %v2109_v22, 16  ;;  %v3059_v55 = vor.u32 %v3058_v0, %v3054_v30  ;;  %v2604_v43 = vld [vmem:[#allocation2 + $0xb8] sm:$0xf]  ;;  %v6269_v42 = vrot.slane %v2603_v5, 9  ;;  %v6683_v29 = vpop.f32.mrf.mxu1 }
 0x1a8   : > { %v2452_v52 = vrot.slane %v2450_v57, 4  ;;  %v2455_v15 = vrot.slane %v2453_v18, 5  ;;  %v7313_v54 = vld [vmem:[#allocation3 + $0xf4] ss:$36 sps:$4 sm:$0xff]   ;;  %v3050_v16 = vrot.slane %v3049_v20, 4  ;;  %v2461_v25 = vrot.slane %v2459_v3, 5 }
 0x1a9   : > { %v7316_v39 = vld [vmem:[#allocation3 + $0xf0] ss:$36 sps:$4 sm:$0xff]   ;;  %v3060_v58 = vrot.slane %v3059_v55, 4  ;;  %v2465_v1 = vrot.slane %v2463_v31, 4  ;;  %v2605_v37 = vld [vmem:[#allocation2 + $0xbc] sm:$0x1]  ;;  %5677 = vmatprep.mubr.bf16.mxu1 %v7313_v54  ;;  %v8498_v3 = vadd.f32 %v6681_v4, %v8366_v59 }
 0x1aa   : > { %v2456_v63 = vor.u32 %v2455_v15, %v2452_v52  ;;  %v3055_v0 = vsel %vm7614_vm4, %v3050_v16, %v3054_v30  ;;  %v2471_v22 = vrot.slane %v2469_v62, 5  ;;  %v2757_v57 = vrot.slane %v2604_v43, 5  ;;  %v2844_v5 = vld [vmem:[#allocation2 + $0x54] sm:$0xf]  ;;  %5678 = vmatmul.mubr.bf16.gmra.mxu1 %v7316_v39  ;;  %v2845_v62 = vld [vmem:[#allocation2 + $0x58] sm:$0xf]  ;;  %v6592_v15 = vpop.f32.mrf.mxu0 }
 0x1ab   : > { %v2760_v18 = vrot.slane %v2605_v37, 5  ;;  %v7317_v20 = vld [vmem:[#allocation3 + $0x3bc] ss:$36 sps:$4 sm:$0xff]   ;;  %v3065_v32 = vsel %vm7614_vm4, %v3060_v58, %v3064_v17  ;;  %3370 = vst [vmem:[#allocation3 + $0x13c] sm:$0xf] %v3055_v0  ;;  %v2466_v27 = vor.u32 %v2465_v1, %v2461_v25  ;;  %v6572_v52 = vadd.f32 %v8372_v34, %v8368_v46 }
 0x1ac   : > { %v7322_v26 = vld [vmem:[#allocation3 + $0x3b8] ss:$36 sps:$4 sm:$0xff]   ;;  %v2457_v12 = vrot.slane %v2456_v63, 4  ;;  %2876 = vst [vmem:[#allocation3 + $0x180] sm:$0xf] %v2844_v5  ;;  %v2758_v30 = vsel %vm7897_vm13, %v6269_v42, %v2757_v57  ;;  %v2759_v31 = vrot.slane %v2757_v57, 4  ;;  %v6684_v17 = vadd.f32 %v6683_v29, %v6682_v11  ;;  %5596 = vmatprep.mubr.bf16.mxu0 %v7317_v20  ;;  %v8510_v63 = vpop.f32.mrf.mxu0 }
 0x1ad   : > { %3371 = vst [vmem:[#allocation3 + $0x160] sm:$0xf] %v3065_v32  ;;  %v2913_v55 = vld [vmem:[#allocation2 + $0x54] sm:$0xf]  ;;  %v2467_v54 = vrot.slane %v2466_v27, 4  ;;  %v8506_v4 = vadd.f32 %v6592_v15, %v6591_v38  ;;  %5597 = vmatmul.mubr.bf16.gmra.mxu0 %v7322_v26  ;;  %v9059_v38 = vrot.slane %v8314_v40, 4 }
 0x1ae   : > { %v2462_v43 = vsel %vm7614_vm4, %v2457_v12, %v2461_v25  ;;  %2829 = vst [vmem:[#allocation3 + $0x404] sm:$0xf] %v2758_v30  ;;  %2877 = vst [vmem:[#allocation3 + $0x1a4] sm:$0xf] %v2845_v62  ;;  %v2914_v59 = vld [vmem:[#allocation2 + $0x58] sm:$0xf]  ;;  %v2761_v42 = vsel %vm7897_vm13, %v2759_v31, %v2760_v18  ;;  %v6685_v25 = vpop.f32.mrf.mxu1  ;;  %v8518_v27 = vpop.f32.mrf.mxu0 }
 0x1af   : > { %v2915_v39 = vld [vmem:[#allocation2 + $0x5c] sm:$0x1]  ;;  %v3067_v16 = vshrl.u32 %v2913_v55, 16  ;;  %2557 = vst [vmem:[#allocation3 + $0x400] sm:$0xf] %v2462_v43  ;;  %v3070_v46 = vshll.u32 %v2913_v55, 16  ;;  %v2472_v1 = vsel %vm7614_vm4, %v2467_v54, %v2471_v22 }
 0x1b0   : > { %v3076_v34 = vshll.u32 %v2914_v59, 16  ;;  %v3080_v11 = vshrl.u32 %v2914_v59, 16  ;;  %v1160_v58 = vld [vmem:[#allocation2 + $0xc8] sm:$0x1]  ;;  %2830 = vst [vmem:[#allocation3 + $0x428] sm:$0xf] %v2761_v42  ;;  %v6686_v22 = vpop.f32.mrf.mxu1 }
 0x1b1   : > { %v3069_v37 = vrot.slane %v3067_v16, 4  ;;  %v3086_v29 = vshll.u32 %v2915_v39, 16  ;;  %v1161_v0 = vsel %vm7639_vm8, %v9059_v38, %v1160_v58  ;;  %v2110_v57 = vld [vmem:[#allocation2 + $0xc0] sm:$0xf]  ;;  %v2111_v18 = vld [vmem:[#allocation2 + $0xc4] sm:$0xf]  ;;  %v6597_v39 = vpop.f32.mrf.mxu0  ;;  %v6687_v58 = vadd.f32 %v6686_v22, %v6685_v25 }
 0x1b2   : > { %2558 = vst [vmem:[#allocation3 + $0x424] sm:$0xf] %v2472_v1  ;;  %v3072_v5 = vrot.slane %v3070_v46, 5  ;;  %v3078_v20 = vrot.slane %v3076_v34, 5  ;;  %v3082_v32 = vrot.slane %v3080_v11, 4  ;;  %v2474_v26 = vshrl.u32 %v2110_v57, 16  ;;  %v6688_v16 = vpop.f32.mrf.mxu1 }
 0x1b3   : > { %1162 = vst [vmem:[#allocation2 + $0xc8] sm:$0x1] %v1161_v0  ;;  %v2606_v12 = vld [vmem:[#allocation2 + $0xc0] sm:$0xe]  ;;  %v3088_v30 = vrot.slane %v3086_v29, 5  ;;  %v2477_v31 = vshll.u32 %v2110_v57, 16  ;;  %v8520_v11 = vadd.f32 %v6684_v17, %v6572_v52 }
 0x1b4   : > { %v2483_v62 = vshll.u32 %v2111_v18, 16  ;;  %v2487_v55 = vshrl.u32 %v2111_v18, 16  ;;  %v2607_v40 = vld [vmem:[#allocation2 + $0xc4] sm:$0xf]  ;;  %v3073_v15 = vor.u32 %v3072_v5, %v3069_v37  ;;  %v3083_v36 = vor.u32 %v3082_v32, %v3078_v20  ;;  %v2846_v59 = vld [vmem:[#allocation2 + $0x60] sm:$0xf]  ;;  %v6598_v18 = vpop.f32.mrf.mxu0  ;;  %v6689_v37 = vpop.f32.mrf.mxu1 }
 0x1b5   : > { %v2476_v43 = vrot.slane %v2474_v26, 4  ;;  %v6270_v54 = vrot.slane %v2606_v12, 9  ;;  %v7319_v42 = vld [vmem:[#allocation3 + $0x13c] ss:$36 sps:$4 sm:$0xff]   ;;  %v2479_v34 = vrot.slane %v2477_v31, 5  ;;  %v2764_v32 = vrot.slane %v2607_v40, 5 }
 0x1b6   : > { %v7323_v46 = vld [vmem:[#allocation3 + $0x138] ss:$36 sps:$4 sm:$0xff]   ;;  %2878 = vst [vmem:[#allocation3 + $0x1c8] sm:$0xf] %v2846_v59  ;;  %v3074_v1 = vrot.slane %v3073_v15, 4  ;;  %v3084_v29 = vrot.slane %v3083_v36, 4  ;;  %5685 = vmatprep.mubr.bf16.mxu1 %v7319_v42  ;;  %v8522_v56 = vadd.f32 %v6598_v18, %v6597_v39  ;;  %v8525_v31 = vadd.f32 %v6687_v58, %v8382_v33 }
 0x1b7   : > { %v2485_v38 = vrot.slane %v2483_v62, 5  ;;  %v2489_v0 = vrot.slane %v2487_v55, 4  ;;  %v2847_v57 = vld [vmem:[#allocation2 + $0x64] sm:$0xf]  ;;  %v2480_v5 = vor.u32 %v2479_v34, %v2476_v43  ;;  %v2916_v26 = vld [vmem:[#allocation2 + $0x60] sm:$0xf]  ;;  %5686 = vmatmul.mubr.bf16.gmra.mxu1 %v7323_v46  ;;  %v6691_v55 = vpop.f32.mrf.mxu1  ;;  %v2765_v33 = vsel %vm7897_vm13, %v6270_v54, %v2764_v32 }
 0x1b8   : > { %2879 = vst [vmem:[#allocation3 + $0x1ec] sm:$0xf] %v2847_v57  ;;  %v2917_v12 = vld [vmem:[#allocation2 + $0x64] sm:$0xf]  ;;  %v3079_v52 = vsel %vm7614_vm4, %v3074_v1, %v3078_v20  ;;  %v3089_v17 = vsel %vm7614_vm4, %v3084_v29, %v3088_v30  ;;  %v2918_v22 = vld [vmem:[#allocation2 + $0x68] sm:$0x1]  ;;  %v6690_v43 = vadd.f32 %v6689_v37, %v6688_v16  ;;  %v6578_v30 = vadd.f32 %v8411_v23, %v8403_v2  ;;  %v8537_v37 = vpop.f32.mrf.mxu0 }
 0x1b9   : > { %v2490_v25 = vor.u32 %v2489_v0, %v2485_v38  ;;  %v3091_v62 = vshrl.u32 %v2916_v26, 16  ;;  %v7324_v40 = vld [vmem:[#allocation3 + $0x404] ss:$36 sps:$4 sm:$0xff]   ;;  %3372 = vst [vmem:[#allocation3 + $0x184] sm:$0xf] %v3079_v52  ;;  %v2481_v36 = vrot.slane %v2480_v5, 4  ;;  %v6692_v46 = vpop.f32.mrf.mxu1  ;;  %v8543_v52 = vadd.f32 %v8461_v60, %v8453_v48 }
 0x1ba   : > { %3373 = vst [vmem:[#allocation3 + $0x1a8] sm:$0xf] %v3089_v17  ;;  %v7328_v15 = vld [vmem:[#allocation3 + $0x400] ss:$36 sps:$4 sm:$0xff]   ;;  %v2112_v59 = vld [vmem:[#allocation2 + $0xc8] sm:$0x1]  ;;  %5604 = vmatprep.mubr.bf16.mxu0 %v7324_v40  ;;  %v8545_v17 = vadd.f32 %v6690_v43, %v6578_v30  ;;  %v8549_v30 = vpop.f32.mrf.mxu0 }
 0x1bb   : > { %v2491_v39 = vrot.slane %v2490_v25, 4  ;;  %v2608_v42 = vld [vmem:[#allocation2 + $0xc8] sm:$0x1]  ;;  %v2766_v20 = vrot.slane %v2764_v32, 4  ;;  %2831 = vst [vmem:[#allocation3 + $0x44c] sm:$0xf] %v2765_v33  ;;  %v2486_v34 = vsel %vm7614_vm4, %v2481_v36, %v2485_v38  ;;  %5605 = vmatmul.mubr.bf16.gmra.mxu0 %v7328_v15  ;;  %v6694_v5 = vpop.f32.mrf.mxu1 }
 0x1bc   : > { %v2493_v58 = vshll.u32 %v2112_v59, 16  ;;  %v2767_v1 = vrot.slane %v2608_v42, 5  ;;  %v3093_v29 = vrot.slane %v3091_v62, 4  ;;  %2559 = vst [vmem:[#allocation3 + $0x448] sm:$0xf] %v2486_v34  ;;  %v3094_v54 = vshll.u32 %v2916_v26, 16 }
 0x1bd   : > { %v3100_v16 = vshll.u32 %v2917_v12, 16  ;;  %v3104_v0 = vshrl.u32 %v2917_v12, 16  ;;  %v3110_v57 = vshll.u32 %v2918_v22, 16  ;;  %v2848_v18 = vld [vmem:[#allocation2 + $0x6c] sm:$0xf]  ;;  %v6695_v34 = vpop.f32.mrf.mxu1 }
 0x1be   : > { %v2495_v32 = vrot.slane %v2493_v58, 5  ;;  %v2768_v2 = vsel %vm7897_vm13, %v2766_v20, %v2767_v1  ;;  %v2849_v23 = vld [vmem:[#allocation2 + $0x70] sm:$0xf]  ;;  %2880 = vst [vmem:[#allocation3 + $0x210] sm:$0xf] %v2848_v18  ;;  %v3096_v26 = vrot.slane %v3094_v54, 5 }
 0x1bf   : > { %v2919_v38 = vld [vmem:[#allocation2 + $0x6c] sm:$0xf]  ;;  %2832 = vst [vmem:[#allocation3 + $0x470] sm:$0xf] %v2768_v2  ;;  %v3102_v12 = vrot.slane %v3100_v16, 5  ;;  %v3106_v25 = vrot.slane %v3104_v0, 4  ;;  %v6693_v0 = vadd.f32 %v6692_v46, %v6691_v55 }
 0x1c0   : > { %v3112_v22 = vrot.slane %v3110_v57, 5  ;;  %2881 = vst [vmem:[#allocation3 + $0x234] sm:$0xf] %v2849_v23  ;;  %v2920_v62 = vld [vmem:[#allocation2 + $0x70] sm:$0xf]  ;;  %v2496_v40 = vsel %vm7614_vm4, %v2491_v39, %v2495_v32  ;;  %v3115_v36 = vshrl.u32 %v2919_v38, 16  ;;  %v3097_v48 = vor.u32 %v3096_v26, %v3093_v29 }
 0x1c1   : > { %v2921_v15 = vld [vmem:[#allocation2 + $0x74] sm:$0x1]  ;;  %v3118_v33 = vshll.u32 %v2919_v38, 16  ;;  %v3124_v59 = vshll.u32 %v2920_v62, 16  ;;  %v7326_v42 = vld [vmem:[#allocation3 + $0x184] ss:$36 sps:$4 sm:$0xff]   ;;  %v3107_v60 = vor.u32 %v3106_v25, %v3102_v12  ;;  %v8552_v25 = vadd.f32 %v6693_v0, %v8425_v49 }
 0x1c2   : > { %2560 = vst [vmem:[#allocation3 + $0x46c] sm:$0xf] %v2496_v40  ;;  %v3128_v43 = vshrl.u32 %v2920_v62, 16  ;;  %v3134_v20 = vshll.u32 %v2921_v15, 16  ;;  %v7329_v58 = vld [vmem:[#allocation3 + $0x180] ss:$36 sps:$4 sm:$0xff]   ;;  %5693 = vmatprep.mubr.bf16.mxu1 %v7326_v42  ;;  %v6696_v62 = vadd.f32 %v6695_v34, %v6694_v5 }
 0x1c3   : > { %v3117_v1 = vrot.slane %v3115_v36, 4  ;;  %v3120_v54 = vrot.slane %v3118_v33, 5  ;;  %v3126_v16 = vrot.slane %v3124_v59, 5  ;;  %v3098_v39 = vrot.slane %v3097_v48, 4  ;;  %v3394_v2 = vld [vmem:[#allocation2 + $0x18] sm:$0xe]  ;;  %5694 = vmatmul.mubr.bf16.gmra.mxu1 %v7329_v58  ;;  %v6603_v59 = vpop.f32.mrf.mxu0 }
 0x1c4   : > { %v3108_v57 = vrot.slane %v3107_v60, 4  ;;  %v3130_v18 = vrot.slane %v3128_v43, 4  ;;  %v3136_v32 = vrot.slane %v3134_v20, 5  ;;  %v3395_v29 = vld [vmem:[#allocation2 + $0x1c] sm:$0xf]  ;;  %v6271_v26 = vrot.slane %v3394_v2, 9 }
 0x1c5   : > { %v3121_v23 = vor.u32 %v3120_v54, %v3117_v1  ;;  %v3396_v38 = vld [vmem:[#allocation2 + $0x20] sm:$0x1]  ;;  %v3103_v40 = vsel %vm7614_vm4, %v3098_v39, %v3102_v12  ;;  %v3492_v15 = vrot.slane %v3395_v29, 5  ;;  %v3397_v36 = vld [vmem:[#allocation2 + $0x24] sm:$0xe] }
 0x1c6   : > { %v3113_v55 = vsel %vm7614_vm4, %v3108_v57, %v3112_v22  ;;  %v3131_v46 = vor.u32 %v3130_v18, %v3126_v16  ;;  %v3398_v33 = vld [vmem:[#allocation2 + $0x28] sm:$0xf]  ;;  %3374 = vst [vmem:[#allocation3 + $0x1cc] sm:$0xf] %v3103_v40  ;;  %v3495_v48 = vrot.slane %v3396_v38, 5  ;;  %v6272_v43 = vrot.slane %v3397_v36, 9  ;;  %v6604_v22 = vpop.f32.mrf.mxu0 }
 0x1c7   : > { %3375 = vst [vmem:[#allocation3 + $0x1f0] sm:$0xf] %v3113_v55  ;;  %v3122_v42 = vrot.slane %v3121_v23, 4  ;;  %v3399_v60 = vld [vmem:[#allocation2 + $0x2c] sm:$0x1]  ;;  %v3499_v49 = vrot.slane %v3398_v33, 5  ;;  %v3493_v5 = vsel %vm7897_vm13, %v6271_v26, %v3492_v15  ;;  %v8564_v18 = vadd.f32 %v6604_v22, %v6603_v59  ;;  %v6697_v55 = vpop.f32.mrf.mxu1 }
 0x1c8   : > { %v3132_v20 = vrot.slane %v3131_v46, 4  ;;  %v3494_v12 = vrot.slane %v3492_v15, 4  ;;  %v3502_v34 = vrot.slane %v3399_v60, 5  ;;  %v2850_v58 = vld [vmem:[#allocation2 + $0x78] sm:$0xf]  ;;  %v8571_v40 = vadd.f32 %v6696_v62, %v8543_v52 }
 0x1c9   : > { %v7330_v1 = vld [vmem:[#allocation3 + $0x44c] ss:$36 sps:$4 sm:$0xff]   ;;  %v3127_v0 = vsel %vm7614_vm4, %v3122_v42, %v3126_v16  ;;  %3634 = vst [vmem:[#allocation3 + $0x20] sm:$0xf] %v3493_v5  ;;  %v3500_v39 = vsel %vm7897_vm13, %v6272_v43, %v3499_v49  ;;  %v3501_v57 = vrot.slane %v3499_v49, 4  ;;  %v6606_v16 = vpop.f32.mrf.mxu0  ;;  %v6698_v62 = vpop.f32.mrf.mxu1 }
 0x1ca   : > { %v7335_v54 = vld [vmem:[#allocation3 + $0x448] ss:$36 sps:$4 sm:$0xff]   ;;  %2882 = vst [vmem:[#allocation3 + $0x258] sm:$0xf] %v2850_v58  ;;  %v3137_v2 = vsel %vm7614_vm4, %v3132_v20, %v3136_v32  ;;  %3376 = vst [vmem:[#allocation3 + $0x214] sm:$0xf] %v3127_v0  ;;  %v3496_v23 = vsel %vm7897_vm13, %v3494_v12, %v3495_v48  ;;  %5612 = vmatprep.mubr.bf16.mxu0 %v7330_v1  ;;  %v6699_v0 = vadd.f32 %v6698_v62, %v6697_v55 }
 0x1cb   : > { %3636 = vst [vmem:[#allocation3 + $0x68] sm:$0xf] %v3500_v39  ;;  %v2851_v29 = vld [vmem:[#allocation2 + $0x7c] sm:$0xf]  ;;  %v2922_v38 = vld [vmem:[#allocation2 + $0x78] sm:$0xf]  ;;  %v3503_v46 = vsel %vm7897_vm13, %v3501_v57, %v3502_v34  ;;  %5613 = vmatmul.mubr.bf16.gmra.mxu0 %v7335_v54  ;;  %v6607_v52 = vpop.f32.mrf.mxu0  ;;  %v6700_v39 = vpop.f32.mrf.mxu1 }
 0x1cc   : > { %v2923_v26 = vld [vmem:[#allocation2 + $0x7c] sm:$0xf]  ;;  %3377 = vst [vmem:[#allocation3 + $0x238] sm:$0xf] %v3137_v2  ;;  %3635 = vst [vmem:[#allocation3 + $0x44] sm:$0xf] %v3496_v23  ;;  %v8575_v1 = vadd.f32 %v6607_v52, %v6606_v16 }
 0x1cd   : > { %2883 = vst [vmem:[#allocation3 + $0x27c] sm:$0xf] %v2851_v29  ;;  %v2924_v32 = vld [vmem:[#allocation2 + $0x80] sm:$0x1]  ;;  %v3139_v15 = vshrl.u32 %v2922_v38, 16  ;;  %v3142_v36 = vshll.u32 %v2922_v38, 16 }
 0x1ce   : > { %v3148_v33 = vshll.u32 %v2923_v26, 16  ;;  %3637 = vst [vmem:[#allocation3 + $0x8c] sm:$0xf] %v3503_v46  ;;  %v3152_v59 = vshrl.u32 %v2923_v26, 16  ;;  %v3158_v42 = vshll.u32 %v2924_v32, 16  ;;  %v6609_v32 = vpop.f32.mrf.mxu0 }
 0x1cf   : > { %v3400_v48 = vld [vmem:[#allocation2 + $0x30] sm:$0xe]  ;;  %v3401_v60 = vld [vmem:[#allocation2 + $0x34] sm:$0xf]  ;;  %v3141_v43 = vrot.slane %v3139_v15, 4  ;;  %v3144_v49 = vrot.slane %v3142_v36, 5  ;;  %v8578_v15 = vadd.f32 %v6699_v0, %v8475_v21  ;;  %v6701_v36 = vpop.f32.mrf.mxu1 }
 0x1d0   : > { %v3150_v20 = vrot.slane %v3148_v33, 5  ;;  %v3402_v5 = vld [vmem:[#allocation2 + $0x38] sm:$0x1]  ;;  %v6273_v12 = vrot.slane %v3400_v48, 9  ;;  %v7332_v58 = vld [vmem:[#allocation3 + $0x1cc] ss:$36 sps:$4 sm:$0xff]   ;;  %v6610_v52 = vpop.f32.mrf.mxu0  ;;  %v6702_v62 = vadd.f32 %v6701_v36, %v6700_v39 }
 0x1d1   : > { %v3154_v34 = vrot.slane %v3152_v59, 4  ;;  %v3160_v22 = vrot.slane %v3158_v42, 5  ;;  %v7336_v54 = vld [vmem:[#allocation3 + $0x1c8] ss:$36 sps:$4 sm:$0xff]   ;;  %v3145_v57 = vor.u32 %v3144_v49, %v3141_v43  ;;  %v3506_v2 = vrot.slane %v3401_v60, 5  ;;  %5701 = vmatprep.mubr.bf16.mxu1 %v7332_v58  ;;  %v6703_v43 = vpop.f32.mrf.mxu1 }
 0x1d2   : > { %v3509_v23 = vrot.slane %v3402_v5, 5  ;;  %v3403_v29 = vld [vmem:[#allocation2 + $0x3c] sm:$0xe]  ;;  %v3404_v26 = vld [vmem:[#allocation2 + $0x40] sm:$0xf]  ;;  %5702 = vmatmul.mubr.bf16.gmra.mxu1 %v7336_v54  ;;  %v6590_v60 = vadd.f32 %v8488_v7, %v8481_v47  ;;  %v6612_v54 = vpop.f32.mrf.mxu0 }
 0x1d3   : > { %v3155_v38 = vor.u32 %v3154_v34, %v3150_v20  ;;  %v3405_v46 = vld [vmem:[#allocation2 + $0x44] sm:$0x1]  ;;  %v3146_v33 = vrot.slane %v3145_v57, 4  ;;  %v3507_v16 = vsel %vm7897_vm13, %v6273_v12, %v3506_v2  ;;  %v3508_v55 = vrot.slane %v3506_v2, 4  ;;  %v7337_v42 = vld [vmem:[#allocation3 + $0x214] ss:$36 sps:$4 sm:$0xff]   ;;  %v6704_v2 = vpop.f32.mrf.mxu1 }
 0x1d4   : > { %v6274_v59 = vrot.slane %v3403_v29, 9  ;;  %3638 = vst [vmem:[#allocation3 + $0xb0] sm:$0xf] %v3507_v16  ;;  %v7339_v49 = vld [vmem:[#allocation3 + $0x20] ss:$36 sps:$4 sm:$0xff]   ;;  %v8588_v12 = vadd.f32 %v6610_v52, %v6609_v32  ;;  %5709 = vmatprep.mubr.bf16.mxu1 %v7337_v42  ;;  %v3513_v47 = vrot.slane %v3404_v26, 5  ;;  %v8592_v57 = vadd.f32 %v6702_v62, %v6590_v60  ;;  %v6613_v16 = vpop.f32.mrf.mxu0 }
 0x1d5   : > { %v3156_v48 = vrot.slane %v3155_v38, 4  ;;  %v7340_v21 = vld [vmem:[#allocation3 + $0x210] ss:$36 sps:$4 sm:$0xff]   ;;  %v3151_v5 = vsel %vm7614_vm4, %v3146_v33, %v3150_v20  ;;  %v3510_v58 = vsel %vm7897_vm13, %v3508_v55, %v3509_v23  ;;  %v7341_v34 = vld [vmem:[#allocation3 + $0x68] ss:$36 sps:$4 sm:$0xff]   ;;  %v3516_v7 = vrot.slane %v3405_v46, 5  ;;  %7027 = vmatprep.mubr.bf16.mxu0 %v7339_v49  ;;  %v6706_v55 = vpop.f32.mrf.mxu1 }
 0x1d6   : > { %3378 = vst [vmem:[#allocation3 + $0x25c] sm:$0xf] %v3151_v5  ;;  %3639 = vst [vmem:[#allocation3 + $0xd4] sm:$0xf] %v3510_v58  ;;  %v2852_v39 = vld [vmem:[#allocation2 + $0x84] sm:$0xf]  ;;  %v6596_v38 = vadd.f32 %v8518_v27, %v8510_v63  ;;  %v6705_v32 = vadd.f32 %v6704_v2, %v6703_v43  ;;  %7028 = vmatmul.mubr.bf16.vlgmr.msra.gmra.mxu0 %v7341_v34  ;;  %v8598_v62 = vadd.f32 %v6613_v16, %v6612_v54  ;;  %v6615_v2 = vpop.f32.mrf.mxu0 }
 0x1d7   : > { %v3161_v0 = vsel %vm7614_vm4, %v3156_v48, %v3160_v22  ;;  %v2853_v20 = vld [vmem:[#allocation2 + $0x88] sm:$0xf]  ;;  %2884 = vst [vmem:[#allocation3 + $0x2a0] sm:$0xf] %v2852_v39  ;;  %v2925_v23 = vld [vmem:[#allocation2 + $0x84] sm:$0xf]  ;;  %v3514_v22 = vsel %vm7897_vm13, %v6274_v59, %v3513_v47  ;;  %v6707_v58 = vpop.f32.mrf.mxu1 }
 0x1d8   : > { %3379 = vst [vmem:[#allocation3 + $0x280] sm:$0xf] %v3161_v0  ;;  %v2926_v29 = vld [vmem:[#allocation2 + $0x88] sm:$0xf]  ;;  %v3515_v26 = vrot.slane %v3513_v47, 4  ;;  %v3163_v36 = vshrl.u32 %v2925_v23, 16  ;;  %v8603_v5 = vadd.f32 %v6705_v32, %v8506_v4 }
 0x1d9   : > { %2885 = vst [vmem:[#allocation3 + $0x2c4] sm:$0xf] %v2853_v20  ;;  %v2927_v46 = vld [vmem:[#allocation2 + $0x8c] sm:$0x1]  ;;  %v3166_v33 = vshll.u32 %v2925_v23, 16  ;;  %v3172_v42 = vshll.u32 %v2926_v29, 16 }
 0x1da   : > { %3640 = vst [vmem:[#allocation3 + $0xf8] sm:$0xf] %v3514_v22  ;;  %v3176_v48 = vshrl.u32 %v2926_v29, 16  ;;  %v3182_v60 = vshll.u32 %v2927_v46, 16  ;;  %v3406_v52 = vld [vmem:[#allocation2 + $0x48] sm:$0xe]  ;;  %v3517_v63 = vsel %vm7897_vm13, %v3515_v26, %v3516_v7  ;;  %5710 = vmatmul.mubr.bf16.gmra.mxu1 %v7340_v21  ;;  %v6708_v22 = vadd.f32 %v6707_v58, %v6706_v55  ;;  %v6709_v58 = vpop.f32.mrf.mxu1 }
 0x1db   : > { %v3165_v27 = vrot.slane %v3163_v36, 4  ;;  %v3168_v43 = vrot.slane %v3166_v33, 5  ;;  %v3407_v59 = vld [vmem:[#allocation2 + $0x4c] sm:$0xf]  ;;  %v3408_v49 = vld [vmem:[#allocation2 + $0x50] sm:$0x1]  ;;  %v6616_v33 = vpop.f32.mrf.mxu0 }
 0x1dc   : > { %3641 = vst [vmem:[#allocation3 + $0x11c] sm:$0xf] %v3517_v63  ;;  %v3174_v34 = vrot.slane %v3172_v42, 5  ;;  %v3178_v0 = vrot.slane %v3176_v48, 4  ;;  %v3184_v47 = vrot.slane %v3182_v60, 5  ;;  %v6275_v39 = vrot.slane %v3406_v52, 9 }
 0x1dd   : > { %v3169_v54 = vor.u32 %v3168_v43, %v3165_v27  ;;  %v3520_v20 = vrot.slane %v3407_v59, 5  ;;  %v3523_v23 = vrot.slane %v3408_v49, 5  ;;  %v3409_v29 = vld [vmem:[#allocation2 + $0x54] sm:$0xe]  ;;  %v3410_v7 = vld [vmem:[#allocation2 + $0x58] sm:$0xf]  ;;  %v8607_v42 = vadd.f32 %v6616_v33, %v6615_v2  ;;  %v6618_v27 = vpop.f32.mrf.mxu0 }
 0x1de   : > { %v7345_v26 = vld [vmem:[#allocation3 + $0xb0] ss:$36 sps:$4 sm:$0xff]   ;;  %v3179_v46 = vor.u32 %v3178_v0, %v3174_v34  ;;  %v6276_v36 = vrot.slane %v3409_v29, 9  ;;  %v7342_v4 = vld [vmem:[#allocation3 + $0x258] ss:$36 sps:$4 sm:$0xff]   ;;  %v8609_v48 = vadd.f32 %v6708_v22, %v6596_v38  ;;  %v3527_v55 = vrot.slane %v3410_v7, 5 }
 0x1df   : > { %v7344_v32 = vld [vmem:[#allocation3 + $0x25c] ss:$36 sps:$4 sm:$0xff]   ;;  %v3170_v16 = vrot.slane %v3169_v54, 4  ;;  %v3521_v21 = vsel %vm7897_vm13, %v6275_v39, %v3520_v20  ;;  %7031 = vmatprep.mubr.bf16.mxu0 %v7345_v26  ;;  %v3522_v52 = vrot.slane %v3520_v20, 4  ;;  %v3411_v63 = vld [vmem:[#allocation2 + $0x5c] sm:$0x1]  ;;  %v6619_v29 = vpop.f32.mrf.mxu0 }
 0x1e0   : > { %v3180_v60 = vrot.slane %v3179_v46, 4  ;;  %3642 = vst [vmem:[#allocation3 + $0x140] sm:$0xf] %v3521_v21  ;;  %5717 = vmatprep.mubr.bf16.mxu1 %v7344_v32  ;;  %v3530_v59 = vrot.slane %v3411_v63, 5  ;;  %v2854_v49 = vld [vmem:[#allocation2 + $0x90] sm:$0xf]  ;;  %v3528_v39 = vsel %vm7897_vm13, %v6276_v36, %v3527_v55  ;;  %v8619_v22 = vadd.f32 %v6619_v29, %v6618_v27 }
 0x1e1   : > { %v3175_v43 = vsel %vm7614_vm4, %v3170_v16, %v3174_v34  ;;  %v3524_v38 = vsel %vm7897_vm13, %v3522_v52, %v3523_v23  ;;  %v3529_v2 = vrot.slane %v3527_v55, 4  ;;  %v2855_v54 = vld [vmem:[#allocation2 + $0x94] sm:$0xf]  ;;  %2886 = vst [vmem:[#allocation3 + $0x2e8] sm:$0xf] %v2854_v49 }
 0x1e2   : > { %v3185_v0 = vsel %vm7614_vm4, %v3180_v60, %v3184_v47  ;;  %3380 = vst [vmem:[#allocation3 + $0x2a4] sm:$0xf] %v3175_v43  ;;  %v2928_v20 = vld [vmem:[#allocation2 + $0x90] sm:$0xf]  ;;  %3643 = vst [vmem:[#allocation3 + $0x164] sm:$0xf] %v3524_v38  ;;  %v6710_v47 = vpop.f32.mrf.mxu1  ;;  %5718 = vmatmul.mubr.bf16.gmra.mxu1 %v7342_v4 }
 0x1e3   : > { %v7346_v7 = vld [vmem:[#allocation3 + $0xf8] ss:$36 sps:$4 sm:$0xff]   ;;  %3381 = vst [vmem:[#allocation3 + $0x2c8] sm:$0xf] %v3185_v0  ;;  %3644 = vst [vmem:[#allocation3 + $0x188] sm:$0xf] %v3528_v39  ;;  %v3531_v23 = vsel %vm7897_vm13, %v3529_v2, %v3530_v59  ;;  %v6711_v52 = vadd.f32 %v6710_v47, %v6709_v58 }
 0x1e4   : > { %2887 = vst [vmem:[#allocation3 + $0x30c] sm:$0xf] %v2855_v54  ;;  %v2929_v34 = vld [vmem:[#allocation2 + $0x94] sm:$0xf]  ;;  %v2930_v26 = vld [vmem:[#allocation2 + $0x98] sm:$0x1]  ;;  %7032 = vmatmul.mubr.bf16.gmra.mxu0 %v7346_v7  ;;  %v6712_v63 = vpop.f32.mrf.mxu1 }
 0x1e5   : > { %v3187_v46 = vshrl.u32 %v2928_v20, 16  ;;  %v3190_v36 = vshll.u32 %v2928_v20, 16  ;;  %v3196_v33 = vshll.u32 %v2929_v34, 16  ;;  %3645 = vst [vmem:[#allocation3 + $0x1ac] sm:$0xf] %v3531_v23  ;;  %v3200_v32 = vshrl.u32 %v2929_v34, 16 }
 0x1e6   : > { %v3206_v16 = vshll.u32 %v2930_v26, 16  ;;  %v3412_v21 = vld [vmem:[#allocation2 + $0x60] sm:$0xe]  ;;  %v3413_v60 = vld [vmem:[#allocation2 + $0x64] sm:$0xf]  ;;  %v6713_v2 = vpop.f32.mrf.mxu1  ;;  %v6602_v34 = vadd.f32 %v8549_v30, %v8537_v37  ;;  %v8626_v58 = vadd.f32 %v6711_v52, %v8522_v56 }
 0x1e7   : > { %v3189_v55 = vrot.slane %v3187_v46, 4  ;;  %v3192_v27 = vrot.slane %v3190_v36, 5  ;;  %v3198_v43 = vrot.slane %v3196_v33, 5  ;;  %v3414_v49 = vld [vmem:[#allocation2 + $0x68] sm:$0x1]  ;;  %v6277_v4 = vrot.slane %v3412_v21, 9 }
 0x1e8   : > { %v3202_v0 = vrot.slane %v3200_v32, 4  ;;  %v3208_v38 = vrot.slane %v3206_v16, 5  ;;  %v3534_v59 = vrot.slane %v3413_v60, 5  ;;  %v3537_v39 = vrot.slane %v3414_v49, 5  ;;  %v3415_v20 = vld [vmem:[#allocation2 + $0x6c] sm:$0xe] }
 0x1e9   : > { %v3193_v54 = vor.u32 %v3192_v27, %v3189_v55  ;;  %v3416_v29 = vld [vmem:[#allocation2 + $0x70] sm:$0xf]  ;;  %v3417_v7 = vld [vmem:[#allocation2 + $0x74] sm:$0x1]  ;;  %v6714_v47 = vadd.f32 %v6713_v2, %v6712_v63  ;;  %v6278_v36 = vrot.slane %v3415_v20, 9  ;;  %v6621_v20 = vpop.f32.mrf.mxu0 }
 0x1ea   : > { %v3203_v23 = vor.u32 %v3202_v0, %v3198_v43  ;;  %v3535_v26 = vsel %vm7897_vm13, %v6277_v4, %v3534_v59  ;;  %v3536_v46 = vrot.slane %v3534_v59, 4  ;;  %v2856_v33 = vld [vmem:[#allocation2 + $0x9c] sm:$0xf]  ;;  %v3541_v63 = vrot.slane %v3416_v29, 5  ;;  %v2857_v49 = vld [vmem:[#allocation2 + $0xa0] sm:$0xf] }
 0x1eb   : > { %v7347_v32 = vld [vmem:[#allocation3 + $0x2a0] ss:$36 sps:$4 sm:$0xff]   ;;  %v3194_v21 = vrot.slane %v3193_v54, 4  ;;  %3646 = vst [vmem:[#allocation3 + $0x1d0] sm:$0xf] %v3535_v26  ;;  %v8630_v60 = vadd.f32 %v6714_v47, %v6602_v34  ;;  %v3544_v27 = vrot.slane %v3417_v7, 5  ;;  %v6715_v26 = vpop.f32.mrf.mxu1 }
 0x1ec   : > { %v7349_v16 = vld [vmem:[#allocation3 + $0x2a4] ss:$36 sps:$4 sm:$0xff]   ;;  %2888 = vst [vmem:[#allocation3 + $0x330] sm:$0xf] %v2856_v33  ;;  %v3538_v56 = vsel %vm7897_vm13, %v3536_v46, %v3537_v39  ;;  %v3204_v52 = vrot.slane %v3203_v23, 4  ;;  %v3542_v59 = vsel %vm7897_vm13, %v6278_v36, %v3541_v63  ;;  %v3543_v39 = vrot.slane %v3541_v63, 4 }
 0x1ed   : > { %v7350_v55 = vld [vmem:[#allocation3 + $0x140] ss:$36 sps:$4 sm:$0xff]   ;;  %5725 = vmatprep.mubr.bf16.mxu1 %v7349_v16  ;;  %v7351_v37 = vld [vmem:[#allocation3 + $0x188] ss:$36 sps:$4 sm:$0xff]   ;;  %v3199_v30 = vsel %vm7614_vm4, %v3194_v21, %v3198_v43  ;;  %3647 = vst [vmem:[#allocation3 + $0x1f4] sm:$0xf] %v3538_v56  ;;  %v6622_v16 = vpop.f32.mrf.mxu0 }
 0x1ee   : > { %7035 = vmatprep.mubr.bf16.mxu0 %v7350_v55  ;;  %5726 = vmatmul.mubr.bf16.gmra.mxu1 %v7347_v32  ;;  %3382 = vst [vmem:[#allocation3 + $0x2ec] sm:$0xf] %v3199_v30  ;;  %v2931_v4 = vld [vmem:[#allocation2 + $0x9c] sm:$0xf]  ;;  %v3209_v0 = vsel %vm7614_vm4, %v3204_v52, %v3208_v38  ;;  %2889 = vst [vmem:[#allocation3 + $0x354] sm:$0xf] %v2857_v49  ;;  %v3545_v38 = vsel %vm7897_vm13, %v3543_v39, %v3544_v27  ;;  %v6716_v30 = vpop.f32.mrf.mxu1 }
 0x1ef   : > { %7036 = vmatmul.mubr.bf16.gmra.mxu0 %v7351_v37  ;;  %v2932_v2 = vld [vmem:[#allocation2 + $0xa0] sm:$0xf]  ;;  %v2933_v43 = vld [vmem:[#allocation2 + $0xa4] sm:$0x1]  ;;  %v3211_v54 = vshrl.u32 %v2931_v4, 16  ;;  %v3214_v29 = vshll.u32 %v2931_v4, 16 }
 0x1f0   : > { %3383 = vst [vmem:[#allocation3 + $0x310] sm:$0xf] %v3209_v0  ;;  %3648 = vst [vmem:[#allocation3 + $0x218] sm:$0xf] %v3542_v59  ;;  %v3220_v34 = vshll.u32 %v2932_v2, 16  ;;  %v3224_v7 = vshrl.u32 %v2932_v2, 16  ;;  %v8642_v0 = vadd.f32 %v6622_v16, %v6621_v20  ;;  %v6624_v59 = vpop.f32.mrf.mxu0  ;;  %v6717_v2 = vadd.f32 %v6716_v30, %v6715_v26 }
 0x1f1   : > { %v3230_v47 = vshll.u32 %v2933_v43, 16  ;;  %v3418_v23 = vld [vmem:[#allocation2 + $0x78] sm:$0xe]  ;;  %v3213_v46 = vrot.slane %v3211_v54, 4  ;;  %v3419_v33 = vld [vmem:[#allocation2 + $0x7c] sm:$0xf] }
 0x1f2   : > { %v3420_v36 = vld [vmem:[#allocation2 + $0x80] sm:$0x1]  ;;  %v6279_v32 = vrot.slane %v3418_v23, 9  ;;  %3649 = vst [vmem:[#allocation3 + $0x23c] sm:$0xf] %v3545_v38  ;;  %v3216_v21 = vrot.slane %v3214_v29, 5  ;;  %v6718_v23 = vpop.f32.mrf.mxu1 }
 0x1f3   : > { %v3222_v55 = vrot.slane %v3220_v34, 5  ;;  %v3226_v56 = vrot.slane %v3224_v7, 4  ;;  %v3232_v37 = vrot.slane %v3230_v47, 5  ;;  %v3548_v52 = vrot.slane %v3419_v33, 5  ;;  %v3421_v49 = vld [vmem:[#allocation2 + $0x84] sm:$0xe]  ;;  %v6625_v33 = vpop.f32.mrf.mxu0 }
 0x1f4   : > { %v3551_v63 = vrot.slane %v3420_v36, 5  ;;  %v3422_v4 = vld [vmem:[#allocation2 + $0x88] sm:$0xf]  ;;  %v3217_v39 = vor.u32 %v3216_v21, %v3213_v46  ;;  %v3423_v54 = vld [vmem:[#allocation2 + $0x8c] sm:$0x1]  ;;  %v6280_v7 = vrot.slane %v3421_v49, 9  ;;  %v8646_v26 = vadd.f32 %v6625_v33, %v6624_v59  ;;  %v6719_v46 = vpop.f32.mrf.mxu1 }
 0x1f5   : > { %v7355_v27 = vld [vmem:[#allocation3 + $0x1d0] ss:$36 sps:$4 sm:$0xff]   ;;  %v3227_v43 = vor.u32 %v3226_v56, %v3222_v55  ;;  %v3549_v29 = vsel %vm7897_vm13, %v6279_v32, %v3548_v52  ;;  %v3550_v34 = vrot.slane %v3548_v52, 4  ;;  %v3555_v47 = vrot.slane %v3422_v4, 5  ;;  %v7352_v21 = vld [vmem:[#allocation3 + $0x2e8] ss:$36 sps:$4 sm:$0xff]   ;;  %v6779_v49 = vpop.f32.mrf.mxu0 }
 0x1f6   : > { %v2858_v38 = vld [vmem:[#allocation2 + $0xa8] sm:$0xf]  ;;  %7039 = vmatprep.mubr.bf16.mxu0 %v7355_v27  ;;  %v3218_v36 = vrot.slane %v3217_v39, 4  ;;  %3650 = vst [vmem:[#allocation3 + $0x260] sm:$0xf] %v3549_v29  ;;  %v3558_v20 = vrot.slane %v3423_v54, 5  ;;  %v8653_v4 = vadd.f32 %v6717_v2, %v8564_v18 }
 0x1f7   : > { %v3228_v53 = vrot.slane %v3227_v43, 4  ;;  %v2859_v16 = vld [vmem:[#allocation2 + $0xac] sm:$0xf]  ;;  %2890 = vst [vmem:[#allocation3 + $0x378] sm:$0xf] %v2858_v38  ;;  %v3552_v32 = vsel %vm7897_vm13, %v3550_v34, %v3551_v63  ;;  %v3556_v30 = vsel %vm7897_vm13, %v6280_v7, %v3555_v47  ;;  %v3557_v52 = vrot.slane %v3555_v47, 4  ;;  %v6780_v2 = vpop.f32.mrf.mxu0  ;;  %v6721_v47 = vpop.f32.mrf.mxu1 }
 0x1f8   : > { %v7354_v56 = vld [vmem:[#allocation3 + $0x2ec] ss:$36 sps:$4 sm:$0xff]   ;;  %2891 = vst [vmem:[#allocation3 + $0x39c] sm:$0xf] %v2859_v16  ;;  %9060 = vst [vmem:[#allocation8_spill] sm:$0xff] %v8653_v4  ;;  %v3223_v27 = vsel %vm7614_vm4, %v3218_v36, %v3222_v55  ;;  %v6720_v63 = vadd.f32 %v6719_v46, %v6718_v23  ;;  %v6781_v16 = vadd.f32 %v6780_v2, %v6779_v49 }
 0x1f9   : > { %v3233_v59 = vsel %vm7614_vm4, %v3228_v53, %v3232_v37  ;;  %3651 = vst [vmem:[#allocation3 + $0x284] sm:$0xf] %v3552_v32  ;;  %3652 = vst [vmem:[#allocation3 + $0x2a8] sm:$0xf] %v3556_v30  ;;  %v2934_v39 = vld [vmem:[#allocation2 + $0xa8] sm:$0xf]  ;;  %5733 = vmatprep.mubr.bf16.mxu1 %v7354_v56  ;;  %v3559_v29 = vsel %vm7897_vm13, %v3557_v52, %v3558_v20  ;;  %v6782_v46 = vpop.f32.mrf.mxu0 }
 0x1fa   : > { %v2935_v43 = vld [vmem:[#allocation2 + $0xac] sm:$0xf]  ;;  %v7356_v54 = vld [vmem:[#allocation3 + $0x218] ss:$36 sps:$4 sm:$0xff]   ;;  %3384 = vst [vmem:[#allocation3 + $0x334] sm:$0xf] %v3223_v27  ;;  %5734 = vmatmul.mubr.bf16.gmra.mxu1 %v7352_v21  ;;  %v8662_v56 = vadd.f32 %v6720_v63, %v8575_v1  ;;  %v6722_v27 = vpop.f32.mrf.mxu1  ;;  %v8665_v2 = vadd.f32 %v6781_v16, %v8464_v14 }
 0x1fb   : > { %3385 = vst [vmem:[#allocation3 + $0x358] sm:$0xf] %v3233_v59  ;;  %v2936_v18 = vld [vmem:[#allocation2 + $0xb0] sm:$0x1]  ;;  %3653 = vst [vmem:[#allocation3 + $0x2cc] sm:$0xf] %v3559_v29  ;;  %7040 = vmatmul.mubr.bf16.gmra.mxu0 %v7356_v54  ;;  %v6783_v54 = vpop.f32.mrf.mxu0 }
 0x1fc   : > { %v3235_v55 = vshrl.u32 %v2934_v39, 16  ;;  %v3238_v34 = vshll.u32 %v2934_v39, 16  ;;  %v3244_v7 = vshll.u32 %v2935_v43, 16  ;;  %v3248_v53 = vshrl.u32 %v2935_v43, 16  ;;  %v3424_v37 = vld [vmem:[#allocation2 + $0x90] sm:$0xe]  ;;  %v6724_v63 = vpop.f32.mrf.mxu1 }
 0x1fd   : > { %v3254_v38 = vshll.u32 %v2936_v18, 16  ;;  %v3425_v23 = vld [vmem:[#allocation2 + $0x94] sm:$0xf]  ;;  %v3426_v33 = vld [vmem:[#allocation2 + $0x98] sm:$0x1]  ;;  %v6281_v36 = vrot.slane %v3424_v37, 9  ;;  %v6784_v1 = vadd.f32 %v6783_v54, %v6782_v46 }
 0x1fe   : > { %v3237_v20 = vrot.slane %v3235_v55, 4  ;;  %v3240_v32 = vrot.slane %v3238_v34, 5  ;;  %v3246_v21 = vrot.slane %v3244_v7, 5  ;;  %v3250_v30 = vrot.slane %v3248_v53, 4  ;;  %v3427_v52 = vld [vmem:[#allocation2 + $0x9c] sm:$0xe]  ;;  %v6785_v7 = vpop.f32.mrf.mxu0 }
 0x1ff   : > { %v3256_v59 = vrot.slane %v3254_v38, 5  ;;  %v3562_v39 = vrot.slane %v3425_v23, 5  ;;  %v3565_v43 = vrot.slane %v3426_v33, 5  ;;  %v6282_v29 = vrot.slane %v3427_v52, 9  ;;  %v3428_v10 = vld [vmem:[#allocation2 + $0xa0] sm:$0xf] }
 0x200   : > { %v3241_v18 = vor.u32 %v3240_v32, %v3237_v20  ;;  %v3251_v4 = vor.u32 %v3250_v30, %v3246_v21  ;;  %v3429_v37 = vld [vmem:[#allocation2 + $0xa4] sm:$0x1]  ;;  %v2860_v49 = vld [vmem:[#allocation2 + $0xb4] sm:$0xf]  ;;  %9061 = vst [vmem:[#allocation9_spill] sm:$0xff] %v8665_v2  ;;  %v6723_v53 = vadd.f32 %v6722_v27, %v6721_v47  ;;  %v8670_v20 = vadd.f32 %v6784_v1, %v8469_v50  ;;  %v6725_v32 = vpop.f32.mrf.mxu1  ;;  %v6786_v16 = vpop.f32.mrf.mxu0 }
 0x201   : > { %v7360_v55 = vld [vmem:[#allocation3 + $0x260] ss:$36 sps:$4 sm:$0xff]   ;;  %v3563_v34 = vsel %vm7897_vm13, %v6281_v36, %v3562_v39  ;;  %2892 = vst [vmem:[#allocation3 + $0x3c0] sm:$0xf] %v2860_v49  ;;  %v7357_v38 = vld [vmem:[#allocation3 + $0x330] ss:$36 sps:$4 sm:$0xff]   ;;  %v6726_v52 = vadd.f32 %v6725_v32, %v6724_v63  ;;  %v6787_v63 = vadd.f32 %v6786_v16, %v6785_v7 }
 0x202   : > { %v3242_v23 = vrot.slane %v3241_v18, 4  ;;  %v3252_v33 = vrot.slane %v3251_v4, 4  ;;  %3654 = vst [vmem:[#allocation3 + $0x2f0] sm:$0xf] %v3563_v34  ;;  %9062 = vst [vmem:[#allocation10_spill] sm:$0xff] %v8670_v20  ;;  %7043 = vmatprep.mubr.bf16.mxu0 %v7360_v55  ;;  %v8673_v46 = vadd.f32 %v6723_v53, %v8588_v12  ;;  %v3564_v4 = vrot.slane %v3562_v39, 4  ;;  %v6788_v55 = vpop.f32.mrf.mxu0 }
 0x203   : > { %v7359_v30 = vld [vmem:[#allocation3 + $0x334] ss:$36 sps:$4 sm:$0xff]   ;;  %v7361_v14 = vld [vmem:[#allocation3 + $0x2a8] ss:$36 sps:$4 sm:$0xff]   ;;  %v3569_v27 = vrot.slane %v3428_v10, 5  ;;  %v3572_v18 = vrot.slane %v3429_v37, 5 }
 0x204   : > { %v3247_v36 = vsel %vm7614_vm4, %v3242_v23, %v3246_v21  ;;  %v3257_v47 = vsel %vm7614_vm4, %v3252_v33, %v3256_v59  ;;  %v2861_v54 = vld [vmem:[#allocation2 + $0xb8] sm:$0xf]  ;;  %v2937_v50 = vld [vmem:[#allocation2 + $0xb4] sm:$0xf]  ;;  %5741 = vmatprep.mubr.bf16.mxu1 %v7359_v30  ;;  %7044 = vmatmul.mubr.bf16.gmra.mxu0 %v7361_v14  ;;  %v2939_v12 = vld [vmem:[#allocation2 + $0xbc] sm:$0x1]  ;;  %v8680_v21 = vadd.f32 %v6726_v52, %v8598_v62  ;;  %v6789_v62 = vpop.f32.mrf.mxu0  ;;  %v6727_v14 = vpop.f32.mrf.mxu1 }
 0x205   : > { %3386 = vst [vmem:[#allocation3 + $0x37c] sm:$0xf] %v3247_v36  ;;  %3387 = vst [vmem:[#allocation3 + $0x3a0] sm:$0xf] %v3257_v47  ;;  %v2938_v49 = vld [vmem:[#allocation2 + $0xb8] sm:$0xf]  ;;  %5742 = vmatmul.mubr.bf16.gmra.mxu1 %v7357_v38  ;;  %v3566_v10 = vsel %vm7897_vm13, %v3564_v4, %v3565_v43  ;;  %v3570_v59 = vsel %vm7897_vm13, %v6282_v29, %v3569_v27 }
 0x206   : > { %2893 = vst [vmem:[#allocation3 + $0x3e4] sm:$0xf] %v2861_v54  ;;  %v3259_v1 = vshrl.u32 %v2937_v50, 16  ;;  %v3571_v39 = vrot.slane %v3569_v27, 4  ;;  %v3262_v34 = vshll.u32 %v2937_v50, 16  ;;  %v3268_v33 = vshll.u32 %v2938_v49, 16  ;;  %v6791_v54 = vpop.f32.mrf.mxu0  ;;  %v6728_v50 = vpop.f32.mrf.mxu1 }
 0x207   : > { %v3430_v53 = vld [vmem:[#allocation2 + $0xa8] sm:$0xe]  ;;  %v3431_v37 = vld [vmem:[#allocation2 + $0xac] sm:$0xf]  ;;  %3655 = vst [vmem:[#allocation3 + $0x314] sm:$0xf] %v3566_v10 }
 0x208   : > { %3656 = vst [vmem:[#allocation3 + $0x338] sm:$0xf] %v3570_v59  ;;  %v3261_v23 = vrot.slane %v3259_v1, 4  ;;  %v3272_v7 = vshrl.u32 %v2938_v49, 16  ;;  %v3278_v32 = vshll.u32 %v2939_v12, 16  ;;  %v3573_v38 = vsel %vm7897_vm13, %v3571_v39, %v3572_v18 }
 0x209   : > { %v3432_v30 = vld [vmem:[#allocation2 + $0xb0] sm:$0x1]  ;;  %v3264_v43 = vrot.slane %v3262_v34, 5  ;;  %v6283_v16 = vrot.slane %v3430_v53, 9  ;;  %v3576_v52 = vrot.slane %v3431_v37, 5  ;;  %v3270_v36 = vrot.slane %v3268_v33, 5 }
 0x20a   : > { %v3433_v29 = vld [vmem:[#allocation2 + $0xb4] sm:$0xe]  ;;  %3657 = vst [vmem:[#allocation3 + $0x35c] sm:$0xf] %v3573_v38  ;;  %v3274_v47 = vrot.slane %v3272_v7, 4  ;;  %v3280_v4 = vrot.slane %v3278_v32, 5  ;;  %v8691_v33 = vadd.f32 %v6787_v63, %v8486_v28  ;;  %v6792_v7 = vpop.f32.mrf.mxu0  ;;  %v6730_v32 = vpop.f32.mrf.mxu1 }
 0x20b   : > { %v3579_v27 = vrot.slane %v3432_v30, 5  ;;  %v3265_v1 = vor.u32 %v3264_v43, %v3261_v23  ;;  %v3577_v49 = vsel %vm7897_vm13, %v6283_v16, %v3576_v52  ;;  %v3578_v12 = vrot.slane %v3576_v52, 4  ;;  %v3434_v10 = vld [vmem:[#allocation2 + $0xb8] sm:$0xf]  ;;  %v3435_v59 = vld [vmem:[#allocation2 + $0xbc] sm:$0x1] }
 0x20c   : > { %v6284_v20 = vrot.slane %v3433_v29, 9  ;;  %v3275_v18 = vor.u32 %v3274_v47, %v3270_v36  ;;  %3658 = vst [vmem:[#allocation3 + $0x380] sm:$0xf] %v3577_v49  ;;  %v3583_v39 = vrot.slane %v3434_v10, 5  ;;  %v3586_v34 = vrot.slane %v3435_v59, 5  ;;  %v6794_v63 = vpop.f32.mrf.mxu0  ;;  %v6731_v59 = vpop.f32.mrf.mxu1 }
 0x20d   : > { %v2862_v53 = vld [vmem:[#allocation2 + $0xc0] sm:$0xf]  ;;  %v2863_v37 = vld [vmem:[#allocation2 + $0xc4] sm:$0xf]  ;;  %v7362_v30 = vld [vmem:[#allocation3 + $0x378] ss:$36 sps:$4 sm:$0xff]   ;;  %v3580_v38 = vsel %vm7897_vm13, %v3578_v12, %v3579_v27  ;;  %v6790_v43 = vadd.f32 %v6789_v62, %v6788_v55  ;;  %v6793_v16 = vadd.f32 %v6792_v7, %v6791_v54  ;;  %v6729_v10 = vadd.f32 %v6728_v50, %v6727_v14 }
 0x20e   : > { %v3266_v23 = vrot.slane %v3265_v1, 4  ;;  %2894 = vst [vmem:[#allocation3 + $0x408] sm:$0xf] %v2862_v53  ;;  %2895 = vst [vmem:[#allocation3 + $0x42c] sm:$0xf] %v2863_v37  ;;  %v3276_v29 = vrot.slane %v3275_v18, 4  ;;  %v3584_v47 = vsel %vm7897_vm13, %v6284_v20, %v3583_v39  ;;  %v6732_v62 = vadd.f32 %v6731_v59, %v6730_v32  ;;  %v6795_v18 = vpop.f32.mrf.mxu0 }
 0x20f   : > { %v7364_v52 = vld [vmem:[#allocation3 + $0x37c] ss:$36 sps:$4 sm:$0xff]   ;;  %3659 = vst [vmem:[#allocation3 + $0x3a4] sm:$0xf] %v3580_v38  ;;  %v3585_v49 = vrot.slane %v3583_v39, 4  ;;  %v8700_v27 = vadd.f32 %v6790_v43, %v8491_v35  ;;  %v8703_v55 = vadd.f32 %v6793_v16, %v8498_v3  ;;  %v6796_v53 = vadd.f32 %v6795_v18, %v6794_v63 }
 0x210   : > { %v2940_v28 = vld [vmem:[#allocation2 + $0xc0] sm:$0xf]  ;;  %v7365_v2 = vld [vmem:[#allocation3 + $0x2f0] ss:$36 sps:$4 sm:$0xff]   ;;  %v3271_v1 = vsel %vm7614_vm4, %v3266_v23, %v3270_v36  ;;  %3660 = vst [vmem:[#allocation3 + $0x3c8] sm:$0xf] %v3584_v47  ;;  %5749 = vmatprep.mubr.bf16.mxu1 %v7364_v52  ;;  %v3281_v20 = vsel %vm7614_vm4, %v3276_v29, %v3280_v4  ;;  %v8710_v37 = vadd.f32 %v6729_v10, %v8607_v42  ;;  %v6797_v23 = vpop.f32.mrf.mxu0 }
 0x211   : > { %3388 = vst [vmem:[#allocation3 + $0x3c4] sm:$0xf] %v3271_v1  ;;  %v3587_v14 = vsel %vm7897_vm13, %v3585_v49, %v3586_v34  ;;  %v2941_v54 = vld [vmem:[#allocation2 + $0xc4] sm:$0xf]  ;;  %v2942_v50 = vld [vmem:[#allocation2 + $0xc8] sm:$0x1]  ;;  %7047 = vmatprep.mubr.bf16.mxu0 %v7365_v2  ;;  %5750 = vmatmul.mubr.bf16.gmra.mxu1 %v7362_v30  ;;  %v8713_v38 = vadd.f32 %v6732_v62, %v8619_v22 }
 0x212   : > { %v3283_v12 = vshrl.u32 %v2940_v28, 16  ;;  %v3286_v36 = vshll.u32 %v2940_v28, 16  ;;  %v7366_v35 = vld [vmem:[#allocation3 + $0x338] ss:$36 sps:$4 sm:$0xff]   ;;  %3389 = vst [vmem:[#allocation3 + $0x3e8] sm:$0xf] %v3281_v20  ;;  %v8716_v16 = vadd.f32 %v6796_v53, %v8520_v11  ;;  %v6798_v49 = vpop.f32.mrf.mxu0  ;;  %v6733_v28 = vpop.f32.mrf.mxu1 }
 0x213   : > { %3661 = vst [vmem:[#allocation3 + $0x3ec] sm:$0xf] %v3587_v14  ;;  %v3292_v3 = vshll.u32 %v2941_v54, 16  ;;  %v3296_v39 = vshrl.u32 %v2941_v54, 16  ;;  %v3302_v32 = vshll.u32 %v2942_v50, 16  ;;  %7048 = vmatmul.mubr.bf16.gmra.mxu0 %v7366_v35  ;;  %v6799_v20 = vadd.f32 %v6798_v49, %v6797_v23 }
 0x214   : > { %v3285_v4 = vrot.slane %v3283_v12, 4  ;;  %v3288_v7 = vrot.slane %v3286_v36, 5  ;;  %v3436_v34 = vld [vmem:[#allocation2 + $0xc0] sm:$0xe]  ;;  %v3437_v43 = vld [vmem:[#allocation2 + $0xc4] sm:$0xf]  ;;  %v6800_v50 = vpop.f32.mrf.mxu0  ;;  %v6734_v11 = vpop.f32.mrf.mxu1 }
 0x215   : > { %v3294_v2 = vrot.slane %v3292_v3, 5  ;;  %v3298_v30 = vrot.slane %v3296_v39, 4  ;;  %v3438_v29 = vld [vmem:[#allocation2 + $0xc8] sm:$0x1]  ;;  %v6285_v47 = vrot.slane %v3436_v34, 9  ;;  %v3590_v42 = vrot.slane %v3437_v43, 5 }
 0x216   : > { %v3289_v52 = vor.u32 %v3288_v7, %v3285_v4  ;;  %v7370_v63 = vld [vmem:[#allocation3 + $0x380] ss:$36 sps:$4 sm:$0xff]   ;;  %v3304_v59 = vrot.slane %v3302_v32, 5  ;;  %v3593_v1 = vrot.slane %v3438_v29, 5  ;;  %v3439_v54 = vld [vmem:[#allocation2 + $0xcc] sm:$0xe]  ;;  %v8721_v35 = vadd.f32 %v6799_v20, %v8525_v31  ;;  %v6801_v34 = vpop.f32.mrf.mxu0  ;;  %v6736_v23 = vpop.f32.mrf.mxu1 }
 0x217   : > { %v3299_v10 = vor.u32 %v3298_v30, %v3294_v2  ;;  %v3591_v62 = vsel %vm7897_vm13, %v6285_v47, %v3590_v42  ;;  %v3592_v14 = vrot.slane %v3590_v42, 4  ;;  %7051 = vmatprep.mubr.bf16.mxu0 %v7370_v63  ;;  %v3440_v36 = vld [vmem:[#allocation2 + $0xd0] sm:$0xf]  ;;  %v3441_v18 = vld [vmem:[#allocation2 + $0xd4] sm:$0x1]  ;;  %v6735_v3 = vadd.f32 %v6734_v11, %v6733_v28 }
 0x218   : > { %v3290_v22 = vrot.slane %v3289_v52, 4  ;;  %3662 = vst [vmem:[#allocation3 + $0x410] sm:$0xf] %v3591_v62  ;;  %v7367_v39 = vld [vmem:[#allocation3 + $0x3c0] ss:$36 sps:$4 sm:$0xff]   ;;  %v6286_v32 = vrot.slane %v3439_v54, 9  ;;  %v6802_v29 = vadd.f32 %v6801_v34, %v6800_v50  ;;  %v6737_v28 = vpop.f32.mrf.mxu1  ;;  %v6803_v62 = vpop.f32.mrf.mxu0 }
 0x219   : > { %v3300_v12 = vrot.slane %v3299_v10, 4  ;;  %v7369_v53 = vld [vmem:[#allocation3 + $0x3c4] ss:$36 sps:$4 sm:$0xff]   ;;  %v3594_v7 = vsel %vm7897_vm13, %v3592_v14, %v3593_v1  ;;  %v3597_v31 = vrot.slane %v3440_v36, 5  ;;  %v3600_v52 = vrot.slane %v3441_v18, 5 }
 0x21a   : > { %v3295_v4 = vsel %vm7614_vm4, %v3290_v22, %v3294_v2  ;;  %v7371_v30 = vld [vmem:[#allocation3 + $0x3c8] ss:$36 sps:$4 sm:$0xff]   ;;  %3663 = vst [vmem:[#allocation3 + $0x434] sm:$0xf] %v3594_v7  ;;  %5757 = vmatprep.mubr.bf16.mxu1 %v7369_v53  ;;  %v2864_v47 = vld [vmem:[#allocation2 + $0xcc] sm:$0xf]  ;;  %v8730_v49 = vadd.f32 %v6735_v3, %v8642_v0  ;;  %v8735_v22 = vadd.f32 %v6802_v29, %v8545_v17  ;;  %v6804_v36 = vpop.f32.mrf.mxu0  ;;  %v6739_v3 = vpop.f32.mrf.mxu1 }
 0x21b   : > { %v3305_v43 = vsel %vm7614_vm4, %v3300_v12, %v3304_v59  ;;  %3390 = vst [vmem:[#allocation3 + $0x40c] sm:$0xf] %v3295_v4  ;;  %v2865_v42 = vld [vmem:[#allocation2 + $0xd0] sm:$0xf]  ;;  %v2943_v2 = vld [vmem:[#allocation2 + $0xcc] sm:$0xf]  ;;  %5758 = vmatmul.mubr.bf16.gmra.mxu1 %v7367_v39  ;;  %7052 = vmatmul.mubr.bf16.gmra.mxu0 %v7371_v30  ;;  %v3598_v63 = vsel %vm7897_vm13, %v6286_v32, %v3597_v31 }
 0x21c   : > { %3391 = vst [vmem:[#allocation3 + $0x430] sm:$0xf] %v3305_v43  ;;  %v3599_v10 = vrot.slane %v3597_v31, 4  ;;  %2896 = vst [vmem:[#allocation3 + $0x450] sm:$0xf] %v2864_v47  ;;  %v3307_v20 = vshrl.u32 %v2943_v2, 16  ;;  %v6738_v18 = vadd.f32 %v6737_v28, %v6736_v23  ;;  %v6805_v7 = vadd.f32 %v6804_v36, %v6803_v62  ;;  %v6806_v17 = vpop.f32.mrf.mxu0  ;;  %v6740_v34 = vpop.f32.mrf.mxu1 }
 0x21d   : > { %2897 = vst [vmem:[#allocation3 + $0x474] sm:$0xf] %v2865_v42  ;;  %v2944_v59 = vld [vmem:[#allocation2 + $0xd0] sm:$0xf]  ;;  %v2945_v1 = vld [vmem:[#allocation2 + $0xd4] sm:$0x1]  ;;  %v6741_v41 = vadd.f32 %v6740_v34, %v6739_v3  ;;  %v6638_v34 = vadd.f32 %v8396_v44, %v8392_v45 }
 0x21e   : > { %3664 = vst [vmem:[#allocation3 + $0x458] sm:$0xf] %v3598_v63  ;;  %v3310_v14 = vshll.u32 %v2943_v2, 16  ;;  %v3316_v0 = vshll.u32 %v2944_v59, 16  ;;  %v3320_v54 = vshrl.u32 %v2944_v59, 16  ;;  %v3326_v50 = vshll.u32 %v2945_v1, 16  ;;  %v6807_v42 = vpop.f32.mrf.mxu0  ;;  %v6742_v2 = vpop.f32.mrf.mxu1 }
 0x21f   : > { %v3601_v11 = vsel %vm7897_vm13, %v3599_v10, %v3600_v52  ;;  %v3309_v12 = vrot.slane %v3307_v20, 4  ;;  %v8740_v32 = vadd.f32 %v6738_v18, %v8646_v26  ;;  %v7372_v52 = vld [vmem:[#allocation3 + $0x408] ss:$36 sps:$4 sm:$0xff]   ;;  %v8743_v23 = vadd.f32 %v6805_v7, %v8552_v25 }
 0x220   : > { %3665 = vst [vmem:[#allocation3 + $0x47c] sm:$0xf] %v3601_v11  ;;  %v3312_v39 = vrot.slane %v3310_v14, 5  ;;  %v3318_v53 = vrot.slane %v3316_v0, 5  ;;  %v3322_v4 = vrot.slane %v3320_v54, 4  ;;  %v3328_v29 = vrot.slane %v3326_v50, 5  ;;  %v6743_v1 = vpop.f32.mrf.mxu1 }
 0x221   : > { %v7375_v30 = vld [vmem:[#allocation3 + $0x410] ss:$36 sps:$4 sm:$0xff]   ;;  %v6808_v10 = vadd.f32 %v6807_v42, %v6806_v17  ;;  %v8746_v26 = vadd.f32 %v6741_v41, %v8321_v9  ;;  %v6632_v59 = vadd.f32 %v8360_v24, %v8348_v13  ;;  %v6744_v14 = vadd.f32 %v6743_v1, %v6742_v2  ;;  %v6809_v9 = vpop.f32.mrf.mxu0 }
 0x222   : > { %v3313_v43 = vor.u32 %v3312_v39, %v3309_v12  ;;  %v3323_v31 = vor.u32 %v3322_v4, %v3318_v53  ;;  %7055 = vmatprep.mubr.bf16.mxu0 %v7375_v30  ;;  %v6745_v11 = vpop.f32.mrf.mxu1 }
 0x223   : > { %v7374_v47 = vld [vmem:[#allocation3 + $0x40c] ss:$36 sps:$4 sm:$0xff]   ;;  %v8755_v62 = vadd.f32 %v6808_v10, %v8571_v40  ;;  %v8757_v54 = vadd.f32 %v6744_v14, %v6632_v59  ;;  %v6810_v13 = vpop.f32.mrf.mxu0 }
 0x224   : > { %v3314_v28 = vrot.slane %v3313_v43, 4  ;;  %v3324_v63 = vrot.slane %v3323_v31, 4  ;;  %5765 = vmatprep.mubr.bf16.mxu1 %v7374_v47  ;;  %v6811_v24 = vadd.f32 %v6810_v13, %v6809_v9  ;;  %v6746_v36 = vpop.f32.mrf.mxu1  ;;  %v7377_v18 = vld [vmem:[#allocation3 + $0x450] ss:$36 sps:$4 sm:$0xff]  }
 0x225   : > { %5766 = vmatmul.mubr.bf16.gmra.mxu1 %v7372_v52  ;;  %v6812_v50 = vpop.f32.mrf.mxu0  ;;  %v6747_v3 = vadd.f32 %v6746_v36, %v6745_v11 }
 0x226   : > { %v3319_v20 = vsel %vm7614_vm4, %v3314_v28, %v3318_v53  ;;  %v3329_v25 = vsel %vm7614_vm4, %v3324_v63, %v3328_v29  ;;  %v8760_v12 = vadd.f32 %v6811_v24, %v8578_v15  ;;  %v6748_v53 = vpop.f32.mrf.mxu1  ;;  %v6644_v63 = vadd.f32 %v8417_v6, %v8413_v61 }
 0x227   : > { %v7376_v0 = vld [vmem:[#allocation3 + $0x458] ss:$36 sps:$4 sm:$0xff]   ;;  %3392 = vst [vmem:[#allocation3 + $0x454] sm:$0xf] %v3319_v20  ;;  %3393 = vst [vmem:[#allocation3 + $0x478] sm:$0xf] %v3329_v25  ;;  %v6813_v8 = vpop.f32.mrf.mxu0  ;;  %v8766_v7 = vadd.f32 %v6747_v3, %v8370_v19 }
 0x228   : > { %7056 = vmatmul.mubr.bf16.gmra.mxu0 %v7376_v0  ;;  %v6814_v40 = vadd.f32 %v6813_v8, %v6812_v50  ;;  %v6749_v17 = vpop.f32.mrf.mxu1 }
 0x229   : > { %v6815_v15 = vpop.f32.mrf.mxu0  ;;  %v6750_v30 = vadd.f32 %v6749_v17, %v6748_v53 }
 0x22a   : > { %v8763_v4 = vadd.f32 %v6814_v40, %v8592_v57  ;;  %v6751_v43 = vpop.f32.mrf.mxu1  ;;  %v9065_v40 = vld [vmem:[#allocation7_spill] sm:$0xff] }
 0x22b   : > { %v6816_v31 = vpop.f32.mrf.mxu0  ;;  %v8770_v29 = vadd.f32 %v6750_v30, %v6638_v34 }
 0x22c   : > { %v6817_v41 = vadd.f32 %v6816_v31, %v6815_v15  ;;  %v6752_v52 = vpop.f32.mrf.mxu1  ;;  %v9066_v15 = vld [vmem:[#allocation8_spill] sm:$0xff] }
 0x22d   : > { %v6818_v47 = vpop.f32.mrf.mxu0  ;;  %v6753_v57 = vadd.f32 %v6752_v52, %v6751_v43 }
 0x22e   : > { %v7379_v39 = vld [vmem:[#allocation3 + $0x454] ss:$36 sps:$4 sm:$0xff]   ;;  %v8773_v42 = vadd.f32 %v6817_v41, %v8603_v5  ;;  %v6754_v19 = vpop.f32.mrf.mxu1 }
 0x22f   : > { %5773 = vmatprep.mubr.bf16.mxu1 %v7379_v39  ;;  %v6819_v2 = vpop.f32.mrf.mxu0  ;;  %v8776_v28 = vadd.f32 %v6753_v57, %v8415_v51 }
 0x230   : > { %5774 = vmatmul.mubr.bf16.gmra.mxu1 %v7377_v18  ;;  %v6820_v45 = vadd.f32 %v6819_v2, %v6818_v47  ;;  %v6755_v44 = vpop.f32.mrf.mxu1  ;;  %v9064_v18 = vld [vmem:[#allocation5_spill] sm:$0xff] }
 0x231   : > { %v6756_v10 = vadd.f32 %v6755_v44, %v6754_v19  ;;  %v6821_v1 = vpop.f32.mrf.mxu0  ;;  %v6650_v3 = vadd.f32 %v9065_v40, %v9064_v18 }
 0x232   : > { %v8781_v59 = vadd.f32 %v6820_v45, %v8609_v48  ;;  %v6757_v9 = vpop.f32.mrf.mxu1  ;;  %v9063_v48 = vld [vmem:[#allocation6_spill] sm:$0xff] }
 0x233   : > { %v8783_v20 = vadd.f32 %v6756_v10, %v6644_v63  ;;  %v6822_v25 = vpop.f32.mrf.mxu0 }
 0x234   : > { %v6823_v5 = vadd.f32 %v6822_v25, %v6821_v1  ;;  %v6758_v24 = vpop.f32.mrf.mxu1 }
 0x235   : > { %v6824_v14 = vpop.f32.mrf.mxu0  ;;  %v6759_v61 = vadd.f32 %v6758_v24, %v6757_v9 }
 0x236   : > { %v8786_v0 = vadd.f32 %v6823_v5, %v8626_v58  ;;  %v6760_v6 = vpop.f32.mrf.mxu1 }
 0x237   : > { %v6825_v51 = vpop.f32.mrf.mxu0  ;;  %v8792_v11 = vadd.f32 %v6759_v61, %v9063_v48 }
 0x238   : > { %v6826_v13 = vadd.f32 %v6825_v51, %v6824_v14  ;;  %v6761_v36 = vpop.f32.mrf.mxu1 }
 0x239   : > { %v6827_v8 = vpop.f32.mrf.mxu0  ;;  %v6762_v39 = vadd.f32 %v6761_v36, %v6760_v6 }
 0x23a   : > { %v8789_v50 = vadd.f32 %v6826_v13, %v8630_v60 }
 0x23b   : > { %v6828_v58 = vpop.f32.mrf.mxu0  ;;  %v8796_v17 = vadd.f32 %v6762_v39, %v6650_v3 }
 0x23c   : > { %v6829_v53 = vadd.f32 %v6828_v58, %v6827_v8 }
 0x23d   : > { %v6830_v34 = vpop.f32.mrf.mxu0 }
 0x23e   : > { %v8799_v30 = vadd.f32 %v6829_v53, %v9066_v15 }
 0x23f   : > { %v6831_v60 = vpop.f32.mrf.mxu0 }
 0x240   : > { %v6832_v43 = vadd.f32 %v6831_v60, %v6830_v34 }
 0x241   : > { %v6833_v31 = vpop.f32.mrf.mxu0 }
 0x242   : > { %v8802_v41 = vadd.f32 %v6832_v43, %v8662_v56 }
 0x243   : > { %v6834_v52 = vpop.f32.mrf.mxu0 }
 0x244   : > { %v6835_v47 = vadd.f32 %v6834_v52, %v6833_v31  ;;  %v8804_v19 = vpop.f32.mrf.mxu1 }
 0x245   : > { %v6836_v57 = vpop.f32.mrf.mxu0 }
 0x246   : > { %v8807_v2 = vadd.f32 %v6835_v47, %v8673_v46  ;;  %v8809_v44 = vpop.f32.mrf.mxu1 }
 0x247   : > { %v6837_v45 = vpop.f32.mrf.mxu0 }
 0x248   : > { %v6838_v63 = vadd.f32 %v6837_v45, %v6836_v57  ;;  %v8811_v10 = vpop.f32.mrf.mxu1 }
 0x249   : > { %v6839_v25 = vpop.f32.mrf.mxu0 }
 0x24a   : > { %v8814_v1 = vadd.f32 %v6838_v63, %v8680_v21  ;;  %v8816_v5 = vpop.f32.mrf.mxu1 }
 0x24b   : > { %v6840_v56 = vpop.f32.mrf.mxu0 }
 0x24c   : > { %v6841_v14 = vadd.f32 %v6840_v56, %v6839_v25 }
 0x24d   : > { %v6842_v51 = vpop.f32.mrf.mxu0 }
 0x24e   : > { %v8819_v9 = vadd.f32 %v6841_v14, %v8710_v37 }
 0x24f   : > { %v6843_v46 = vpop.f32.mrf.mxu0  ;;  %v6897_v13 = vpop.f32.mrf.mxu1 }
 0x250   : > { %v6844_v24 = vadd.f32 %v6843_v46, %v6842_v51 }
 0x251   : > { %v6898_v61 = vpop.f32.mrf.mxu1 }
 0x252   : > { %v8822_v6 = vadd.f32 %v6844_v24, %v8713_v38 }
 0x253   : > { %v8824_v48 = vpop.f32.mrf.mxu1  ;;  %v6845_v21 = vpop.f32.mrf.mxu0 }
 0x255   : > { %v6846_v8 = vpop.f32.mrf.mxu0  ;;  %v6901_v36 = vpop.f32.mrf.mxu1 }
 0x256   : > { %v6847_v18 = vadd.f32 %v6846_v8, %v6845_v21 }
 0x257   : > { %v6848_v40 = vpop.f32.mrf.mxu0 }
 0x258   : > { %v8827_v3 = vadd.f32 %v6847_v18, %v8730_v49 }
 0x259   : > { %v6849_v39 = vpop.f32.mrf.mxu0 }
 0x25a   : > { %v6850_v58 = vadd.f32 %v6849_v39, %v6848_v40 }
 0x25c   : > { %v8834_v34 = vadd.f32 %v6850_v58, %v8740_v32 }
 0x25d   : > { %v8829_v37 = vpop.f32.mrf.mxu1 }
 0x25f   : > { %v8831_v53 = vpop.f32.mrf.mxu1 }
 0x261   : > { %v8836_v38 = vpop.f32.mrf.mxu1  ;;  %v6851_v15 = vpop.f32.mrf.mxu0 }
 0x263   : > { %v6852_v60 = vpop.f32.mrf.mxu0  ;;  %v8838_v31 = vpop.f32.mrf.mxu1 }
 0x264   : > { %v6853_v43 = vadd.f32 %v6852_v60, %v6851_v15 }
 0x265   : > { %v6854_v52 = vpop.f32.mrf.mxu0 }
 0x266   : > { %v8841_v49 = vadd.f32 %v6853_v43, %v8746_v26 }
 0x267   : > { %v6855_v47 = vpop.f32.mrf.mxu0 }
 0x268   : > { %v6856_v57 = vadd.f32 %v6855_v47, %v6854_v52 }
 0x26a   : > { %v8843_v45 = vpop.f32.mrf.mxu1  ;;  %v8846_v63 = vadd.f32 %v6856_v57, %v8757_v54 }
 0x26c   : > { %v6910_v32 = vpop.f32.mrf.mxu1 }
 0x26d   : > { %v6857_v25 = vpop.f32.mrf.mxu0 }
 0x26e   : > { %v8848_v56 = vpop.f32.mrf.mxu1 }
 0x26f   : > { %v6858_v14 = vpop.f32.mrf.mxu0 }
 0x270   : > { %v6859_v51 = vadd.f32 %v6858_v14, %v6857_v25  ;;  %v8850_v46 = vpop.f32.mrf.mxu1 }
 0x271   : > { %v6860_v24 = vpop.f32.mrf.mxu0 }
 0x272   : > { %v8853_v21 = vadd.f32 %v6859_v51, %v8766_v7 }
 0x273   : > { %v6861_v26 = vpop.f32.mrf.mxu0 }
 0x274   : > { %v6862_v8 = vadd.f32 %v6861_v26, %v6860_v24 }
 0x276   : > { %v8858_v54 = vadd.f32 %v6862_v8, %v8770_v29 }
 0x277   : > { %v8855_v18 = vpop.f32.mrf.mxu1 }
 0x279   : > { %v8860_v40 = vpop.f32.mrf.mxu1 }
 0x27b   : > { %v8862_v39 = vpop.f32.mrf.mxu1  ;;  %v6863_v58 = vpop.f32.mrf.mxu0 }
 0x27d   : > { %v6864_v15 = vpop.f32.mrf.mxu0  ;;  %v8864_v60 = vpop.f32.mrf.mxu1 }
 0x27e   : > { %v6865_v43 = vadd.f32 %v6864_v15, %v6863_v58  ;;  %v6899_v15 = vadd.f32 %v6898_v61, %v6897_v13 }
 0x27f   : > { %v6866_v7 = vpop.f32.mrf.mxu0 }
 0x280   : > { %v8867_v52 = vadd.f32 %v6865_v43, %v8776_v28  ;;  %v5664_v13 = vadd.f32 %v6899_v15, %v8691_v33 }
 0x281   : > { %v6867_v47 = vpop.f32.mrf.mxu0 }
 0x282   : > { %9067 = vst [vmem:[#allocation6_spill] sm:$0xff] %v8867_v52  ;;  %v6868_v25 = vadd.f32 %v6867_v47, %v6866_v7  ;;  %v6893_v47 = vadd.f32 %v8809_v44, %v8804_v19  ;;  %v6896_v19 = vadd.f32 %v8816_v5, %v8811_v10  ;;  %v9072_v10 = vld [vmem:[#allocation10_spill] sm:$0xff] }
 0x283   : > { %v8869_v57 = vpop.f32.mrf.mxu1 }
 0x284   : > { %v8874_v14 = vadd.f32 %v6868_v25, %v8783_v20  ;;  %v5659_v5 = vadd.f32 %v6896_v19, %v9072_v10 }
 0x285   : > { %v8871_v29 = vpop.f32.mrf.mxu1 }
 0x286   : > { %9068 = vst [vmem:[#allocation5_spill] sm:$0xff] %v8874_v14 }
 0x287   : > { %v8876_v51 = vpop.f32.mrf.mxu1 }
 0x289   : > { %v8880_v26 = vpop.f32.mrf.mxu1 }
 0x28b   : > { %v6869_v24 = vpop.f32.mrf.mxu0 }
 0x28d   : > { %v6870_v8 = vpop.f32.mrf.mxu0 }
 0x28e   : > { %v6871_v58 = vadd.f32 %v6870_v8, %v6869_v24  ;;  %v6902_v24 = vadd.f32 %v6901_v36, %v8824_v48  ;;  %v9071_v48 = vld [vmem:[#allocation9_spill] sm:$0xff] }
 0x28f   : > { %v6872_v28 = vpop.f32.mrf.mxu0 }
 0x290   : > { %v8889_v20 = vadd.f32 %v6871_v58, %v8792_v11  ;;  %v5667_v58 = vadd.f32 %v6902_v24, %v8700_v27 }
 0x291   : > { %v6873_v7 = vpop.f32.mrf.mxu0 }
 0x292   : > { %v8886_v43 = vpop.f32.mrf.mxu1  ;;  %9069 = vst [vmem:[#allocation7_spill] sm:$0xff] %v8889_v20  ;;  %v6874_v14 = vadd.f32 %v6873_v7, %v6872_v28 }
 0x294   : > { %v8893_v25 = vpop.f32.mrf.mxu1  ;;  %v8900_v52 = vadd.f32 %v6874_v14, %v8796_v17  ;;  %v5656_v17 = vadd.f32 %v6893_v47, %v9071_v48  ;;  %v6905_v48 = vadd.f32 %v8831_v53, %v8829_v37  ;;  %v6908_v37 = vadd.f32 %v8838_v31, %v8836_v38 }
 0x295   : > { %v6923_v38 = vadd.f32 %v8871_v29, %v8869_v57  ;;  %v6926_v57 = vadd.f32 %v8880_v26, %v8876_v51 }
 0x296   : > { %v8897_v8 = vpop.f32.mrf.mxu1  ;;  %9070 = vst [vmem:[#allocation8_spill] sm:$0xff] %v8900_v52  ;;  %v7029_v11 = vpop.f32.mrf.mxu0  ;;  %v6911_v52 = vadd.f32 %v6910_v32, %v8843_v45  ;;  %v6914_v45 = vadd.f32 %v8850_v46, %v8848_v56 }
 0x297   : > { %v5825_v61 = vadd.f32 %v7029_v11, %v5664_v13  ;;  %v5699_v26 = vadd.f32 %v6926_v57, %v8763_v4  ;;  %v6929_v4 = vadd.f32 %v8893_v25, %v8886_v43 }
 0x298   : > { %v8910_v44 = vpop.f32.mrf.mxu1  ;;  %v5816_v36 = vpop.f32.mrf.mxu0 }
 0x299   : > { %6053 = vst [vmem:[%s8906_s9 + $0x10] sm:$0xff] %v5825_v61  ;;  %v5817_v33 = vadd.f32 %v5816_v36, %v5656_v17  ;;  %v5983_v32 = vmul.f32 %v5825_v61, %v5825_v61  ;;  %v5704_v43 = vadd.f32 %v6929_v4, %v8773_v42 }
 0x29a   : > { %v8913_v14 = vpop.f32.mrf.mxu1  ;;  %v7030_v28 = vpop.f32.mrf.mxu0 }
 0x29b   : > { %6051 = vst [vmem:[%s8906_s9] sm:$0xff] %v5817_v33  ;;  %v5828_v7 = vadd.f32 %v7030_v28, %v5667_v58  ;;  %v5981_v17 = vmul.f32 %v5817_v33, %v5817_v33  ;;  %v5680_v58 = vadd.f32 %v6911_v52, %v8721_v35 }
 0x29c   : > { %v8917_v15 = vpop.f32.mrf.mxu1  ;;  %v5819_v13 = vpop.f32.mrf.mxu0 }
 0x29d   : > { %6054 = vst [vmem:[%s8906_s9 + $0x18] sm:$0xff] %v5828_v7  ;;  %v5820_v47 = vadd.f32 %v5819_v13, %v5659_v5  ;;  %v5672_v5 = vadd.f32 %v6905_v48, %v8703_v55 }
 0x29e   : > { %v8922_v11 = vpop.f32.mrf.mxu1 }
 0x29f   : > { %v5943_v24 = vadd.f32 %v5820_v47, %v5817_v33  ;;  %v5982_v36 = vmul.f32 %v5820_v47, %v5820_v47  ;;  %6052 = vst [vmem:[%s8906_s9 + $0x8] sm:$0xff] %v5820_v47  ;;  %v5984_v33 = vmul.f32 %v5828_v7, %v5828_v7 }
 0x2a0   : > { %v8927_v27 = vpop.f32.mrf.mxu1 }
 0x2a1   : > { %v5944_v19 = vadd.f32 %v5943_v24, %v5825_v61  ;;  %v6013_v28 = vadd.f32 %v5982_v36, %v5981_v17  ;;  %v5683_v17 = vadd.f32 %v6914_v45, %v8735_v22  ;;  %v5696_v45 = vadd.f32 %v6923_v38, %v8760_v12 }
 0x2a2   : > { %v8933_v10 = vpop.f32.mrf.mxu1 }
 0x2a3   : > { %v6014_v13 = vadd.f32 %v6013_v28, %v5983_v32  ;;  %v5945_v35 = vadd.f32 %v5944_v19, %v5828_v7  ;;  %v5675_v7 = vadd.f32 %v6908_v37, %v8716_v16  ;;  %v6920_v16 = vadd.f32 %v8864_v60, %v8862_v39 }
 0x2a4   : > { %v7033_v53 = vpop.f32.mrf.mxu0  ;;  %v8938_v20 = vpop.f32.mrf.mxu1 }
 0x2a5   : > { %v5841_v47 = vadd.f32 %v7033_v53, %v5680_v58  ;;  %v6015_v46 = vadd.f32 %v6014_v13, %v5984_v33  ;;  %v6917_v58 = vadd.f32 %v8860_v40, %v8855_v18  ;;  %v5691_v60 = vadd.f32 %v6920_v16, %v8755_v62 }
 0x2a6   : > { %v5832_v52 = vpop.f32.mrf.mxu0  ;;  %v8941_v61 = vpop.f32.mrf.mxu1  ;;  %v6938_v62 = vadd.f32 %v8927_v27, %v8922_v11  ;;  %v6941_v42 = vadd.f32 %v8938_v20, %v8933_v10 }
 0x2a7   : > { %6057 = vst [vmem:[%s8906_s9 + $0x30] sm:$0xff] %v5841_v47  ;;  %v5833_v56 = vadd.f32 %v5832_v52, %v5672_v5  ;;  %v5688_v37 = vadd.f32 %v6917_v58, %v8743_v23  ;;  %v5987_v33 = vmul.f32 %v5841_v47, %v5841_v47  ;;  %v6935_v23 = vadd.f32 %v8917_v15, %v8913_v14 }
 0x2a8   : > { %v7034_v55 = vpop.f32.mrf.mxu0  ;;  %v8947_v36 = vpop.f32.mrf.mxu1 }
 0x2a9   : > { %v5946_v31 = vadd.f32 %v5945_v35, %v5833_v56  ;;  %v5985_v48 = vmul.f32 %v5833_v56, %v5833_v56  ;;  %6055 = vst [vmem:[%s8906_s9 + $0x20] sm:$0xff] %v5833_v56  ;;  %v5844_v24 = vadd.f32 %v7034_v55, %v5683_v17 }
 0x2aa   : > { %v5835_v32 = vpop.f32.mrf.mxu0 }
 0x2ab   : > { %v6016_v19 = vadd.f32 %v6015_v46, %v5985_v48  ;;  %6058 = vst [vmem:[%s8906_s9 + $0x38] sm:$0xff] %v5844_v24  ;;  %v5836_v22 = vadd.f32 %v5835_v32, %v5675_v7  ;;  %v5988_v56 = vmul.f32 %v5844_v24, %v5844_v24 }
 0x2ad   : > { %v5947_v28 = vadd.f32 %v5946_v31, %v5836_v22  ;;  %v5986_v53 = vmul.f32 %v5836_v22, %v5836_v22  ;;  %6056 = vst [vmem:[%s8906_s9 + $0x28] sm:$0xff] %v5836_v22  ;;  %v5712_v22 = vadd.f32 %v6935_v23, %v8786_v0  ;;  %v5720_v23 = vadd.f32 %v6941_v42, %v8799_v30 }
 0x2ae   : > { %v6945_v29 = vpop.f32.mrf.mxu1 }
 0x2af   : > { %v7037_v5 = vpop.f32.mrf.mxu0  ;;  %v5948_v13 = vadd.f32 %v5947_v28, %v5841_v47  ;;  %v6017_v35 = vadd.f32 %v6016_v19, %v5986_v53  ;;  %v6932_v28 = vadd.f32 %v8910_v44, %v8897_v8 }
 0x2b0   : > { %v5857_v18 = vadd.f32 %v7037_v5, %v5696_v45  ;;  %v6946_v40 = vpop.f32.mrf.mxu1 }
 0x2b1   : > { %v5848_v52 = vpop.f32.mrf.mxu0  ;;  %v6018_v46 = vadd.f32 %v6017_v35, %v5987_v33  ;;  %v5949_v17 = vadd.f32 %v5948_v13, %v5844_v24  ;;  %v6947_v13 = vadd.f32 %v6946_v40, %v6945_v29  ;;  %v5715_v35 = vadd.f32 %v6938_v62, %v8789_v50 }
 0x2b2   : > { %6061 = vst [vmem:[%s8906_s9 + $0x50] sm:$0xff] %v5857_v18  ;;  %v5849_v51 = vadd.f32 %v5848_v52, %v5688_v37  ;;  %v6948_v12 = vpop.f32.mrf.mxu1  ;;  %v5991_v14 = vmul.f32 %v5857_v18, %v5857_v18  ;;  %v5707_v8 = vadd.f32 %v6932_v28, %v8781_v59  ;;  %v6944_v59 = vadd.f32 %v8947_v36, %v8941_v61 }
 0x2b3   : > { %v7038_v38 = vpop.f32.mrf.mxu0  ;;  %v6019_v31 = vadd.f32 %v6018_v46, %v5988_v56  ;;  %v5728_v50 = vadd.f32 %v6947_v13, %v8807_v2 }
 0x2b4   : > { %6059 = vst [vmem:[%s8906_s9 + $0x40] sm:$0xff] %v5849_v51  ;;  %v5860_v39 = vadd.f32 %v7038_v38, %v5699_v26  ;;  %v5950_v47 = vadd.f32 %v5949_v17, %v5849_v51  ;;  %v5989_v55 = vmul.f32 %v5849_v51, %v5849_v51  ;;  %v6949_v7 = vpop.f32.mrf.mxu1  ;;  %v5723_v36 = vadd.f32 %v6944_v59, %v8802_v41 }
 0x2b5   : > { %v5851_v48 = vpop.f32.mrf.mxu0  ;;  %v6950_v29 = vadd.f32 %v6949_v7, %v6948_v12 }
 0x2b6   : > { %6062 = vst [vmem:[%s8906_s9 + $0x58] sm:$0xff] %v5860_v39  ;;  %v5852_v58 = vadd.f32 %v5851_v48, %v5691_v60  ;;  %v6020_v24 = vadd.f32 %v6019_v31, %v5989_v55  ;;  %v5992_v25 = vmul.f32 %v5860_v39, %v5860_v39 }
 0x2b8   : > { %v5951_v32 = vadd.f32 %v5950_v47, %v5852_v58  ;;  %v5990_v19 = vmul.f32 %v5852_v58, %v5852_v58  ;;  %6060 = vst [vmem:[%s8906_s9 + $0x48] sm:$0xff] %v5852_v58  ;;  %v5731_v47 = vadd.f32 %v6950_v29, %v8814_v1 }
 0x2ba   : > { %v5952_v15 = vadd.f32 %v5951_v32, %v5857_v18  ;;  %v6021_v57 = vadd.f32 %v6020_v24, %v5990_v19  ;;  %v8973_v45 = vpop.f32.mrf.mxu1 }
 0x2bb   : > { %v7041_v53 = vpop.f32.mrf.mxu0 }
 0x2bc   : > { %v6022_v5 = vadd.f32 %v6021_v57, %v5991_v14  ;;  %v5873_v16 = vadd.f32 %v7041_v53, %v5712_v22  ;;  %v6952_v0 = vpop.f32.mrf.mxu1  ;;  %v5953_v37 = vadd.f32 %v5952_v15, %v5860_v39 }
 0x2bd   : > { %v5864_v33 = vpop.f32.mrf.mxu0  ;;  %v6953_v41 = vadd.f32 %v6952_v0, %v8973_v45 }
 0x2be   : > { %6065 = vst [vmem:[%s8906_s9 + $0x70] sm:$0xff] %v5873_v16  ;;  %v5865_v11 = vadd.f32 %v5864_v33, %v5704_v43  ;;  %v6023_v27 = vadd.f32 %v6022_v5, %v5992_v25  ;;  %v6954_v18 = vpop.f32.mrf.mxu1  ;;  %v5995_v55 = vmul.f32 %v5873_v16, %v5873_v16 }
 0x2bf   : > { %v7042_v52 = vpop.f32.mrf.mxu0 }
 0x2c0   : > { %v5954_v44 = vadd.f32 %v5953_v37, %v5865_v11  ;;  %v5993_v51 = vmul.f32 %v5865_v11, %v5865_v11  ;;  %6063 = vst [vmem:[%s8906_s9 + $0x60] sm:$0xff] %v5865_v11  ;;  %v5876_v26 = vadd.f32 %v7042_v52, %v5715_v35  ;;  %v6955_v56 = vpop.f32.mrf.mxu1 }
 0x2c1   : > { %v5867_v40 = vpop.f32.mrf.mxu0  ;;  %v6956_v11 = vadd.f32 %v6955_v56, %v6954_v18 }
 0x2c2   : > { %v6024_v46 = vadd.f32 %v6023_v27, %v5993_v51  ;;  %6066 = vst [vmem:[%s8906_s9 + $0x78] sm:$0xff] %v5876_v26  ;;  %v5868_v17 = vadd.f32 %v5867_v40, %v5707_v8  ;;  %v5996_v58 = vmul.f32 %v5876_v26, %v5876_v26  ;;  %v5736_v51 = vadd.f32 %v6953_v41, %v8819_v9 }
 0x2c3   : > { %v5739_v18 = vadd.f32 %v6956_v11, %v8822_v6 }
 0x2c4   : > { %v7045_v38 = vpop.f32.mrf.mxu0  ;;  %v5955_v39 = vadd.f32 %v5954_v44, %v5868_v17  ;;  %v5994_v20 = vmul.f32 %v5868_v17, %v5868_v17  ;;  %6064 = vst [vmem:[%s8906_s9 + $0x68] sm:$0xff] %v5868_v17 }
 0x2c5   : > { %v6957_v10 = vpop.f32.mrf.mxu1  ;;  %v5889_v60 = vadd.f32 %v7045_v38, %v5728_v50 }
 0x2c6   : > { %v5880_v12 = vpop.f32.mrf.mxu0  ;;  %v5956_v31 = vadd.f32 %v5955_v39, %v5873_v16  ;;  %v6025_v48 = vadd.f32 %v6024_v46, %v5994_v20 }
 0x2c7   : > { %6069 = vst [vmem:[%s8906_s9 + $0x90] sm:$0xff] %v5889_v60  ;;  %v6958_v2 = vpop.f32.mrf.mxu1  ;;  %v5881_v7 = vadd.f32 %v5880_v12, %v5720_v23  ;;  %v5999_v25 = vmul.f32 %v5889_v60, %v5889_v60 }
 0x2c8   : > { %v7046_v61 = vpop.f32.mrf.mxu0  ;;  %v6026_v4 = vadd.f32 %v6025_v48, %v5995_v55  ;;  %v5957_v24 = vadd.f32 %v5956_v31, %v5876_v26  ;;  %v6959_v57 = vadd.f32 %v6958_v2, %v6957_v10 }
 0x2c9   : > { %6067 = vst [vmem:[%s8906_s9 + $0x80] sm:$0xff] %v5881_v7  ;;  %v6960_v32 = vpop.f32.mrf.mxu1  ;;  %v5892_v30 = vadd.f32 %v7046_v61, %v5731_v47  ;;  %v5997_v1 = vmul.f32 %v5881_v7, %v5881_v7 }
 0x2ca   : > { %v5883_v19 = vpop.f32.mrf.mxu0  ;;  %v5958_v22 = vadd.f32 %v5957_v24, %v5881_v7  ;;  %v6027_v62 = vadd.f32 %v6026_v4, %v5996_v58  ;;  %v5744_v13 = vadd.f32 %v6959_v57, %v8827_v3 }
 0x2cb   : > { %6070 = vst [vmem:[%s8906_s9 + $0x98] sm:$0xff] %v5892_v30  ;;  %v6961_v14 = vpop.f32.mrf.mxu1  ;;  %v5884_v15 = vadd.f32 %v5883_v19, %v5723_v36  ;;  %v6000_v27 = vmul.f32 %v5892_v30, %v5892_v30 }
 0x2cc   : > { %v6028_v28 = vadd.f32 %v6027_v62, %v5997_v1  ;;  %v6962_v33 = vadd.f32 %v6961_v14, %v6960_v32 }
 0x2cd   : > { %v5959_v53 = vadd.f32 %v5958_v22, %v5884_v15  ;;  %v5998_v43 = vmul.f32 %v5884_v15, %v5884_v15  ;;  %6068 = vst [vmem:[%s8906_s9 + $0x88] sm:$0xff] %v5884_v15 }
 0x2ce   : > { %v5747_v40 = vadd.f32 %v6962_v33, %v8834_v34 }
 0x2cf   : > { %v5960_v5 = vadd.f32 %v5959_v53, %v5889_v60  ;;  %v6029_v16 = vadd.f32 %v6028_v28, %v5998_v43 }
 0x2d1   : > { %v6963_v37 = vpop.f32.mrf.mxu1  ;;  %v6030_v35 = vadd.f32 %v6029_v16, %v5999_v25  ;;  %v5961_v42 = vadd.f32 %v5960_v5, %v5892_v30 }
 0x2d3   : > { %v7049_v52 = vpop.f32.mrf.mxu0  ;;  %v6964_v8 = vpop.f32.mrf.mxu1  ;;  %v6031_v45 = vadd.f32 %v6030_v35, %v6000_v27 }
 0x2d4   : > { %v5905_v44 = vadd.f32 %v7049_v52, %v5744_v13  ;;  %v6965_v56 = vadd.f32 %v6964_v8, %v6963_v37  ;;  %v9073_v52 = vld [vmem:[#allocation6_spill] sm:$0xff] }
 0x2d5   : > { %v5896_v26 = vpop.f32.mrf.mxu0  ;;  %v6966_v0 = vpop.f32.mrf.mxu1 }
 0x2d6   : > { %6073 = vst [vmem:[%s8906_s9 + $0xb0] sm:$0xff] %v5905_v44  ;;  %v5897_v29 = vadd.f32 %v5896_v26, %v5736_v51  ;;  %v5752_v34 = vadd.f32 %v6965_v56, %v8841_v49  ;;  %v6003_v12 = vmul.f32 %v5905_v44, %v5905_v44 }
 0x2d7   : > { %v7050_v46 = vpop.f32.mrf.mxu0  ;;  %v6967_v3 = vpop.f32.mrf.mxu1 }
 0x2d8   : > { %v5962_v17 = vadd.f32 %v5961_v42, %v5897_v29  ;;  %v6001_v50 = vmul.f32 %v5897_v29, %v5897_v29  ;;  %6071 = vst [vmem:[%s8906_s9 + $0xa0] sm:$0xff] %v5897_v29  ;;  %v5908_v59 = vadd.f32 %v7050_v46, %v5747_v40  ;;  %v6968_v47 = vadd.f32 %v6967_v3, %v6966_v0  ;;  %v9074_v46 = vld [vmem:[#allocation5_spill] sm:$0xff] }
 0x2d9   : > { %v5899_v38 = vpop.f32.mrf.mxu0 }
 0x2da   : > { %v6032_v9 = vadd.f32 %v6031_v45, %v6001_v50  ;;  %6074 = vst [vmem:[%s8906_s9 + $0xb8] sm:$0xff] %v5908_v59  ;;  %v5900_v39 = vadd.f32 %v5899_v38, %v5739_v18  ;;  %v6004_v58 = vmul.f32 %v5908_v59, %v5908_v59  ;;  %v5755_v19 = vadd.f32 %v6968_v47, %v8846_v63 }
 0x2db   : > { %v6969_v20 = vpop.f32.mrf.mxu1  ;;  %v7053_v10 = vpop.f32.mrf.mxu0 }
 0x2dc   : > { %v5963_v60 = vadd.f32 %v5962_v17, %v5900_v39  ;;  %v6002_v23 = vmul.f32 %v5900_v39, %v5900_v39  ;;  %6072 = vst [vmem:[%s8906_s9 + $0xa8] sm:$0xff] %v5900_v39 }
 0x2dd   : > { %v6970_v6 = vpop.f32.mrf.mxu1  ;;  %v5912_v55 = vpop.f32.mrf.mxu0 }
 0x2de   : > { %v5964_v31 = vadd.f32 %v5963_v60, %v5905_v44  ;;  %v6033_v48 = vadd.f32 %v6032_v9, %v6002_v23  ;;  %v6971_v2 = vadd.f32 %v6970_v6, %v6969_v20  ;;  %v5913_v7 = vadd.f32 %v5912_v55, %v5752_v34  ;;  %v9075_v60 = vld [vmem:[#allocation7_spill] sm:$0xff] }
 0x2df   : > { %v6972_v61 = vpop.f32.mrf.mxu1  ;;  %v7054_v36 = vpop.f32.mrf.mxu0 }
 0x2e0   : > { %v6034_v4 = vadd.f32 %v6033_v48, %v6003_v12  ;;  %v5760_v24 = vadd.f32 %v6971_v2, %v8853_v21  ;;  %v5965_v32 = vadd.f32 %v5964_v31, %v5908_v59  ;;  %6075 = vst [vmem:[%s8906_s9 + $0xc0] sm:$0xff] %v5913_v7  ;;  %v6005_v30 = vmul.f32 %v5913_v7, %v5913_v7  ;;  %v9076_v31 = vld [vmem:[#allocation8_spill] sm:$0xff] }
 0x2e1   : > { %v6973_v49 = vpop.f32.mrf.mxu1  ;;  %v5915_v22 = vpop.f32.mrf.mxu0 }
 0x2e2   : > { %v5921_v1 = vadd.f32 %v7053_v10, %v5760_v24  ;;  %v5966_v62 = vadd.f32 %v5965_v32, %v5913_v7  ;;  %v6035_v14 = vadd.f32 %v6034_v4, %v6004_v58  ;;  %v6974_v15 = vadd.f32 %v6973_v49, %v6972_v61 }
 0x2e3   : > { %v5916_v57 = vadd.f32 %v5915_v22, %v5755_v19 }
 0x2e4   : > { %6077 = vst [vmem:[%s8906_s9 + $0xd0] sm:$0xff] %v5921_v1  ;;  %v6036_v28 = vadd.f32 %v6035_v14, %v6005_v30  ;;  %v5763_v53 = vadd.f32 %v6974_v15, %v8858_v54  ;;  %v6007_v16 = vmul.f32 %v5921_v1, %v5921_v1 }
 0x2e5   : > { %v6975_v43 = vpop.f32.mrf.mxu1  ;;  %v5967_v21 = vadd.f32 %v5966_v62, %v5916_v57  ;;  %v6006_v41 = vmul.f32 %v5916_v57, %v5916_v57  ;;  %6076 = vst [vmem:[%s8906_s9 + $0xc8] sm:$0xff] %v5916_v57 }
 0x2e6   : > { %v5924_v25 = vadd.f32 %v7054_v36, %v5763_v53 }
 0x2e7   : > { %v6976_v5 = vpop.f32.mrf.mxu1  ;;  %v5968_v37 = vadd.f32 %v5967_v21, %v5921_v1  ;;  %v6037_v63 = vadd.f32 %v6036_v28, %v6006_v41 }
 0x2e8   : > { %v6977_v33 = vadd.f32 %v6976_v5, %v6975_v43  ;;  %v7057_v13 = vpop.f32.mrf.mxu0  ;;  %v6008_v11 = vmul.f32 %v5924_v25, %v5924_v25  ;;  %6078 = vst [vmem:[%s8906_s9 + $0xd8] sm:$0xff] %v5924_v25 }
 0x2e9   : > { %v6978_v27 = vpop.f32.mrf.mxu1  ;;  %v6038_v35 = vadd.f32 %v6037_v63, %v6007_v16  ;;  %v5969_v54 = vadd.f32 %v5968_v37, %v5924_v25 }
 0x2ea   : > { %v5768_v8 = vadd.f32 %v6977_v33, %v9073_v52  ;;  %v5928_v42 = vpop.f32.mrf.mxu0 }
 0x2eb   : > { %v6979_v44 = vpop.f32.mrf.mxu1  ;;  %v6039_v26 = vadd.f32 %v6038_v35, %v6008_v11 }
 0x2ec   : > { %v5929_v51 = vadd.f32 %v5928_v42, %v5768_v8  ;;  %v6980_v45 = vadd.f32 %v6979_v44, %v6978_v27  ;;  %v7058_v0 = vpop.f32.mrf.mxu0 }
 0x2ee   : > { %v5970_v29 = vadd.f32 %v5969_v54, %v5929_v51  ;;  %v6009_v40 = vmul.f32 %v5929_v51, %v5929_v51  ;;  %6079 = vst [vmem:[%s8906_s9 + $0xe0] sm:$0xff] %v5929_v51  ;;  %v5771_v3 = vadd.f32 %v6980_v45, %v9074_v46  ;;  %v5931_v18 = vpop.f32.mrf.mxu0 }
 0x2f0   : > { %v6040_v56 = vadd.f32 %v6039_v26, %v6009_v40  ;;  %v5932_v17 = vadd.f32 %v5931_v18, %v5771_v3  ;;  %v6981_v50 = vpop.f32.mrf.mxu1 }
 0x2f2   : > { %v5971_v59 = vadd.f32 %v5970_v29, %v5932_v17  ;;  %v6010_v38 = vmul.f32 %v5932_v17, %v5932_v17  ;;  %6080 = vst [vmem:[%s8906_s9 + $0xe8] sm:$0xff] %v5932_v17  ;;  %v6982_v9 = vpop.f32.mrf.mxu1 }
 0x2f3   : > { %v6983_v20 = vadd.f32 %v6982_v9, %v6981_v50 }
 0x2f4   : > { %v6041_v39 = vadd.f32 %v6040_v56, %v6010_v38  ;;  %v6984_v10 = vpop.f32.mrf.mxu1 }
 0x2f5   : > { %v5776_v23 = vadd.f32 %v6983_v20, %v9075_v60 }
 0x2f6   : > { %v6985_v34 = vpop.f32.mrf.mxu1 }
 0x2f7   : > { %v5937_v12 = vadd.f32 %v7057_v13, %v5776_v23  ;;  %v6986_v47 = vadd.f32 %v6985_v34, %v6984_v10 }
 0x2f9   : > { %v5972_v6 = vadd.f32 %v5971_v59, %v5937_v12  ;;  %v6011_v55 = vmul.f32 %v5937_v12, %v5937_v12  ;;  %6081 = vst [vmem:[%s8906_s9 + $0xf0] sm:$0xff] %v5937_v12  ;;  %v5779_v48 = vadd.f32 %v6986_v47, %v9076_v31 }
 0x2fb   : > { %v6042_v2 = vadd.f32 %v6041_v39, %v6011_v55  ;;  %v5940_v7 = vadd.f32 %v7058_v0, %v5779_v48 }
 0x2fd   : > { %v5973_v61 = vadd.f32 %v5972_v6, %v5940_v7  ;;  %v6012_v36 = vmul.f32 %v5940_v7, %v5940_v7  ;;  %6082 = vst [vmem:[%s8906_s9 + $0xf8] sm:$0xff] %v5940_v7 }
 0x2ff   : > { %v5974_v58 = vrot.slane %v5973_v61, 4  ;;  %v6043_v4 = vadd.f32 %v6042_v2, %v6012_v36 }
 0x301   : > { %v5975_v24 = vadd.f32 %v5974_v58, %v5973_v61  ;;  %v6044_v32 = vrot.slane %v6043_v4, 4 }
 0x303   : > { %v5976_v30 = vrot.slane %v5975_v24, 2  ;;  %v6045_v49 = vadd.f32 %v6044_v32, %v6043_v4 }
 0x305   : > { %v5977_v19 = vadd.f32 %v5976_v30, %v5975_v24  ;;  %v6046_v22 = vrot.slane %v6045_v49, 2 }
 0x307   : > { %v5978_v1 = vrot.slane %v5977_v19, 1  ;;  %v6047_v62 = vadd.f32 %v6046_v22, %v6045_v49 }
 0x309   : > { %v5979_v14 = vadd.f32 %v5978_v1, %v5977_v19  ;;  %v6048_v15 = vrot.slane %v6047_v62, 1 }
 0x30b   : > { %5980 = vst [vmem:[%s425_s19] sm:$0x1] %v5979_v14  ;;  %v6049_v57 = vadd.f32 %v6048_v15, %v6047_v62 }
 0x30d   : > { %6050 = vst [vmem:[%s428_s14] sm:$0x1] %v6049_v57 }
 0x30e PF: > { %p14_p9 = scmp.ge.s32.totalorder %s7461_s25, 4   ;;  %s9077_s21 = smov %s7402_s22 }
 0x30f   : > { %s9078_s22 = smov %s7470_s28  ;;  %s9079_s23 = smov %s7461_s25 }
 0x310   :  { %16 = sbr.rel (!%p14_p9) target bundleno = 2 (0x2), region = 135 }

</bundles_post_ra>
